<compile_context>
chip_gen: v5e
topology: v5e:2x2
jax: 0.10.0
libtpu: 0.0.40
codegen_flags: <defaults>
</compile_context>

<pallas_src>
import functools

import jax
import jax.numpy as jnp
from jax import lax
from jax.experimental import pallas as pl
from jax.experimental.pallas import tpu as pltpu

LANES = 128


def _round_up(x, m):
    return ((x + m - 1) // m) * m


# ------------------------------- Pallas kernel ------------------------------ #

def _nnq_fused_kernel(*refs, conv_plan, w_stride, block_b, n_fc):
    """Whole-network forward for one block of `block_b` images.

    refs layout (inputs, output, scratch):
      x_ref                         (r0buf, C0*B)   rows = h*W + w, lanes = c*B + b
      [conv_wbd, conv_b] * n_conv   (K*K*Cin*B, Cout*B), (1, Cout*B)
      [fc1_w3, fc1_b]               (C_last, d1, Rbuf_last), (d1, 1)
      [fcT_w, fc_b] * (n_fc-1)      (d_out, d_in), (d_out, 1)  (last padded to 128 rows)
      o_ref                         (dpad, B)
      patch scratch * n_conv        (Rout_l, K*K*Cin_l*B)
      act scratch * n_conv          (Rbuf_l, Cout_l*B)   (last one feeds FC1)
    """
    n_conv = len(conv_plan)
    x_ref = refs[0]
    conv_w = [refs[1 + 2 * l] for l in range(n_conv)]
    conv_b = [refs[2 + 2 * l] for l in range(n_conv)]
    base = 1 + 2 * n_conv
    fc_w = [refs[base + 2 * i] for i in range(n_fc)]
    fc_b = [refs[base + 2 * i + 1] for i in range(n_fc)]
    o_ref = refs[base + 2 * n_fc]
    sbase = base + 2 * n_fc + 1
    patch_refs = list(refs[sbase:sbase + n_conv])
    act_refs = list(refs[sbase + n_conv:sbase + 2 * n_conv])

    bb = block_b
    ws = w_stride

    # ---------------- Conv stack: one deep im2col matmul per layer ---------------- #
    src = x_ref
    for l, (kk, cin, cout, rout) in enumerate(conv_plan):
        cb = cin * bb
        p_ref = patch_refs[l]
        # Full-width-row im2col: each tap strip is ONE contiguous sublane-slice copy.
        for kh in range(kk):
            for kw in range(kk):
                t = kh * kk + kw
                shift = kh * ws + kw
                p_ref[:, t * cb:(t + 1) * cb] = src[shift:shift + rout, :]
        a = jnp.dot(p_ref[...], conv_w[l][...], preferred_element_type=jnp.float32)
        a = jnp.maximum(a + conv_b[l][...], 0.0)          # (rout, cout*bb), ReLU
        dst = act_refs[l]
        dst[0:rout, :] = a
        if dst.shape[0] > rout:                           # zero tail rows the next layer reads
            dst[rout:, :] = jnp.zeros((dst.shape[0] - rout, dst.shape[1]), jnp.float32)
        src = dst

    # ------- FC1: per-conv-channel batched matmuls (absorbs the CHW flatten) -------- #
    feat_ref = act_refs[-1]                               # (Rbuf_last, C_last*B)
    c_last = conv_plan[-1][2]
    hcol = fc_b[0][...]                                   # (d1, 1) broadcasts over B lanes
    for c in range(c_last):
        hcol = hcol + jnp.dot(fc_w[0][c], feat_ref[:, c * bb:(c + 1) * bb],
                              preferred_element_type=jnp.float32)
    hcol = jnp.maximum(hcol, 0.0)                         # n_fc >= 2 -> FC1 always has ReLU

    # ------------ Remaining linears, column-oriented: h <- W^T h + b ---------------- #
    for i in range(1, n_fc):
        hcol = jnp.dot(fc_w[i][...], hcol,
                       preferred_element_type=jnp.float32) + fc_b[i][...]
        if i != n_fc - 1:
            hcol = jnp.maximum(hcol, 0.0)

    o_ref[...] = hcol.astype(o_ref.dtype)                 # (dpad, B); host transposes/slices


# ------------------------------- Host wrappers ------------------------------ #

def prepare_params(conv_params, fc_params, input_hw, block_b):
    """One-time, host-side reorganisation of PyTorch-layout params into kernel layout."""
    h0, w0 = input_hw
    bb = block_b
    eye_b = jnp.eye(bb, dtype=jnp.float32)

    hv, wv = h0, w0
    conv_plan, conv_ws, conv_bs = [], [], []
    for (w_hwio, bias) in conv_params:
        kh, kw, cin, cout = w_hwio.shape
        assert kh == kw, "square kernels only"
        k = kh
        hv, wv = hv - k + 1, wv - k + 1
        rout = hv * w0                                    # rows incl. invalid w >= wv columns
        conv_plan.append((k, cin, cout, rout))
        w2d = w_hwio.reshape(k * k * cin, cout)
        # Block-diagonal-per-batch weight: row (tap*cin+ci)*B + b, col co*B + b.
        wbd = jnp.einsum("kc,bd->kbcd", w2d, eye_b).reshape(k * k * cin * bb, cout * bb)
        conv_ws.append(wbd)
        conv_bs.append(jnp.repeat(bias, bb).reshape(1, cout * bb))

    n_conv = len(conv_plan)
    # Buffer row counts: conv l reads rows [0, rout_l + (K_l-1)*(W+1)) of its input.
    r0buf = _round_up(conv_plan[0][3] + (conv_plan[0][0] - 1) * (w0 + 1), 8)
    rbufs = []
    for l in range(n_conv):
        rout = conv_plan[l][3]
        if l + 1 < n_conv:
            k_next = conv_plan[l + 1][0]
            need = conv_plan[l + 1][3] + (k_next - 1) * (w0 + 1)
            rbufs.append(_round_up(max(rout, need), 8))
        else:
            rbufs.append(_round_up(rout, 8))

    c_last, rbuf_last = conv_plan[-1][2], rbufs[-1]

    n_fc = len(fc_params)
    assert n_fc >= 2, "fused kernel expects at least two linear layers (as in NNQ)"
    fc_ws, fc_bs = [], []
    # FC1: absorb PyTorch's CHW flatten order AND the full-width-row layout into a
    # (C_last, d1, Rbuf_last) weight whose invalid columns / tail rows are zero.
    w1, b1 = fc_params[0]
    din, d1 = w1.shape
    assert din == c_last * hv * wv, (din, c_last, hv, wv)
    w1_4 = w1.reshape(c_last, hv, wv, d1)
    w1_4 = jnp.pad(w1_4, ((0, 0), (0, 0), (0, w0 - wv), (0, 0)))      # zero cols w >= wv
    w1_3 = jnp.transpose(w1_4, (0, 3, 1, 2)).reshape(c_last, d1, hv * w0)
    w1_3 = jnp.pad(w1_3, ((0, 0), (0, 0), (0, rbuf_last - hv * w0)))  # zero tail rows
    fc_ws.append(w1_3)
    fc_bs.append(b1.reshape(d1, 1))
    # Remaining linears: stored transposed (column-oriented); last padded to 128 rows.
    for i in range(1, n_fc):
        wi, bi = fc_params[i]
        dout = wi.shape[1]
        if i == n_fc - 1:
            dpad = _round_up(dout, LANES)
            wi = jnp.pad(wi, ((0, 0), (0, dpad - dout)))
            bi = jnp.pad(bi, (0, dpad - dout))
        fc_ws.append(wi.T)                                # (d_out, d_in)
        fc_bs.append(bi.reshape(-1, 1))

    plan = (h0, w0, int(conv_params[0][0].shape[2]), bb, r0buf,
            tuple(conv_plan), tuple(rbufs), int(fc_params[-1][0].shape[1]))
    return dict(plan=plan,
                conv_ws=tuple(conv_ws), conv_bs=tuple(conv_bs),
                fc_ws=tuple(fc_ws), fc_bs=tuple(fc_bs))


@functools.partial(jax.jit, static_argnames=("plan",))
def _nnq_forward_jit(x_nchw, conv_ws, conv_bs, fc_ws, fc_bs, plan):
    h0, w0, c0, bb, r0buf, conv_plan, rbufs, n_out = plan
    n = x_nchw.shape[0]
    g = -(-n // bb)                                       # number of grid steps
    npad = g * bb
    dpad = fc_ws[-1].shape[0]
    n_fc = len(fc_ws)

    # Host-side layout prep (tiny XLA ops): rows = h*W + w, lanes = c*B + b, plus zero
    # pad rows so every in-kernel shifted tap read stays in bounds.
    x_p = jnp.pad(x_nchw, ((0, npad - n), (0, 0), (0, 0), (0, 0)))
    xk = x_p.reshape(g, bb, c0, h0, w0).transpose(0, 3, 4, 2, 1)
    xk = xk.reshape(g, h0 * w0, c0 * bb)
    xk = jnp.pad(xk, ((0, 0), (0, r0buf - h0 * w0), (0, 0)))

    def const_spec(arr):
        nd = arr.ndim
        return pl.BlockSpec(arr.shape, lambda i: (0,) * nd)   # resident across grid steps

    operands = [xk]
    in_specs = [pl.BlockSpec((None, r0buf, c0 * bb), lambda i: (i, 0, 0))]
    for wgt, bias in list(zip(conv_ws, conv_bs)) + list(zip(fc_ws, fc_bs)):
        operands += [wgt, bias]
        in_specs += [const_spec(wgt), const_spec(bias)]

    scratch = []
    for (k, cin, cout, rout) in conv_plan:                # im2col patch buffers
        scratch.append(pltpu.VMEM((rout, k * k * cin * bb), jnp.float32))
    for (k, cin, cout, rout), rbuf in zip(conv_plan, rbufs):   # conv output buffers
        scratch.append(pltpu.VMEM((rbuf, cout * bb), jnp.float32))

    kern = functools.partial(_nnq_fused_kernel, conv_plan=conv_plan, w_stride=w0,
                             block_b=bb, n_fc=n_fc)
    out = pl.pallas_call(
        kern,
        out_shape=jax.ShapeDtypeStruct((g, dpad, bb), jnp.float32),
        grid_spec=pltpu.PrefetchScalarGridSpec(
            num_scalar_prefetch=0,
            grid=(g,),
            in_specs=in_specs,
            out_specs=pl.BlockSpec((None, dpad, bb), lambda i: (i, 0, 0)),
            scratch_shapes=scratch),
        compiler_params=pltpu.CompilerParams(dimension_semantics=("parallel",)),
    )(*operands)
    out = jnp.transpose(out, (0, 2, 1)).reshape(g * bb, dpad)
    return out[:n, :n_out]


def nnq_forward(x_nchw, prepared):
    """Forward pass matching NNQ.forward on an NCHW input."""
    return _nnq_forward_jit(x_nchw, prepared["conv_ws"], prepared["conv_bs"],
                            prepared["fc_ws"], prepared["fc_bs"],
                            plan=prepared["plan"])


# ------------------------------ Reference & init ---------------------------- #

def nnq_reference(x_nchw, conv_params, fc_params):
    """Pure-XLA reference matching NNQ.forward for the same parameters."""
    out = x_nchw
    for (w_hwio, b) in conv_params:
        out = lax.conv_general_dilated(out, w_hwio, window_strides=(1, 1),
                                       padding="VALID",
                                       dimension_numbers=("NCHW", "HWIO", "NCHW"))
        out = jnp.maximum(out + b.reshape(1, -1, 1, 1), 0.0)
    out = out.reshape(out.shape[0], -1)                   # NCHW flatten == nn.Flatten(1, 3)
    n_fc = len(fc_params)
    for i, (w_io, b) in enumerate(fc_params):
        out = out @ w_io + b
        if i != n_fc - 1:
            out = jnp.maximum(out, 0.0)
    return out


def init_params(key, channels_in, channels_out, kernels, linear_in, linear_out):
    """PyTorch-equivalent init.  Conv weights HWIO; linear weights (in, out) with the
    `in` axis in PyTorch's CHW flatten order (so fc_params[0] matches nn.Flatten)."""
    conv_params, fc_params = [], []
    for i in range(len(channels_in)):
        key, k1, k2 = jax.random.split(key, 3)
        cin, cout, kk = channels_in[i], channels_out[i], kernels[i]
        bound = 1.0 / jnp.sqrt(cin * kk * kk)
        w = jax.random.uniform(k1, (kk, kk, cin, cout), jnp.float32, -bound, bound)
        b = jax.random.uniform(k2, (cout,), jnp.float32, -bound, bound)
        conv_params.append((w, b))
    for i in range(len(linear_in)):
        key, k1, k2 = jax.random.split(key, 3)
        din, dout = linear_in[i], linear_out[i]
        bound = 1.0 / jnp.sqrt(din)
        w = jax.random.uniform(k1, (din, dout), jnp.float32, -bound, bound)
        b = jax.random.uniform(k2, (dout,), jnp.float32, -bound, bound)
        fc_params.append((w, b))
    return conv_params, fc_params


# --------------------------------- Main ------------------------------------- #

if __name__ == "__main__":
    # Small NNQ config: two conv layers, two linear layers.
    channels_in = [4, 8]
    channels_out = [8, 16]
    kernels = [3, 3]
    N, H, W = 16, 16, 16
    BLOCK_B = 8            # images per grid step -> feat lanes = 16*8 = 128 (dense),
                           # grid = (2,) so both v7x TensorCores get work.
    ho, wo = H, W
    for k in kernels:
        ho, wo = ho - k + 1, wo - k + 1                   # -> 12, 12
    linear_in = [channels_out[-1] * ho * wo, 32]          # [2304, 32]
    linear_out = [32, 5]

    key = jax.random.PRNGKey(0)
    key, kx = jax.random.split(key)
    x = jax.random.normal(kx, (N, channels_in[0], H, W), jnp.float32)   # NCHW like PyTorch

    conv_params, fc_params = init_params(key, channels_in, channels_out, kernels,
                                         linear_in, linear_out)
    prepared = prepare_params(conv_params, fc_params, (H, W), BLOCK_B)  # one-time reorg

    out = nnq_forward(x, prepared)
    out = jax.block_until_ready(out)

    assert out.shape == (N, linear_out[-1]), out.shape
    assert out.dtype == jnp.float32
    assert bool(jnp.all(jnp.isfinite(out)))

    # Numerical check against the plain-XLA reference of the PyTorch module.
    ref = nnq_reference(x, conv_params, fc_params)
    err = float(jnp.max(jnp.abs(out - ref)))
    scale = float(jnp.max(jnp.abs(ref)))
    # Tightened vs. the previous 1e-2: layout/indexing bugs show up as O(1) errors,
    # while this stays robust to MXU-vs-XLA f32 accumulation-pass differences.
    assert err <= 2e-3 * (1.0 + scale), (err, scale)

    print("KERNEL_OK")
</pallas_src>

<mosaic_0001>
module attributes {stable_mosaic.version = 11 : i64} {
  func.func @_nnq_fused_kernel(%arg0: i32, %arg1: memref<1x264x32xf32, #tpu.memory_space<vmem>>, %arg2: memref<288x64xf32, #tpu.memory_space<vmem>>, %arg3: memref<1x64xf32, #tpu.memory_space<vmem>>, %arg4: memref<576x128xf32, #tpu.memory_space<vmem>>, %arg5: memref<1x128xf32, #tpu.memory_space<vmem>>, %arg6: memref<16x32x192xf32, #tpu.memory_space<vmem>>, %arg7: memref<32x1xf32, #tpu.memory_space<vmem>>, %arg8: memref<128x32xf32, #tpu.memory_space<vmem>>, %arg9: memref<128x1xf32, #tpu.memory_space<vmem>>, %arg10: memref<1x128x8xf32, #tpu.memory_space<vmem>>, %arg11: memref<224x288xf32, #tpu.memory_space<vmem>>, %arg12: memref<192x576xf32, #tpu.memory_space<vmem>>, %arg13: memref<232x64xf32, #tpu.memory_space<vmem>>, %arg14: memref<192x128xf32, #tpu.memory_space<vmem>>) attributes {dimension_semantics = [#tpu.dimension_semantics<parallel>], iteration_bounds = array<i64: 2>, scalar_prefetch = 0 : i64, scratch_operands = 4 : i64, tpu.core_type = #tpu.core_type<tc>, window_params = [{transform_indices = @transform_0, window_bounds = array<i64: 1, 264, 32>}, {pipeline_mode = #tpu.pipeline_mode<synchronous>, transform_indices = @transform_1, window_bounds = array<i64: 288, 64>}, {pipeline_mode = #tpu.pipeline_mode<synchronous>, transform_indices = @transform_2, window_bounds = array<i64: 1, 64>}, {pipeline_mode = #tpu.pipeline_mode<synchronous>, transform_indices = @transform_3, window_bounds = array<i64: 576, 128>}, {pipeline_mode = #tpu.pipeline_mode<synchronous>, transform_indices = @transform_4, window_bounds = array<i64: 1, 128>}, {pipeline_mode = #tpu.pipeline_mode<synchronous>, transform_indices = @transform_5, window_bounds = array<i64: 16, 32, 192>}, {pipeline_mode = #tpu.pipeline_mode<synchronous>, transform_indices = @transform_6, window_bounds = array<i64: 32, 1>}, {pipeline_mode = #tpu.pipeline_mode<synchronous>, transform_indices = @transform_7, window_bounds = array<i64: 128, 32>}, {pipeline_mode = #tpu.pipeline_mode<synchronous>, transform_indices = @transform_8, window_bounds = array<i64: 128, 1>}, {transform_indices = @transform_9, window_bounds = array<i64: 1, 128, 8>}]} {
    %c0 = arith.constant 0 : index
    %c0_0 = arith.constant 0 : index
    %c0_1 = arith.constant 0 : index
    %0 = vector.load %arg1[%c0, %c0_0, %c0_1] : memref<1x264x32xf32, #tpu.memory_space<vmem>>, vector<1x224x32xf32>
    %1 = vector.shape_cast %0 : vector<1x224x32xf32> to vector<224x32xf32>
    %c0_2 = arith.constant 0 : index
    %c0_3 = arith.constant 0 : index
    %2 = vector.load %arg11[%c0_2, %c0_3] : memref<224x288xf32, #tpu.memory_space<vmem>>, vector<224x32xf32>
    tpu.vector_store %arg11[%c0_2, %c0_3], %1 {strides = array<i32>} : memref<224x288xf32, #tpu.memory_space<vmem>>, vector<224x32xf32>,
    %c0_4 = arith.constant 0 : index
    %c1 = arith.constant 1 : index
    %c0_5 = arith.constant 0 : index
    %3 = vector.load %arg1[%c0_4, %c1, %c0_5] : memref<1x264x32xf32, #tpu.memory_space<vmem>>, vector<1x224x32xf32>
    %4 = vector.shape_cast %3 : vector<1x224x32xf32> to vector<224x32xf32>
    %c0_6 = arith.constant 0 : index
    %c32 = arith.constant 32 : index
    %5 = vector.load %arg11[%c0_6, %c32] : memref<224x288xf32, #tpu.memory_space<vmem>>, vector<224x32xf32>
    tpu.vector_store %arg11[%c0_6, %c32], %4 {strides = array<i32>} : memref<224x288xf32, #tpu.memory_space<vmem>>, vector<224x32xf32>,
    %c0_7 = arith.constant 0 : index
    %c2 = arith.constant 2 : index
    %c0_8 = arith.constant 0 : index
    %6 = vector.load %arg1[%c0_7, %c2, %c0_8] : memref<1x264x32xf32, #tpu.memory_space<vmem>>, vector<1x224x32xf32>
    %7 = vector.shape_cast %6 : vector<1x224x32xf32> to vector<224x32xf32>
    %c0_9 = arith.constant 0 : index
    %c64 = arith.constant 64 : index
    %8 = vector.load %arg11[%c0_9, %c64] : memref<224x288xf32, #tpu.memory_space<vmem>>, vector<224x32xf32>
    tpu.vector_store %arg11[%c0_9, %c64], %7 {strides = array<i32>} : memref<224x288xf32, #tpu.memory_space<vmem>>, vector<224x32xf32>,
    %c0_10 = arith.constant 0 : index
    %c16 = arith.constant 16 : index
    %c0_11 = arith.constant 0 : index
    %9 = vector.load %arg1[%c0_10, %c16, %c0_11] : memref<1x264x32xf32, #tpu.memory_space<vmem>>, vector<1x224x32xf32>
    %10 = vector.shape_cast %9 : vector<1x224x32xf32> to vector<224x32xf32>
    %c0_12 = arith.constant 0 : index
    %c96 = arith.constant 96 : index
    %11 = vector.load %arg11[%c0_12, %c96] : memref<224x288xf32, #tpu.memory_space<vmem>>, vector<224x32xf32>
    tpu.vector_store %arg11[%c0_12, %c96], %10 {strides = array<i32>} : memref<224x288xf32, #tpu.memory_space<vmem>>, vector<224x32xf32>,
    %c0_13 = arith.constant 0 : index
    %c17 = arith.constant 17 : index
    %c0_14 = arith.constant 0 : index
    %12 = vector.load %arg1[%c0_13, %c17, %c0_14] : memref<1x264x32xf32, #tpu.memory_space<vmem>>, vector<1x224x32xf32>
    %13 = vector.shape_cast %12 : vector<1x224x32xf32> to vector<224x32xf32>
    %c0_15 = arith.constant 0 : index
    %c128 = arith.constant 128 : index
    %14 = vector.load %arg11[%c0_15, %c128] : memref<224x288xf32, #tpu.memory_space<vmem>>, vector<224x32xf32>
    tpu.vector_store %arg11[%c0_15, %c128], %13 {strides = array<i32>} : memref<224x288xf32, #tpu.memory_space<vmem>>, vector<224x32xf32>,
    %c0_16 = arith.constant 0 : index
    %c18 = arith.constant 18 : index
    %c0_17 = arith.constant 0 : index
    %15 = vector.load %arg1[%c0_16, %c18, %c0_17] : memref<1x264x32xf32, #tpu.memory_space<vmem>>, vector<1x224x32xf32>
    %16 = vector.shape_cast %15 : vector<1x224x32xf32> to vector<224x32xf32>
    %c0_18 = arith.constant 0 : index
    %c160 = arith.constant 160 : index
    %17 = vector.load %arg11[%c0_18, %c160] : memref<224x288xf32, #tpu.memory_space<vmem>>, vector<224x32xf32>
    tpu.vector_store %arg11[%c0_18, %c160], %16 {strides = array<i32>} : memref<224x288xf32, #tpu.memory_space<vmem>>, vector<224x32xf32>,
    %c0_19 = arith.constant 0 : index
    %c32_20 = arith.constant 32 : index
    %c0_21 = arith.constant 0 : index
    %18 = vector.load %arg1[%c0_19, %c32_20, %c0_21] : memref<1x264x32xf32, #tpu.memory_space<vmem>>, vector<1x224x32xf32>
    %19 = vector.shape_cast %18 : vector<1x224x32xf32> to vector<224x32xf32>
    %c0_22 = arith.constant 0 : index
    %c192 = arith.constant 192 : index
    %20 = vector.load %arg11[%c0_22, %c192] : memref<224x288xf32, #tpu.memory_space<vmem>>, vector<224x32xf32>
    tpu.vector_store %arg11[%c0_22, %c192], %19 {strides = array<i32>} : memref<224x288xf32, #tpu.memory_space<vmem>>, vector<224x32xf32>,
    %c0_23 = arith.constant 0 : index
    %c33 = arith.constant 33 : index
    %c0_24 = arith.constant 0 : index
    %21 = vector.load %arg1[%c0_23, %c33, %c0_24] : memref<1x264x32xf32, #tpu.memory_space<vmem>>, vector<1x224x32xf32>
    %22 = vector.shape_cast %21 : vector<1x224x32xf32> to vector<224x32xf32>
    %c0_25 = arith.constant 0 : index
    %c224 = arith.constant 224 : index
    %23 = vector.load %arg11[%c0_25, %c224] : memref<224x288xf32, #tpu.memory_space<vmem>>, vector<224x32xf32>
    tpu.vector_store %arg11[%c0_25, %c224], %22 {strides = array<i32>} : memref<224x288xf32, #tpu.memory_space<vmem>>, vector<224x32xf32>,
    %c0_26 = arith.constant 0 : index
    %c34 = arith.constant 34 : index
    %c0_27 = arith.constant 0 : index
    %24 = vector.load %arg1[%c0_26, %c34, %c0_27] : memref<1x264x32xf32, #tpu.memory_space<vmem>>, vector<1x224x32xf32>
    %25 = vector.shape_cast %24 : vector<1x224x32xf32> to vector<224x32xf32>
    %c0_28 = arith.constant 0 : index
    %c256 = arith.constant 256 : index
    %26 = vector.load %arg11[%c0_28, %c256] : memref<224x288xf32, #tpu.memory_space<vmem>>, vector<224x32xf32>
    tpu.vector_store %arg11[%c0_28, %c256], %25 {strides = array<i32>} : memref<224x288xf32, #tpu.memory_space<vmem>>, vector<224x32xf32>,
    %c0_29 = arith.constant 0 : index
    %c0_30 = arith.constant 0 : index
    %27 = vector.load %arg11[%c0_29, %c0_30] : memref<224x288xf32, #tpu.memory_space<vmem>>, vector<224x288xf32>
    %c0_31 = arith.constant 0 : index
    %c0_32 = arith.constant 0 : index
    %28 = vector.load %arg2[%c0_31, %c0_32] : memref<288x64xf32, #tpu.memory_space<vmem>>, vector<288x64xf32>
    %cst = arith.constant dense<0.000000e+00> : vector<224x64xf32>
    %29 = tpu.matmul %27, %28, %cst {dimension_numbers = #tpu.dot_dimension_numbers<[1], [0], [0], [1], [0, 0, 1, 1], [], []>} : vector<224x288xf32>, vector<288x64xf32>, vector<224x64xf32> -> vector<224x64xf32>
    %c0_33 = arith.constant 0 : index
    %c0_34 = arith.constant 0 : index
    %30 = vector.load %arg3[%c0_33, %c0_34] : memref<1x64xf32, #tpu.memory_space<vmem>>, vector<1x64xf32>
    %31 = vector.broadcast %30 : vector<1x64xf32> to vector<224x64xf32>
    %32 = arith.addf %29, %31 : vector<224x64xf32>
    %cst_35 = arith.constant 0.000000e+00 : f32
    %33 = vector.broadcast %cst_35 : f32 to vector<224x64xf32>
    %34 = arith.maximumf %32, %33 : vector<224x64xf32>
    %c0_36 = arith.constant 0 : index
    %c0_37 = arith.constant 0 : index
    %35 = vector.load %arg13[%c0_36, %c0_37] : memref<232x64xf32, #tpu.memory_space<vmem>>, vector<224x64xf32>
    tpu.vector_store %arg13[%c0_36, %c0_37], %34 {strides = array<i32>} : memref<232x64xf32, #tpu.memory_space<vmem>>, vector<224x64xf32>,
    %cst_38 = arith.constant 0.000000e+00 : f32
    %36 = vector.broadcast %cst_38 : f32 to vector<8x64xf32>
    %c224_39 = arith.constant 224 : index
    %c0_40 = arith.constant 0 : index
    %37 = vector.load %arg13[%c224_39, %c0_40] : memref<232x64xf32, #tpu.memory_space<vmem>>, vector<8x64xf32>
    tpu.vector_store %arg13[%c224_39, %c0_40], %36 {strides = array<i32>} : memref<232x64xf32, #tpu.memory_space<vmem>>, vector<8x64xf32>,
    %c0_41 = arith.constant 0 : index
    %c0_42 = arith.constant 0 : index
    %38 = vector.load %arg13[%c0_41, %c0_42] : memref<232x64xf32, #tpu.memory_space<vmem>>, vector<192x64xf32>
    %c0_43 = arith.constant 0 : index
    %c0_44 = arith.constant 0 : index
    %39 = vector.load %arg12[%c0_43, %c0_44] : memref<192x576xf32, #tpu.memory_space<vmem>>, vector<192x64xf32>
    tpu.vector_store %arg12[%c0_43, %c0_44], %38 {strides = array<i32>} : memref<192x576xf32, #tpu.memory_space<vmem>>, vector<192x64xf32>,
    %c1_45 = arith.constant 1 : index
    %c0_46 = arith.constant 0 : index
    %40 = vector.load %arg13[%c1_45, %c0_46] : memref<232x64xf32, #tpu.memory_space<vmem>>, vector<192x64xf32>
    %c0_47 = arith.constant 0 : index
    %c64_48 = arith.constant 64 : index
    %41 = vector.load %arg12[%c0_47, %c64_48] : memref<192x576xf32, #tpu.memory_space<vmem>>, vector<192x64xf32>
    tpu.vector_store %arg12[%c0_47, %c64_48], %40 {strides = array<i32>} : memref<192x576xf32, #tpu.memory_space<vmem>>, vector<192x64xf32>,
    %c2_49 = arith.constant 2 : index
    %c0_50 = arith.constant 0 : index
    %42 = vector.load %arg13[%c2_49, %c0_50] : memref<232x64xf32, #tpu.memory_space<vmem>>, vector<192x64xf32>
    %c0_51 = arith.constant 0 : index
    %c128_52 = arith.constant 128 : index
    %43 = vector.load %arg12[%c0_51, %c128_52] : memref<192x576xf32, #tpu.memory_space<vmem>>, vector<192x64xf32>
    tpu.vector_store %arg12[%c0_51, %c128_52], %42 {strides = array<i32>} : memref<192x576xf32, #tpu.memory_space<vmem>>, vector<192x64xf32>,
    %c16_53 = arith.constant 16 : index
    %c0_54 = arith.constant 0 : index
    %44 = vector.load %arg13[%c16_53, %c0_54] : memref<232x64xf32, #tpu.memory_space<vmem>>, vector<192x64xf32>
    %c0_55 = arith.constant 0 : index
    %c192_56 = arith.constant 192 : index
    %45 = vector.load %arg12[%c0_55, %c192_56] : memref<192x576xf32, #tpu.memory_space<vmem>>, vector<192x64xf32>
    tpu.vector_store %arg12[%c0_55, %c192_56], %44 {strides = array<i32>} : memref<192x576xf32, #tpu.memory_space<vmem>>, vector<192x64xf32>,
    %c17_57 = arith.constant 17 : index
    %c0_58 = arith.constant 0 : index
    %46 = vector.load %arg13[%c17_57, %c0_58] : memref<232x64xf32, #tpu.memory_space<vmem>>, vector<192x64xf32>
    %c0_59 = arith.constant 0 : index
    %c256_60 = arith.constant 256 : index
    %47 = vector.load %arg12[%c0_59, %c256_60] : memref<192x576xf32, #tpu.memory_space<vmem>>, vector<192x64xf32>
    tpu.vector_store %arg12[%c0_59, %c256_60], %46 {strides = array<i32>} : memref<192x576xf32, #tpu.memory_space<vmem>>, vector<192x64xf32>,
    %c18_61 = arith.constant 18 : index
    %c0_62 = arith.constant 0 : index
    %48 = vector.load %arg13[%c18_61, %c0_62] : memref<232x64xf32, #tpu.memory_space<vmem>>, vector<192x64xf32>
    %c0_63 = arith.constant 0 : index
    %c320 = arith.constant 320 : index
    %49 = vector.load %arg12[%c0_63, %c320] : memref<192x576xf32, #tpu.memory_space<vmem>>, vector<192x64xf32>
    tpu.vector_store %arg12[%c0_63, %c320], %48 {strides = array<i32>} : memref<192x576xf32, #tpu.memory_space<vmem>>, vector<192x64xf32>,
    %c32_64 = arith.constant 32 : index
    %c0_65 = arith.constant 0 : index
    %50 = vector.load %arg13[%c32_64, %c0_65] : memref<232x64xf32, #tpu.memory_space<vmem>>, vector<192x64xf32>
    %c0_66 = arith.constant 0 : index
    %c384 = arith.constant 384 : index
    %51 = vector.load %arg12[%c0_66, %c384] : memref<192x576xf32, #tpu.memory_space<vmem>>, vector<192x64xf32>
    tpu.vector_store %arg12[%c0_66, %c384], %50 {strides = array<i32>} : memref<192x576xf32, #tpu.memory_space<vmem>>, vector<192x64xf32>,
    %c33_67 = arith.constant 33 : index
    %c0_68 = arith.constant 0 : index
    %52 = vector.load %arg13[%c33_67, %c0_68] : memref<232x64xf32, #tpu.memory_space<vmem>>, vector<192x64xf32>
    %c0_69 = arith.constant 0 : index
    %c448 = arith.constant 448 : index
    %53 = vector.load %arg12[%c0_69, %c448] : memref<192x576xf32, #tpu.memory_space<vmem>>, vector<192x64xf32>
    tpu.vector_store %arg12[%c0_69, %c448], %52 {strides = array<i32>} : memref<192x576xf32, #tpu.memory_space<vmem>>, vector<192x64xf32>,
    %c34_70 = arith.constant 34 : index
    %c0_71 = arith.constant 0 : index
    %54 = vector.load %arg13[%c34_70, %c0_71] : memref<232x64xf32, #tpu.memory_space<vmem>>, vector<192x64xf32>
    %c0_72 = arith.constant 0 : index
    %c512 = arith.constant 512 : index
    %55 = vector.load %arg12[%c0_72, %c512] : memref<192x576xf32, #tpu.memory_space<vmem>>, vector<192x64xf32>
    tpu.vector_store %arg12[%c0_72, %c512], %54 {strides = array<i32>} : memref<192x576xf32, #tpu.memory_space<vmem>>, vector<192x64xf32>,
    %c0_73 = arith.constant 0 : index
    %c0_74 = arith.constant 0 : index
    %56 = vector.load %arg12[%c0_73, %c0_74] : memref<192x576xf32, #tpu.memory_space<vmem>>, vector<192x576xf32>
    %c0_75 = arith.constant 0 : index
    %c0_76 = arith.constant 0 : index
    %57 = vector.load %arg4[%c0_75, %c0_76] : memref<576x128xf32, #tpu.memory_space<vmem>>, vector<576x128xf32>
    %cst_77 = arith.constant dense<0.000000e+00> : vector<192x128xf32>
    %58 = tpu.matmul %56, %57, %cst_77 {dimension_numbers = #tpu.dot_dimension_numbers<[1], [0], [0], [1], [0, 0, 1, 1], [], []>} : vector<192x576xf32>, vector<576x128xf32>, vector<192x128xf32> -> vector<192x128xf32>
    %c0_78 = arith.constant 0 : index
    %c0_79 = arith.constant 0 : index
    %59 = vector.load %arg5[%c0_78, %c0_79] : memref<1x128xf32, #tpu.memory_space<vmem>>, vector<1x128xf32>
    %60 = vector.broadcast %59 : vector<1x128xf32> to vector<192x128xf32>
    %61 = arith.addf %58, %60 : vector<192x128xf32>
    %cst_80 = arith.constant 0.000000e+00 : f32
    %62 = vector.broadcast %cst_80 : f32 to vector<192x128xf32>
    %63 = arith.maximumf %61, %62 : vector<192x128xf32>
    %c0_81 = arith.constant 0 : index
    %c0_82 = arith.constant 0 : index
    %64 = vector.load %arg14[%c0_81, %c0_82] : memref<192x128xf32, #tpu.memory_space<vmem>>, vector<192x128xf32>
    tpu.vector_store %arg14[%c0_81, %c0_82], %63 {strides = array<i32>} : memref<192x128xf32, #tpu.memory_space<vmem>>, vector<192x128xf32>,
    %c0_83 = arith.constant 0 : index
    %c0_84 = arith.constant 0 : index
    %65 = vector.load %arg7[%c0_83, %c0_84] : memref<32x1xf32, #tpu.memory_space<vmem>>, vector<32x1xf32>
    %c0_85 = arith.constant 0 : index
    %c0_86 = arith.constant 0 : index
    %c0_87 = arith.constant 0 : index
    %66 = vector.load %arg6[%c0_85, %c0_86, %c0_87] : memref<16x32x192xf32, #tpu.memory_space<vmem>>, vector<1x32x192xf32>
    %67 = vector.shape_cast %66 : vector<1x32x192xf32> to vector<32x192xf32>
    %c0_88 = arith.constant 0 : index
    %c0_89 = arith.constant 0 : index
    %68 = vector.load %arg14[%c0_88, %c0_89] : memref<192x128xf32, #tpu.memory_space<vmem>>, vector<192x8xf32>
    %cst_90 = arith.constant dense<0.000000e+00> : vector<32x8xf32>
    %69 = tpu.matmul %67, %68, %cst_90 {dimension_numbers = #tpu.dot_dimension_numbers<[1], [0], [0], [1], [0, 0, 1, 1], [], []>} : vector<32x192xf32>, vector<192x8xf32>, vector<32x8xf32> -> vector<32x8xf32>
    %70 = vector.broadcast %65 : vector<32x1xf32> to vector<32x8xf32>
    %71 = arith.addf %70, %69 : vector<32x8xf32>
    %c1_91 = arith.constant 1 : index
    %c0_92 = arith.constant 0 : index
    %c0_93 = arith.constant 0 : index
    %72 = vector.load %arg6[%c1_91, %c0_92, %c0_93] : memref<16x32x192xf32, #tpu.memory_space<vmem>>, vector<1x32x192xf32>
    %73 = vector.shape_cast %72 : vector<1x32x192xf32> to vector<32x192xf32>
    %c0_94 = arith.constant 0 : index
    %c8 = arith.constant 8 : index
    %74 = vector.load %arg14[%c0_94, %c8] : memref<192x128xf32, #tpu.memory_space<vmem>>, vector<192x8xf32>
    %cst_95 = arith.constant dense<0.000000e+00> : vector<32x8xf32>
    %75 = tpu.matmul %73, %74, %cst_95 {dimension_numbers = #tpu.dot_dimension_numbers<[1], [0], [0], [1], [0, 0, 1, 1], [], []>} : vector<32x192xf32>, vector<192x8xf32>, vector<32x8xf32> -> vector<32x8xf32>
    %76 = arith.addf %71, %75 : vector<32x8xf32>
    %c2_96 = arith.constant 2 : index
    %c0_97 = arith.constant 0 : index
    %c0_98 = arith.constant 0 : index
    %77 = vector.load %arg6[%c2_96, %c0_97, %c0_98] : memref<16x32x192xf32, #tpu.memory_space<vmem>>, vector<1x32x192xf32>
    %78 = vector.shape_cast %77 : vector<1x32x192xf32> to vector<32x192xf32>
    %c0_99 = arith.constant 0 : index
    %c16_100 = arith.constant 16 : index
    %79 = vector.load %arg14[%c0_99, %c16_100] : memref<192x128xf32, #tpu.memory_space<vmem>>, vector<192x8xf32>
    %cst_101 = arith.constant dense<0.000000e+00> : vector<32x8xf32>
    %80 = tpu.matmul %78, %79, %cst_101 {dimension_numbers = #tpu.dot_dimension_numbers<[1], [0], [0], [1], [0, 0, 1, 1], [], []>} : vector<32x192xf32>, vector<192x8xf32>, vector<32x8xf32> -> vector<32x8xf32>
    %81 = arith.addf %76, %80 : vector<32x8xf32>
    %c3 = arith.constant 3 : index
    %c0_102 = arith.constant 0 : index
    %c0_103 = arith.constant 0 : index
    %82 = vector.load %arg6[%c3, %c0_102, %c0_103] : memref<16x32x192xf32, #tpu.memory_space<vmem>>, vector<1x32x192xf32>
    %83 = vector.shape_cast %82 : vector<1x32x192xf32> to vector<32x192xf32>
    %c0_104 = arith.constant 0 : index
    %c24 = arith.constant 24 : index
    %84 = vector.load %arg14[%c0_104, %c24] : memref<192x128xf32, #tpu.memory_space<vmem>>, vector<192x8xf32>
    %cst_105 = arith.constant dense<0.000000e+00> : vector<32x8xf32>
    %85 = tpu.matmul %83, %84, %cst_105 {dimension_numbers = #tpu.dot_dimension_numbers<[1], [0], [0], [1], [0, 0, 1, 1], [], []>} : vector<32x192xf32>, vector<192x8xf32>, vector<32x8xf32> -> vector<32x8xf32>
    %86 = arith.addf %81, %85 : vector<32x8xf32>
    %c4 = arith.constant 4 : index
    %c0_106 = arith.constant 0 : index
    %c0_107 = arith.constant 0 : index
    %87 = vector.load %arg6[%c4, %c0_106, %c0_107] : memref<16x32x192xf32, #tpu.memory_space<vmem>>, vector<1x32x192xf32>
    %88 = vector.shape_cast %87 : vector<1x32x192xf32> to vector<32x192xf32>
    %c0_108 = arith.constant 0 : index
    %c32_109 = arith.constant 32 : index
    %89 = vector.load %arg14[%c0_108, %c32_109] : memref<192x128xf32, #tpu.memory_space<vmem>>, vector<192x8xf32>
    %cst_110 = arith.constant dense<0.000000e+00> : vector<32x8xf32>
    %90 = tpu.matmul %88, %89, %cst_110 {dimension_numbers = #tpu.dot_dimension_numbers<[1], [0], [0], [1], [0, 0, 1, 1], [], []>} : vector<32x192xf32>, vector<192x8xf32>, vector<32x8xf32> -> vector<32x8xf32>
    %91 = arith.addf %86, %90 : vector<32x8xf32>
    %c5 = arith.constant 5 : index
    %c0_111 = arith.constant 0 : index
    %c0_112 = arith.constant 0 : index
    %92 = vector.load %arg6[%c5, %c0_111, %c0_112] : memref<16x32x192xf32, #tpu.memory_space<vmem>>, vector<1x32x192xf32>
    %93 = vector.shape_cast %92 : vector<1x32x192xf32> to vector<32x192xf32>
    %c0_113 = arith.constant 0 : index
    %c40 = arith.constant 40 : index
    %94 = vector.load %arg14[%c0_113, %c40] : memref<192x128xf32, #tpu.memory_space<vmem>>, vector<192x8xf32>
    %cst_114 = arith.constant dense<0.000000e+00> : vector<32x8xf32>
    %95 = tpu.matmul %93, %94, %cst_114 {dimension_numbers = #tpu.dot_dimension_numbers<[1], [0], [0], [1], [0, 0, 1, 1], [], []>} : vector<32x192xf32>, vector<192x8xf32>, vector<32x8xf32> -> vector<32x8xf32>
    %96 = arith.addf %91, %95 : vector<32x8xf32>
    %c6 = arith.constant 6 : index
    %c0_115 = arith.constant 0 : index
    %c0_116 = arith.constant 0 : index
    %97 = vector.load %arg6[%c6, %c0_115, %c0_116] : memref<16x32x192xf32, #tpu.memory_space<vmem>>, vector<1x32x192xf32>
    %98 = vector.shape_cast %97 : vector<1x32x192xf32> to vector<32x192xf32>
    %c0_117 = arith.constant 0 : index
    %c48 = arith.constant 48 : index
    %99 = vector.load %arg14[%c0_117, %c48] : memref<192x128xf32, #tpu.memory_space<vmem>>, vector<192x8xf32>
    %cst_118 = arith.constant dense<0.000000e+00> : vector<32x8xf32>
    %100 = tpu.matmul %98, %99, %cst_118 {dimension_numbers = #tpu.dot_dimension_numbers<[1], [0], [0], [1], [0, 0, 1, 1], [], []>} : vector<32x192xf32>, vector<192x8xf32>, vector<32x8xf32> -> vector<32x8xf32>
    %101 = arith.addf %96, %100 : vector<32x8xf32>
    %c7 = arith.constant 7 : index
    %c0_119 = arith.constant 0 : index
    %c0_120 = arith.constant 0 : index
    %102 = vector.load %arg6[%c7, %c0_119, %c0_120] : memref<16x32x192xf32, #tpu.memory_space<vmem>>, vector<1x32x192xf32>
    %103 = vector.shape_cast %102 : vector<1x32x192xf32> to vector<32x192xf32>
    %c0_121 = arith.constant 0 : index
    %c56 = arith.constant 56 : index
    %104 = vector.load %arg14[%c0_121, %c56] : memref<192x128xf32, #tpu.memory_space<vmem>>, vector<192x8xf32>
    %cst_122 = arith.constant dense<0.000000e+00> : vector<32x8xf32>
    %105 = tpu.matmul %103, %104, %cst_122 {dimension_numbers = #tpu.dot_dimension_numbers<[1], [0], [0], [1], [0, 0, 1, 1], [], []>} : vector<32x192xf32>, vector<192x8xf32>, vector<32x8xf32> -> vector<32x8xf32>
    %106 = arith.addf %101, %105 : vector<32x8xf32>
    %c8_123 = arith.constant 8 : index
    %c0_124 = arith.constant 0 : index
    %c0_125 = arith.constant 0 : index
    %107 = vector.load %arg6[%c8_123, %c0_124, %c0_125] : memref<16x32x192xf32, #tpu.memory_space<vmem>>, vector<1x32x192xf32>
    %108 = vector.shape_cast %107 : vector<1x32x192xf32> to vector<32x192xf32>
    %c0_126 = arith.constant 0 : index
    %c64_127 = arith.constant 64 : index
    %109 = vector.load %arg14[%c0_126, %c64_127] : memref<192x128xf32, #tpu.memory_space<vmem>>, vector<192x8xf32>
    %cst_128 = arith.constant dense<0.000000e+00> : vector<32x8xf32>
    %110 = tpu.matmul %108, %109, %cst_128 {dimension_numbers = #tpu.dot_dimension_numbers<[1], [0], [0], [1], [0, 0, 1, 1], [], []>} : vector<32x192xf32>, vector<192x8xf32>, vector<32x8xf32> -> vector<32x8xf32>
    %111 = arith.addf %106, %110 : vector<32x8xf32>
    %c9 = arith.constant 9 : index
    %c0_129 = arith.constant 0 : index
    %c0_130 = arith.constant 0 : index
    %112 = vector.load %arg6[%c9, %c0_129, %c0_130] : memref<16x32x192xf32, #tpu.memory_space<vmem>>, vector<1x32x192xf32>
    %113 = vector.shape_cast %112 : vector<1x32x192xf32> to vector<32x192xf32>
    %c0_131 = arith.constant 0 : index
    %c72 = arith.constant 72 : index
    %114 = vector.load %arg14[%c0_131, %c72] : memref<192x128xf32, #tpu.memory_space<vmem>>, vector<192x8xf32>
    %cst_132 = arith.constant dense<0.000000e+00> : vector<32x8xf32>
    %115 = tpu.matmul %113, %114, %cst_132 {dimension_numbers = #tpu.dot_dimension_numbers<[1], [0], [0], [1], [0, 0, 1, 1], [], []>} : vector<32x192xf32>, vector<192x8xf32>, vector<32x8xf32> -> vector<32x8xf32>
    %116 = arith.addf %111, %115 : vector<32x8xf32>
    %c10 = arith.constant 10 : index
    %c0_133 = arith.constant 0 : index
    %c0_134 = arith.constant 0 : index
    %117 = vector.load %arg6[%c10, %c0_133, %c0_134] : memref<16x32x192xf32, #tpu.memory_space<vmem>>, vector<1x32x192xf32>
    %118 = vector.shape_cast %117 : vector<1x32x192xf32> to vector<32x192xf32>
    %c0_135 = arith.constant 0 : index
    %c80 = arith.constant 80 : index
    %119 = vector.load %arg14[%c0_135, %c80] : memref<192x128xf32, #tpu.memory_space<vmem>>, vector<192x8xf32>
    %cst_136 = arith.constant dense<0.000000e+00> : vector<32x8xf32>
    %120 = tpu.matmul %118, %119, %cst_136 {dimension_numbers = #tpu.dot_dimension_numbers<[1], [0], [0], [1], [0, 0, 1, 1], [], []>} : vector<32x192xf32>, vector<192x8xf32>, vector<32x8xf32> -> vector<32x8xf32>
    %121 = arith.addf %116, %120 : vector<32x8xf32>
    %c11 = arith.constant 11 : index
    %c0_137 = arith.constant 0 : index
    %c0_138 = arith.constant 0 : index
    %122 = vector.load %arg6[%c11, %c0_137, %c0_138] : memref<16x32x192xf32, #tpu.memory_space<vmem>>, vector<1x32x192xf32>
    %123 = vector.shape_cast %122 : vector<1x32x192xf32> to vector<32x192xf32>
    %c0_139 = arith.constant 0 : index
    %c88 = arith.constant 88 : index
    %124 = vector.load %arg14[%c0_139, %c88] : memref<192x128xf32, #tpu.memory_space<vmem>>, vector<192x8xf32>
    %cst_140 = arith.constant dense<0.000000e+00> : vector<32x8xf32>
    %125 = tpu.matmul %123, %124, %cst_140 {dimension_numbers = #tpu.dot_dimension_numbers<[1], [0], [0], [1], [0, 0, 1, 1], [], []>} : vector<32x192xf32>, vector<192x8xf32>, vector<32x8xf32> -> vector<32x8xf32>
    %126 = arith.addf %121, %125 : vector<32x8xf32>
    %c12 = arith.constant 12 : index
    %c0_141 = arith.constant 0 : index
    %c0_142 = arith.constant 0 : index
    %127 = vector.load %arg6[%c12, %c0_141, %c0_142] : memref<16x32x192xf32, #tpu.memory_space<vmem>>, vector<1x32x192xf32>
    %128 = vector.shape_cast %127 : vector<1x32x192xf32> to vector<32x192xf32>
    %c0_143 = arith.constant 0 : index
    %c96_144 = arith.constant 96 : index
    %129 = vector.load %arg14[%c0_143, %c96_144] : memref<192x128xf32, #tpu.memory_space<vmem>>, vector<192x8xf32>
    %cst_145 = arith.constant dense<0.000000e+00> : vector<32x8xf32>
    %130 = tpu.matmul %128, %129, %cst_145 {dimension_numbers = #tpu.dot_dimension_numbers<[1], [0], [0], [1], [0, 0, 1, 1], [], []>} : vector<32x192xf32>, vector<192x8xf32>, vector<32x8xf32> -> vector<32x8xf32>
    %131 = arith.addf %126, %130 : vector<32x8xf32>
    %c13 = arith.constant 13 : index
    %c0_146 = arith.constant 0 : index
    %c0_147 = arith.constant 0 : index
    %132 = vector.load %arg6[%c13, %c0_146, %c0_147] : memref<16x32x192xf32, #tpu.memory_space<vmem>>, vector<1x32x192xf32>
    %133 = vector.shape_cast %132 : vector<1x32x192xf32> to vector<32x192xf32>
    %c0_148 = arith.constant 0 : index
    %c104 = arith.constant 104 : index
    %134 = vector.load %arg14[%c0_148, %c104] : memref<192x128xf32, #tpu.memory_space<vmem>>, vector<192x8xf32>
    %cst_149 = arith.constant dense<0.000000e+00> : vector<32x8xf32>
    %135 = tpu.matmul %133, %134, %cst_149 {dimension_numbers = #tpu.dot_dimension_numbers<[1], [0], [0], [1], [0, 0, 1, 1], [], []>} : vector<32x192xf32>, vector<192x8xf32>, vector<32x8xf32> -> vector<32x8xf32>
    %136 = arith.addf %131, %135 : vector<32x8xf32>
    %c14 = arith.constant 14 : index
    %c0_150 = arith.constant 0 : index
    %c0_151 = arith.constant 0 : index
    %137 = vector.load %arg6[%c14, %c0_150, %c0_151] : memref<16x32x192xf32, #tpu.memory_space<vmem>>, vector<1x32x192xf32>
    %138 = vector.shape_cast %137 : vector<1x32x192xf32> to vector<32x192xf32>
    %c0_152 = arith.constant 0 : index
    %c112 = arith.constant 112 : index
    %139 = vector.load %arg14[%c0_152, %c112] : memref<192x128xf32, #tpu.memory_space<vmem>>, vector<192x8xf32>
    %cst_153 = arith.constant dense<0.000000e+00> : vector<32x8xf32>
    %140 = tpu.matmul %138, %139, %cst_153 {dimension_numbers = #tpu.dot_dimension_numbers<[1], [0], [0], [1], [0, 0, 1, 1], [], []>} : vector<32x192xf32>, vector<192x8xf32>, vector<32x8xf32> -> vector<32x8xf32>
    %141 = arith.addf %136, %140 : vector<32x8xf32>
    %c15 = arith.constant 15 : index
    %c0_154 = arith.constant 0 : index
    %c0_155 = arith.constant 0 : index
    %142 = vector.load %arg6[%c15, %c0_154, %c0_155] : memref<16x32x192xf32, #tpu.memory_space<vmem>>, vector<1x32x192xf32>
    %143 = vector.shape_cast %142 : vector<1x32x192xf32> to vector<32x192xf32>
    %c0_156 = arith.constant 0 : index
    %c120 = arith.constant 120 : index
    %144 = vector.load %arg14[%c0_156, %c120] : memref<192x128xf32, #tpu.memory_space<vmem>>, vector<192x8xf32>
    %cst_157 = arith.constant dense<0.000000e+00> : vector<32x8xf32>
    %145 = tpu.matmul %143, %144, %cst_157 {dimension_numbers = #tpu.dot_dimension_numbers<[1], [0], [0], [1], [0, 0, 1, 1], [], []>} : vector<32x192xf32>, vector<192x8xf32>, vector<32x8xf32> -> vector<32x8xf32>
    %146 = arith.addf %141, %145 : vector<32x8xf32>
    %cst_158 = arith.constant 0.000000e+00 : f32
    %147 = vector.broadcast %cst_158 : f32 to vector<32x8xf32>
    %148 = arith.maximumf %146, %147 : vector<32x8xf32>
    %c0_159 = arith.constant 0 : index
    %c0_160 = arith.constant 0 : index
    %149 = vector.load %arg8[%c0_159, %c0_160] : memref<128x32xf32, #tpu.memory_space<vmem>>, vector<128x32xf32>
    %cst_161 = arith.constant dense<0.000000e+00> : vector<128x8xf32>
    %150 = tpu.matmul %149, %148, %cst_161 {dimension_numbers = #tpu.dot_dimension_numbers<[1], [0], [0], [1], [0, 0, 1, 1], [], []>} : vector<128x32xf32>, vector<32x8xf32>, vector<128x8xf32> -> vector<128x8xf32>
    %c0_162 = arith.constant 0 : index
    %c0_163 = arith.constant 0 : index
    %151 = vector.load %arg9[%c0_162, %c0_163] : memref<128x1xf32, #tpu.memory_space<vmem>>, vector<128x1xf32>
    %152 = vector.broadcast %151 : vector<128x1xf32> to vector<128x8xf32>
    %153 = arith.addf %150, %152 : vector<128x8xf32>
    %c0_164 = arith.constant 0 : index
    %c0_165 = arith.constant 0 : index
    %c0_166 = arith.constant 0 : index
    %154 = vector.load %arg10[%c0_164, %c0_165, %c0_166] : memref<1x128x8xf32, #tpu.memory_space<vmem>>, vector<1x128x8xf32>
    %155 = vector.shape_cast %154 : vector<1x128x8xf32> to vector<128x8xf32>
    %156 = vector.shape_cast %153 : vector<128x8xf32> to vector<1x128x8xf32>
    tpu.vector_store %arg10[%c0_164, %c0_165, %c0_166], %156 {strides = array<i32>} : memref<1x128x8xf32, #tpu.memory_space<vmem>>, vector<1x128x8xf32>,
    return
  }
  func.func @transform_0(%arg0: i32) -> (i32, i32, i32) {
    %c0_i32 = arith.constant 0 : i32
    %c0_i32_0 = arith.constant 0 : i32
    %c0_i32_1 = arith.constant 0 : i32
    return %arg0, %c0_i32, %c0_i32_0 : i32, i32, i32
  }
  func.func @transform_1(%arg0: i32) -> (i32, i32) {
    %c0_i32 = arith.constant 0 : i32
    %c0_i32_0 = arith.constant 0 : i32
    %c0_i32_1 = arith.constant 0 : i32
    return %c0_i32, %c0_i32_0 : i32, i32
  }
  func.func @transform_2(%arg0: i32) -> (i32, i32) {
    %c0_i32 = arith.constant 0 : i32
    %c0_i32_0 = arith.constant 0 : i32
    %c0_i32_1 = arith.constant 0 : i32
    return %c0_i32, %c0_i32_0 : i32, i32
  }
  func.func @transform_3(%arg0: i32) -> (i32, i32) {
    %c0_i32 = arith.constant 0 : i32
    %c0_i32_0 = arith.constant 0 : i32
    %c0_i32_1 = arith.constant 0 : i32
    return %c0_i32, %c0_i32_0 : i32, i32
  }
  func.func @transform_4(%arg0: i32) -> (i32, i32) {
    %c0_i32 = arith.constant 0 : i32
    %c0_i32_0 = arith.constant 0 : i32
    %c0_i32_1 = arith.constant 0 : i32
    return %c0_i32, %c0_i32_0 : i32, i32
  }
  func.func @transform_5(%arg0: i32) -> (i32, i32, i32) {
    %c0_i32 = arith.constant 0 : i32
    %c0_i32_0 = arith.constant 0 : i32
    %c0_i32_1 = arith.constant 0 : i32
    %c0_i32_2 = arith.constant 0 : i32
    return %c0_i32, %c0_i32_0, %c0_i32_1 : i32, i32, i32
  }
  func.func @transform_6(%arg0: i32) -> (i32, i32) {
    %c0_i32 = arith.constant 0 : i32
    %c0_i32_0 = arith.constant 0 : i32
    %c0_i32_1 = arith.constant 0 : i32
    return %c0_i32, %c0_i32_0 : i32, i32
  }
  func.func @transform_7(%arg0: i32) -> (i32, i32) {
    %c0_i32 = arith.constant 0 : i32
    %c0_i32_0 = arith.constant 0 : i32
    %c0_i32_1 = arith.constant 0 : i32
    return %c0_i32, %c0_i32_0 : i32, i32
  }
  func.func @transform_8(%arg0: i32) -> (i32, i32) {
    %c0_i32 = arith.constant 0 : i32
    %c0_i32_0 = arith.constant 0 : i32
    %c0_i32_1 = arith.constant 0 : i32
    return %c0_i32, %c0_i32_0 : i32, i32
  }
  func.func @transform_9(%arg0: i32) -> (i32, i32, i32) {
    %c0_i32 = arith.constant 0 : i32
    %c0_i32_0 = arith.constant 0 : i32
    %c0_i32_1 = arith.constant 0 : i32
    return %arg0, %c0_i32, %c0_i32_0 : i32, i32, i32
  }
}

</mosaic_0001>

<bundles_post_ra>
// kernel: _nnq_forward_jit.1
= control target key start
LH: loop header
LB: loop body
LE: loop exit
PB: predicated region body
PF: predicated region fallthrough
CT: control target
= control target key end

     0   :  { %s7742_s30 = smov 0   ;;  %s11739_s0 = inlined_call_operand.vmem [shape: f32[2,264,32], index: 0, kind: input, shape index: {}]   ;;  %s11740_s1 = inlined_call_operand.vmem [shape: f32[288,64], index: 1, kind: input, shape index: {}]   ;;  %s11741_s2 = inlined_call_operand.vmem [shape: f32[1,64], index: 2, kind: input, shape index: {}]   ;;  %s11742_s3 = inlined_call_operand.vmem [shape: f32[576,128], index: 3, kind: input, shape index: {}]   ;;  %s11743_s4 = inlined_call_operand.vmem [shape: f32[1,128], index: 4, kind: input, shape index: {}]   ;;  %s11744_s5 = inlined_call_operand.vmem [shape: f32[16,32,192], index: 5, kind: input, shape index: {}]   ;;  %s11745_s6 = inlined_call_operand.vmem [shape: f32[32,1], index: 6, kind: input, shape index: {}]   ;;  %s11746_s7 = inlined_call_operand.vmem [shape: f32[128,32], index: 7, kind: input, shape index: {}]   ;;  %s11747_s8 = inlined_call_operand.vmem [shape: f32[128,1], index: 8, kind: input, shape index: {}]   ;;  %s11748_s9 = inlined_call_operand.vmem [shape: f32[2,128,8], index: 9, kind: output, shape index: {}]  }
   0x1 LB: > { %s6440_s10 = sadd.s32 4294967295, %s7673_s30   ;;  %p6444_p0 = scmp.ge.s32.totalorder %s7673_s30, 1  ;;  %s7673_s30 = sphi %s7742_s30, %s19_s30  }
   0x2   : > { %p287_p1 = scmp.lt.s32.totalorder %s7673_s30, 3 }
   0x4   : > { %p288_p2 = pnand %p6444_p0, %p287_p1 }
   0x6   : > { %291 = sbr.rel (%p288_p2) target bundleno = 2283 (0x8eb), region = 56 }
   0xb   : > { %p323_p3 = scmp.lt.s32.totalorder %s6440_s10, 1  ;;  %s7675_s15 = smov 32   ;;  %vm361_vm0 = vcmask 261120   ;;  %vm530_vm1 = vcmask 523520   ;;  %vm699_vm2 = vcmask 785920   ;;  %vm868_vm3 = vcmask 1048320  }
   0xc   : > { %s7676_s16 = smov 64   ;;  %s7677_s17 = smov 96   ;;  %vm2052_vm4 = vcmask 523264   ;;  %vm2250_vm5 = vcmask 1048064   ;;  %vm6368_vm6 = vcmask 64512  }
   0xd   : > { %s11866_s10 = smov (!%p323_p3, %s6440_s10), 1  ;;  %s7680_s28 = smov 120  }
   0xe   : > { %s6735_s11 = smul.u32 264, %s11866_s10  ;;  %s7681_s29 = smov 112  }
   0xf   : > { %s7683_s12 = smov 88   ;;  %s7685_s25 = smov 72  }
  0x10   : > { %s7756_s14 = scalar_lea.vmem %s11739_s0, %s6735_s11  ;;  %s7682_s11 = smov 104  }
  0x11   : > { %v394_v0 = vld [vmem:[%s7756_s14 + $0x21] sm:$0xff]  ;;  %v392_v2 = vld [vmem:[%s7756_s14 + $0x11] sm:$0xff]  ;;  %v395_v3 = vld [vmem:[%s7756_s14 + $0x29] sm:$0xff]  ;;  %s7687_s22 = smov 48   ;;  %s7688_s13 = smov 40  }
  0x12   : > { %v390_v1 = vld [vmem:[%s7756_s14 + $0x1] sm:$0xff]  ;;  %454 = vrot.lane.b32.xlu2 %v394_v0, %s7675_s15  ;;  %450 = vrot.lane.b32.xlu1 %v392_v2, %s7675_s15  ;;  %v391_v4 = vld [vmem:[%s7756_s14 + $0x9] sm:$0xff]  ;;  %927 = vst.msk [vmem:[#allocation2 + $0x38] sm:$0xff] %vm361_vm0, %v394_v0  ;;  %s7689_s24 = smov 24   ;;  %s7691_s18 = smov 16  }
  0x13   : > { %446 = vrot.lane.b32.xlu0 %v390_v1, %s7675_s15  ;;  %v393_v5 = vld [vmem:[%s7756_s14 + $0x19] sm:$0xff]  ;;  %v398_v6 = vld [vmem:[%s7756_s14 + $0x41] sm:$0xff]  ;;  %v396_v7 = vld [vmem:[%s7756_s14 + $0x31] sm:$0xff] }
  0x14   : > { %v397_v8 = vld [vmem:[%s7756_s14 + $0x39] sm:$0xff]  ;;  %v399_v10 = vld [vmem:[%s7756_s14 + $0x49] sm:$0xff]  ;;  %v400_v11 = vld [vmem:[%s7756_s14 + $0x51] sm:$0xff] }
  0x15   : > { %v401_v9 = vld [vmem:[%s7756_s14 + $0x59] sm:$0xff]  ;;  %v404_v12 = vld [vmem:[%s7756_s14 + $0x71] sm:$0xff]  ;;  %v402_v13 = vld [vmem:[%s7756_s14 + $0x61] sm:$0xff]  ;;  %930 = vst.msk [vmem:[#allocation2 + $0x80] sm:$0xff] %vm361_vm0, %v397_v8 }
  0x16   : > { %v403_v14 = vld [vmem:[%s7756_s14 + $0x69] sm:$0xff]  ;;  %v405_v16 = vld [vmem:[%s7756_s14 + $0x79] sm:$0xff]  ;;  %v406_v17 = vld [vmem:[%s7756_s14 + $0x81] sm:$0xff]  ;;  %933 = vst.msk [vmem:[#allocation2 + $0xc8] sm:$0xff] %vm361_vm0, %v400_v11 }
  0x17   : > { %v407_v15 = vld [vmem:[%s7756_s14 + $0x89] sm:$0xff]  ;;  %v410_v18 = vld [vmem:[%s7756_s14 + $0xa1] sm:$0xff]  ;;  %v408_v19 = vld [vmem:[%s7756_s14 + $0x91] sm:$0xff] }
  0x18   : > { %v409_v20 = vld [vmem:[%s7756_s14 + $0x99] sm:$0xff]  ;;  %v411_v22 = vld [vmem:[%s7756_s14 + $0xa9] sm:$0xff]  ;;  %v412_v23 = vld [vmem:[%s7756_s14 + $0xb1] sm:$0xff] }
  0x19   : > { %v413_v21 = vld [vmem:[%s7756_s14 + $0xb9] sm:$0xff]  ;;  %v416_v25 = vld [vmem:[%s7756_s14 + $0xd1] sm:$0xff]  ;;  %v414_v26 = vld [vmem:[%s7756_s14 + $0xc1] sm:$0xff] }
  0x1a   : > { %456 = vrot.lane.b32.xlu2 %v395_v3, %s7675_s15  ;;  %452 = vrot.lane.b32.xlu1 %v393_v5, %s7675_s15  ;;  %v7808_v24 = vld [vmem:[%s7756_s14 + $0x20] sm:$0xff]  ;;  %v415_v27 = vld [vmem:[%s7756_s14 + $0xc9] sm:$0xff] }
  0x1b   : > { %448 = vrot.lane.b32.xlu0 %v391_v4, %s7675_s15  ;;  %366 = vst.msk [vmem:[#allocation2 + $0x60] sm:$0xff] %vm361_vm0, %v7808_v24  ;;  %v7821_v28 = vld [vmem:[%s7756_s14 + $0x28] sm:$0xff]  ;;  %v417_v30 = vld [vmem:[%s7756_s14 + $0xd9] sm:$0xff]  ;;  %v7874_v42 = vld [vmem:[%s7756_s14 + $0x70] sm:$0xff] }
  0x1c   : > { %367 = vst.msk [vmem:[#allocation2 + $0x78] sm:$0xff] %vm361_vm0, %v7821_v28  ;;  %v560_v29 = vld [vmem:[%s7756_s14 + $0xa] sm:$0xff]  ;;  %v559_v31 = vld [vmem:[%s7756_s14 + $0x2] sm:$0xff]  ;;  %v7840_v34 = vld [vmem:[%s7756_s14 + $0x12] sm:$0xff] }
  0x1d   : > { %v7832_v32 = vld [vmem:[%s7756_s14 + $0x40] sm:$0xff]  ;;  %v7853_v37 = vld [vmem:[%s7756_s14 + $0x58] sm:$0xff]  ;;  %v7862_v39 = vld [vmem:[%s7756_s14 + $0x2a] sm:$0xff]  ;;  %376 = vst.msk [vmem:[#allocation2 + $0x150] sm:$0xff] %vm361_vm0, %v7874_v42 }
  0x1e   : > { %370 = vst.msk [vmem:[#allocation2 + $0xc0] sm:$0xff] %vm361_vm0, %v7832_v32  ;;  %v7837_v33 = vld [vmem:[%s7756_s14 + $0x22] sm:$0xff]  ;;  %v7843_v35 = vld [vmem:[%s7756_s14 + $0x1a] sm:$0xff]  ;;  %v7865_v40 = vld [vmem:[%s7756_s14 + $0x32] sm:$0xff] }
  0x1f   : > { %v333_v36 = vld [vmem:[%s7756_s14] sm:$0xff]  ;;  %373 = vst.msk [vmem:[#allocation2 + $0x108] sm:$0xff] %vm361_vm0, %v7853_v37  ;;  %v7877_v43 = vld [vmem:[%s7756_s14 + $0x10] sm:$0xff]  ;;  %v334_v44 = vld [vmem:[%s7756_s14 + $0x8] sm:$0xff] }
  0x20   : > { %362 = vst.msk [vmem:[#allocation2] sm:$0xff] %vm361_vm0, %v333_v36  ;;  %v7859_v38 = vld [vmem:[%s7756_s14 + $0x3a] sm:$0xff]  ;;  %v7884_v45 = vld [vmem:[%s7756_s14 + $0x52] sm:$0xff]  ;;  %v7887_v46 = vld [vmem:[%s7756_s14 + $0x42] sm:$0xff] }
  0x21   : > { %364 = vst.msk [vmem:[#allocation2 + $0x30] sm:$0xff] %vm361_vm0, %v7877_v43  ;;  %v7892_v47 = vld [vmem:[%s7756_s14 + $0x4a] sm:$0xff]  ;;  %v7905_v50 = vld [vmem:[%s7756_s14 + $0x18] sm:$0xff]  ;;  %v7922_v54 = vld [vmem:[%s7756_s14 + $0x62] sm:$0xff] }
  0x22   : > { %462 = vrot.lane.b32.xlu2 %v398_v6, %s7675_s15  ;;  %460 = vrot.lane.b32.xlu1 %v397_v8, %s7675_s15  ;;  %363 = vst.msk [vmem:[#allocation2 + $0x18] sm:$0xff] %vm361_vm0, %v334_v44  ;;  %v7902_v49 = vld [vmem:[%s7756_s14 + $0x88] sm:$0xff]  ;;  %v7909_v51 = vld [vmem:[%s7756_s14 + $0x30] sm:$0xff] }
  0x23   : > { %458 = vrot.lane.b32.xlu0 %v396_v7, %s7675_s15  ;;  %379 = vst.msk [vmem:[#allocation2 + $0x198] sm:$0xff] %vm361_vm0, %v7902_v49  ;;  %v7914_v52 = vld [vmem:[%s7756_s14 + $0x6a] sm:$0xff]  ;;  %v7917_v53 = vld [vmem:[%s7756_s14 + $0x5a] sm:$0xff]  ;;  %v7945_v59 = vld [vmem:[%s7756_s14 + $0x82] sm:$0xff] }
  0x24   : > { %365 = vst.msk [vmem:[#allocation2 + $0x48] sm:$0xff] %vm361_vm0, %v7905_v50  ;;  %v7933_v56 = vld [vmem:[%s7756_s14 + $0xa0] sm:$0xff]  ;;  %v7936_v57 = vld [vmem:[%s7756_s14 + $0x38] sm:$0xff]  ;;  %v7940_v58 = vld [vmem:[%s7756_s14 + $0x48] sm:$0xff] }
  0x25   : > { %368 = vst.msk [vmem:[#allocation2 + $0x90] sm:$0xff] %vm361_vm0, %v7909_v51  ;;  %v7948_v60 = vld [vmem:[%s7756_s14 + $0x72] sm:$0xff]  ;;  %v7953_v61 = vld [vmem:[%s7756_s14 + $0x7a] sm:$0xff]  ;;  %v7975_v4 = vld [vmem:[%s7756_s14 + $0x8a] sm:$0xff] }
  0x26   : > { %382 = vst.msk [vmem:[#allocation2 + $0x1e0] sm:$0xff] %vm361_vm0, %v7933_v56  ;;  %v7965_v1 = vld [vmem:[%s7756_s14 + $0xb8] sm:$0xff]  ;;  %v7969_v2 = vld [vmem:[%s7756_s14 + $0x50] sm:$0xff]  ;;  %v7979_v5 = vld [vmem:[%s7756_s14 + $0x60] sm:$0xff] }
  0x27   : > { %369 = vst.msk [vmem:[#allocation2 + $0xa8] sm:$0xff] %vm361_vm0, %v7936_v57  ;;  %v7972_v3 = vld [vmem:[%s7756_s14 + $0x9a] sm:$0xff]  ;;  %v7982_v6 = vld [vmem:[%s7756_s14 + $0x92] sm:$0xff] }
  0x28   : > { %371 = vst.msk [vmem:[#allocation2 + $0xd8] sm:$0xff] %vm361_vm0, %v7940_v58  ;;  %v8070_v36 = vld [vmem:[%s7756_s14 + $0xda] sm:$0xff] }
  0x29   : > { %385 = vst.msk [vmem:[#allocation2 + $0x228] sm:$0xff] %vm361_vm0, %v7965_v1 }
  0x2a   : > { %468 = vrot.lane.b32.xlu2 %v401_v9, %s7675_s15  ;;  %466 = vrot.lane.b32.xlu1 %v400_v11, %s7675_s15  ;;  %372 = vst.msk [vmem:[#allocation2 + $0xf0] sm:$0xff] %vm361_vm0, %v7969_v2  ;;  %v8002_v11 = vld [vmem:[%s7756_s14 + $0x68] sm:$0xff] }
  0x2b   : > { %464 = vrot.lane.b32.xlu0 %v399_v10, %s7675_s15  ;;  %374 = vst.msk [vmem:[#allocation2 + $0x120] sm:$0xff] %vm361_vm0, %v7979_v5  ;;  %v7998_v10 = vld [vmem:[%s7756_s14 + $0xd0] sm:$0xff] }
  0x2c   : > { %388 = vst.msk [vmem:[#allocation2 + $0x270] sm:$0xff] %vm361_vm0, %v7998_v10 }
  0x2d   : > { %375 = vst.msk [vmem:[#allocation2 + $0x138] sm:$0xff] %vm361_vm0, %v8002_v11 }
  0x32   : > { %474 = vrot.lane.b32.xlu2 %v404_v12, %s7675_s15  ;;  %472 = vrot.lane.b32.xlu1 %v403_v14, %s7675_s15  ;;  %v8005_v12 = vld [vmem:[%s7756_s14 + $0xb2] sm:$0xff] }
  0x33   : > { %470 = vrot.lane.b32.xlu0 %v402_v13, %s7675_s15  ;;  %v8008_v13 = vld [vmem:[%s7756_s14 + $0xa2] sm:$0xff]  ;;  %v8012_v14 = vld [vmem:[%s7756_s14 + $0x78] sm:$0xff] }
  0x34   : > { %377 = vst.msk [vmem:[#allocation2 + $0x168] sm:$0xff] %vm361_vm0, %v8012_v14 }
  0x3a   : > { %480 = vrot.lane.b32.xlu2 %v407_v15, %s7675_s15  ;;  %478 = vrot.lane.b32.xlu1 %v406_v17, %s7675_s15  ;;  %v8015_v15 = vld [vmem:[%s7756_s14 + $0xaa] sm:$0xff] }
  0x3b   : > { %476 = vrot.lane.b32.xlu0 %v405_v16, %s7675_s15 }
  0x42   : > { %486 = vrot.lane.b32.xlu2 %v410_v18, %s7675_s15  ;;  %484 = vrot.lane.b32.xlu1 %v409_v20, %s7675_s15  ;;  %v8035_v20 = vld [vmem:[%s7756_s14 + $0x90] sm:$0xff] }
  0x43   : > { %482 = vrot.lane.b32.xlu0 %v408_v19, %s7675_s15  ;;  %v8031_v19 = vld [vmem:[%s7756_s14 + $0x80] sm:$0xff]  ;;  %380 = vst.msk [vmem:[#allocation2 + $0x1b0] sm:$0xff] %vm361_vm0, %v8035_v20 }
  0x44   : > { %378 = vst.msk [vmem:[#allocation2 + $0x180] sm:$0xff] %vm361_vm0, %v8031_v19 }
  0x4a   : > { %492 = vrot.lane.b32.xlu2 %v413_v21, %s7675_s15  ;;  %490 = vrot.lane.b32.xlu1 %v412_v23, %s7675_s15  ;;  %v8038_v21 = vld [vmem:[%s7756_s14 + $0xca] sm:$0xff]  ;;  %v8045_v23 = vld [vmem:[%s7756_s14 + $0xc2] sm:$0xff] }
  0x4b   : > { %488 = vrot.lane.b32.xlu0 %v411_v22, %s7675_s15  ;;  %v8041_v22 = vld [vmem:[%s7756_s14 + $0xba] sm:$0xff] }
  0x52   : > { %498 = vrot.lane.b32.xlu2 %v416_v25, %s7675_s15  ;;  %496 = vrot.lane.b32.xlu1 %v415_v27, %s7675_s15 }
  0x53   : > { %494 = vrot.lane.b32.xlu0 %v414_v26, %s7675_s15 }
  0x5a   : > { %617 = vrot.lane.b32.xlu2 %v560_v29, %s7676_s16  ;;  %615 = vrot.lane.b32.xlu1 %v559_v31, %s7676_s16  ;;  %v8059_v29 = vld [vmem:[%s7756_s14 + $0x98] sm:$0xff] }
  0x5b   : > { %500 = vrot.lane.b32.xlu0 %v417_v30, %s7675_s15  ;;  %v8063_v30 = vld [vmem:[%s7756_s14 + $0xa8] sm:$0xff]  ;;  %v8066_v31 = vld [vmem:[%s7756_s14 + $0xd2] sm:$0xff]  ;;  %381 = vst.msk [vmem:[#allocation2 + $0x1c8] sm:$0xff] %vm361_vm0, %v8059_v29 }
  0x5c   : > { %383 = vst.msk [vmem:[#allocation2 + $0x1f8] sm:$0xff] %vm361_vm0, %v8063_v30 }
  0x62   : > { %623 = vrot.lane.b32.xlu2 %v7837_v33, %s7676_s16  ;;  %621 = vrot.lane.b32.xlu1 %v7843_v35, %s7676_s16 }
  0x63   : > { %619 = vrot.lane.b32.xlu0 %v7840_v34, %s7676_s16 }
  0x6a   : > { %629 = vrot.lane.b32.xlu2 %v7859_v38, %s7676_s16  ;;  %627 = vrot.lane.b32.xlu1 %v7865_v40, %s7676_s16 }
  0x6b   : > { %625 = vrot.lane.b32.xlu0 %v7862_v39, %s7676_s16 }
  0x6c   : > { %v455_v41 = vpop.permute.xlu2 %454 }
  0x6d   : > { %535 = vst.msk [vmem:[#allocation2 + $0x60] sm:$0xff] %vm530_vm1, %v455_v41 }
  0x72   : > { %635 = vrot.lane.b32.xlu2 %v7884_v45, %s7676_s16  ;;  %633 = vrot.lane.b32.xlu1 %v7892_v47, %s7676_s16 }
  0x73   : > { %631 = vrot.lane.b32.xlu0 %v7887_v46, %s7676_s16 }
  0x74   : > { %v457_v48 = vpop.permute.xlu2 %456 }
  0x75   : > { %536 = vst.msk [vmem:[#allocation2 + $0x78] sm:$0xff] %vm530_vm1, %v457_v48 }
  0x7a   : > { %641 = vrot.lane.b32.xlu2 %v7914_v52, %s7676_s16  ;;  %639 = vrot.lane.b32.xlu1 %v7922_v54, %s7676_s16 }
  0x7b   : > { %637 = vrot.lane.b32.xlu0 %v7917_v53, %s7676_s16 }
  0x7c   : > { %v463_v55 = vpop.permute.xlu2 %462 }
  0x7d   : > { %539 = vst.msk [vmem:[#allocation2 + $0xc0] sm:$0xff] %vm530_vm1, %v463_v55  ;;  %v8084_v55 = vld [vmem:[%s7756_s14 + $0xb0] sm:$0xff] }
  0x7e   : > { %384 = vst.msk [vmem:[#allocation2 + $0x210] sm:$0xff] %vm361_vm0, %v8084_v55 }
  0x82   : > { %647 = vrot.lane.b32.xlu2 %v7945_v59, %s7676_s16  ;;  %645 = vrot.lane.b32.xlu1 %v7953_v61, %s7676_s16 }
  0x83   : > { %643 = vrot.lane.b32.xlu0 %v7948_v60, %s7676_s16 }
  0x84   : > { %v469_v62 = vpop.permute.xlu2 %468  ;;  %v451_v0 = vpop.permute.xlu1 %450 }
  0x85   : > { %v447_v63 = vpop.permute.xlu0 %446  ;;  %542 = vst.msk [vmem:[#allocation2 + $0x108] sm:$0xff] %vm530_vm1, %v469_v62  ;;  %v8088_v62 = vld [vmem:[%s7756_s14 + $0xc0] sm:$0xff] }
  0x86   : > { %531 = vst.msk [vmem:[#allocation2] sm:$0xff] %vm530_vm1, %v447_v63 }
  0x87   : > { %533 = vst.msk [vmem:[#allocation2 + $0x30] sm:$0xff] %vm530_vm1, %v451_v0 }
  0x88   : > { %386 = vst.msk [vmem:[#allocation2 + $0x240] sm:$0xff] %vm361_vm0, %v8088_v62 }
  0x8a   : > { %653 = vrot.lane.b32.xlu2 %v7972_v3, %s7676_s16  ;;  %651 = vrot.lane.b32.xlu1 %v7982_v6, %s7676_s16 }
  0x8b   : > { %649 = vrot.lane.b32.xlu0 %v7975_v4, %s7676_s16 }
  0x8c   : > { %v475_v7 = vpop.permute.xlu2 %474  ;;  %v453_v9 = vpop.permute.xlu1 %452 }
  0x8d   : > { %v449_v8 = vpop.permute.xlu0 %448  ;;  %545 = vst.msk [vmem:[#allocation2 + $0x150] sm:$0xff] %vm530_vm1, %v475_v7  ;;  %v8103_v7 = vld [vmem:[%s7756_s14 + $0xc8] sm:$0xff] }
  0x8e   : > { %532 = vst.msk [vmem:[#allocation2 + $0x18] sm:$0xff] %vm530_vm1, %v449_v8  ;;  %v8107_v8 = vld [vmem:[%s7756_s14 + $0xd8] sm:$0xff] }
  0x8f   : > { %534 = vst.msk [vmem:[#allocation2 + $0x48] sm:$0xff] %vm530_vm1, %v453_v9 }
  0x90   : > { %387 = vst.msk [vmem:[#allocation2 + $0x258] sm:$0xff] %vm361_vm0, %v8103_v7 }
  0x91   : > { %389 = vst.msk [vmem:[#allocation2 + $0x288] sm:$0xff] %vm361_vm0, %v8107_v8 }
  0x92   : > { %659 = vrot.lane.b32.xlu2 %v8005_v12, %s7676_s16  ;;  %657 = vrot.lane.b32.xlu1 %v8015_v15, %s7676_s16 }
  0x93   : > { %655 = vrot.lane.b32.xlu0 %v8008_v13, %s7676_s16 }
  0x94   : > { %v481_v16 = vpop.permute.xlu2 %480  ;;  %v461_v18 = vpop.permute.xlu1 %460 }
  0x95   : > { %v459_v17 = vpop.permute.xlu0 %458  ;;  %548 = vst.msk [vmem:[#allocation2 + $0x198] sm:$0xff] %vm530_vm1, %v481_v16 }
  0x96   : > { %537 = vst.msk [vmem:[#allocation2 + $0x90] sm:$0xff] %vm530_vm1, %v459_v17 }
  0x97   : > { %538 = vst.msk [vmem:[#allocation2 + $0xa8] sm:$0xff] %vm530_vm1, %v461_v18 }
  0x9a   : > { %665 = vrot.lane.b32.xlu2 %v8038_v21, %s7676_s16  ;;  %663 = vrot.lane.b32.xlu1 %v8045_v23, %s7676_s16 }
  0x9b   : > { %661 = vrot.lane.b32.xlu0 %v8041_v22, %s7676_s16 }
  0x9c   : > { %v487_v25 = vpop.permute.xlu2 %486  ;;  %v467_v27 = vpop.permute.xlu1 %466 }
  0x9d   : > { %v465_v26 = vpop.permute.xlu0 %464  ;;  %551 = vst.msk [vmem:[#allocation2 + $0x1e0] sm:$0xff] %vm530_vm1, %v487_v25 }
  0x9e   : > { %540 = vst.msk [vmem:[#allocation2 + $0xd8] sm:$0xff] %vm530_vm1, %v465_v26 }
  0x9f   : > { %541 = vst.msk [vmem:[#allocation2 + $0xf0] sm:$0xff] %vm530_vm1, %v467_v27 }
  0xa2   : > { %784 = vrot.lane.b32.xlu2 %v7877_v43, %s7677_s17  ;;  %669 = vrot.lane.b32.xlu1 %v8070_v36, %s7676_s16 }
  0xa3   : > { %667 = vrot.lane.b32.xlu0 %v8066_v31, %s7676_s16 }
  0xa4   : > { %v493_v41 = vpop.permute.xlu2 %492  ;;  %v473_v48 = vpop.permute.xlu1 %472 }
  0xa5   : > { %v471_v44 = vpop.permute.xlu0 %470  ;;  %554 = vst.msk [vmem:[#allocation2 + $0x228] sm:$0xff] %vm530_vm1, %v493_v41 }
  0xa6   : > { %543 = vst.msk [vmem:[#allocation2 + $0x120] sm:$0xff] %vm530_vm1, %v471_v44 }
  0xa7   : > { %544 = vst.msk [vmem:[#allocation2 + $0x138] sm:$0xff] %vm530_vm1, %v473_v48 }
  0xaa   : > { %790 = vrot.lane.b32.xlu2 %v7821_v28, %s7677_s17  ;;  %788 = vrot.lane.b32.xlu1 %v7808_v24, %s7677_s17 }
  0xab   : > { %786 = vrot.lane.b32.xlu0 %v7905_v50, %s7677_s17 }
  0xac   : > { %v499_v43 = vpop.permute.xlu2 %498  ;;  %v479_v0 = vpop.permute.xlu1 %478 }
  0xad   : > { %v477_v63 = vpop.permute.xlu0 %476  ;;  %557 = vst.msk [vmem:[#allocation2 + $0x270] sm:$0xff] %vm530_vm1, %v499_v43 }
  0xae   : > { %546 = vst.msk [vmem:[#allocation2 + $0x168] sm:$0xff] %vm530_vm1, %v477_v63 }
  0xaf   : > { %547 = vst.msk [vmem:[#allocation2 + $0x180] sm:$0xff] %vm530_vm1, %v479_v0 }
  0xb2   : > { %796 = vrot.lane.b32.xlu2 %v7832_v32, %s7677_s17  ;;  %794 = vrot.lane.b32.xlu1 %v7936_v57, %s7677_s17 }
  0xb3   : > { %792 = vrot.lane.b32.xlu0 %v7909_v51, %s7677_s17 }
  0xb4   : > { %v618_v50 = vpop.permute.xlu2 %617  ;;  %v485_v16 = vpop.permute.xlu1 %484 }
  0xb5   : > { %v483_v9 = vpop.permute.xlu0 %482  ;;  %701 = vst.msk [vmem:[#allocation2 + $0x18] sm:$0xff] %vm699_vm2, %v618_v50 }
  0xb6   : > { %549 = vst.msk [vmem:[#allocation2 + $0x1b0] sm:$0xff] %vm530_vm1, %v483_v9 }
  0xb7   : > { %550 = vst.msk [vmem:[#allocation2 + $0x1c8] sm:$0xff] %vm530_vm1, %v485_v16 }
  0xba   : > { %802 = vrot.lane.b32.xlu2 %v7853_v37, %s7677_s17  ;;  %800 = vrot.lane.b32.xlu1 %v7969_v2, %s7677_s17 }
  0xbb   : > { %798 = vrot.lane.b32.xlu0 %v7940_v58, %s7677_s17 }
  0xbc   : > { %v624_v17 = vpop.permute.xlu2 %623  ;;  %v491_v25 = vpop.permute.xlu1 %490 }
  0xbd   : > { %v489_v18 = vpop.permute.xlu0 %488  ;;  %704 = vst.msk [vmem:[#allocation2 + $0x60] sm:$0xff] %vm699_vm2, %v624_v17 }
  0xbe   : > { %552 = vst.msk [vmem:[#allocation2 + $0x1f8] sm:$0xff] %vm530_vm1, %v489_v18  ;;  %v1612_v18 = vld [vmem:[%s11740_s1 + $0x78] sm:$0xff] }
  0xbf   : > { %553 = vst.msk [vmem:[#allocation2 + $0x210] sm:$0xff] %vm530_vm1, %v491_v25  ;;  %v1611_v25 = vld [vmem:[%s11740_s1 + $0x70] sm:$0xff]  ;;  %1721 = vmatpush.msra.mxu0 %v1612_v18 }
  0xc1   : > { %1722 = vmatpush.msra.mxu0 %v1611_v25 }
  0xc2   : > { %808 = vrot.lane.b32.xlu2 %v7874_v42, %s7677_s17  ;;  %806 = vrot.lane.b32.xlu1 %v8002_v11, %s7677_s17 }
  0xc3   : > { %804 = vrot.lane.b32.xlu0 %v7979_v5, %s7677_s17 }
  0xc4   : > { %v630_v26 = vpop.permute.xlu2 %629  ;;  %v497_v41 = vpop.permute.xlu1 %496 }
  0xc5   : > { %v495_v27 = vpop.permute.xlu0 %494  ;;  %707 = vst.msk [vmem:[#allocation2 + $0xa8] sm:$0xff] %vm699_vm2, %v630_v26  ;;  %v1610_v26 = vld [vmem:[%s11740_s1 + $0x68] sm:$0xff] }
  0xc6   : > { %555 = vst.msk [vmem:[#allocation2 + $0x240] sm:$0xff] %vm530_vm1, %v495_v27  ;;  %v1609_v27 = vld [vmem:[%s11740_s1 + $0x60] sm:$0xff]  ;;  %1723 = vmatpush.msra.mxu0 %v1610_v26  ;;  %v1604_v26 = vld [vmem:[%s11740_s1 + $0x38] sm:$0xff] }
  0xc7   : > { %556 = vst.msk [vmem:[#allocation2 + $0x258] sm:$0xff] %vm530_vm1, %v497_v41 }
  0xc8   : > { %1724 = vmatpush.msra.mxu0 %v1609_v27  ;;  %v1603_v27 = vld [vmem:[%s11740_s1 + $0x30] sm:$0xff] }
  0xca   : > { %814 = vrot.lane.b32.xlu2 %v7902_v49, %s7677_s17  ;;  %812 = vrot.lane.b32.xlu1 %v8031_v19, %s7677_s17 }
  0xcb   : > { %810 = vrot.lane.b32.xlu0 %v8012_v14, %s7677_s17 }
  0xcc   : > { %v636_v44 = vpop.permute.xlu2 %635  ;;  %v616_v43 = vpop.permute.xlu1 %615 }
  0xcd   : > { %v501_v48 = vpop.permute.xlu0 %500  ;;  %710 = vst.msk [vmem:[#allocation2 + $0xf0] sm:$0xff] %vm699_vm2, %v636_v44 }
  0xce   : > { %558 = vst.msk [vmem:[#allocation2 + $0x288] sm:$0xff] %vm530_vm1, %v501_v48 }
  0xcf   : > { %700 = vst.msk [vmem:[#allocation2] sm:$0xff] %vm699_vm2, %v616_v43  ;;  %v1608_v43 = vld [vmem:[%s11740_s1 + $0x58] sm:$0xff] }
  0xd0   : > { %1725 = vmatpush.msra.mxu0 %v1608_v43 }
  0xd2   : > { %820 = vrot.lane.b32.xlu2 %v7933_v56, %s7677_s17  ;;  %818 = vrot.lane.b32.xlu1 %v8059_v29, %s7677_s17 }
  0xd3   : > { %816 = vrot.lane.b32.xlu0 %v8035_v20, %s7677_s17 }
  0xd4   : > { %v642_v63 = vpop.permute.xlu2 %641  ;;  %v622_v50 = vpop.permute.xlu1 %621 }
  0xd5   : > { %v620_v0 = vpop.permute.xlu0 %619  ;;  %713 = vst.msk [vmem:[#allocation2 + $0x138] sm:$0xff] %vm699_vm2, %v642_v63  ;;  %v1607_v63 = vld [vmem:[%s11740_s1 + $0x50] sm:$0xff] }
  0xd6   : > { %702 = vst.msk [vmem:[#allocation2 + $0x30] sm:$0xff] %vm699_vm2, %v620_v0  ;;  %v8195_v0 = vld [vmem:[%s7756_s14 + $0xe8] sm:$0xff]  ;;  %1726 = vmatpush.msra.mxu0 %v1607_v63 }
  0xd7   : > { %703 = vst.msk [vmem:[#allocation2 + $0x48] sm:$0xff] %vm699_vm2, %v622_v50  ;;  %v8199_v50 = vld [vmem:[%s7756_s14 + $0xe0] sm:$0xff] }
  0xda   : > { %826 = vrot.lane.b32.xlu2 %v7965_v1, %s7677_s17  ;;  %824 = vrot.lane.b32.xlu1 %v8084_v55, %s7677_s17 }
  0xdb   : > { %822 = vrot.lane.b32.xlu0 %v8063_v30, %s7677_s17 }
  0xdc   : > { %v648_v9 = vpop.permute.xlu2 %647  ;;  %v628_v17 = vpop.permute.xlu1 %627 }
  0xdd   : > { %v626_v16 = vpop.permute.xlu0 %625  ;;  %716 = vst.msk [vmem:[#allocation2 + $0x180] sm:$0xff] %vm699_vm2, %v648_v9  ;;  %v1606_v9 = vld [vmem:[%s11740_s1 + $0x48] sm:$0xff] }
  0xde   : > { %705 = vst.msk [vmem:[#allocation2 + $0x78] sm:$0xff] %vm699_vm2, %v626_v16  ;;  %v1605_v16 = vld [vmem:[%s11740_s1 + $0x40] sm:$0xff]  ;;  %1727 = vmatpush.msra.mxu0 %v1606_v9 }
  0xdf   : > { %706 = vst.msk [vmem:[#allocation2 + $0x90] sm:$0xff] %vm699_vm2, %v628_v17  ;;  %v1597_v9 = vld [vmem:[%s11740_s1] sm:$0xff] }
  0xe0   : > { %1728 = vmatpush.msra.mxu0 %v1605_v16 }
  0xe2   : > { %832 = vrot.lane.b32.xlu2 %v7998_v10, %s7677_s17  ;;  %830 = vrot.lane.b32.xlu1 %v8103_v7, %s7677_s17 }
  0xe3   : > { %828 = vrot.lane.b32.xlu0 %v8088_v62, %s7677_s17  ;;  %1729 = vmatpush.msra.mxu0 %v1604_v26 }
  0xe4   : > { %v654_v41 = vpop.permute.xlu2 %653  ;;  %v634_v48 = vpop.permute.xlu1 %633 }
  0xe5   : > { %v632_v44 = vpop.permute.xlu0 %631  ;;  %719 = vst.msk [vmem:[#allocation2 + $0x1c8] sm:$0xff] %vm699_vm2, %v654_v41  ;;  %v1602_v41 = vld [vmem:[%s11740_s1 + $0x28] sm:$0xff]  ;;  %1730 = vmatpush.msra.mxu0 %v1603_v27 }
  0xe6   : > { %708 = vst.msk [vmem:[#allocation2 + $0xc0] sm:$0xff] %vm699_vm2, %v632_v44  ;;  %v1601_v44 = vld [vmem:[%s11740_s1 + $0x20] sm:$0xff] }
  0xe7   : > { %709 = vst.msk [vmem:[#allocation2 + $0xd8] sm:$0xff] %vm699_vm2, %v634_v48  ;;  %1731 = vmatpush.msra.mxu0 %v1602_v41  ;;  %v979_v41 = vld [vmem:[%s7756_s14 + $0xe2] sm:$0xff] }
  0xe9   : > { %1732 = vmatpush.msra.mxu0 %v1601_v44 }
  0xea   : > { %838 = vrot.lane.b32.xlu2 %v8195_v0, %s7677_s17  ;;  %836 = vrot.lane.b32.xlu1 %v8199_v50, %s7677_s17 }
  0xeb   : > { %834 = vrot.lane.b32.xlu0 %v8107_v8, %s7677_s17 }
  0xec   : > { %v660_v17 = vpop.permute.xlu2 %659  ;;  %v640_v25 = vpop.permute.xlu1 %639 }
  0xed   : > { %v638_v18 = vpop.permute.xlu0 %637  ;;  %722 = vst.msk [vmem:[#allocation2 + $0x210] sm:$0xff] %vm699_vm2, %v660_v17 }
  0xee   : > { %711 = vst.msk [vmem:[#allocation2 + $0x108] sm:$0xff] %vm699_vm2, %v638_v18 }
  0xef   : > { %712 = vst.msk [vmem:[#allocation2 + $0x120] sm:$0xff] %vm699_vm2, %v640_v25 }
  0xf2   : > { %1013 = vrot.lane.b32.xlu2 %v7837_v33, %s7675_s15  ;;  %1011 = vrot.lane.b32.xlu1 %v7843_v35, %s7675_s15  ;;  %v1600_v33 = vld [vmem:[%s11740_s1 + $0x18] sm:$0xff]  ;;  %v1598_v35 = vld [vmem:[%s11740_s1 + $0x8] sm:$0xff] }
  0xf3   : > { %1009 = vrot.lane.b32.xlu0 %v7840_v34, %s7675_s15  ;;  %v1599_v34 = vld [vmem:[%s11740_s1 + $0x10] sm:$0xff]  ;;  %1733 = vmatpush.msra.mxu0 %v1600_v33 }
  0xf4   : > { %v666_v48 = vpop.permute.xlu2 %665  ;;  %v646_v63 = vpop.permute.xlu1 %645 }
  0xf5   : > { %v644_v43 = vpop.permute.xlu0 %643  ;;  %725 = vst.msk [vmem:[#allocation2 + $0x258] sm:$0xff] %vm699_vm2, %v666_v48  ;;  %1734 = vmatpush.msra.mxu0 %v1599_v34  ;;  %v980_v48 = vld [vmem:[%s7756_s14 + $0xea] sm:$0xff] }
  0xf6   : > { %714 = vst.msk [vmem:[#allocation2 + $0x150] sm:$0xff] %vm699_vm2, %v644_v43 }
  0xf7   : > { %715 = vst.msk [vmem:[#allocation2 + $0x168] sm:$0xff] %vm699_vm2, %v646_v63  ;;  %1735 = vmatpush.msra.mxu0 %v1598_v35 }
  0xf9   : > { %1736 = vmatpush.msra.mxu0 %v1597_v9 }
  0xfa   : > { %1019 = vrot.lane.b32.xlu2 %v7859_v38, %s7675_s15  ;;  %1017 = vrot.lane.b32.xlu1 %v7865_v40, %s7675_s15 }
  0xfb   : > { %1015 = vrot.lane.b32.xlu0 %v7862_v39, %s7675_s15 }
  0xfc   : > { %v785_v16 = vpop.permute.xlu2 %784  ;;  %v652_v18 = vpop.permute.xlu1 %651 }
  0xfd   : > { %v650_v17 = vpop.permute.xlu0 %649  ;;  %869 = vst.msk [vmem:[#allocation2] sm:$0xff] %vm868_vm3, %v785_v16 }
  0xfe   : > { %717 = vst.msk [vmem:[#allocation2 + $0x198] sm:$0xff] %vm699_vm2, %v650_v17 }
  0xff   : > { %718 = vst.msk [vmem:[#allocation2 + $0x1b0] sm:$0xff] %vm699_vm2, %v652_v18  ;;  %v898_v18 = vld [vmem:[%s7756_s14 + $0x19] sm:$0xff] }
 0x100   : > { %926 = vst.msk [vmem:[#allocation2 + $0x20] sm:$0xff] %vm361_vm0, %v898_v18 }
 0x102   : > { %1025 = vrot.lane.b32.xlu2 %v7884_v45, %s7675_s15  ;;  %1023 = vrot.lane.b32.xlu1 %v7892_v47, %s7675_s15 }
 0x103   : > { %1021 = vrot.lane.b32.xlu0 %v7887_v46, %s7675_s15 }
 0x104   : > { %v791_v38 = vpop.permute.xlu2 %790  ;;  %v1513_v40 = vld [vmem:[#allocation2] sm:$0xff]  ;;  %v658_v25 = vpop.permute.xlu1 %657 }
 0x105   : > { %v656_v39 = vpop.permute.xlu0 %655  ;;  %872 = vst.msk [vmem:[#allocation2 + $0x48] sm:$0xff] %vm868_vm3, %v791_v38  ;;  %1737 = vmatmul.f32.vlgmr.msra.gmra.mxu0 %v1513_v40 }
 0x106   : > { %720 = vst.msk [vmem:[#allocation2 + $0x1e0] sm:$0xff] %vm699_vm2, %v656_v39 }
 0x107   : > { %721 = vst.msk [vmem:[#allocation2 + $0x1f8] sm:$0xff] %vm699_vm2, %v658_v25  ;;  %v8380_v25 = vld [vmem:[%s7756_s14 + $0x31] sm:$0xff] }
 0x108   : > { %929 = vst.msk [vmem:[#allocation2 + $0x68] sm:$0xff] %vm361_vm0, %v8380_v25 }
 0x10a   : > { %1031 = vrot.lane.b32.xlu2 %v7914_v52, %s7675_s15  ;;  %1029 = vrot.lane.b32.xlu1 %v7922_v54, %s7675_s15 }
 0x10b   : > { %1027 = vrot.lane.b32.xlu0 %v7917_v53, %s7675_s15 }
 0x10c   : > { %v797_v45 = vpop.permute.xlu2 %796  ;;  %v664_v47 = vpop.permute.xlu1 %663 }
 0x10d   : > { %v662_v46 = vpop.permute.xlu0 %661  ;;  %875 = vst.msk [vmem:[#allocation2 + $0x90] sm:$0xff] %vm868_vm3, %v797_v45 }
 0x10e   : > { %723 = vst.msk [vmem:[#allocation2 + $0x228] sm:$0xff] %vm699_vm2, %v662_v46 }
 0x10f   : > { %724 = vst.msk [vmem:[#allocation2 + $0x240] sm:$0xff] %vm699_vm2, %v664_v47 }
 0x112   : > { %1037 = vrot.lane.b32.xlu2 %v7945_v59, %s7675_s15  ;;  %1035 = vrot.lane.b32.xlu1 %v7953_v61, %s7675_s15 }
 0x113   : > { %1033 = vrot.lane.b32.xlu0 %v7948_v60, %s7675_s15 }
 0x114   : > { %v803_v52 = vpop.permute.xlu2 %802  ;;  %v670_v54 = vpop.permute.xlu1 %669  ;;  %v1531_v16 = vld [vmem:[#allocation2 + $0x90] sm:$0xff] }
 0x115   : > { %v668_v53 = vpop.permute.xlu0 %667  ;;  %878 = vst.msk [vmem:[#allocation2 + $0xd8] sm:$0xff] %vm868_vm3, %v803_v52  ;;  %v8404_v52 = vld [vmem:[%s7756_s14 + $0x49] sm:$0xff] }
 0x116   : > { %726 = vst.msk [vmem:[#allocation2 + $0x270] sm:$0xff] %vm699_vm2, %v668_v53 }
 0x117   : > { %727 = vst.msk [vmem:[#allocation2 + $0x288] sm:$0xff] %vm699_vm2, %v670_v54 }
 0x118   : > { %932 = vst.msk [vmem:[#allocation2 + $0xb0] sm:$0xff] %vm361_vm0, %v8404_v52 }
 0x11a   : > { %1043 = vrot.lane.b32.xlu2 %v7972_v3, %s7675_s15  ;;  %1041 = vrot.lane.b32.xlu1 %v7982_v6, %s7675_s15 }
 0x11b   : > { %1039 = vrot.lane.b32.xlu0 %v7975_v4, %s7675_s15 }
 0x11c   : > { %v809_v59 = vpop.permute.xlu2 %808  ;;  %v789_v61 = vpop.permute.xlu1 %788  ;;  %v1540_v54 = vld [vmem:[#allocation2 + $0xd8] sm:$0xff] }
 0x11d   : > { %v787_v60 = vpop.permute.xlu0 %786  ;;  %881 = vst.msk [vmem:[#allocation2 + $0x120] sm:$0xff] %vm868_vm3, %v809_v59 }
 0x11e   : > { %870 = vst.msk [vmem:[#allocation2 + $0x18] sm:$0xff] %vm868_vm3, %v787_v60  ;;  %v8428_v60 = vld [vmem:[%s7756_s14 + $0x61] sm:$0xff] }
 0x11f   : > { %871 = vst.msk [vmem:[#allocation2 + $0x30] sm:$0xff] %vm868_vm3, %v789_v61 }
 0x120   : > { %935 = vst.msk [vmem:[#allocation2 + $0xf8] sm:$0xff] %vm361_vm0, %v8428_v60 }
 0x122   : > { %1049 = vrot.lane.b32.xlu2 %v8005_v12, %s7675_s15  ;;  %1047 = vrot.lane.b32.xlu1 %v8015_v15, %s7675_s15 }
 0x123   : > { %1045 = vrot.lane.b32.xlu0 %v8008_v13, %s7675_s15 }
 0x124   : > { %v815_v3 = vpop.permute.xlu2 %814  ;;  %v795_v26 = vpop.permute.xlu1 %794 }
 0x125   : > { %v793_v4 = vpop.permute.xlu0 %792  ;;  %884 = vst.msk [vmem:[#allocation2 + $0x168] sm:$0xff] %vm868_vm3, %v815_v3  ;;  %v1516_v6 = vld [vmem:[#allocation2 + $0x18] sm:$0xff] }
 0x126   : > { %873 = vst.msk [vmem:[#allocation2 + $0x60] sm:$0xff] %vm868_vm3, %v793_v4  ;;  %1740 = vmatmul.f32.gmra.mxu0 %v1516_v6  ;;  %v1519_v12 = vld [vmem:[#allocation2 + $0x30] sm:$0xff]  ;;  %v8452_v6 = vld [vmem:[%s7756_s14 + $0x79] sm:$0xff] }
 0x127   : > { %874 = vst.msk [vmem:[#allocation2 + $0x78] sm:$0xff] %vm868_vm3, %v795_v26 }
 0x128   : > { %938 = vst.msk [vmem:[#allocation2 + $0x140] sm:$0xff] %vm361_vm0, %v8452_v6 }
 0x12a   : > { %1055 = vrot.lane.b32.xlu2 %v8038_v21, %s7675_s15  ;;  %1053 = vrot.lane.b32.xlu1 %v8045_v23, %s7675_s15  ;;  %v1522_v23 = vld [vmem:[#allocation2 + $0x48] sm:$0xff] }
 0x12b   : > { %1051 = vrot.lane.b32.xlu0 %v8041_v22, %s7675_s15 }
 0x12c   : > { %v821_v13 = vpop.permute.xlu2 %820  ;;  %v801_v27 = vpop.permute.xlu1 %800 }
 0x12d   : > { %v799_v15 = vpop.permute.xlu0 %798  ;;  %887 = vst.msk [vmem:[#allocation2 + $0x1b0] sm:$0xff] %vm868_vm3, %v821_v13  ;;  %v1525_v43 = vld [vmem:[#allocation2 + $0x60] sm:$0xff]  ;;  %v8471_v13 = vld [vmem:[%s7756_s14 + $0x91] sm:$0xff] }
 0x12e   : > { %876 = vst.msk [vmem:[#allocation2 + $0xa8] sm:$0xff] %vm868_vm3, %v799_v15  ;;  %1743 = vmatmul.f32.gmra.mxu0 %v1519_v12  ;;  %v1528_v34 = vld [vmem:[#allocation2 + $0x78] sm:$0xff]  ;;  %v1549_v15 = vld [vmem:[#allocation2 + $0x120] sm:$0xff] }
 0x12f   : > { %877 = vst.msk [vmem:[#allocation2 + $0xc0] sm:$0xff] %vm868_vm3, %v801_v27 }
 0x130   : > { %941 = vst.msk [vmem:[#allocation2 + $0x188] sm:$0xff] %vm361_vm0, %v8471_v13 }
 0x132   : > { %1061 = vrot.lane.b32.xlu2 %v979_v41, %s7675_s15  ;;  %1059 = vrot.lane.b32.xlu1 %v8070_v36, %s7675_s15  ;;  %v8490_v41 = vld [vmem:[%s7756_s14 + $0xa9] sm:$0xff] }
 0x133   : > { %1057 = vrot.lane.b32.xlu0 %v8066_v31, %s7675_s15  ;;  %944 = vst.msk [vmem:[#allocation2 + $0x1d0] sm:$0xff] %vm361_vm0, %v8490_v41 }
 0x134   : > { %v827_v21 = vpop.permute.xlu2 %826  ;;  %v807_v44 = vpop.permute.xlu1 %806 }
 0x135   : > { %v805_v22 = vpop.permute.xlu0 %804  ;;  %890 = vst.msk [vmem:[#allocation2 + $0x1f8] sm:$0xff] %vm868_vm3, %v827_v21  ;;  %v1534_v39 = vld [vmem:[#allocation2 + $0xa8] sm:$0xff]  ;;  %v8494_v21 = vld [vmem:[%s7756_s14 + $0xb9] sm:$0xff] }
 0x136   : > { %879 = vst.msk [vmem:[#allocation2 + $0xf0] sm:$0xff] %vm868_vm3, %v805_v22  ;;  %1746 = vmatmul.f32.gmra.mxu0 %v1522_v23  ;;  %v1537_v46 = vld [vmem:[#allocation2 + $0xc0] sm:$0xff]  ;;  %v1147_v22 = vld [vmem:[%s7756_s14 + $0xf0] sm:$0xff] }
 0x137   : > { %880 = vst.msk [vmem:[#allocation2 + $0x108] sm:$0xff] %vm868_vm3, %v807_v44 }
 0x138   : > { %946 = vst.msk [vmem:[#allocation2 + $0x200] sm:$0xff] %vm361_vm0, %v8494_v21 }
 0x13a   : > { %1179 = vrot.lane.b32.xlu2 %v7821_v28, %s7676_s16  ;;  %1177 = vrot.lane.b32.xlu1 %v7808_v24, %s7676_s16  ;;  %v8335_v24 = vld [vmem:[%s7756_s14 + $0x69] sm:$0xff] }
 0x13b   : > { %1063 = vrot.lane.b32.xlu0 %v980_v48, %s7675_s15  ;;  %936 = vst.msk [vmem:[#allocation2 + $0x110] sm:$0xff] %vm361_vm0, %v8335_v24 }
 0x13c   : > { %v833_v31 = vpop.permute.xlu2 %832  ;;  %v813_v63 = vpop.permute.xlu1 %812 }
 0x13d   : > { %v811_v36 = vpop.permute.xlu0 %810  ;;  %893 = vst.msk [vmem:[#allocation2 + $0x240] sm:$0xff] %vm868_vm3, %v833_v31  ;;  %v1543_v3 = vld [vmem:[#allocation2 + $0xf0] sm:$0xff]  ;;  %v8509_v31 = vld [vmem:[%s7756_s14 + $0xc1] sm:$0xff] }
 0x13e   : > { %882 = vst.msk [vmem:[#allocation2 + $0x138] sm:$0xff] %vm868_vm3, %v811_v36  ;;  %1749 = vmatmul.f32.gmra.mxu0 %v1525_v43  ;;  %v1546_v26 = vld [vmem:[#allocation2 + $0x108] sm:$0xff]  ;;  %v8513_v36 = vld [vmem:[%s7756_s14 + $0xd1] sm:$0xff] }
 0x13f   : > { %883 = vst.msk [vmem:[#allocation2 + $0x150] sm:$0xff] %vm868_vm3, %v813_v63 }
 0x140   : > { %947 = vst.msk [vmem:[#allocation2 + $0x218] sm:$0xff] %vm361_vm0, %v8509_v31 }
 0x141   : > { %949 = vst.msk [vmem:[#allocation2 + $0x248] sm:$0xff] %vm361_vm0, %v8513_v36 }
 0x142   : > { %1185 = vrot.lane.b32.xlu2 %v7832_v32, %s7676_s16  ;;  %1183 = vrot.lane.b32.xlu1 %v7936_v57, %s7676_s16  ;;  %v897_v32 = vld [vmem:[%s7756_s14 + $0x11] sm:$0xff] }
 0x143   : > { %1181 = vrot.lane.b32.xlu0 %v7909_v51, %s7676_s16  ;;  %925 = vst.msk [vmem:[#allocation2 + $0x8] sm:$0xff] %vm361_vm0, %v897_v32  ;;  %v8351_v51 = vld [vmem:[%s7756_s14 + $0x81] sm:$0xff]  ;;  %v1292_v32 = vld [vmem:[%s7756_s14 + $0x39] sm:$0xff] }
 0x144   : > { %v839_v28 = vpop.permute.xlu2 %838  ;;  %v819_v35 = vpop.permute.xlu1 %818  ;;  %939 = vst.msk [vmem:[#allocation2 + $0x158] sm:$0xff] %vm361_vm0, %v8351_v51 }
 0x145   : > { %v817_v33 = vpop.permute.xlu0 %816  ;;  %896 = vst.msk [vmem:[#allocation2 + $0x288] sm:$0xff] %vm868_vm3, %v839_v28  ;;  %v1552_v44 = vld [vmem:[#allocation2 + $0x138] sm:$0xff] }
 0x146   : > { %885 = vst.msk [vmem:[#allocation2 + $0x180] sm:$0xff] %vm868_vm3, %v817_v33  ;;  %1752 = vmatmul.f32.gmra.mxu0 %v1528_v34  ;;  %v1555_v28 = vld [vmem:[#allocation2 + $0x150] sm:$0xff]  ;;  %v8526_v34 = vld [vmem:[%s7756_s14 + $0xd9] sm:$0xff] }
 0x147   : > { %886 = vst.msk [vmem:[#allocation2 + $0x198] sm:$0xff] %vm868_vm3, %v819_v35  ;;  %v8530_v35 = vld [vmem:[%s7756_s14 + $0xe9] sm:$0xff] }
 0x148   : > { %950 = vst.msk [vmem:[#allocation2 + $0x260] sm:$0xff] %vm361_vm0, %v8526_v34 }
 0x149   : > { %952 = vst.msk [vmem:[#allocation2 + $0x290] sm:$0xff] %vm361_vm0, %v8530_v35 }
 0x14a   : > { %1191 = vrot.lane.b32.xlu2 %v7853_v37, %s7676_s16  ;;  %1189 = vrot.lane.b32.xlu1 %v7969_v2, %s7676_s16  ;;  %v8361_v37 = vld [vmem:[%s7756_s14 + $0x29] sm:$0xff] }
 0x14b   : > { %1187 = vrot.lane.b32.xlu0 %v7940_v58, %s7676_s16  ;;  %928 = vst.msk [vmem:[#allocation2 + $0x50] sm:$0xff] %vm361_vm0, %v8361_v37  ;;  %v8372_v58 = vld [vmem:[%s7756_s14 + $0x99] sm:$0xff] }
 0x14c   : > { %v1014_v57 = vpop.permute.xlu2 %1013  ;;  %v825_v17 = vpop.permute.xlu1 %824  ;;  %942 = vst.msk [vmem:[#allocation2 + $0x1a0] sm:$0xff] %vm361_vm0, %v8372_v58 }
 0x14d   : > { %v823_v9 = vpop.permute.xlu0 %822  ;;  %1095 = vst.msk [vmem:[#allocation2 + $0x38] sm:$0xff] %vm530_vm1, %v1014_v57 }
 0x14e   : > { %888 = vst.msk [vmem:[#allocation2 + $0x1c8] sm:$0xff] %vm868_vm3, %v823_v9  ;;  %1755 = vmatmul.f32.gmra.mxu0 %v1531_v16  ;;  %v1558_v16 = vld [vmem:[#allocation2 + $0x168] sm:$0xff] }
 0x14f   : > { %889 = vst.msk [vmem:[#allocation2 + $0x1e0] sm:$0xff] %vm868_vm3, %v825_v17 }
 0x152   : > { %1197 = vrot.lane.b32.xlu2 %v7874_v42, %s7676_s16  ;;  %1195 = vrot.lane.b32.xlu1 %v8002_v11, %s7676_s16  ;;  %v8384_v42 = vld [vmem:[%s7756_s14 + $0x41] sm:$0xff] }
 0x153   : > { %1193 = vrot.lane.b32.xlu0 %v7979_v5, %s7676_s16  ;;  %931 = vst.msk [vmem:[#allocation2 + $0x98] sm:$0xff] %vm361_vm0, %v8384_v42  ;;  %v8396_v5 = vld [vmem:[%s7756_s14 + $0xb1] sm:$0xff] }
 0x154   : > { %v1020_v2 = vpop.permute.xlu2 %1019  ;;  %v831_v40 = vpop.permute.xlu1 %830  ;;  %945 = vst.msk [vmem:[#allocation2 + $0x1e8] sm:$0xff] %vm361_vm0, %v8396_v5 }
 0x155   : > { %v829_v38 = vpop.permute.xlu0 %828  ;;  %1098 = vst.msk [vmem:[#allocation2 + $0x80] sm:$0xff] %vm530_vm1, %v1020_v2  ;;  %v1561_v2 = vld [vmem:[#allocation2 + $0x180] sm:$0xff] }
 0x156   : > { %891 = vst.msk [vmem:[#allocation2 + $0x210] sm:$0xff] %vm868_vm3, %v829_v38  ;;  %1758 = vmatmul.f32.gmra.mxu0 %v1534_v39 }
 0x157   : > { %892 = vst.msk [vmem:[#allocation2 + $0x228] sm:$0xff] %vm868_vm3, %v831_v40 }
 0x15a   : > { %1203 = vrot.lane.b32.xlu2 %v7902_v49, %s7676_s16  ;;  %1201 = vrot.lane.b32.xlu1 %v8031_v19, %s7676_s16  ;;  %v8408_v49 = vld [vmem:[%s7756_s14 + $0x59] sm:$0xff] }
 0x15b   : > { %1199 = vrot.lane.b32.xlu0 %v8012_v14, %s7676_s16  ;;  %934 = vst.msk [vmem:[#allocation2 + $0xe0] sm:$0xff] %vm361_vm0, %v8408_v49  ;;  %v8420_v14 = vld [vmem:[%s7756_s14 + $0xc9] sm:$0xff] }
 0x15c   : > { %v1026_v11 = vpop.permute.xlu2 %1025  ;;  %v837_v47 = vpop.permute.xlu1 %836  ;;  %948 = vst.msk [vmem:[#allocation2 + $0x230] sm:$0xff] %vm361_vm0, %v8420_v14 }
 0x15d   : > { %v835_v45 = vpop.permute.xlu0 %834  ;;  %1101 = vst.msk [vmem:[#allocation2 + $0xc8] sm:$0xff] %vm530_vm1, %v1026_v11  ;;  %v1628_v11 = vld [vmem:[%s11740_s1 + $0xf8] sm:$0xff] }
 0x15e   : > { %894 = vst.msk [vmem:[#allocation2 + $0x258] sm:$0xff] %vm868_vm3, %v835_v45  ;;  %1761 = vmatmul.f32.gmra.mxu0 %v1537_v46  ;;  %v1627_v45 = vld [vmem:[%s11740_s1 + $0xf0] sm:$0xff]  ;;  %1822 = vmatpush.msra.mxu1 %v1628_v11 }
 0x15f   : > { %895 = vst.msk [vmem:[#allocation2 + $0x270] sm:$0xff] %vm868_vm3, %v837_v47  ;;  %v1295_v46 = vld [vmem:[%s7756_s14 + $0x51] sm:$0xff]  ;;  %v1626_v47 = vld [vmem:[%s11740_s1 + $0xe8] sm:$0xff] }
 0x160   : > { %1823 = vmatpush.msra.mxu1 %v1627_v45 }
 0x162   : > { %1209 = vrot.lane.b32.xlu2 %v7933_v56, %s7676_s16  ;;  %1207 = vrot.lane.b32.xlu1 %v8059_v29, %s7676_s16  ;;  %v8432_v56 = vld [vmem:[%s7756_s14 + $0x71] sm:$0xff] }
 0x163   : > { %1205 = vrot.lane.b32.xlu0 %v8035_v20, %s7676_s16  ;;  %937 = vst.msk [vmem:[#allocation2 + $0x128] sm:$0xff] %vm361_vm0, %v8432_v56  ;;  %v8444_v20 = vld [vmem:[%s7756_s14 + $0xe1] sm:$0xff]  ;;  %1824 = vmatpush.msra.mxu1 %v1626_v47 }
 0x164   : > { %v1032_v19 = vpop.permute.xlu2 %1031  ;;  %v1012_v59 = vpop.permute.xlu1 %1011  ;;  %951 = vst.msk [vmem:[#allocation2 + $0x278] sm:$0xff] %vm361_vm0, %v8444_v20 }
 0x165   : > { %v1010_v53 = vpop.permute.xlu0 %1009  ;;  %1104 = vst.msk [vmem:[#allocation2 + $0x110] sm:$0xff] %vm530_vm1, %v1032_v19  ;;  %v1625_v19 = vld [vmem:[%s11740_s1 + $0xe0] sm:$0xff] }
 0x166   : > { %1093 = vst.msk [vmem:[#allocation2 + $0x8] sm:$0xff] %vm530_vm1, %v1010_v53  ;;  %1764 = vmatmul.f32.gmra.mxu0 %v1540_v54  ;;  %v1567_v53 = vld [vmem:[#allocation2 + $0x1b0] sm:$0xff]  ;;  %1825 = vmatpush.msra.mxu1 %v1625_v19  ;;  %v1594_v19 = vld [vmem:[#allocation2 + $0x288] sm:$0xff] }
 0x167   : > { %1094 = vst.msk [vmem:[#allocation2 + $0x20] sm:$0xff] %vm530_vm1, %v1012_v59  ;;  %v1624_v59 = vld [vmem:[%s11740_s1 + $0xd8] sm:$0xff]  ;;  %v1591_v45 = vld [vmem:[#allocation2 + $0x270] sm:$0xff] }
 0x168   : > { %1826 = vmatpush.msra.mxu1 %v1624_v59 }
 0x16a   : > { %1215 = vrot.lane.b32.xlu2 %v7965_v1, %s7676_s16  ;;  %1213 = vrot.lane.b32.xlu1 %v8084_v55, %s7676_s16  ;;  %v8456_v1 = vld [vmem:[%s7756_s14 + $0x89] sm:$0xff] }
 0x16b   : > { %1211 = vrot.lane.b32.xlu0 %v8063_v30, %s7676_s16  ;;  %940 = vst.msk [vmem:[#allocation2 + $0x170] sm:$0xff] %vm361_vm0, %v8456_v1 }
 0x16c   : > { %v1038_v29 = vpop.permute.xlu2 %1037  ;;  %v1018_v4 = vpop.permute.xlu1 %1017 }
 0x16d   : > { %v1016_v61 = vpop.permute.xlu0 %1015  ;;  %1107 = vst.msk [vmem:[#allocation2 + $0x158] sm:$0xff] %vm530_vm1, %v1038_v29 }
 0x16e   : > { %1096 = vst.msk [vmem:[#allocation2 + $0x50] sm:$0xff] %vm530_vm1, %v1016_v61  ;;  %1767 = vmatmul.f32.gmra.mxu0 %v1543_v3  ;;  %v1621_v3 = vld [vmem:[%s11740_s1 + $0xc0] sm:$0xff] }
 0x16f   : > { %1097 = vst.msk [vmem:[#allocation2 + $0x68] sm:$0xff] %vm530_vm1, %v1018_v4  ;;  %v1570_v4 = vld [vmem:[#allocation2 + $0x1c8] sm:$0xff] }
 0x172   : > { %1221 = vrot.lane.b32.xlu2 %v7998_v10, %s7676_s16  ;;  %1219 = vrot.lane.b32.xlu1 %v8103_v7, %s7676_s16  ;;  %v8475_v10 = vld [vmem:[%s7756_s14 + $0xa1] sm:$0xff] }
 0x173   : > { %1217 = vrot.lane.b32.xlu0 %v8088_v62, %s7676_s16  ;;  %943 = vst.msk [vmem:[#allocation2 + $0x1b8] sm:$0xff] %vm361_vm0, %v8475_v10 }
 0x174   : > { %v1044_v30 = vpop.permute.xlu2 %1043  ;;  %v1024_v12 = vpop.permute.xlu1 %1023 }
 0x175   : > { %v1022_v55 = vpop.permute.xlu0 %1021  ;;  %1110 = vst.msk [vmem:[#allocation2 + $0x1a0] sm:$0xff] %vm530_vm1, %v1044_v30  ;;  %v1632_v30 = vld [vmem:[%s11740_s1 + $0x118] sm:$0xff] }
 0x176   : > { %1099 = vst.msk [vmem:[#allocation2 + $0x98] sm:$0xff] %vm530_vm1, %v1022_v55  ;;  %1770 = vmatmul.f32.gmra.mxu0 %v1546_v26  ;;  %v1618_v55 = vld [vmem:[%s11740_s1 + $0xa8] sm:$0xff]  ;;  %1935 = vmatpush.msra.mxu2 %v1632_v30 }
 0x177   : > { %1100 = vst.msk [vmem:[#allocation2 + $0xb0] sm:$0xff] %vm530_vm1, %v1024_v12  ;;  %v1457_v26 = vld [vmem:[%s7756_s14 + $0x22] sm:$0xff] }
 0x178   : > { %1485 = vst.msk [vmem:[#allocation2 + $0x10] sm:$0xff] %vm361_vm0, %v1457_v26 }
 0x17a   : > { %1227 = vrot.lane.b32.xlu2 %v8195_v0, %s7676_s16  ;;  %1225 = vrot.lane.b32.xlu1 %v8199_v50, %s7676_s16  ;;  %v1289_v0 = vld [vmem:[%s7756_s14 + $0x21] sm:$0xff] }
 0x17b   : > { %1223 = vrot.lane.b32.xlu0 %v8107_v8, %s7676_s16  ;;  %v1148_v8 = vld [vmem:[%s7756_s14 + $0xf8] sm:$0xff] }
 0x17c   : > { %v1050_v62 = vpop.permute.xlu2 %1049  ;;  %v1030_v27 = vpop.permute.xlu1 %1029 }
 0x17d   : > { %v1028_v7 = vpop.permute.xlu0 %1027  ;;  %1113 = vst.msk [vmem:[#allocation2 + $0x1e8] sm:$0xff] %vm530_vm1, %v1050_v62  ;;  %v1573_v62 = vld [vmem:[#allocation2 + $0x1e0] sm:$0xff] }
 0x17e   : > { %1102 = vst.msk [vmem:[#allocation2 + $0xe0] sm:$0xff] %vm530_vm1, %v1028_v7  ;;  %1773 = vmatmul.f32.gmra.mxu0 %v1549_v15  ;;  %v1616_v15 = vld [vmem:[%s11740_s1 + $0x98] sm:$0xff] }
 0x17f   : > { %1103 = vst.msk [vmem:[#allocation2 + $0xf8] sm:$0xff] %vm530_vm1, %v1030_v27  ;;  %v1630_v27 = vld [vmem:[%s11740_s1 + $0x108] sm:$0xff] }
 0x182   : > { %1345 = vrot.lane.b32.xlu2 %v1289_v0, %s7677_s17  ;;  %1231 = vrot.lane.b32.xlu1 %v1148_v8, %s7676_s16  ;;  %v1614_v0 = vld [vmem:[%s11740_s1 + $0x88] sm:$0xff] }
 0x183   : > { %1229 = vrot.lane.b32.xlu0 %v1147_v22, %s7676_s16  ;;  %v1515_v22 = vld [vmem:[#allocation2 + $0x10] sm:$0xff] }
 0x184   : > { %v1056_v50 = vpop.permute.xlu2 %1055  ;;  %v1036_v48 = vpop.permute.xlu1 %1035 }
 0x185   : > { %v1034_v23 = vpop.permute.xlu0 %1033  ;;  %1116 = vst.msk [vmem:[#allocation2 + $0x230] sm:$0xff] %vm530_vm1, %v1056_v50 }
 0x186   : > { %1105 = vst.msk [vmem:[#allocation2 + $0x128] sm:$0xff] %vm530_vm1, %v1034_v23  ;;  %1776 = vmatmul.f32.gmra.mxu0 %v1552_v44  ;;  %v1613_v23 = vld [vmem:[%s11740_s1 + $0x80] sm:$0xff] }
 0x187   : > { %1106 = vst.msk [vmem:[#allocation2 + $0x140] sm:$0xff] %vm530_vm1, %v1036_v48 }
 0x18a   : > { %1349 = vrot.lane.b32.xlu1 %v8380_v25, %s7677_s17  ;;  %1351 = vrot.lane.b32.xlu2 %v1292_v32, %s7677_s17  ;;  %v1564_v25 = vld [vmem:[#allocation2 + $0x198] sm:$0xff] }
 0x18b   : > { %1347 = vrot.lane.b32.xlu0 %v8361_v37, %s7677_s17 }
 0x18c   : > { %v1062_v43 = vpop.permute.xlu2 %1061  ;;  %v1042_v33 = vpop.permute.xlu1 %1041 }
 0x18d   : > { %v1040_v63 = vpop.permute.xlu0 %1039  ;;  %1119 = vst.msk [vmem:[#allocation2 + $0x278] sm:$0xff] %vm530_vm1, %v1062_v43 }
 0x18e   : > { %1108 = vst.msk [vmem:[#allocation2 + $0x170] sm:$0xff] %vm530_vm1, %v1040_v63  ;;  %1779 = vmatmul.f32.gmra.mxu0 %v1555_v28  ;;  %v1582_v28 = vld [vmem:[#allocation2 + $0x228] sm:$0xff] }
 0x18f   : > { %1109 = vst.msk [vmem:[#allocation2 + $0x188] sm:$0xff] %vm530_vm1, %v1042_v33 }
 0x192   : > { %1355 = vrot.lane.b32.xlu1 %v8404_v52, %s7677_s17  ;;  %1357 = vrot.lane.b32.xlu2 %v1295_v46, %s7677_s17 }
 0x193   : > { %1353 = vrot.lane.b32.xlu0 %v8384_v42, %s7677_s17 }
 0x194   : > { %v1180_v57 = vpop.permute.xlu2 %1179  ;;  %v1048_v17 = vpop.permute.xlu1 %1047 }
 0x195   : > { %v1046_v9 = vpop.permute.xlu0 %1045  ;;  %1262 = vst.msk [vmem:[#allocation2 + $0x20] sm:$0xff] %vm699_vm2, %v1180_v57  ;;  %v1585_v57 = vld [vmem:[#allocation2 + $0x240] sm:$0xff] }
 0x196   : > { %1111 = vst.msk [vmem:[#allocation2 + $0x1b8] sm:$0xff] %vm530_vm1, %v1046_v9  ;;  %1782 = vmatmul.f32.gmra.mxu0 %v1558_v16 }
 0x197   : > { %1112 = vst.msk [vmem:[#allocation2 + $0x1d0] sm:$0xff] %vm530_vm1, %v1048_v17 }
 0x19a   : > { %1361 = vrot.lane.b32.xlu1 %v8428_v60, %s7677_s17  ;;  %v1623_v60 = vld [vmem:[%s11740_s1 + $0xd0] sm:$0xff]  ;;  %1363 = vrot.lane.b32.xlu2 %v8335_v24, %s7677_s17  ;;  %v1620_v24 = vld [vmem:[%s11740_s1 + $0xb8] sm:$0xff] }
 0x19b   : > { %1359 = vrot.lane.b32.xlu0 %v8408_v49, %s7677_s17  ;;  %1827 = vmatpush.msra.mxu1 %v1623_v60  ;;  %v1462_v60 = vld [vmem:[%s7756_s14 + $0x4a] sm:$0xff] }
 0x19c   : > { %v1186_v18 = vpop.permute.xlu2 %1185  ;;  %v1054_v38 = vpop.permute.xlu1 %1053  ;;  %1490 = vst.msk [vmem:[#allocation2 + $0x88] sm:$0xff] %vm361_vm0, %v1462_v60 }
 0x19d   : > { %v1052_v37 = vpop.permute.xlu0 %1051  ;;  %1265 = vst.msk [vmem:[#allocation2 + $0x68] sm:$0xff] %vm699_vm2, %v1186_v18  ;;  %v1459_v18 = vld [vmem:[%s7756_s14 + $0x32] sm:$0xff] }
 0x19e   : > { %1114 = vst.msk [vmem:[#allocation2 + $0x200] sm:$0xff] %vm530_vm1, %v1052_v37  ;;  %1785 = vmatmul.f32.gmra.mxu0 %v1561_v2  ;;  %v1588_v2 = vld [vmem:[#allocation2 + $0x258] sm:$0xff] }
 0x19f   : > { %1115 = vst.msk [vmem:[#allocation2 + $0x218] sm:$0xff] %vm530_vm1, %v1054_v38 }
 0x1a0   : > { %1487 = vst.msk [vmem:[#allocation2 + $0x40] sm:$0xff] %vm361_vm0, %v1459_v18  ;;  %v1472_v18 = vld [vmem:[%s7756_s14 + $0x9a] sm:$0xff] }
 0x1a1   : > { %1500 = vst.msk [vmem:[#allocation2 + $0x178] sm:$0xff] %vm361_vm0, %v1472_v18 }
 0x1a2   : > { %1367 = vrot.lane.b32.xlu1 %v8452_v6, %s7677_s17  ;;  %1369 = vrot.lane.b32.xlu2 %v8351_v51, %s7677_s17  ;;  %v1631_v51 = vld [vmem:[%s11740_s1 + $0x110] sm:$0xff] }
 0x1a3   : > { %1365 = vrot.lane.b32.xlu0 %v8432_v56, %s7677_s17  ;;  %v1622_v56 = vld [vmem:[%s11740_s1 + $0xc8] sm:$0xff]  ;;  %1936 = vmatpush.msra.mxu2 %v1631_v51 }
 0x1a4   : > { %v1192_v39 = vpop.permute.xlu2 %1191  ;;  %v1060_v42 = vpop.permute.xlu1 %1059  ;;  %1828 = vmatpush.msra.mxu1 %v1622_v56 }
 0x1a5   : > { %v1058_v40 = vpop.permute.xlu0 %1057  ;;  %1268 = vst.msk [vmem:[#allocation2 + $0xb0] sm:$0xff] %vm699_vm2, %v1192_v39  ;;  %1937 = vmatpush.msra.mxu2 %v1630_v27 }
 0x1a6   : > { %1117 = vst.msk [vmem:[#allocation2 + $0x248] sm:$0xff] %vm530_vm1, %v1058_v40  ;;  %1788 = vmatmul.f32.gmra.mxu0 %v1564_v25  ;;  %1829 = vmatpush.msra.mxu1 %v1621_v3  ;;  %v1460_v40 = vld [vmem:[%s7756_s14 + $0x3a] sm:$0xff]  ;;  %v1463_v3 = vld [vmem:[%s7756_s14 + $0x52] sm:$0xff] }
 0x1a7   : > { %1118 = vst.msk [vmem:[#allocation2 + $0x260] sm:$0xff] %vm530_vm1, %v1060_v42  ;;  %v1521_v39 = vld [vmem:[#allocation2 + $0x40] sm:$0xff] }
 0x1a8   : > { %1830 = vmatpush.msra.mxu1 %v1620_v24  ;;  %1488 = vst.msk [vmem:[#allocation2 + $0x58] sm:$0xff] %vm361_vm0, %v1460_v40 }
 0x1a9   : > { %1491 = vst.msk [vmem:[#allocation2 + $0xa0] sm:$0xff] %vm361_vm0, %v1463_v3 }
 0x1aa   : > { %1373 = vrot.lane.b32.xlu1 %v8471_v13, %s7677_s17  ;;  %1375 = vrot.lane.b32.xlu2 %v8372_v58, %s7677_s17  ;;  %v1576_v58 = vld [vmem:[#allocation2 + $0x1f8] sm:$0xff] }
 0x1ab   : > { %1371 = vrot.lane.b32.xlu0 %v8456_v1, %s7677_s17  ;;  %v1619_v1 = vld [vmem:[%s11740_s1 + $0xb0] sm:$0xff] }
 0x1ac   : > { %v1198_v52 = vpop.permute.xlu2 %1197  ;;  %v1178_v54 = vpop.permute.xlu1 %1177  ;;  %1831 = vmatpush.msra.mxu1 %v1619_v1 }
 0x1ad   : > { %v1064_v49 = vpop.permute.xlu0 %1063  ;;  %1271 = vst.msk [vmem:[#allocation2 + $0xf8] sm:$0xff] %vm699_vm2, %v1198_v52  ;;  %v1461_v52 = vld [vmem:[%s7756_s14 + $0x42] sm:$0xff] }
 0x1ae   : > { %1120 = vst.msk [vmem:[#allocation2 + $0x290] sm:$0xff] %vm530_vm1, %v1064_v49  ;;  %1791 = vmatmul.f32.gmra.mxu0 %v1567_v53  ;;  %1832 = vmatpush.msra.mxu1 %v1618_v55  ;;  %v1464_v55 = vld [vmem:[%s7756_s14 + $0x5a] sm:$0xff] }
 0x1af   : > { %1261 = vst.msk [vmem:[#allocation2 + $0x8] sm:$0xff] %vm699_vm2, %v1178_v54  ;;  %v1524_v47 = vld [vmem:[#allocation2 + $0x58] sm:$0xff] }
 0x1b0   : > { %1489 = vst.msk [vmem:[#allocation2 + $0x70] sm:$0xff] %vm361_vm0, %v1461_v52  ;;  %v1533_v30 = vld [vmem:[#allocation2 + $0xa0] sm:$0xff] }
 0x1b1   : > { %1492 = vst.msk [vmem:[#allocation2 + $0xb8] sm:$0xff] %vm361_vm0, %v1464_v55  ;;  %v8764_v52 = vld [vmem:[%s11741_s2] ss:$0 sm:$0xff] }
 0x1b2   : > { %1379 = vrot.lane.b32.xlu1 %v8490_v41, %s7677_s17  ;;  %v1615_v41 = vld [vmem:[%s11740_s1 + $0x90] sm:$0xff]  ;;  %1381 = vrot.lane.b32.xlu2 %v8396_v5, %s7677_s17 }
 0x1b3   : > { %1377 = vrot.lane.b32.xlu0 %v8475_v10, %s7677_s17  ;;  %v1617_v10 = vld [vmem:[%s11740_s1 + $0xa0] sm:$0xff] }
 0x1b4   : > { %v1204_v29 = vpop.permute.xlu2 %1203  ;;  %v1184_v6 = vpop.permute.xlu1 %1183  ;;  %1833 = vmatpush.msra.mxu1 %v1617_v10  ;;  %v1465_v10 = vld [vmem:[%s7756_s14 + $0x62] sm:$0xff] }
 0x1b5   : > { %v1182_v61 = vpop.permute.xlu0 %1181  ;;  %1274 = vst.msk [vmem:[#allocation2 + $0x140] sm:$0xff] %vm699_vm2, %v1204_v29 }
 0x1b6   : > { %1263 = vst.msk [vmem:[#allocation2 + $0x38] sm:$0xff] %vm699_vm2, %v1182_v61  ;;  %1794 = vmatmul.f32.gmra.mxu0 %v1570_v4  ;;  %1834 = vmatpush.msra.mxu1 %v1616_v15  ;;  %v1530_v61 = vld [vmem:[#allocation2 + $0x88] sm:$0xff] }
 0x1b7   : > { %1264 = vst.msk [vmem:[#allocation2 + $0x50] sm:$0xff] %vm699_vm2, %v1184_v6  ;;  %v1527_v59 = vld [vmem:[#allocation2 + $0x70] sm:$0xff] }
 0x1b8   : > { %1835 = vmatpush.msra.mxu1 %v1615_v41  ;;  %1493 = vst.msk [vmem:[#allocation2 + $0xd0] sm:$0xff] %vm361_vm0, %v1465_v10  ;;  %v1466_v15 = vld [vmem:[%s7756_s14 + $0x6a] sm:$0xff]  ;;  %v1477_v10 = vld [vmem:[%s7756_s14 + $0xc2] sm:$0xff] }
 0x1b9   : > { %1494 = vst.msk [vmem:[#allocation2 + $0xe8] sm:$0xff] %vm361_vm0, %v1466_v15 }
 0x1ba   : > { %1385 = vrot.lane.b32.xlu1 %v8509_v31, %s7677_s17  ;;  %1836 = vmatpush.msra.mxu1 %v1614_v0  ;;  %v1467_v0 = vld [vmem:[%s7756_s14 + $0x72] sm:$0xff]  ;;  %1505 = vst.msk [vmem:[#allocation2 + $0x1f0] sm:$0xff] %vm361_vm0, %v1477_v10 }
 0x1bb   : > { %1383 = vrot.lane.b32.xlu0 %v8494_v21, %s7677_s17  ;;  %v1629_v21 = vld [vmem:[%s11740_s1 + $0x100] sm:$0xff]  ;;  %1387 = vrot.lane.b32.xlu2 %v8420_v14, %s7677_s17  ;;  %1495 = vst.msk [vmem:[#allocation2 + $0x100] sm:$0xff] %vm361_vm0, %v1467_v0 }
 0x1bc   : > { %v1210_v12 = vpop.permute.xlu2 %1209  ;;  %v1190_v7 = vpop.permute.xlu1 %1189  ;;  %1938 = vmatpush.msra.mxu2 %v1629_v21  ;;  %1837 = vmatpush.msra.mxu1 %v1613_v23  ;;  %v1468_v23 = vld [vmem:[%s7756_s14 + $0x7a] sm:$0xff] }
 0x1bd   : > { %v1188_v13 = vpop.permute.xlu0 %1187  ;;  %1277 = vst.msk [vmem:[#allocation2 + $0x188] sm:$0xff] %vm699_vm2, %v1210_v12  ;;  %6448 = vmatmul.msk.f32.vlgmr.msra.gmra.mxu2 %vm361_vm0, %v1515_v22 }
 0x1be   : > { %1266 = vst.msk [vmem:[#allocation2 + $0x80] sm:$0xff] %vm699_vm2, %v1188_v13  ;;  %1797 = vmatmul.f32.gmra.mxu0 %v1573_v62  ;;  %v1536_v13 = vld [vmem:[#allocation2 + $0xb8] sm:$0xff] }
 0x1bf   : > { %1267 = vst.msk [vmem:[#allocation2 + $0x98] sm:$0xff] %vm699_vm2, %v1190_v7  ;;  %v1539_v7 = vld [vmem:[#allocation2 + $0xd0] sm:$0xff] }
 0x1c0   : > { %v1542_v21 = vld [vmem:[#allocation2 + $0xe8] sm:$0xff]  ;;  %1496 = vst.msk [vmem:[#allocation2 + $0x118] sm:$0xff] %vm361_vm0, %v1468_v23 }
 0x1c2   : > { %1391 = vrot.lane.b32.xlu1 %v8526_v34, %s7677_s17  ;;  %v8670_v34 = vpop.f32.mrf.mxu0 }
 0x1c3   : > { %1389 = vrot.lane.b32.xlu0 %v8513_v36, %s7677_s17  ;;  %v1579_v36 = vld [vmem:[#allocation2 + $0x210] sm:$0xff]  ;;  %1393 = vrot.lane.b32.xlu2 %v8444_v20, %s7677_s17 }
 0x1c4   : > { %v1216_v8 = vpop.permute.xlu2 %1215  ;;  %v1196_v44 = vpop.permute.xlu1 %1195 }
 0x1c5   : > { %v1194_v50 = vpop.permute.xlu0 %1193  ;;  %1280 = vst.msk [vmem:[#allocation2 + $0x1d0] sm:$0xff] %vm699_vm2, %v1216_v8 }
 0x1c6   : > { %1269 = vst.msk [vmem:[#allocation2 + $0xc8] sm:$0xff] %vm699_vm2, %v1194_v50  ;;  %1800 = vmatmul.f32.gmra.mxu0 %v1576_v58  ;;  %v1545_v50 = vld [vmem:[#allocation2 + $0x100] sm:$0xff] }
 0x1c7   : > { %1270 = vst.msk [vmem:[#allocation2 + $0xe0] sm:$0xff] %vm699_vm2, %v1196_v44 }
 0x1ca   : > { %v8680_v16 = vpop.f32.mrf.mxu0 }
 0x1cb   : > { %1395 = vrot.lane.b32.xlu0 %v8530_v35, %s7677_s17  ;;  %v1458_v35 = vld [vmem:[%s7756_s14 + $0x2a] sm:$0xff] }
 0x1cc   : > { %v1222_v48 = vpop.permute.xlu2 %1221  ;;  %v1202_v43 = vpop.permute.xlu1 %1201  ;;  %1486 = vst.msk [vmem:[#allocation2 + $0x28] sm:$0xff] %vm361_vm0, %v1458_v35 }
 0x1cd   : > { %v1200_v31 = vpop.permute.xlu0 %1199  ;;  %1283 = vst.msk [vmem:[#allocation2 + $0x218] sm:$0xff] %vm699_vm2, %v1222_v48  ;;  %v1315_v48 = vld [vmem:[%s7756_s14 + $0xf1] sm:$0xff] }
 0x1ce   : > { %1272 = vst.msk [vmem:[#allocation2 + $0x110] sm:$0xff] %vm699_vm2, %v1200_v31  ;;  %1803 = vmatmul.f32.gmra.mxu0 %v1579_v36  ;;  %1397 = vrot.lane.b32.xlu1 %v1315_v48, %s7677_s17  ;;  %v1548_v31 = vld [vmem:[#allocation2 + $0x118] sm:$0xff]  ;;  %v1469_v36 = vld [vmem:[%s7756_s14 + $0x82] sm:$0xff] }
 0x1cf   : > { %1273 = vst.msk [vmem:[#allocation2 + $0x128] sm:$0xff] %vm699_vm2, %v1202_v43 }
 0x1d0   : > { %1497 = vst.msk [vmem:[#allocation2 + $0x130] sm:$0xff] %vm361_vm0, %v1469_v36 }
 0x1d2   : > { %v8690_v25 = vpop.f32.mrf.mxu0 }
 0x1d3   : > { %v1518_v17 = vld [vmem:[#allocation2 + $0x28] sm:$0xff] }
 0x1d4   : > { %v1228_v63 = vpop.permute.xlu2 %1227  ;;  %v1208_v33 = vpop.permute.xlu1 %1207  ;;  %6449 = vmatmul.msk.f32.gmra.mxu2 %vm361_vm0, %v1518_v17 }
 0x1d5   : > { %v1206_v5 = vpop.permute.xlu0 %1205  ;;  %1286 = vst.msk [vmem:[#allocation2 + $0x260] sm:$0xff] %vm699_vm2, %v1228_v63 }
 0x1d6   : > { %1275 = vst.msk [vmem:[#allocation2 + $0x158] sm:$0xff] %vm699_vm2, %v1206_v5  ;;  %1806 = vmatmul.f32.gmra.mxu0 %v1582_v28  ;;  %v1470_v28 = vld [vmem:[%s7756_s14 + $0x8a] sm:$0xff] }
 0x1d7   : > { %1276 = vst.msk [vmem:[#allocation2 + $0x170] sm:$0xff] %vm699_vm2, %v1208_v33  ;;  %v1551_v5 = vld [vmem:[#allocation2 + $0x130] sm:$0xff] }
 0x1d8   : > { %1498 = vst.msk [vmem:[#allocation2 + $0x148] sm:$0xff] %vm361_vm0, %v1470_v28  ;;  %v1745_v28 = vadd.f32 %v8764_v52, %v8690_v25 }
 0x1da   : > { %v8699_v54 = vpop.f32.mrf.mxu0 }
 0x1dc   : > { %v1346_v14 = vpop.permute.xlu2 %1345  ;;  %v1214_v9 = vpop.permute.xlu1 %1213  ;;  %6450 = vmatmul.msk.f32.gmra.mxu2 %vm361_vm0, %v1521_v39  ;;  %v1473_v39 = vld [vmem:[%s7756_s14 + $0xa2] sm:$0xff] }
 0x1dd   : > { %v1212_v32 = vpop.permute.xlu0 %1211  ;;  %1429 = vst.msk [vmem:[#allocation2 + $0x8] sm:$0xff] %vm868_vm3, %v1346_v14 }
 0x1de   : > { %1278 = vst.msk [vmem:[#allocation2 + $0x1a0] sm:$0xff] %vm699_vm2, %v1212_v32  ;;  %1809 = vmatmul.f32.gmra.mxu0 %v1585_v57  ;;  %v1471_v32 = vld [vmem:[%s7756_s14 + $0x92] sm:$0xff] }
 0x1df   : > { %1279 = vst.msk [vmem:[#allocation2 + $0x1b8] sm:$0xff] %vm699_vm2, %v1214_v9  ;;  %v1554_v14 = vld [vmem:[#allocation2 + $0x148] sm:$0xff] }
 0x1e0   : > { %1499 = vst.msk [vmem:[#allocation2 + $0x160] sm:$0xff] %vm361_vm0, %v1471_v32 }
 0x1e1   : > { %1501 = vst.msk [vmem:[#allocation2 + $0x190] sm:$0xff] %vm361_vm0, %v1473_v39 }
 0x1e4   : > { %v1514_v37 = vld [vmem:[#allocation2 + $0x8] sm:$0xff]  ;;  %v1220_v38 = vpop.permute.xlu1 %1219  ;;  %v1352_v11 = vpop.permute.xlu2 %1351  ;;  %6451 = vmatmul.msk.f32.gmra.mxu2 %vm361_vm0, %v1524_v47 }
 0x1e5   : > { %v1218_v20 = vpop.permute.xlu0 %1217  ;;  %1838 = vmatmul.f32.vlgmr.msra.gmra.mxu1 %v1514_v37  ;;  %1282 = vst.msk [vmem:[#allocation2 + $0x200] sm:$0xff] %vm699_vm2, %v1220_v38  ;;  %v1560_v38 = vld [vmem:[#allocation2 + $0x178] sm:$0xff] }
 0x1e6   : > { %1281 = vst.msk [vmem:[#allocation2 + $0x1e8] sm:$0xff] %vm699_vm2, %v1218_v20  ;;  %1812 = vmatmul.f32.gmra.mxu0 %v1588_v2  ;;  %v1316_v2 = vld [vmem:[%s7756_s14 + $0xf9] sm:$0xff] }
 0x1e7   : > { %1432 = vst.msk [vmem:[#allocation2 + $0x50] sm:$0xff] %vm868_vm3, %v1352_v11  ;;  %v1557_v17 = vld [vmem:[#allocation2 + $0x160] sm:$0xff]  ;;  %1399 = vrot.lane.b32.xlu2 %v1316_v2, %s7677_s17 }
 0x1ec   : > { %v1226_v46 = vpop.permute.xlu1 %1225  ;;  %6452 = vmatmul.msk.f32.gmra.mxu2 %vm361_vm0, %v1527_v59  ;;  %v1358_v24 = vpop.permute.xlu2 %1357  ;;  %v1475_v59 = vld [vmem:[%s7756_s14 + $0xb2] sm:$0xff] }
 0x1ed   : > { %v1224_v42 = vpop.permute.xlu0 %1223  ;;  %1285 = vst.msk [vmem:[#allocation2 + $0x248] sm:$0xff] %vm699_vm2, %v1226_v46  ;;  %v1474_v46 = vld [vmem:[%s7756_s14 + $0xaa] sm:$0xff] }
 0x1ee   : > { %1284 = vst.msk [vmem:[#allocation2 + $0x230] sm:$0xff] %vm699_vm2, %v1224_v42  ;;  %1815 = vmatmul.f32.gmra.mxu0 %v1591_v45  ;;  %v1523_v51 = vld [vmem:[#allocation2 + $0x50] sm:$0xff] }
 0x1ef   : > { %1435 = vst.msk [vmem:[#allocation2 + $0x98] sm:$0xff] %vm868_vm3, %v1358_v24  ;;  %v1563_v45 = vld [vmem:[#allocation2 + $0x190] sm:$0xff] }
 0x1f0   : > { %1502 = vst.msk [vmem:[#allocation2 + $0x1a8] sm:$0xff] %vm361_vm0, %v1474_v46 }
 0x1f1   : > { %1503 = vst.msk [vmem:[#allocation2 + $0x1c0] sm:$0xff] %vm361_vm0, %v1475_v59 }
 0x1f4   : > { %v1232_v53 = vpop.permute.xlu1 %1231  ;;  %6453 = vmatmul.msk.f32.gmra.mxu2 %vm361_vm0, %v1530_v61  ;;  %v1364_v41 = vpop.permute.xlu2 %1363 }
 0x1f5   : > { %v1230_v49 = vpop.permute.xlu0 %1229  ;;  %1288 = vst.msk [vmem:[#allocation2 + $0x290] sm:$0xff] %vm699_vm2, %v1232_v53 }
 0x1f6   : > { %1287 = vst.msk [vmem:[#allocation2 + $0x278] sm:$0xff] %vm699_vm2, %v1230_v49  ;;  %1818 = vmatmul.f32.gmra.mxu0 %v1594_v19  ;;  %v1532_v58 = vld [vmem:[#allocation2 + $0x98] sm:$0xff]  ;;  %v1739_v19 = vadd.f32 %v8764_v52, %v8670_v34  ;;  %v8772_v34 = vpop.f32.mrf.mxu0 }
 0x1f7   : > { %1438 = vst.msk [vmem:[#allocation2 + $0xe0] sm:$0xff] %vm868_vm3, %v1364_v41  ;;  %v1566_v53 = vld [vmem:[#allocation2 + $0x1a8] sm:$0xff] }
 0x1f8   : > { %v1569_v24 = vld [vmem:[#allocation2 + $0x1c0] sm:$0xff]  ;;  %v1478_v41 = vld [vmem:[%s7756_s14 + $0xca] sm:$0xff] }
 0x1f9   : > { %1506 = vst.msk [vmem:[#allocation2 + $0x208] sm:$0xff] %vm361_vm0, %v1478_v41 }
 0x1fc   : > { %v1350_v29 = vpop.permute.xlu1 %1349  ;;  %6454 = vmatmul.msk.f32.gmra.mxu2 %vm361_vm0, %v1533_v30  ;;  %v1370_v63 = vpop.permute.xlu2 %1369 }
 0x1fd   : > { %v1348_v56 = vpop.permute.xlu0 %1347  ;;  %1431 = vst.msk [vmem:[#allocation2 + $0x38] sm:$0xff] %vm868_vm3, %v1350_v29 }
 0x1fe   : > { %1430 = vst.msk [vmem:[#allocation2 + $0x20] sm:$0xff] %vm868_vm3, %v1348_v56  ;;  %v1541_v57 = vld [vmem:[#allocation2 + $0xe0] sm:$0xff] }
 0x1ff   : > { %1441 = vst.msk [vmem:[#allocation2 + $0x128] sm:$0xff] %vm868_vm3, %v1370_v63 }
 0x200   : > { %v1578_v23 = vld [vmem:[#allocation2 + $0x208] sm:$0xff] }
 0x204   : > { %v1356_v1 = vpop.permute.xlu1 %1355  ;;  %v1520_v26 = vld [vmem:[#allocation2 + $0x38] sm:$0xff]  ;;  %6455 = vmatmul.msk.f32.gmra.mxu2 %vm361_vm0, %v1536_v13  ;;  %v1376_v37 = vpop.permute.xlu2 %1375 }
 0x205   : > { %v1517_v4 = vld [vmem:[#allocation2 + $0x20] sm:$0xff]  ;;  %v1354_v6 = vpop.permute.xlu0 %1353  ;;  %1434 = vst.msk [vmem:[#allocation2 + $0x80] sm:$0xff] %vm868_vm3, %v1356_v1 }
 0x206   : > { %1841 = vmatmul.f32.gmra.mxu1 %v1517_v4  ;;  %1433 = vst.msk [vmem:[#allocation2 + $0x68] sm:$0xff] %vm868_vm3, %v1354_v6  ;;  %v1550_v47 = vld [vmem:[#allocation2 + $0x128] sm:$0xff]  ;;  %v1476_v1 = vld [vmem:[%s7756_s14 + $0xba] sm:$0xff] }
 0x207   : > { %1444 = vst.msk [vmem:[#allocation2 + $0x170] sm:$0xff] %vm868_vm3, %v1376_v37 }
 0x208   : > { %1504 = vst.msk [vmem:[#allocation2 + $0x1d8] sm:$0xff] %vm361_vm0, %v1476_v1 }
 0x20c   : > { %v1362_v62 = vpop.permute.xlu1 %1361  ;;  %6456 = vmatmul.msk.f32.gmra.mxu2 %vm361_vm0, %v1539_v7  ;;  %v1529_v22 = vld [vmem:[#allocation2 + $0x80] sm:$0xff]  ;;  %v1382_v4 = vpop.permute.xlu2 %1381 }
 0x20d   : > { %v1360_v12 = vpop.permute.xlu0 %1359  ;;  %1437 = vst.msk [vmem:[#allocation2 + $0xc8] sm:$0xff] %vm868_vm3, %v1362_v62  ;;  %v1526_v27 = vld [vmem:[#allocation2 + $0x68] sm:$0xff] }
 0x20e   : > { %1844 = vmatmul.f32.gmra.mxu1 %v1520_v26  ;;  %1436 = vst.msk [vmem:[#allocation2 + $0xb0] sm:$0xff] %vm868_vm3, %v1360_v12  ;;  %v1559_v62 = vld [vmem:[#allocation2 + $0x170] sm:$0xff] }
 0x20f   : > { %1447 = vst.msk [vmem:[#allocation2 + $0x1b8] sm:$0xff] %vm868_vm3, %v1382_v4  ;;  %v1572_v13 = vld [vmem:[#allocation2 + $0x1d8] sm:$0xff] }
 0x214   : > { %6457 = vmatmul.msk.f32.gmra.mxu2 %vm361_vm0, %v1542_v21  ;;  %v1368_v44 = vpop.permute.xlu1 %1367  ;;  %v1538_v33 = vld [vmem:[#allocation2 + $0xc8] sm:$0xff] }
 0x215   : > { %v1366_v8 = vpop.permute.xlu0 %1365  ;;  %1440 = vst.msk [vmem:[#allocation2 + $0x110] sm:$0xff] %vm868_vm3, %v1368_v44  ;;  %v1535_v43 = vld [vmem:[#allocation2 + $0xb0] sm:$0xff] }
 0x216   : > { %1847 = vmatmul.f32.gmra.mxu1 %v1523_v51  ;;  %1439 = vst.msk [vmem:[#allocation2 + $0xf8] sm:$0xff] %vm868_vm3, %v1366_v8  ;;  %v8781_v51 = vpop.f32.mrf.mxu0  ;;  %v1388_v8 = vpop.permute.xlu2 %1387  ;;  %v1568_v32 = vld [vmem:[#allocation2 + $0x1b8] sm:$0xff] }
 0x217   : > { %1450 = vst.msk [vmem:[#allocation2 + $0x200] sm:$0xff] %vm868_vm3, %v1388_v8 }
 0x21c   : > { %6458 = vmatmul.msk.f32.gmra.mxu2 %vm361_vm0, %v1545_v50  ;;  %v1374_v9 = vpop.permute.xlu1 %1373  ;;  %v1547_v40 = vld [vmem:[#allocation2 + $0x110] sm:$0xff]  ;;  %v1742_v50 = vadd.f32 %v8764_v52, %v8680_v16 }
 0x21d   : > { %v1372_v35 = vpop.permute.xlu0 %1371  ;;  %1443 = vst.msk [vmem:[#allocation2 + $0x158] sm:$0xff] %vm868_vm3, %v1374_v9  ;;  %v1544_v20 = vld [vmem:[#allocation2 + $0xf8] sm:$0xff] }
 0x21e   : > { %1850 = vmatmul.f32.gmra.mxu1 %v1526_v27  ;;  %1442 = vst.msk [vmem:[#allocation2 + $0x140] sm:$0xff] %vm868_vm3, %v1372_v35  ;;  %v1575_v27 = vld [vmem:[#allocation2 + $0x1f0] sm:$0xff]  ;;  %v8789_v0 = vpop.f32.mrf.mxu0  ;;  %v1480_v35 = vld [vmem:[%s7756_s14 + $0xda] sm:$0xff] }
 0x21f   : > { %1508 = vst.msk [vmem:[#allocation2 + $0x238] sm:$0xff] %vm361_vm0, %v1480_v35 }
 0x224   : > { %6459 = vmatmul.msk.f32.gmra.mxu2 %vm361_vm0, %v1548_v31  ;;  %v1380_v11 = vpop.permute.xlu1 %1379  ;;  %v1556_v30 = vld [vmem:[#allocation2 + $0x158] sm:$0xff] }
 0x225   : > { %v1378_v42 = vpop.permute.xlu0 %1377  ;;  %1446 = vst.msk [vmem:[#allocation2 + $0x1a0] sm:$0xff] %vm868_vm3, %v1380_v11  ;;  %v1553_v56 = vld [vmem:[#allocation2 + $0x140] sm:$0xff] }
 0x226   : > { %1853 = vmatmul.f32.gmra.mxu1 %v1529_v22  ;;  %1445 = vst.msk [vmem:[#allocation2 + $0x188] sm:$0xff] %vm868_vm3, %v1378_v42  ;;  %v1584_v39 = vld [vmem:[#allocation2 + $0x238] sm:$0xff] }
 0x22c   : > { %6460 = vmatmul.msk.f32.gmra.mxu2 %vm361_vm0, %v1551_v5  ;;  %v1386_v15 = vpop.permute.xlu1 %1385  ;;  %v1565_v48 = vld [vmem:[#allocation2 + $0x1a0] sm:$0xff]  ;;  %v8801_v5 = vpop.f32.mrf.mxu0 }
 0x22d   : > { %v1384_v26 = vpop.permute.xlu0 %1383  ;;  %1449 = vst.msk [vmem:[#allocation2 + $0x1e8] sm:$0xff] %vm868_vm3, %v1386_v15  ;;  %v1562_v21 = vld [vmem:[#allocation2 + $0x188] sm:$0xff] }
 0x22e   : > { %1856 = vmatmul.f32.gmra.mxu1 %v1532_v58  ;;  %1448 = vst.msk [vmem:[#allocation2 + $0x1d0] sm:$0xff] %vm868_vm3, %v1384_v26  ;;  %v1479_v58 = vld [vmem:[%s7756_s14 + $0xd2] sm:$0xff] }
 0x22f   : > { %1507 = vst.msk [vmem:[#allocation2 + $0x220] sm:$0xff] %vm361_vm0, %v1479_v58 }
 0x234   : > { %6461 = vmatmul.msk.f32.gmra.mxu2 %vm361_vm0, %v1554_v14  ;;  %v1392_v18 = vpop.permute.xlu1 %1391 }
 0x235   : > { %v1390_v63 = vpop.permute.xlu0 %1389  ;;  %1452 = vst.msk [vmem:[#allocation2 + $0x230] sm:$0xff] %vm868_vm3, %v1392_v18 }
 0x236   : > { %1859 = vmatmul.f32.gmra.mxu1 %v1535_v43  ;;  %1451 = vst.msk [vmem:[#allocation2 + $0x218] sm:$0xff] %vm868_vm3, %v1390_v63 }
 0x23c   : > { %6462 = vmatmul.msk.f32.gmra.mxu2 %vm361_vm0, %v1557_v17 }
 0x23e   : > { %1862 = vmatmul.f32.gmra.mxu1 %v1538_v33  ;;  %v1581_v33 = vld [vmem:[#allocation2 + $0x220] sm:$0xff] }
 0x240   : > { %v1940_v49 = vpop.f32.mrf.mxu2 }
 0x244   : > { %6463 = vmatmul.msk.f32.gmra.mxu2 %vm361_vm0, %v1560_v38  ;;  %v1748_v38 = vadd.f32 %v8764_v52, %v8699_v54 }
 0x246   : > { %1865 = vmatmul.f32.gmra.mxu1 %v1541_v57 }
 0x24c   : > { %6464 = vmatmul.msk.f32.gmra.mxu2 %vm361_vm0, %v1563_v45  ;;  %v1571_v45 = vld [vmem:[#allocation2 + $0x1d0] sm:$0xff] }
 0x24e   : > { %1868 = vmatmul.f32.gmra.mxu1 %v1544_v20  ;;  %v8813_v20 = vpop.f32.mrf.mxu0 }
 0x254   : > { %6465 = vmatmul.msk.f32.gmra.mxu2 %vm361_vm0, %v1566_v53 }
 0x256   : > { %1871 = vmatmul.f32.gmra.mxu1 %v1547_v40  ;;  %v1481_v40 = vld [vmem:[%s7756_s14 + $0xe2] sm:$0xff] }
 0x257   : > { %v1943_v3 = vpop.f32.mrf.mxu2  ;;  %1509 = vst.msk [vmem:[#allocation2 + $0x250] sm:$0xff] %vm361_vm0, %v1481_v40 }
 0x25c   : > { %6466 = vmatmul.msk.f32.gmra.mxu2 %vm361_vm0, %v1569_v24 }
 0x25e   : > { %1874 = vmatmul.f32.gmra.mxu1 %v1550_v47 }
 0x25f   : > { %v1946_v55 = vpop.f32.mrf.mxu2 }
 0x262   : > { %v1839_v60 = vpop.f32.mrf.mxu1 }
 0x263   : > { %v1840_v29 = vadd.f32 %v1839_v60, %v1739_v19  ;;  %v1751_v60 = vadd.f32 %v8764_v52, %v8772_v34 }
 0x264   : > { %6467 = vmatmul.msk.f32.gmra.mxu2 %vm361_vm0, %v1572_v13  ;;  %v1754_v13 = vadd.f32 %v8764_v52, %v8781_v51 }
 0x265   : > { %v1941_v61 = vadd.f32 %v1940_v49, %v1840_v29  ;;  %v1394_v49 = vpop.permute.xlu2 %1393  ;;  %v1482_v29 = vld [vmem:[%s7756_s14 + $0xea] sm:$0xff] }
 0x266   : > { %1877 = vmatmul.f32.gmra.mxu1 %v1553_v56  ;;  %1453 = vst.msk [vmem:[#allocation2 + $0x248] sm:$0xff] %vm868_vm3, %v1394_v49  ;;  %v1587_v56 = vld [vmem:[#allocation2 + $0x250] sm:$0xff]  ;;  %v3087_v49 = vld [vmem:[%s11742_s3 + $0x220] sm:$0xff] }
 0x267   : > { %v2024_v6 = vmax.f32 %v1941_v61, 0.0  ;;  %v1949_v7 = vpop.f32.mrf.mxu2  ;;  %1510 = vst.msk [vmem:[#allocation2 + $0x268] sm:$0xff] %vm361_vm0, %v1482_v29 }
 0x269   : > { %2053 = vst.msk [vmem:[#allocation4] sm:$0xff] %vm2052_vm4, %v2024_v6  ;;  %v1574_v6 = vld [vmem:[#allocation2 + $0x1e8] sm:$0xff] }
 0x26c   : > { %6468 = vmatmul.msk.f32.gmra.mxu2 %vm361_vm0, %v1575_v27  ;;  %v1577_v27 = vld [vmem:[#allocation2 + $0x200] sm:$0xff] }
 0x26e   : > { %1880 = vmatmul.f32.gmra.mxu1 %v1556_v30  ;;  %v1396_v30 = vpop.permute.xlu0 %1395  ;;  %v1590_v10 = vld [vmem:[#allocation2 + $0x268] sm:$0xff] }
 0x26f   : > { %v8791_v22 = vpop.f32.mrf.mxu2  ;;  %1454 = vst.msk [vmem:[#allocation2 + $0x260] sm:$0xff] %vm868_vm3, %v1396_v30 }
 0x270   : > { %v2082_v12 = vld [vmem:[#allocation4] sm:$0xff] }
 0x271   : > { %2106 = vst.msk [vmem:[#allocation3] sm:$0xff] %vm2052_vm4, %v2082_v12 }
 0x274   : > { %6469 = vmatmul.msk.f32.gmra.mxu2 %vm361_vm0, %v1578_v23 }
 0x276   : > { %1883 = vmatmul.f32.gmra.mxu1 %v1559_v62  ;;  %v1483_v62 = vld [vmem:[%s7756_s14 + $0xf2] sm:$0xff] }
 0x277   : > { %v8799_v43 = vpop.f32.mrf.mxu2  ;;  %1511 = vst.msk [vmem:[#allocation2 + $0x280] sm:$0xff] %vm361_vm0, %v1483_v62  ;;  %v3083_v62 = vld [vmem:[%s11742_s3 + $0x200] sm:$0xff] }
 0x27c   : > { %6470 = vmatmul.msk.f32.gmra.mxu2 %vm361_vm0, %v1581_v33 }
 0x27e   : > { %1886 = vmatmul.f32.gmra.mxu1 %v1562_v21 }
 0x27f   : > { %v8810_v17 = vpop.f32.mrf.mxu2 }
 0x283   : > { %v1842_v44 = vpop.f32.mrf.mxu1 }
 0x284   : > { %v1843_v31 = vadd.f32 %v1842_v44, %v1742_v50  ;;  %6471 = vmatmul.msk.f32.gmra.mxu2 %vm361_vm0, %v1584_v39  ;;  %v1398_v50 = vpop.permute.xlu1 %1397 }
 0x285   : > { %1455 = vst.msk [vmem:[#allocation2 + $0x278] sm:$0xff] %vm868_vm3, %v1398_v50 }
 0x286   : > { %v1944_v36 = vadd.f32 %v1943_v3, %v1843_v31  ;;  %1889 = vmatmul.f32.gmra.mxu1 %v1565_v48  ;;  %v8834_v3 = vpop.f32.mrf.mxu0  ;;  %v1757_v48 = vadd.f32 %v8764_v52, %v8789_v0  ;;  %v1593_v31 = vld [vmem:[#allocation2 + $0x280] sm:$0xff] }
 0x287   : > { %v8824_v47 = vpop.f32.mrf.mxu2 }
 0x288   : > { %v2025_v16 = vmax.f32 %v1944_v36, 0.0  ;;  %v1484_v36 = vld [vmem:[%s7756_s14 + $0xfa] sm:$0xff]  ;;  %s7684_s14 = smov 80  }
 0x289   : > { %1512 = vst.msk [vmem:[#allocation2 + $0x298] sm:$0xff] %vm361_vm0, %v1484_v36 }
 0x28a   : > { %2054 = vst.msk [vmem:[#allocation4 + $0x8] sm:$0xff] %vm2052_vm4, %v2025_v16  ;;  %v1580_v16 = vld [vmem:[#allocation2 + $0x218] sm:$0xff] }
 0x28b   : > { %v1845_v14 = vpop.f32.mrf.mxu1 }
 0x28c   : > { %v1846_v57 = vadd.f32 %v1845_v14, %v1745_v28  ;;  %6472 = vmatmul.msk.f32.gmra.mxu2 %vm361_vm0, %v1587_v56 }
 0x28e   : > { %v1947_v9 = vadd.f32 %v1946_v55, %v1846_v57  ;;  %1892 = vmatmul.f32.gmra.mxu1 %v1568_v32  ;;  %v8858_v51 = vpop.f32.mrf.mxu0  ;;  %v1400_v32 = vpop.permute.xlu2 %1399 }
 0x28f   : > { %v8842_v1 = vpop.f32.mrf.mxu2  ;;  %1456 = vst.msk [vmem:[#allocation2 + $0x290] sm:$0xff] %vm868_vm3, %v1400_v32 }
 0x290   : > { %v2026_v25 = vmax.f32 %v1947_v9, 0.0  ;;  %v3090_v9 = vld [vmem:[%s11742_s3 + $0x238] sm:$0xff] }
 0x291   : > { %v2130_v37 = vld [vmem:[#allocation4 + $0x1] sm:$0xff]  ;;  %3531 = vmatpush.msrb.mxu1 %v3090_v9 }
 0x292   : > { %v2083_v2 = vld [vmem:[#allocation4 + $0x8] sm:$0xff]  ;;  %2055 = vst.msk [vmem:[#allocation4 + $0x10] sm:$0xff] %vm2052_vm4, %v2026_v25  ;;  %2178 = vrot.lane.b32.xlu0 %v2130_v37, %s7676_s16  ;;  %v3089_v37 = vld [vmem:[%s11742_s3 + $0x230] sm:$0xff] }
 0x293   : > { %v2275_v42 = vld [vmem:[#allocation4 + $0x2] sm:$0xff]  ;;  %v1848_v11 = vpop.f32.mrf.mxu1  ;;  %2107 = vst.msk [vmem:[#allocation3 + $0x28] sm:$0xff] %vm2052_vm4, %v2083_v2  ;;  %v1760_v2 = vadd.f32 %v8764_v52, %v8801_v5  ;;  %3532 = vmatpush.msrb.mxu1 %v3089_v37 }
 0x294   : > { %v1849_v46 = vadd.f32 %v1848_v11, %v1748_v38  ;;  %2299 = vst.msk [vmem:[#allocation3 + $0x8] sm:$0xff] %vm2052_vm4, %v2275_v42  ;;  %6473 = vmatmul.msk.f32.gmra.mxu2 %vm361_vm0, %v1590_v10  ;;  %v1596_v38 = vld [vmem:[#allocation2 + $0x298] sm:$0xff]  ;;  %v1583_v11 = vld [vmem:[#allocation2 + $0x230] sm:$0xff]  ;;  %v3088_v5 = vld [vmem:[%s11742_s3 + $0x228] sm:$0xff] }
 0x295   : > { %3533 = vmatpush.msrb.mxu1 %v3088_v5  ;;  %v3033_v5 = vld [vmem:[%s11742_s3 + $0x70] sm:$0xff] }
 0x296   : > { %v1950_v54 = vadd.f32 %v1949_v7, %v1849_v46  ;;  %1895 = vmatmul.f32.gmra.mxu1 %v1571_v45  ;;  %v8886_v57 = vpop.f32.mrf.mxu0 }
 0x297   : > { %v8863_v8 = vpop.f32.mrf.mxu2  ;;  %3534 = vmatpush.msrb.mxu1 %v3087_v49 }
 0x298   : > { %v2027_v19 = vmax.f32 %v1950_v54, 0.0 }
 0x299   : > { %v2131_v53 = vld [vmem:[#allocation4 + $0x9] sm:$0xff] }
 0x29a   : > { %v8827_v59 = vld [vmem:[#allocation4 + $0x10] sm:$0xff]  ;;  %2056 = vst.msk [vmem:[#allocation4 + $0x18] sm:$0xff] %vm2052_vm4, %v2027_v19  ;;  %2180 = vrot.lane.b32.xlu1 %v2131_v53, %s7676_s16 }
 0x29b   : > { %v2276_v61 = vld [vmem:[#allocation4 + $0xa] sm:$0xff]  ;;  %v1851_v4 = vpop.f32.mrf.mxu1  ;;  %2108 = vst.msk [vmem:[#allocation3 + $0x50] sm:$0xff] %vm2052_vm4, %v8827_v59 }
 0x29c   : > { %v1852_v24 = vadd.f32 %v1851_v4, %v1751_v60  ;;  %2300 = vst.msk [vmem:[#allocation3 + $0x30] sm:$0xff] %vm2052_vm4, %v2276_v61  ;;  %6474 = vmatmul.msk.f32.gmra.mxu2 %vm361_vm0, %v1593_v31  ;;  %v3086_v60 = vld [vmem:[%s11742_s3 + $0x218] sm:$0xff]  ;;  %v1586_v61 = vld [vmem:[#allocation2 + $0x248] sm:$0xff]  ;;  %v1763_v4 = vadd.f32 %v8764_v52, %v8813_v20  ;;  %v1589_v31 = vld [vmem:[#allocation2 + $0x260] sm:$0xff] }
 0x29d   : > { %3535 = vmatpush.msrb.mxu1 %v3086_v60  ;;  %v3032_v60 = vld [vmem:[%s11742_s3 + $0x68] sm:$0xff] }
 0x29e   : > { %v1953_v34 = vadd.f32 %v8791_v22, %v1852_v24  ;;  %1898 = vmatmul.f32.gmra.mxu1 %v1574_v6  ;;  %v8927_v29 = vpop.f32.mrf.mxu0 }
 0x29f   : > { %v8883_v14 = vpop.f32.mrf.mxu2 }
 0x2a0   : > { %v2028_v55 = vmax.f32 %v1953_v34, 0.0 }
 0x2a1   : > { %v2132_v26 = vld [vmem:[#allocation4 + $0x11] sm:$0xff] }
 0x2a2   : > { %v8845_v12 = vld [vmem:[#allocation4 + $0x18] sm:$0xff]  ;;  %2057 = vst.msk [vmem:[#allocation4 + $0x20] sm:$0xff] %vm2052_vm4, %v2028_v55  ;;  %2182 = vrot.lane.b32.xlu2 %v2132_v26, %s7676_s16  ;;  %v3084_v55 = vld [vmem:[%s11742_s3 + $0x208] sm:$0xff] }
 0x2a3   : > { %v8852_v7 = vld [vmem:[#allocation4 + $0x12] sm:$0xff]  ;;  %v1854_v15 = vpop.f32.mrf.mxu1  ;;  %2109 = vst.msk [vmem:[#allocation3 + $0x78] sm:$0xff] %vm2052_vm4, %v8845_v12 }
 0x2a4   : > { %v2467_v41 = vld [vmem:[#allocation4 + $0x11] sm:$0xff]  ;;  %v1855_v21 = vadd.f32 %v1854_v15, %v1754_v13  ;;  %2301 = vst.msk [vmem:[#allocation3 + $0x58] sm:$0xff] %vm2052_vm4, %v8852_v7  ;;  %6475 = vmatmul.msk.f32.gmra.mxu2 %vm361_vm0, %v1596_v38 }
 0x2a5   : > { %2491 = vst.msk [vmem:[#allocation3 + $0x10] sm:$0xff] %vm2052_vm4, %v2467_v41 }
 0x2a6   : > { %v1956_v22 = vadd.f32 %v8799_v43, %v1855_v21  ;;  %1901 = vmatmul.f32.gmra.mxu1 %v1577_v27 }
 0x2a7   : > { %v8919_v53 = vpop.f32.mrf.mxu2 }
 0x2a8   : > { %v2029_v23 = vmax.f32 %v1956_v22, 0.0 }
 0x2a9   : > { %v2133_v58 = vld [vmem:[#allocation4 + $0x19] sm:$0xff] }
 0x2aa   : > { %v8867_v44 = vld [vmem:[#allocation4 + $0x20] sm:$0xff]  ;;  %2058 = vst.msk [vmem:[#allocation4 + $0x28] sm:$0xff] %vm2052_vm4, %v2029_v23  ;;  %2184 = vrot.lane.b32.xlu0 %v2133_v58, %s7676_s16  ;;  %v1766_v23 = vadd.f32 %v8764_v52, %v8834_v3  ;;  %v8967_v58 = vpop.f32.mrf.mxu0 }
 0x2ab   : > { %v8874_v43 = vld [vmem:[#allocation4 + $0x1a] sm:$0xff]  ;;  %v1857_v63 = vpop.f32.mrf.mxu1  ;;  %2110 = vst.msk [vmem:[#allocation3 + $0xa0] sm:$0xff] %vm2052_vm4, %v8867_v44 }
 0x2ac   : > { %v2468_v28 = vld [vmem:[#allocation4 + $0x19] sm:$0xff]  ;;  %v1858_v33 = vadd.f32 %v1857_v63, %v1757_v48  ;;  %2302 = vst.msk [vmem:[#allocation3 + $0x80] sm:$0xff] %vm2052_vm4, %v8874_v43 }
 0x2ad   : > { %v2659_v0 = vld [vmem:[#allocation4 + $0x20] sm:$0xff]  ;;  %2492 = vst.msk [vmem:[#allocation3 + $0x38] sm:$0xff] %vm2052_vm4, %v2468_v28 }
 0x2ae   : > { %v1959_v35 = vadd.f32 %v8810_v17, %v1858_v33  ;;  %1904 = vmatmul.f32.gmra.mxu1 %v1580_v16  ;;  %2683 = vst.msk [vmem:[#allocation3 + $0x18] sm:$0xff] %vm2052_vm4, %v2659_v0  ;;  %v1769_v0 = vadd.f32 %v8764_v52, %v8858_v51 }
 0x2af   : > { %v8954_v27 = vpop.f32.mrf.mxu2 }
 0x2b0   : > { %v2030_v18 = vmax.f32 %v1959_v35, 0.0 }
 0x2b1   : > { %v2851_v25 = vld [vmem:[#allocation4 + $0x22] sm:$0xff] }
 0x2b2   : > { %v2134_v17 = vld [vmem:[#allocation4 + $0x21] sm:$0xff]  ;;  %2875 = vst.msk [vmem:[#allocation3 + $0x20] sm:$0xff] %vm2052_vm4, %v2851_v25 }
 0x2b3   : > { %2186 = vrot.lane.b32.xlu1 %v2134_v17, %s7676_s16  ;;  %v8900_v39 = vld [vmem:[#allocation4 + $0x28] sm:$0xff]  ;;  %2059 = vst.msk [vmem:[#allocation4 + $0x30] sm:$0xff] %vm2052_vm4, %v2030_v18  ;;  %v1860_v42 = vpop.f32.mrf.mxu1  ;;  %v1592_v18 = vld [vmem:[#allocation2 + $0x278] sm:$0xff] }
 0x2b4   : > { %v8902_v40 = vld [vmem:[#allocation4 + $0x22] sm:$0xff]  ;;  %v1861_v46 = vadd.f32 %v1860_v42, %v1760_v2  ;;  %2111 = vst.msk [vmem:[#allocation3 + $0xc8] sm:$0xff] %vm2052_vm4, %v8900_v39  ;;  %v8995_v2 = vpop.f32.mrf.mxu0  ;;  %v3034_v42 = vld [vmem:[%s11742_s3 + $0x78] sm:$0xff] }
 0x2b5   : > { %v8909_v45 = vld [vmem:[#allocation4 + $0x21] sm:$0xff]  ;;  %2303 = vst.msk [vmem:[#allocation3 + $0xa8] sm:$0xff] %vm2052_vm4, %v8902_v40  ;;  %3167 = vmatpush.msrb.mxu2 %v3034_v42  ;;  %6703 = vmatpush.msra.mxu3 %v3034_v42 }
 0x2b6   : > { %v2660_v54 = vld [vmem:[#allocation4 + $0x28] sm:$0xff]  ;;  %v1962_v19 = vadd.f32 %v8824_v47, %v1861_v46  ;;  %1907 = vmatmul.f32.gmra.mxu1 %v1583_v11  ;;  %2493 = vst.msk [vmem:[#allocation3 + $0x60] sm:$0xff] %vm2052_vm4, %v8909_v45  ;;  %v3085_v47 = vld [vmem:[%s11742_s3 + $0x210] sm:$0xff] }
 0x2b7   : > { %2684 = vst.msk [vmem:[#allocation3 + $0x40] sm:$0xff] %vm2052_vm4, %v2660_v54  ;;  %3536 = vmatpush.msrb.mxu1 %v3085_v47  ;;  %v8979_v28 = vpop.f32.mrf.mxu2  ;;  %3168 = vmatpush.msrb.mxu2 %v3033_v5  ;;  %v1595_v47 = vld [vmem:[#allocation2 + $0x290] sm:$0xff] }
 0x2b8   : > { %v2031_v56 = vmax.f32 %v1962_v19, 0.0  ;;  %6704 = vmatpush.msra.mxu3 %v3033_v5  ;;  %v1772_v19 = vadd.f32 %v8764_v52, %v8886_v57  ;;  %v3031_v57 = vld [vmem:[%s11742_s3 + $0x60] sm:$0xff] }
 0x2b9   : > { %3537 = vmatpush.msrb.mxu1 %v3084_v55  ;;  %3169 = vmatpush.msrb.mxu2 %v3032_v60  ;;  %v3030_v55 = vld [vmem:[%s11742_s3 + $0x58] sm:$0xff] }
 0x2ba   : > { %v2852_v6 = vld [vmem:[#allocation4 + $0x2a] sm:$0xff]  ;;  %2060 = vst.msk [vmem:[#allocation4 + $0x38] sm:$0xff] %vm2052_vm4, %v2031_v56  ;;  %6705 = vmatpush.msra.mxu3 %v3032_v60 }
 0x2bb   : > { %v2135_v24 = vld [vmem:[#allocation4 + $0x29] sm:$0xff]  ;;  %2876 = vst.msk [vmem:[#allocation3 + $0x48] sm:$0xff] %vm2052_vm4, %v2852_v6  ;;  %v1863_v30 = vpop.f32.mrf.mxu1  ;;  %3538 = vmatpush.msrb.mxu1 %v3083_v62  ;;  %3170 = vmatpush.msrb.mxu2 %v3031_v57 }
 0x2bc   : > { %v8935_v34 = vld [vmem:[#allocation4 + $0x30] sm:$0xff]  ;;  %2188 = vrot.lane.b32.xlu2 %v2135_v24, %s7676_s16  ;;  %v1864_v20 = vadd.f32 %v1863_v30, %v1763_v4  ;;  %6706 = vmatpush.msra.mxu3 %v3031_v57 }
 0x2bd   : > { %v8942_v26 = vld [vmem:[#allocation4 + $0x2a] sm:$0xff]  ;;  %2112 = vst.msk [vmem:[#allocation3 + $0xf0] sm:$0xff] %vm2052_vm4, %v8935_v34  ;;  %3171 = vmatpush.msrb.mxu2 %v3030_v55 }
 0x2be   : > { %v8944_v13 = vld [vmem:[#allocation4 + $0x29] sm:$0xff]  ;;  %2304 = vst.msk [vmem:[#allocation3 + $0xd0] sm:$0xff] %vm2052_vm4, %v8942_v26  ;;  %v1965_v15 = vadd.f32 %v8842_v1, %v1864_v20  ;;  %1910 = vmatmul.f32.gmra.mxu1 %v1586_v61  ;;  %v9038_v20 = vpop.f32.mrf.mxu0  ;;  %6707 = vmatpush.msra.mxu3 %v3030_v55 }
 0x2bf   : > { %v2661_v10 = vld [vmem:[#allocation4 + $0x30] sm:$0xff]  ;;  %2494 = vst.msk [vmem:[#allocation3 + $0x88] sm:$0xff] %vm2052_vm4, %v8944_v13  ;;  %v9011_v54 = vpop.f32.mrf.mxu2 }
 0x2c0   : > { %2685 = vst.msk [vmem:[#allocation3 + $0x68] sm:$0xff] %vm2052_vm4, %v2661_v10  ;;  %v2032_v41 = vmax.f32 %v1965_v15, 0.0  ;;  %v3029_v62 = vld [vmem:[%s11742_s3 + $0x50] sm:$0xff] }
 0x2c1   : > { %v2853_v21 = vld [vmem:[#allocation4 + $0x32] sm:$0xff]  ;;  %3172 = vmatpush.msrb.mxu2 %v3029_v62  ;;  %6708 = vmatpush.msra.mxu3 %v3029_v62 }
 0x2c2   : > { %v2136_v22 = vld [vmem:[#allocation4 + $0x31] sm:$0xff]  ;;  %2877 = vst.msk [vmem:[#allocation3 + $0x70] sm:$0xff] %vm2052_vm4, %v2853_v21  ;;  %v3028_v21 = vld [vmem:[%s11742_s3 + $0x48] sm:$0xff] }
 0x2c3   : > { %v8959_v50 = vld [vmem:[#allocation4 + $0x38] sm:$0xff]  ;;  %2190 = vrot.lane.b32.xlu0 %v2136_v22, %s7676_s16  ;;  %2061 = vst.msk [vmem:[#allocation4 + $0x40] sm:$0xff] %vm2052_vm4, %v2032_v41  ;;  %v1866_v48 = vpop.f32.mrf.mxu1  ;;  %3173 = vmatpush.msrb.mxu2 %v3028_v21  ;;  %v2908_v60 = vld [vmem:[#allocation3 + $0x48] sm:$0xff] }
 0x2c4   : > { %v8965_v1 = vld [vmem:[#allocation4 + $0x32] sm:$0xff]  ;;  %v1867_v63 = vadd.f32 %v1866_v48, %v1766_v23  ;;  %2113 = vst.msk [vmem:[#allocation3 + $0x118] sm:$0xff] %vm2052_vm4, %v8959_v50  ;;  %6709 = vmatpush.msra.mxu3 %v3028_v21 }
 0x2c5   : > { %v8970_v36 = vld [vmem:[#allocation4 + $0x31] sm:$0xff]  ;;  %2305 = vst.msk [vmem:[#allocation3 + $0xf8] sm:$0xff] %vm2052_vm4, %v8965_v1 }
 0x2c6   : > { %v2662_v16 = vld [vmem:[#allocation4 + $0x38] sm:$0xff]  ;;  %v1968_v3 = vadd.f32 %v8863_v8, %v1867_v63  ;;  %1913 = vmatmul.f32.gmra.mxu1 %v1589_v31  ;;  %2495 = vst.msk [vmem:[#allocation3 + $0xb0] sm:$0xff] %vm2052_vm4, %v8970_v36 }
 0x2c7   : > { %2686 = vst.msk [vmem:[#allocation3 + $0x90] sm:$0xff] %vm2052_vm4, %v2662_v16  ;;  %v9055_v23 = vpop.f32.mrf.mxu2  ;;  %v3027_v16 = vld [vmem:[%s11742_s3 + $0x40] sm:$0xff] }
 0x2c8   : > { %v2033_v33 = vmax.f32 %v1968_v3, 0.0  ;;  %3174 = vmatpush.msrb.mxu2 %v3027_v16  ;;  %6710 = vmatpush.msra.mxu3 %v3027_v16  ;;  %v3019_v16 = vld [vmem:[%s11742_s3] sm:$0xff] }
 0x2ca   : > { %v2854_v35 = vld [vmem:[#allocation4 + $0x3a] sm:$0xff]  ;;  %2062 = vst.msk [vmem:[#allocation4 + $0x48] sm:$0xff] %vm2052_vm4, %v2033_v33 }
 0x2cb   : > { %v2137_v32 = vld [vmem:[#allocation4 + $0x39] sm:$0xff]  ;;  %2878 = vst.msk [vmem:[#allocation3 + $0x98] sm:$0xff] %vm2052_vm4, %v2854_v35  ;;  %v1869_v8 = vpop.f32.mrf.mxu1 }
 0x2cc   : > { %v8985_v9 = vld [vmem:[#allocation4 + $0x40] sm:$0xff]  ;;  %2192 = vrot.lane.b32.xlu1 %v2137_v32, %s7676_s16  ;;  %v1870_v37 = vadd.f32 %v1869_v8, %v1769_v0  ;;  %v3026_v35 = vld [vmem:[%s11742_s3 + $0x38] sm:$0xff]  ;;  %v9075_v8 = vpop.f32.mrf.mxu0 }
 0x2cd   : > { %v8989_v25 = vld [vmem:[#allocation4 + $0x3a] sm:$0xff]  ;;  %2114 = vst.msk [vmem:[#allocation3 + $0x140] sm:$0xff] %vm2052_vm4, %v8985_v9  ;;  %3175 = vmatpush.msrb.mxu2 %v3026_v35  ;;  %6711 = vmatpush.msra.mxu3 %v3026_v35 }
 0x2ce   : > { %v8991_v17 = vld [vmem:[#allocation4 + $0x39] sm:$0xff]  ;;  %2306 = vst.msk [vmem:[#allocation3 + $0x120] sm:$0xff] %vm2052_vm4, %v8989_v25  ;;  %v1971_v38 = vadd.f32 %v8883_v14, %v1870_v37  ;;  %1916 = vmatmul.f32.gmra.mxu1 %v1592_v18  ;;  %v3025_v37 = vld [vmem:[%s11742_s3 + $0x30] sm:$0xff] }
 0x2cf   : > { %v2663_v51 = vld [vmem:[#allocation4 + $0x40] sm:$0xff]  ;;  %2496 = vst.msk [vmem:[#allocation3 + $0xd8] sm:$0xff] %vm2052_vm4, %v8991_v17  ;;  %3176 = vmatpush.msrb.mxu2 %v3025_v37  ;;  %6712 = vmatpush.msra.mxu3 %v3025_v37 }
 0x2d0   : > { %2687 = vst.msk [vmem:[#allocation3 + $0xb8] sm:$0xff] %vm2052_vm4, %v2663_v51  ;;  %v2034_v11 = vmax.f32 %v1971_v38, 0.0  ;;  %v2903_v33 = vld [vmem:[#allocation3 + $0x20] sm:$0xff]  ;;  %v1778_v51 = vadd.f32 %v8764_v52, %v8967_v58 }
 0x2d1   : > { %v9009_v46 = vld [vmem:[#allocation4 + $0x42] sm:$0xff] }
 0x2d2   : > { %v2138_v14 = vld [vmem:[#allocation4 + $0x41] sm:$0xff]  ;;  %2879 = vst.msk [vmem:[#allocation3 + $0xc0] sm:$0xff] %vm2052_vm4, %v9009_v46 }
 0x2d3   : > { %v9013_v49 = vld [vmem:[#allocation4 + $0x48] sm:$0xff]  ;;  %2194 = vrot.lane.b32.xlu2 %v2138_v14, %s7676_s16  ;;  %2063 = vst.msk [vmem:[#allocation4 + $0x50] sm:$0xff] %vm2052_vm4, %v2034_v11  ;;  %v1872_v61 = vpop.f32.mrf.mxu1 }
 0x2d4   : > { %v2283_v56 = vld [vmem:[#allocation4 + $0x42] sm:$0xff]  ;;  %v1873_v6 = vadd.f32 %v1872_v61, %v1772_v19  ;;  %2115 = vst.msk [vmem:[#allocation3 + $0x168] sm:$0xff] %vm2052_vm4, %v9013_v49  ;;  %v9121_v62 = vpop.f32.mrf.mxu0 }
 0x2d5   : > { %v9024_v4 = vld [vmem:[#allocation4 + $0x41] sm:$0xff]  ;;  %2307 = vst.msk [vmem:[#allocation3 + $0x148] sm:$0xff] %vm2052_vm4, %v2283_v56  ;;  %v9097_v56 = vpop.f32.mrf.mxu2 }
 0x2d6   : > { %v2664_v24 = vld [vmem:[#allocation4 + $0x48] sm:$0xff]  ;;  %v1974_v30 = vadd.f32 %v8919_v53, %v1873_v6  ;;  %1919 = vmatmul.f32.gmra.mxu1 %v1595_v47  ;;  %2497 = vst.msk [vmem:[#allocation3 + $0x100] sm:$0xff] %vm2052_vm4, %v9024_v4  ;;  %v1775_v53 = vadd.f32 %v8764_v52, %v8927_v29  ;;  %v3023_v61 = vld [vmem:[%s11742_s3 + $0x20] sm:$0xff]  ;;  %v3022_v6 = vld [vmem:[%s11742_s3 + $0x18] sm:$0xff] }
 0x2d7   : > { %2688 = vst.msk [vmem:[#allocation3 + $0xe0] sm:$0xff] %vm2052_vm4, %v2664_v24  ;;  %v3024_v11 = vld [vmem:[%s11742_s3 + $0x28] sm:$0xff]  ;;  %v3021_v24 = vld [vmem:[%s11742_s3 + $0x10] sm:$0xff] }
 0x2d8   : > { %v2035_v10 = vmax.f32 %v1974_v30, 0.0  ;;  %3177 = vmatpush.msrb.mxu2 %v3024_v11  ;;  %6713 = vmatpush.msra.mxu3 %v3024_v11 }
 0x2da   : > { %v9046_v15 = vld [vmem:[#allocation4 + $0x4a] sm:$0xff]  ;;  %2064 = vst.msk [vmem:[#allocation4 + $0x58] sm:$0xff] %vm2052_vm4, %v2035_v10  ;;  %3178 = vmatpush.msrb.mxu2 %v3023_v61  ;;  %6714 = vmatpush.msra.mxu3 %v3023_v61 }
 0x2db   : > { %v2139_v41 = vld [vmem:[#allocation4 + $0x49] sm:$0xff]  ;;  %2880 = vst.msk [vmem:[#allocation3 + $0xe8] sm:$0xff] %vm2052_vm4, %v9046_v15  ;;  %v1875_v22 = vpop.f32.mrf.mxu1 }
 0x2dc   : > { %2196 = vrot.lane.b32.xlu0 %v2139_v41, %s7676_s16  ;;  %v9057_v48 = vld [vmem:[#allocation4 + $0x50] sm:$0xff]  ;;  %v1876_v63 = vadd.f32 %v1875_v22, %v1775_v53  ;;  %3179 = vmatpush.msrb.mxu2 %v3022_v6 }
 0x2dd   : > { %v2284_v29 = vld [vmem:[#allocation4 + $0x4a] sm:$0xff]  ;;  %2116 = vst.msk [vmem:[#allocation3 + $0x190] sm:$0xff] %vm2052_vm4, %v9057_v48  ;;  %6715 = vmatpush.msra.mxu3 %v3022_v6 }
 0x2de   : > { %v9059_v31 = vld [vmem:[#allocation4 + $0x49] sm:$0xff]  ;;  %2308 = vst.msk [vmem:[#allocation3 + $0x170] sm:$0xff] %vm2052_vm4, %v2284_v29  ;;  %v1977_v0 = vadd.f32 %v8954_v27, %v1876_v63  ;;  %6476 = vmatmul.msk.f32.vlgmr.msrb.gmra.mxu1 %vm2052_vm4, %v2903_v33  ;;  %3180 = vmatpush.msrb.mxu2 %v3021_v24  ;;  %v9141_v33 = vpop.f32.mrf.mxu2 }
 0x2df   : > { %11789 = vst [vmem:[#allocation6_spill] sm:$0xff] %v9059_v31  ;;  %v2665_v3 = vld [vmem:[#allocation4 + $0x50] sm:$0xff]  ;;  %6716 = vmatpush.msra.mxu3 %v3021_v24 }
 0x2e0   : > { %2498 = vst.msk [vmem:[#allocation3 + $0x128] sm:$0xff] %vm2052_vm4, %v9059_v31  ;;  %v2036_v32 = vmax.f32 %v1977_v0, 0.0  ;;  %v2913_v63 = vld [vmem:[#allocation3 + $0x70] sm:$0xff] }
 0x2e1   : > { %2689 = vst.msk [vmem:[#allocation3 + $0x108] sm:$0xff] %vm2052_vm4, %v2665_v3  ;;  %v9077_v18 = vld [vmem:[#allocation4 + $0x52] sm:$0xff] }
 0x2e2   : > { %v2140_v27 = vld [vmem:[#allocation4 + $0x51] sm:$0xff]  ;;  %2881 = vst.msk [vmem:[#allocation3 + $0x110] sm:$0xff] %vm2052_vm4, %v9077_v18 }
 0x2e3   : > { %2198 = vrot.lane.b32.xlu1 %v2140_v27, %s7676_s16  ;;  %v9087_v38 = vld [vmem:[#allocation4 + $0x58] sm:$0xff]  ;;  %2065 = vst.msk [vmem:[#allocation4 + $0x60] sm:$0xff] %vm2052_vm4, %v2036_v32  ;;  %v1878_v42 = vpop.f32.mrf.mxu1 }
 0x2e4   : > { %v9093_v5 = vld [vmem:[#allocation4 + $0x51] sm:$0xff]  ;;  %v1879_v58 = vadd.f32 %v1878_v42, %v1778_v51  ;;  %2117 = vst.msk [vmem:[#allocation3 + $0x1b8] sm:$0xff] %vm2052_vm4, %v9087_v38 }
 0x2e5   : > { %v2285_v14 = vld [vmem:[#allocation4 + $0x52] sm:$0xff]  ;;  %2499 = vst.msk [vmem:[#allocation3 + $0x150] sm:$0xff] %vm2052_vm4, %v9093_v5 }
 0x2e6   : > { %v2666_v19 = vld [vmem:[#allocation4 + $0x58] sm:$0xff]  ;;  %2309 = vst.msk [vmem:[#allocation3 + $0x198] sm:$0xff] %vm2052_vm4, %v2285_v14  ;;  %v1980_v47 = vadd.f32 %v8979_v28, %v1879_v58  ;;  %6477 = vmatmul.msk.f32.gmra.mxu1 %vm2052_vm4, %v2908_v60  ;;  %v1781_v28 = vadd.f32 %v8764_v52, %v8995_v2  ;;  %v3020_v2 = vld [vmem:[%s11742_s3 + $0x8] sm:$0xff]  ;;  %v1792_v58 = vpop.f32.mrf.mxu0  ;;  %v9164_v61 = vpop.f32.mrf.mxu2 }
 0x2e7   : > { %2690 = vst.msk [vmem:[#allocation3 + $0x130] sm:$0xff] %vm2052_vm4, %v2666_v19  ;;  %3181 = vmatpush.msrb.mxu2 %v3020_v2  ;;  %6717 = vmatpush.msra.mxu3 %v3020_v2  ;;  %v2918_v19 = vld [vmem:[#allocation3 + $0x98] sm:$0xff]  ;;  %v2923_v2 = vld [vmem:[#allocation3 + $0xc0] sm:$0xff] }
 0x2e8   : > { %v2037_v57 = vmax.f32 %v1980_v47, 0.0  ;;  %v1787_v47 = vadd.f32 %v8764_v52, %v9075_v8 }
 0x2e9   : > { %3182 = vmatpush.msrb.mxu2 %v3019_v16  ;;  %6718 = vmatpush.msra.mxu3 %v3019_v16 }
 0x2ea   : > { %v9116_v30 = vld [vmem:[#allocation4 + $0x5a] sm:$0xff]  ;;  %2066 = vst.msk [vmem:[#allocation4 + $0x68] sm:$0xff] %vm2052_vm4, %v2037_v57 }
 0x2eb   : > { %v2141_v55 = vld [vmem:[#allocation4 + $0x59] sm:$0xff]  ;;  %2882 = vst.msk [vmem:[#allocation3 + $0x138] sm:$0xff] %vm2052_vm4, %v9116_v30  ;;  %v1881_v53 = vpop.f32.mrf.mxu1 }
 0x2ec   : > { %v9119_v10 = vld [vmem:[#allocation4 + $0x60] sm:$0xff]  ;;  %2200 = vrot.lane.b32.xlu2 %v2141_v55, %s7676_s16  ;;  %v1882_v22 = vadd.f32 %v1881_v53, %v1781_v28 }
 0x2ed   : > { %v2286_v41 = vld [vmem:[#allocation4 + $0x5a] sm:$0xff]  ;;  %2118 = vst.msk [vmem:[#allocation3 + $0x1e0] sm:$0xff] %vm2052_vm4, %v9119_v10 }
 0x2ee   : > { %v9129_v21 = vld [vmem:[#allocation4 + $0x59] sm:$0xff]  ;;  %2310 = vst.msk [vmem:[#allocation3 + $0x1c0] sm:$0xff] %vm2052_vm4, %v2286_v41  ;;  %v1983_v3 = vadd.f32 %v9011_v54, %v1882_v22  ;;  %6478 = vmatmul.msk.f32.gmra.mxu1 %vm2052_vm4, %v2913_v63  ;;  %v1784_v54 = vadd.f32 %v8764_v52, %v9038_v20 }
 0x2ef   : > { %v2667_v29 = vld [vmem:[#allocation4 + $0x60] sm:$0xff]  ;;  %2500 = vst.msk [vmem:[#allocation3 + $0x178] sm:$0xff] %vm2052_vm4, %v9129_v21 }
 0x2f0   : > { %2691 = vst.msk [vmem:[#allocation3 + $0x158] sm:$0xff] %vm2052_vm4, %v2667_v29  ;;  %v2038_v0 = vmax.f32 %v1983_v3, 0.0  ;;  %v1795_v29 = vpop.f32.mrf.mxu0 }
 0x2f1   : > { %v9144_v35 = vld [vmem:[#allocation4 + $0x62] sm:$0xff] }
 0x2f2   : > { %v2142_v32 = vld [vmem:[#allocation4 + $0x61] sm:$0xff]  ;;  %2883 = vst.msk [vmem:[#allocation3 + $0x160] sm:$0xff] %vm2052_vm4, %v9144_v35 }
 0x2f3   : > { %v9146_v27 = vld [vmem:[#allocation4 + $0x68] sm:$0xff]  ;;  %2202 = vrot.lane.b32.xlu0 %v2142_v32, %s7676_s16  ;;  %2067 = vst.msk [vmem:[#allocation4 + $0x70] sm:$0xff] %vm2052_vm4, %v2038_v0  ;;  %v1884_v51 = vpop.f32.mrf.mxu1  ;;  %v1790_v32 = vadd.f32 %v8764_v52, %v9121_v62 }
 0x2f4   : > { %v2287_v37 = vld [vmem:[#allocation4 + $0x62] sm:$0xff]  ;;  %v1885_v11 = vadd.f32 %v1884_v51, %v1784_v54  ;;  %2119 = vst.msk [vmem:[#allocation3 + $0x208] sm:$0xff] %vm2052_vm4, %v9146_v27  ;;  %v1997_v54 = vpop.f32.mrf.mxu2 }
 0x2f5   : > { %v9154_v42 = vld [vmem:[#allocation4 + $0x61] sm:$0xff]  ;;  %2311 = vst.msk [vmem:[#allocation3 + $0x1e8] sm:$0xff] %vm2052_vm4, %v2287_v37 }
 0x2f6   : > { %11790 = vst [vmem:[#allocation7_spill] sm:$0xff] %v9154_v42  ;;  %v2668_v14 = vld [vmem:[#allocation4 + $0x68] sm:$0xff]  ;;  %v1986_v20 = vadd.f32 %v9055_v23, %v1885_v11  ;;  %6479 = vmatmul.msk.f32.gmra.mxu1 %vm2052_vm4, %v2918_v19 }
 0x2f7   : > { %2501 = vst.msk [vmem:[#allocation3 + $0x1a0] sm:$0xff] %vm2052_vm4, %v9154_v42  ;;  %v2928_v62 = vld [vmem:[#allocation3 + $0xe8] sm:$0xff] }
 0x2f8   : > { %2692 = vst.msk [vmem:[#allocation3 + $0x180] sm:$0xff] %vm2052_vm4, %v2668_v14  ;;  %v2039_v60 = vmax.f32 %v1986_v20, 0.0 }
 0x2fa   : > { %v9168_v6 = vld [vmem:[#allocation4 + $0x6a] sm:$0xff]  ;;  %2068 = vst.msk [vmem:[#allocation4 + $0x78] sm:$0xff] %vm2052_vm4, %v2039_v60 }
 0x2fb   : > { %v2143_v57 = vld [vmem:[#allocation4 + $0x69] sm:$0xff]  ;;  %2884 = vst.msk [vmem:[#allocation3 + $0x188] sm:$0xff] %vm2052_vm4, %v9168_v6  ;;  %v1887_v24 = vpop.f32.mrf.mxu1 }
 0x2fc   : > { %v9171_v23 = vld [vmem:[#allocation4 + $0x70] sm:$0xff]  ;;  %2204 = vrot.lane.b32.xlu1 %v2143_v57, %s7676_s16  ;;  %v1888_v55 = vadd.f32 %v1887_v24, %v1787_v47  ;;  %v2183_v53 = vpop.permute.xlu2 %2182  ;;  %v1798_v47 = vpop.f32.mrf.mxu0  ;;  %v1793_v57 = vadd.f32 %v8764_v52, %v1792_v58 }
 0x2fd   : > { %v2288_v28 = vld [vmem:[#allocation4 + $0x6a] sm:$0xff]  ;;  %2120 = vst.msk [vmem:[#allocation3 + $0x230] sm:$0xff] %vm2052_vm4, %v9171_v23 }
 0x2fe   : > { %v9178_v8 = vld [vmem:[#allocation4 + $0x69] sm:$0xff]  ;;  %2253 = vst.msk [vmem:[#allocation3 + $0x50] sm:$0xff] %vm2250_vm5, %v2183_v53  ;;  %v1989_v22 = vadd.f32 %v9097_v56, %v1888_v55  ;;  %6480 = vmatmul.msk.f32.gmra.mxu1 %vm2052_vm4, %v2923_v2 }
 0x2ff   : > { %11791 = vst [vmem:[#allocation8_spill] sm:$0xff] %v9178_v8  ;;  %v2669_v41 = vld [vmem:[#allocation4 + $0x70] sm:$0xff] }
 0x300   : > { %2312 = vst.msk [vmem:[#allocation3 + $0x210] sm:$0xff] %vm2052_vm4, %v2288_v28  ;;  %v2040_v63 = vmax.f32 %v1989_v22, 0.0  ;;  %v2933_v58 = vld [vmem:[#allocation3 + $0x110] sm:$0xff] }
 0x301   : > { %2502 = vst.msk [vmem:[#allocation3 + $0x1c8] sm:$0xff] %vm2052_vm4, %v9178_v8  ;;  %v9187_v16 = vld [vmem:[#allocation4 + $0x72] sm:$0xff] }
 0x302   : > { %2693 = vst.msk [vmem:[#allocation3 + $0x1a8] sm:$0xff] %vm2052_vm4, %v2669_v41  ;;  %v2144_v3 = vld [vmem:[#allocation4 + $0x71] sm:$0xff] }
 0x303   : > { %v9189_v0 = vld [vmem:[#allocation4 + $0x78] sm:$0xff]  ;;  %2885 = vst.msk [vmem:[#allocation3 + $0x1b0] sm:$0xff] %vm2052_vm4, %v9187_v16  ;;  %2206 = vrot.lane.b32.xlu2 %v2144_v3, %s7676_s16  ;;  %v1890_v56 = vpop.f32.mrf.mxu1 }
 0x304   : > { %2069 = vst.msk [vmem:[#allocation4 + $0x80] sm:$0xff] %vm2052_vm4, %v2040_v63  ;;  %v2289_v37 = vld [vmem:[#allocation4 + $0x72] sm:$0xff]  ;;  %v1891_v51 = vadd.f32 %v1890_v56, %v1790_v32  ;;  %v2179_v11 = vpop.permute.xlu0 %2178  ;;  %v2000_v63 = vpop.f32.mrf.mxu2 }
 0x305   : > { %2121 = vst.msk [vmem:[#allocation3 + $0x258] sm:$0xff] %vm2052_vm4, %v9189_v0  ;;  %v9199_v14 = vld [vmem:[#allocation4 + $0x71] sm:$0xff] }
 0x306   : > { %11792 = vst [vmem:[#allocation9_spill] sm:$0xff] %v9199_v14  ;;  %v2670_v19 = vld [vmem:[#allocation4 + $0x78] sm:$0xff]  ;;  %v1992_v20 = vadd.f32 %v9141_v33, %v1891_v51  ;;  %6481 = vmatmul.msk.f32.gmra.mxu1 %vm2052_vm4, %v2928_v62  ;;  %v9235_v62 = vld [vmem:[%s11741_s2] ss:$0 sm:$0xff] }
 0x307   : > { %2251 = vst.msk [vmem:[#allocation3] sm:$0xff] %vm2250_vm5, %v2179_v11 }
 0x308   : > { %2313 = vst.msk [vmem:[#allocation3 + $0x238] sm:$0xff] %vm2052_vm4, %v2289_v37  ;;  %v2041_v60 = vmax.f32 %v1992_v20, 0.0  ;;  %v1801_v20 = vpop.f32.mrf.mxu0 }
 0x309   : > { %2503 = vst.msk [vmem:[#allocation3 + $0x1f0] sm:$0xff] %vm2052_vm4, %v9199_v14 }
 0x30a   : > { %2694 = vst.msk [vmem:[#allocation3 + $0x1d0] sm:$0xff] %vm2052_vm4, %v2670_v19 }
 0x30b   : > { %v9209_v24 = vld [vmem:[#allocation4 + $0x7a] sm:$0xff]  ;;  %2070 = vst.msk [vmem:[#allocation4 + $0x88] sm:$0xff] %vm2052_vm4, %v2041_v60  ;;  %v1893_v33 = vpop.f32.mrf.mxu1 }
 0x30c   : > { %v2145_v28 = vld [vmem:[#allocation4 + $0x79] sm:$0xff]  ;;  %2886 = vst.msk [vmem:[#allocation3 + $0x1d8] sm:$0xff] %vm2052_vm4, %v9209_v24  ;;  %v1894_v2 = vadd.f32 %v1893_v33, %v1793_v57  ;;  %v2181_v41 = vpop.permute.xlu1 %2180 }
 0x30d   : > { %v9212_v55 = vld [vmem:[#allocation4 + $0x80] sm:$0xff]  ;;  %2208 = vrot.lane.b32.xlu0 %v2145_v28, %s7676_s16  ;;  %2252 = vst.msk [vmem:[#allocation3 + $0x28] sm:$0xff] %vm2250_vm5, %v2181_v41 }
 0x30e   : > { %v2290_v53 = vld [vmem:[#allocation4 + $0x7a] sm:$0xff]  ;;  %2122 = vst.msk [vmem:[#allocation3 + $0x280] sm:$0xff] %vm2052_vm4, %v9212_v55  ;;  %v1995_v32 = vadd.f32 %v9164_v61, %v1894_v2  ;;  %6482 = vmatmul.msk.f32.gmra.mxu1 %vm2052_vm4, %v2933_v58  ;;  %v1796_v61 = vadd.f32 %v9235_v62, %v1795_v29 }
 0x30f   : > { %v2899_v22 = vld [vmem:[#allocation3] sm:$0xff]  ;;  %2314 = vst.msk [vmem:[#allocation3 + $0x260] sm:$0xff] %vm2052_vm4, %v2290_v53  ;;  %v2938_v29 = vld [vmem:[#allocation3 + $0x138] sm:$0xff] }
 0x310   : > { %v9219_v52 = vld [vmem:[#allocation4 + $0x79] sm:$0xff]  ;;  %3183 = vmatmul.f32.vlgmr.msrb.gmra.mxu2 %v2899_v22  ;;  %v2042_v56 = vmax.f32 %v1995_v32, 0.0  ;;  %v2003_v22 = vpop.f32.mrf.mxu2 }
 0x311   : > { %11793 = vst [vmem:[#allocation10_spill] sm:$0xff] %v9219_v52  ;;  %v2671_v3 = vld [vmem:[#allocation4 + $0x80] sm:$0xff] }
 0x312   : > { %2504 = vst.msk [vmem:[#allocation3 + $0x218] sm:$0xff] %vm2052_vm4, %v9219_v52  ;;  %v9228_v37 = vld [vmem:[#allocation4 + $0x82] sm:$0xff] }
 0x313   : > { %2695 = vst.msk [vmem:[#allocation3 + $0x1f8] sm:$0xff] %vm2052_vm4, %v2671_v3  ;;  %v2146_v51 = vld [vmem:[#allocation4 + $0x81] sm:$0xff]  ;;  %v1896_v60 = vpop.f32.mrf.mxu1  ;;  %v1799_v3 = vadd.f32 %v9235_v62, %v1798_v47 }
 0x314   : > { %v9230_v11 = vld [vmem:[#allocation4 + $0x88] sm:$0xff]  ;;  %2887 = vst.msk [vmem:[#allocation3 + $0x200] sm:$0xff] %vm2052_vm4, %v9228_v37  ;;  %2210 = vrot.lane.b32.xlu1 %v2146_v51, %s7676_s16  ;;  %v1897_v57 = vadd.f32 %v1896_v60, %v1796_v61  ;;  %v2909_v60 = vld [vmem:[#allocation3 + $0x50] sm:$0xff] }
 0x315   : > { %v2291_v19 = vld [vmem:[#allocation4 + $0x82] sm:$0xff]  ;;  %2071 = vst.msk [vmem:[#allocation4 + $0x90] sm:$0xff] %vm2052_vm4, %v2042_v56 }
 0x316   : > { %v2904_v28 = vld [vmem:[#allocation3 + $0x28] sm:$0xff]  ;;  %2123 = vst.msk [vmem:[#allocation3 + $0x2a8] sm:$0xff] %vm2052_vm4, %v9230_v11  ;;  %v2189_v53 = vpop.permute.xlu2 %2188  ;;  %v1998_v41 = vadd.f32 %v1997_v54, %v1897_v57  ;;  %6483 = vmatmul.msk.f32.gmra.mxu1 %vm2052_vm4, %v2938_v29  ;;  %v1804_v57 = vpop.f32.mrf.mxu0 }
 0x317   : > { %v9244_v33 = vld [vmem:[#allocation4 + $0x81] sm:$0xff]  ;;  %2315 = vst.msk [vmem:[#allocation3 + $0x288] sm:$0xff] %vm2052_vm4, %v2291_v19 }
 0x318   : > { %11794 = vst [vmem:[#allocation11_spill] sm:$0xff] %v9244_v33  ;;  %3186 = vmatmul.f32.gmra.mxu2 %v2904_v28  ;;  %v2672_v2 = vld [vmem:[#allocation4 + $0x88] sm:$0xff]  ;;  %v2043_v58 = vmax.f32 %v1998_v41, 0.0  ;;  %v2943_v28 = vld [vmem:[#allocation3 + $0x160] sm:$0xff] }
 0x319   : > { %2256 = vst.msk [vmem:[#allocation3 + $0xc8] sm:$0xff] %vm2250_vm5, %v2189_v53 }
 0x31a   : > { %2505 = vst.msk [vmem:[#allocation3 + $0x240] sm:$0xff] %vm2052_vm4, %v9244_v33 }
 0x31b   : > { %2696 = vst.msk [vmem:[#allocation3 + $0x220] sm:$0xff] %vm2052_vm4, %v2672_v2  ;;  %v1899_v54 = vpop.f32.mrf.mxu1 }
 0x31c   : > { %v9253_v32 = vld [vmem:[#allocation4 + $0x8a] sm:$0xff]  ;;  %2072 = vst.msk [vmem:[#allocation4 + $0x98] sm:$0xff] %vm2052_vm4, %v2043_v58  ;;  %v1900_v61 = vadd.f32 %v1899_v54, %v1799_v3  ;;  %v2185_v19 = vpop.permute.xlu0 %2184  ;;  %v2006_v3 = vpop.f32.mrf.mxu2  ;;  %v1802_v54 = vadd.f32 %v9235_v62, %v1801_v20 }
 0x31d   : > { %v2147_v56 = vld [vmem:[#allocation4 + $0x89] sm:$0xff]  ;;  %2888 = vst.msk [vmem:[#allocation3 + $0x228] sm:$0xff] %vm2052_vm4, %v9253_v32 }
 0x31e   : > { %v9256_v51 = vld [vmem:[#allocation4 + $0x90] sm:$0xff]  ;;  %2212 = vrot.lane.b32.xlu2 %v2147_v56, %s7676_s16  ;;  %2254 = vst.msk [vmem:[#allocation3 + $0x78] sm:$0xff] %vm2250_vm5, %v2185_v19  ;;  %v2001_v29 = vadd.f32 %v2000_v63, %v1900_v61  ;;  %6484 = vmatmul.msk.f32.gmra.mxu1 %vm2052_vm4, %v2943_v28  ;;  %v2948_v20 = vld [vmem:[#allocation3 + $0x188] sm:$0xff] }
 0x31f   : > { %2124 = vst.msk [vmem:[#allocation3 + $0x2d0] sm:$0xff] %vm2052_vm4, %v9256_v51  ;;  %v9263_v47 = vld [vmem:[#allocation4 + $0x89] sm:$0xff] }
 0x320   : > { %11795 = vst [vmem:[#allocation12_spill] sm:$0xff] %v9263_v47  ;;  %3189 = vmatmul.f32.gmra.mxu2 %v2909_v60  ;;  %v2673_v53 = vld [vmem:[#allocation4 + $0x90] sm:$0xff]  ;;  %v2044_v2 = vmax.f32 %v2001_v29, 0.0 }
 0x321   : > { %2316 = vst.msk [vmem:[#allocation3 + $0x2b0] sm:$0xff] %vm2052_vm4, %v9253_v32 }
 0x322   : > { %2506 = vst.msk [vmem:[#allocation3 + $0x268] sm:$0xff] %vm2052_vm4, %v9263_v47 }
 0x323   : > { %2697 = vst.msk [vmem:[#allocation3 + $0x248] sm:$0xff] %vm2052_vm4, %v2673_v53  ;;  %v9272_v41 = vld [vmem:[#allocation4 + $0x92] sm:$0xff]  ;;  %v1902_v63 = vpop.f32.mrf.mxu1 }
 0x324   : > { %v2148_v58 = vld [vmem:[#allocation4 + $0x91] sm:$0xff]  ;;  %2889 = vst.msk [vmem:[#allocation3 + $0x250] sm:$0xff] %vm2052_vm4, %v9272_v41  ;;  %v1903_v19 = vadd.f32 %v1902_v63, %v1802_v54  ;;  %v1805_v54 = vadd.f32 %v9235_v62, %v1804_v57 }
 0x325   : > { %v9274_v56 = vld [vmem:[#allocation4 + $0x98] sm:$0xff]  ;;  %2214 = vrot.lane.b32.xlu0 %v2148_v58, %s7676_s16  ;;  %2073 = vst.msk [vmem:[#allocation4 + $0xa0] sm:$0xff] %vm2052_vm4, %v2044_v2  ;;  %v2187_v60 = vpop.permute.xlu1 %2186  ;;  %v1807_v2 = vpop.f32.mrf.mxu0 }
 0x326   : > { %v2293_v61 = vld [vmem:[#allocation4 + $0x92] sm:$0xff]  ;;  %2125 = vst.msk [vmem:[#allocation3 + $0x2f8] sm:$0xff] %vm2052_vm4, %v9274_v56  ;;  %v2004_v52 = vadd.f32 %v2003_v22, %v1903_v19  ;;  %6485 = vmatmul.msk.f32.gmra.mxu1 %vm2052_vm4, %v2948_v20 }
 0x327   : > { %v2914_v28 = vld [vmem:[#allocation3 + $0x78] sm:$0xff]  ;;  %2255 = vst.msk [vmem:[#allocation3 + $0xa0] sm:$0xff] %vm2250_vm5, %v2187_v60 }
 0x328   : > { %v9283_v53 = vld [vmem:[#allocation4 + $0x91] sm:$0xff]  ;;  %3192 = vmatmul.f32.gmra.mxu2 %v2914_v28  ;;  %2317 = vst.msk [vmem:[#allocation3 + $0x2d8] sm:$0xff] %vm2052_vm4, %v2293_v61  ;;  %v2045_v58 = vmax.f32 %v2004_v52, 0.0  ;;  %v2009_v61 = vpop.f32.mrf.mxu2 }
 0x329   : > { %11796 = vst [vmem:[#allocation13_spill] sm:$0xff] %v9283_v53  ;;  %v2674_v29 = vld [vmem:[#allocation4 + $0x98] sm:$0xff] }
 0x32a   : > { %2507 = vst.msk [vmem:[#allocation3 + $0x290] sm:$0xff] %vm2052_vm4, %v9283_v53 }
 0x32b   : > { %2698 = vst.msk [vmem:[#allocation3 + $0x270] sm:$0xff] %vm2052_vm4, %v2674_v29  ;;  %v1905_v22 = vpop.f32.mrf.mxu1 }
 0x32c   : > { %v9292_v63 = vld [vmem:[#allocation4 + $0x9a] sm:$0xff]  ;;  %2074 = vst.msk [vmem:[#allocation4 + $0xa8] sm:$0xff] %vm2052_vm4, %v2045_v58  ;;  %v1906_v52 = vadd.f32 %v1905_v22, %v1805_v54  ;;  %v2953_v58 = vld [vmem:[#allocation3 + $0x1b0] sm:$0xff] }
 0x32d   : > { %v2149_v60 = vld [vmem:[#allocation4 + $0x99] sm:$0xff]  ;;  %2890 = vst.msk [vmem:[#allocation3 + $0x278] sm:$0xff] %vm2052_vm4, %v9292_v63  ;;  %v2195_v20 = vpop.permute.xlu2 %2194 }
 0x32e   : > { %v9295_v28 = vld [vmem:[#allocation4 + $0xa0] sm:$0xff]  ;;  %2216 = vrot.lane.b32.xlu1 %v2149_v60, %s7676_s16  ;;  %2259 = vst.msk [vmem:[#allocation3 + $0x140] sm:$0xff] %vm2250_vm5, %v2195_v20  ;;  %v2007_v47 = vadd.f32 %v2006_v3, %v1906_v52  ;;  %6486 = vmatmul.msk.f32.gmra.mxu1 %vm2052_vm4, %v2953_v58  ;;  %v1810_v60 = vpop.f32.mrf.mxu0  ;;  %v1808_v20 = vadd.f32 %v9235_v62, %v1807_v2  ;;  %v2924_v52 = vld [vmem:[#allocation3 + $0xc8] sm:$0xff]  ;;  %v2958_v2 = vld [vmem:[#allocation3 + $0x1d8] sm:$0xff] }
 0x32f   : > { %v2294_v19 = vld [vmem:[#allocation4 + $0x9a] sm:$0xff]  ;;  %2126 = vst.msk [vmem:[#allocation3 + $0x320] sm:$0xff] %vm2052_vm4, %v9295_v28 }
 0x330   : > { %v2919_v29 = vld [vmem:[#allocation3 + $0xa0] sm:$0xff]  ;;  %2318 = vst.msk [vmem:[#allocation3 + $0x300] sm:$0xff] %vm2052_vm4, %v2294_v19  ;;  %v2046_v54 = vmax.f32 %v2007_v47, 0.0 }
 0x331   : > { %v9302_v57 = vld [vmem:[#allocation4 + $0x99] sm:$0xff]  ;;  %3195 = vmatmul.f32.gmra.mxu2 %v2919_v29  ;;  %v2012_v29 = vpop.f32.mrf.mxu2 }
 0x332   : > { %11797 = vst [vmem:[#allocation14_spill] sm:$0xff] %v9302_v57  ;;  %v2675_v53 = vld [vmem:[#allocation4 + $0xa0] sm:$0xff] }
 0x333   : > { %2508 = vst.msk [vmem:[#allocation3 + $0x2b8] sm:$0xff] %vm2052_vm4, %v9302_v57  ;;  %v9310_v22 = vld [vmem:[#allocation4 + $0xa2] sm:$0xff]  ;;  %v1908_v3 = vpop.f32.mrf.mxu1 }
 0x334   : > { %2699 = vst.msk [vmem:[#allocation3 + $0x298] sm:$0xff] %vm2052_vm4, %v2675_v53  ;;  %v2150_v33 = vld [vmem:[#allocation4 + $0xa1] sm:$0xff]  ;;  %v1909_v19 = vadd.f32 %v1908_v3, %v1808_v20 }
 0x335   : > { %v9312_v42 = vld [vmem:[#allocation4 + $0xa8] sm:$0xff]  ;;  %2891 = vst.msk [vmem:[#allocation3 + $0x2a0] sm:$0xff] %vm2052_vm4, %v9310_v22  ;;  %2218 = vrot.lane.b32.xlu2 %v2150_v33, %s7676_s16  ;;  %v2191_v47 = vpop.permute.xlu0 %2190 }
 0x336   : > { %2075 = vst.msk [vmem:[#allocation4 + $0xb0] sm:$0xff] %vm2052_vm4, %v2046_v54  ;;  %v9321_v53 = vld [vmem:[#allocation4 + $0xa1] sm:$0xff]  ;;  %v2010_v57 = vadd.f32 %v2009_v61, %v1909_v19  ;;  %6487 = vmatmul.msk.f32.gmra.mxu1 %vm2052_vm4, %v2958_v2  ;;  %v1811_v54 = vadd.f32 %v9235_v62, %v1810_v60  ;;  %v1813_v61 = vpop.f32.mrf.mxu0  ;;  %v7678_v2 = vmov 0.0  }
 0x337   : > { %2127 = vst.msk [vmem:[#allocation3 + $0x348] sm:$0xff] %vm2052_vm4, %v9312_v42  ;;  %v2676_v58 = vld [vmem:[#allocation4 + $0xa8] sm:$0xff] }
 0x338   : > { %11798 = vst [vmem:[#allocation15_spill] sm:$0xff] %v9321_v53  ;;  %v2047_v33 = vmax.f32 %v2010_v57, 0.0 }
 0x339   : > { %2257 = vst.msk [vmem:[#allocation3 + $0xf0] sm:$0xff] %vm2250_vm5, %v2191_v47  ;;  %3198 = vmatmul.f32.gmra.mxu2 %v2924_v52 }
 0x33a   : > { %2319 = vst.msk [vmem:[#allocation3 + $0x328] sm:$0xff] %vm2052_vm4, %v9310_v22 }
 0x33b   : > { %2509 = vst.msk [vmem:[#allocation3 + $0x2e0] sm:$0xff] %vm2052_vm4, %v9321_v53  ;;  %v1911_v19 = vpop.f32.mrf.mxu1  ;;  %v2963_v53 = vld [vmem:[#allocation3 + $0x200] sm:$0xff] }
 0x33c   : > { %2700 = vst.msk [vmem:[#allocation3 + $0x2c0] sm:$0xff] %vm2052_vm4, %v2676_v58  ;;  %v1912_v52 = vadd.f32 %v1911_v19, %v1811_v54  ;;  %v2015_v54 = vpop.f32.mrf.mxu2 }
 0x33d   : > { %v9331_v20 = vld [vmem:[#allocation4 + $0xaa] sm:$0xff]  ;;  %2076 = vst.msk [vmem:[#allocation4 + $0xb8] sm:$0xff] %vm2052_vm4, %v2047_v33 }
 0x33e   : > { %v2151_v3 = vld [vmem:[#allocation4 + $0xa9] sm:$0xff]  ;;  %2892 = vst.msk [vmem:[#allocation3 + $0x2c8] sm:$0xff] %vm2052_vm4, %v9331_v20  ;;  %v2193_v58 = vpop.permute.xlu1 %2192  ;;  %v2013_v14 = vadd.f32 %v2012_v29, %v1912_v52  ;;  %6488 = vmatmul.msk.f32.gmra.mxu1 %vm2052_vm4, %v2963_v53  ;;  %v1814_v29 = vadd.f32 %v9235_v62, %v1813_v61 }
 0x33f   : > { %v9334_v47 = vld [vmem:[#allocation4 + $0xb0] sm:$0xff]  ;;  %2220 = vrot.lane.b32.xlu0 %v2151_v3, %s7676_s16  ;;  %2081 = vst.msk [vmem:[#allocation4 + $0xe0] sm:$0xff] %vm2052_vm4, %v7678_v2 }
 0x340   : > { %v2929_v57 = vld [vmem:[#allocation3 + $0xf0] sm:$0xff]  ;;  %2128 = vst.msk [vmem:[#allocation3 + $0x370] sm:$0xff] %vm2052_vm4, %v9334_v47  ;;  %v2048_v19 = vmax.f32 %v2013_v14, 0.0 }
 0x341   : > { %v2296_v60 = vld [vmem:[#allocation4 + $0xaa] sm:$0xff]  ;;  %3201 = vmatmul.f32.gmra.mxu2 %v2929_v57  ;;  %2258 = vst.msk [vmem:[#allocation3 + $0x118] sm:$0xff] %vm2250_vm5, %v2193_v58  ;;  %v1816_v58 = vpop.f32.mrf.mxu0 }
 0x342   : > { %v9342_v33 = vld [vmem:[#allocation4 + $0xa9] sm:$0xff]  ;;  %2320 = vst.msk [vmem:[#allocation3 + $0x350] sm:$0xff] %vm2052_vm4, %v2296_v60 }
 0x343   : > { %11799 = vst [vmem:[#allocation16_spill] sm:$0xff] %v9342_v33  ;;  %v2677_v3 = vld [vmem:[#allocation4 + $0xb0] sm:$0xff]  ;;  %v1914_v53 = vpop.f32.mrf.mxu1 }
 0x344   : > { %2510 = vst.msk [vmem:[#allocation3 + $0x308] sm:$0xff] %vm2052_vm4, %v9342_v33  ;;  %v9349_v57 = vld [vmem:[#allocation4 + $0xb2] sm:$0xff]  ;;  %v1915_v52 = vadd.f32 %v1914_v53, %v1814_v29  ;;  %v2968_v33 = vld [vmem:[#allocation3 + $0x228] sm:$0xff]  ;;  %v1817_v29 = vadd.f32 %v9235_v62, %v1816_v58 }
 0x345   : > { %v9351_v2 = vld [vmem:[#allocation4 + $0xb1] sm:$0xff]  ;;  %2701 = vst.msk [vmem:[#allocation3 + $0x2e8] sm:$0xff] %vm2052_vm4, %v2677_v3 }
 0x346   : > { %11800 = vst [vmem:[#allocation17_spill] sm:$0xff] %v9351_v2  ;;  %v9353_v8 = vld [vmem:[#allocation4 + $0xb8] sm:$0xff]  ;;  %2222 = vrot.lane.b32.xlu1 %v9351_v2, %s7676_s16  ;;  %v2201_v61 = vpop.permute.xlu2 %2200  ;;  %v2016_v2 = vadd.f32 %v2015_v54, %v1915_v52  ;;  %6489 = vmatmul.msk.f32.gmra.mxu1 %vm2052_vm4, %v2968_v33  ;;  %v2973_v58 = vld [vmem:[#allocation3 + $0x250] sm:$0xff] }
 0x347   : > { %2893 = vst.msk [vmem:[#allocation3 + $0x2f0] sm:$0xff] %vm2052_vm4, %v9349_v57  ;;  %v2297_v14 = vld [vmem:[#allocation4 + $0xb2] sm:$0xff]  ;;  %2371 = vrot.lane.b32.xlu0 %v8827_v59, %s7676_s16 }
 0x348   : > { %2077 = vst.msk [vmem:[#allocation4 + $0xc0] sm:$0xff] %vm2052_vm4, %v2048_v19  ;;  %v2487_v60 = vld [vmem:[#allocation4 + $0xb1] sm:$0xff]  ;;  %v2049_v59 = vmax.f32 %v2016_v2, 0.0  ;;  %v2018_v19 = vpop.f32.mrf.mxu2 }
 0x349   : > { %2129 = vst.msk [vmem:[#allocation3 + $0x398] sm:$0xff] %vm2052_vm4, %v9353_v8  ;;  %v2934_v3 = vld [vmem:[#allocation3 + $0x118] sm:$0xff] }
 0x34a   : > { %2321 = vst.msk [vmem:[#allocation3 + $0x378] sm:$0xff] %vm2052_vm4, %v2297_v14  ;;  %v2678_v31 = vld [vmem:[#allocation4 + $0xb8] sm:$0xff]  ;;  %3204 = vmatmul.f32.gmra.mxu2 %v2934_v3 }
 0x34b   : > { %2262 = vst.msk [vmem:[#allocation3 + $0x1b8] sm:$0xff] %vm2250_vm5, %v2201_v61  ;;  %v1819_v61 = vpop.f32.mrf.mxu0 }
 0x34c   : > { %2511 = vst.msk [vmem:[#allocation3 + $0x330] sm:$0xff] %vm2052_vm4, %v2487_v60  ;;  %v2939_v60 = vld [vmem:[#allocation3 + $0x140] sm:$0xff] }
 0x34d   : > { %2702 = vst.msk [vmem:[#allocation3 + $0x310] sm:$0xff] %vm2052_vm4, %v2678_v31  ;;  %v1917_v31 = vpop.f32.mrf.mxu1 }
 0x34e   : > { %2078 = vst.msk [vmem:[#allocation4 + $0xc8] sm:$0xff] %vm2052_vm4, %v2049_v59  ;;  %2373 = vrot.lane.b32.xlu1 %v8845_v12, %s7676_s16  ;;  %v1918_v54 = vadd.f32 %v1917_v31, %v1817_v29  ;;  %v2197_v52 = vpop.permute.xlu0 %2196  ;;  %6490 = vmatmul.msk.f32.gmra.mxu1 %vm2052_vm4, %v2973_v58  ;;  %v1820_v29 = vadd.f32 %v9235_v62, %v1819_v61 }
 0x34f   : > { %v9372_v53 = vld [vmem:[#allocation4 + $0xba] sm:$0xff]  ;;  %2377 = vrot.lane.b32.xlu0 %v8900_v39, %s7676_s16  ;;  %2260 = vst.msk [vmem:[#allocation3 + $0x168] sm:$0xff] %vm2250_vm5, %v2197_v52 }
 0x350   : > { %v9375_v14 = vld [vmem:[#allocation4 + $0xb9] sm:$0xff]  ;;  %2894 = vst.msk [vmem:[#allocation3 + $0x318] sm:$0xff] %vm2052_vm4, %v9372_v53  ;;  %v2019_v12 = vadd.f32 %v2018_v19, %v1918_v54  ;;  %v2021_v31 = vpop.f32.mrf.mxu2 }
 0x351   : > { %2224 = vrot.lane.b32.xlu2 %v9375_v14, %s7676_s16  ;;  %v2488_v33 = vld [vmem:[#allocation4 + $0xb9] sm:$0xff]  ;;  %2322 = vst.msk [vmem:[#allocation3 + $0x3a0] sm:$0xff] %vm2052_vm4, %v9372_v53 }
 0x352   : > { %v2679_v2 = vld [vmem:[#allocation4 + $0xc0] sm:$0xff]  ;;  %2512 = vst.msk [vmem:[#allocation3 + $0x358] sm:$0xff] %vm2052_vm4, %v2488_v33  ;;  %3207 = vmatmul.f32.gmra.mxu2 %v2939_v60  ;;  %v2050_v39 = vmax.f32 %v2019_v12, 0.0 }
 0x353   : > { %2703 = vst.msk [vmem:[#allocation3 + $0x338] sm:$0xff] %vm2052_vm4, %v2679_v2 }
 0x354   : > { %2079 = vst.msk [vmem:[#allocation4 + $0xd0] sm:$0xff] %vm2052_vm4, %v2050_v39 }
 0x355   : > { %v9391_v3 = vld [vmem:[#allocation4 + $0xc2] sm:$0xff]  ;;  %v1920_v19 = vpop.f32.mrf.mxu1  ;;  %v2199_v2 = vpop.permute.xlu1 %2198 }
 0x356   : > { %v9393_v59 = vld [vmem:[#allocation4 + $0xc1] sm:$0xff]  ;;  %2895 = vst.msk [vmem:[#allocation3 + $0x340] sm:$0xff] %vm2052_vm4, %v9391_v3  ;;  %2379 = vrot.lane.b32.xlu1 %v8935_v34, %s7676_s16  ;;  %v1921_v54 = vadd.f32 %v1920_v19, %v1820_v29  ;;  %v2978_v34 = vld [vmem:[#allocation3 + $0x278] sm:$0xff] }
 0x357   : > { %2383 = vrot.lane.b32.xlu0 %v8985_v9, %s7676_s16  ;;  %v2680_v33 = vld [vmem:[#allocation4 + $0xc8] sm:$0xff]  ;;  %2513 = vst.msk [vmem:[#allocation3 + $0x380] sm:$0xff] %vm2052_vm4, %v9393_v59  ;;  %6491 = vmatmul.msk.f32.gmra.mxu1 %vm2052_vm4, %v2978_v34  ;;  %v2954_v19 = vld [vmem:[#allocation3 + $0x1b8] sm:$0xff] }
 0x358   : > { %2261 = vst.msk [vmem:[#allocation3 + $0x190] sm:$0xff] %vm2250_vm5, %v2199_v2  ;;  %v2944_v62 = vld [vmem:[#allocation3 + $0x168] sm:$0xff]  ;;  %v2022_v52 = vadd.f32 %v2021_v31, %v1921_v54 }
 0x359   : > { %2375 = vrot.lane.b32.xlu2 %v8867_v44, %s7676_s16  ;;  %3210 = vmatmul.f32.vlgmr.msra.gmra.mxu3 %v2944_v62  ;;  %2704 = vst.msk [vmem:[#allocation3 + $0x360] sm:$0xff] %vm2052_vm4, %v2680_v33  ;;  %v2988_v31 = vld [vmem:[#allocation3 + $0x2c8] sm:$0xff]  ;;  %v2345_v33 = vld [vmem:[#allocation4 + $0xc0] sm:$0xff]  ;;  %v3050_v62 = vld [vmem:[%s11742_s3 + $0xf8] sm:$0xff] }
 0x35a   : > { %v2051_v44 = vmax.f32 %v2022_v52, 0.0  ;;  %v2346_v54 = vld [vmem:[#allocation4 + $0xc8] sm:$0xff]  ;;  %3256 = vmatpush.msrb.mxu3 %v3050_v62  ;;  %v3047_v52 = vld [vmem:[%s11742_s3 + $0xe0] sm:$0xff] }
 0x35b   : > { %v9410_v9 = vld [vmem:[#allocation4 + $0xca] sm:$0xff] }
 0x35c   : > { %2080 = vst.msk [vmem:[#allocation4 + $0xd8] sm:$0xff] %vm2052_vm4, %v2051_v44  ;;  %v9415_v60 = vld [vmem:[#allocation4 + $0xc9] sm:$0xff] }
 0x35d   : > { %2896 = vst.msk [vmem:[#allocation3 + $0x368] sm:$0xff] %vm2052_vm4, %v9410_v9  ;;  %v2681_v58 = vld [vmem:[#allocation4 + $0xd0] sm:$0xff]  ;;  %v2207_v12 = vpop.permute.xlu2 %2206 }
 0x35e   : > { %2385 = vrot.lane.b32.xlu1 %v9013_v49, %s7676_s16  ;;  %2514 = vst.msk [vmem:[#allocation3 + $0x3a8] sm:$0xff] %vm2052_vm4, %v9415_v60  ;;  %v2983_v49 = vld [vmem:[#allocation3 + $0x2a0] sm:$0xff] }
 0x35f   : > { %2389 = vrot.lane.b32.xlu0 %v9087_v38, %s7676_s16  ;;  %v2949_v61 = vld [vmem:[#allocation3 + $0x190] sm:$0xff]  ;;  %2265 = vst.msk [vmem:[#allocation3 + $0x230] sm:$0xff] %vm2250_vm5, %v2207_v12  ;;  %6492 = vmatmul.msk.f32.gmra.mxu1 %vm2052_vm4, %v2983_v49  ;;  %v3044_v12 = vld [vmem:[%s11742_s3 + $0xc8] sm:$0xff] }
 0x360   : > { %2705 = vst.msk [vmem:[#allocation3 + $0x388] sm:$0xff] %vm2052_vm4, %v2681_v58 }
 0x361   : > { %2381 = vrot.lane.b32.xlu2 %v8959_v50, %s7676_s16  ;;  %3213 = vmatmul.f32.gmra.mxu3 %v2949_v61 }
 0x363   : > { %v2873_v39 = vld [vmem:[#allocation4 + $0xd2] sm:$0xff]  ;;  %v2874_v29 = vld [vmem:[#allocation4 + $0xda] sm:$0xff] }
 0x364   : > { %2897 = vst.msk [vmem:[#allocation3 + $0x390] sm:$0xff] %vm2052_vm4, %v2873_v39  ;;  %v2682_v50 = vld [vmem:[#allocation4 + $0xd8] sm:$0xff] }
 0x365   : > { %2898 = vst.msk [vmem:[#allocation3 + $0x3b8] sm:$0xff] %vm2052_vm4, %v2874_v29  ;;  %v2203_v38 = vpop.permute.xlu0 %2202 }
 0x366   : > { %2391 = vrot.lane.b32.xlu1 %v9119_v10, %s7676_s16  ;;  %2706 = vst.msk [vmem:[#allocation3 + $0x3b0] sm:$0xff] %vm2052_vm4, %v2682_v50 }
 0x367   : > { %2395 = vrot.lane.b32.xlu0 %v9171_v23, %s7676_s16  ;;  %2263 = vst.msk [vmem:[#allocation3 + $0x1e0] sm:$0xff] %vm2250_vm5, %v2203_v38  ;;  %6493 = vmatmul.msk.f32.gmra.mxu1 %vm2052_vm4, %v2988_v31  ;;  %v2993_v23 = vld [vmem:[#allocation3 + $0x2f0] sm:$0xff] }
 0x369   : > { %2387 = vrot.lane.b32.xlu2 %v9057_v48, %s7676_s16  ;;  %3216 = vmatmul.f32.gmra.mxu3 %v2954_v19  ;;  %v3035_v19 = vld [vmem:[%s11742_s3 + $0x80] sm:$0xff] }
 0x36c   : > { %v3018_v58 = vld [vmem:[#allocation3 + $0x3b8] sm:$0xff] }
 0x36e   : > { %2397 = vrot.lane.b32.xlu1 %v9189_v0, %s7676_s16  ;;  %v2959_v48 = vld [vmem:[#allocation3 + $0x1e0] sm:$0xff]  ;;  %v2205_v10 = vpop.permute.xlu1 %2204 }
 0x36f   : > { %2401 = vrot.lane.b32.xlu0 %v9230_v11, %s7676_s16  ;;  %2264 = vst.msk [vmem:[#allocation3 + $0x208] sm:$0xff] %vm2250_vm5, %v2205_v10  ;;  %6494 = vmatmul.msk.f32.gmra.mxu1 %vm2052_vm4, %v2993_v23  ;;  %v2998_v11 = vld [vmem:[#allocation3 + $0x318] sm:$0xff] }
 0x371   : > { %2393 = vrot.lane.b32.xlu2 %v9146_v27, %s7676_s16  ;;  %3219 = vmatmul.f32.gmra.mxu3 %v2959_v48 }
 0x376   : > { %2403 = vrot.lane.b32.xlu1 %v9256_v51, %s7676_s16  ;;  %v2964_v0 = vld [vmem:[#allocation3 + $0x208] sm:$0xff]  ;;  %v2969_v51 = vld [vmem:[#allocation3 + $0x230] sm:$0xff] }
 0x377   : > { %2407 = vrot.lane.b32.xlu0 %v9295_v28, %s7676_s16  ;;  %6495 = vmatmul.msk.f32.gmra.mxu1 %vm2052_vm4, %v2998_v11  ;;  %v3003_v28 = vld [vmem:[#allocation3 + $0x340] sm:$0xff] }
 0x378   : > { %v2213_v27 = vpop.permute.xlu2 %2212 }
 0x379   : > { %2399 = vrot.lane.b32.xlu2 %v9212_v55, %s7676_s16  ;;  %2268 = vst.msk [vmem:[#allocation3 + $0x2a8] sm:$0xff] %vm2250_vm5, %v2213_v27  ;;  %3222 = vmatmul.f32.gmra.mxu3 %v2964_v0  ;;  %v3064_v0 = vld [vmem:[%s11742_s3 + $0x168] sm:$0xff] }
 0x37e   : > { %2409 = vrot.lane.b32.xlu1 %v9312_v42, %s7676_s16 }
 0x37f   : > { %2413 = vrot.lane.b32.xlu0 %v9353_v8, %s7676_s16  ;;  %v2209_v55 = vpop.permute.xlu0 %2208  ;;  %6496 = vmatmul.msk.f32.gmra.mxu1 %vm2052_vm4, %v3003_v28  ;;  %v3061_v28 = vld [vmem:[%s11742_s3 + $0x150] sm:$0xff] }
 0x380   : > { %2266 = vst.msk [vmem:[#allocation3 + $0x258] sm:$0xff] %vm2250_vm5, %v2209_v55  ;;  %v2984_v44 = vld [vmem:[#allocation3 + $0x2a8] sm:$0xff] }
 0x381   : > { %2405 = vrot.lane.b32.xlu2 %v9274_v56, %s7676_s16  ;;  %3225 = vmatmul.f32.gmra.mxu3 %v2969_v51  ;;  %v3008_v56 = vld [vmem:[#allocation3 + $0x368] sm:$0xff]  ;;  %v3063_v51 = vld [vmem:[%s11742_s3 + $0x160] sm:$0xff] }
 0x386   : > { %2415 = vrot.lane.b32.xlu1 %v2345_v33, %s7676_s16  ;;  %v2211_v42 = vpop.permute.xlu1 %2210  ;;  %v3060_v33 = vld [vmem:[%s11742_s3 + $0x148] sm:$0xff] }
 0x387   : > { %2563 = vrot.lane.b32.xlu0 %v8852_v7, %s7676_s16  ;;  %2267 = vst.msk [vmem:[#allocation3 + $0x280] sm:$0xff] %vm2250_vm5, %v2211_v42  ;;  %v2974_v8 = vld [vmem:[#allocation3 + $0x258] sm:$0xff]  ;;  %6497 = vmatmul.msk.f32.gmra.mxu1 %vm2052_vm4, %v3008_v56  ;;  %v3013_v7 = vld [vmem:[#allocation3 + $0x390] sm:$0xff]  ;;  %v3059_v56 = vld [vmem:[%s11742_s3 + $0x140] sm:$0xff] }
 0x389   : > { %2411 = vrot.lane.b32.xlu2 %v9334_v47, %s7676_s16  ;;  %3228 = vmatmul.f32.gmra.mxu3 %v2974_v8 }
 0x38e   : > { %2565 = vrot.lane.b32.xlu1 %v8874_v43, %s7676_s16  ;;  %v2979_v2 = vld [vmem:[#allocation3 + $0x280] sm:$0xff]  ;;  %v3049_v43 = vld [vmem:[%s11742_s3 + $0xf0] sm:$0xff] }
 0x38f   : > { %2569 = vrot.lane.b32.xlu0 %v8942_v26, %s7676_s16  ;;  %v2219_v47 = vpop.permute.xlu2 %2218  ;;  %6498 = vmatmul.msk.f32.gmra.mxu1 %vm2052_vm4, %v3013_v7  ;;  %v3048_v26 = vld [vmem:[%s11742_s3 + $0xe8] sm:$0xff] }
 0x390   : > { %2271 = vst.msk [vmem:[#allocation3 + $0x320] sm:$0xff] %vm2250_vm5, %v2219_v47  ;;  %3257 = vmatpush.msrb.mxu3 %v3049_v43  ;;  %v3057_v47 = vld [vmem:[%s11742_s3 + $0x130] sm:$0xff]  ;;  %v3055_v43 = vld [vmem:[%s11742_s3 + $0x120] sm:$0xff] }
 0x391   : > { %2417 = vrot.lane.b32.xlu2 %v2346_v54, %s7676_s16  ;;  %3231 = vmatmul.f32.gmra.mxu3 %v2979_v2  ;;  %v3080_v54 = vld [vmem:[%s11742_s3 + $0x1e8] sm:$0xff] }
 0x392   : > { %3258 = vmatpush.msrb.mxu3 %v3048_v26  ;;  %v3056_v2 = vld [vmem:[%s11742_s3 + $0x128] sm:$0xff]  ;;  %v3053_v26 = vld [vmem:[%s11742_s3 + $0x110] sm:$0xff] }
 0x394   : > { %3259 = vmatpush.msrb.mxu3 %v3047_v52  ;;  %v11802_v52 = vld [vmem:[#allocation8_spill] sm:$0xff] }
 0x396   : > { %2571 = vrot.lane.b32.xlu1 %v8965_v1, %s7676_s16  ;;  %v3045_v1 = vld [vmem:[%s11742_s3 + $0xd0] sm:$0xff] }
 0x397   : > { %2575 = vrot.lane.b32.xlu0 %v9009_v46, %s7676_s16  ;;  %v2215_v34 = vpop.permute.xlu0 %2214  ;;  %6499 = vmatmul.msk.f32.gmra.mxu1 %vm2052_vm4, %v3018_v58  ;;  %v2999_v38 = vld [vmem:[#allocation3 + $0x320] sm:$0xff] }
 0x398   : > { %2269 = vst.msk [vmem:[#allocation3 + $0x2d0] sm:$0xff] %vm2250_vm5, %v2215_v34  ;;  %v11801_v34 = vld [vmem:[#allocation6_spill] sm:$0xff]  ;;  %v3079_v58 = vld [vmem:[%s11742_s3 + $0x1e0] sm:$0xff] }
 0x399   : > { %2567 = vrot.lane.b32.xlu2 %v8902_v40, %s7676_s16  ;;  %3234 = vmatmul.f32.gmra.mxu3 %v2984_v44  ;;  %v3046_v40 = vld [vmem:[%s11742_s3 + $0xd8] sm:$0xff]  ;;  %v3052_v44 = vld [vmem:[%s11742_s3 + $0x108] sm:$0xff] }
 0x39a   : > { %3260 = vmatpush.msrb.mxu3 %v3046_v40 }
 0x39c   : > { %3261 = vmatpush.msrb.mxu3 %v3045_v1 }
 0x39e   : > { %2577 = vrot.lane.b32.xlu1 %v9046_v15, %s7676_s16  ;;  %v3043_v15 = vld [vmem:[%s11742_s3 + $0xc0] sm:$0xff]  ;;  %3262 = vmatpush.msrb.mxu3 %v3044_v12 }
 0x39f   : > { %2581 = vrot.lane.b32.xlu0 %v9116_v30, %s7676_s16  ;;  %v2989_v46 = vld [vmem:[#allocation3 + $0x2d0] sm:$0xff] }
 0x3a0   : > { %v2217_v61 = vpop.permute.xlu1 %2216  ;;  %3263 = vmatpush.msrb.mxu3 %v3043_v15  ;;  %v3041_v30 = vld [vmem:[%s11742_s3 + $0xb0] sm:$0xff] }
 0x3a1   : > { %2573 = vrot.lane.b32.xlu2 %v8989_v25, %s7676_s16  ;;  %2270 = vst.msk [vmem:[#allocation3 + $0x2f8] sm:$0xff] %vm2250_vm5, %v2217_v61  ;;  %3237 = vmatmul.f32.gmra.mxu3 %v2989_v46  ;;  %v3042_v25 = vld [vmem:[%s11742_s3 + $0xb8] sm:$0xff]  ;;  %v3051_v46 = vld [vmem:[%s11742_s3 + $0x100] sm:$0xff]  ;;  %v11804_v15 = vld [vmem:[#allocation7_spill] sm:$0xff] }
 0x3a2   : > { %3264 = vmatpush.msrb.mxu3 %v3042_v25  ;;  %v11803_v61 = vld [vmem:[#allocation9_spill] sm:$0xff]  ;;  %v11805_v25 = vld [vmem:[#allocation11_spill] sm:$0xff] }
 0x3a4   : > { %3265 = vmatpush.msrb.mxu3 %v3041_v30 }
 0x3a6   : > { %2583 = vrot.lane.b32.xlu1 %v9144_v35, %s7676_s16  ;;  %v3040_v35 = vld [vmem:[%s11742_s3 + $0xa8] sm:$0xff] }
 0x3a7   : > { %2587 = vrot.lane.b32.xlu0 %v9187_v16, %s7676_s16  ;;  %3266 = vmatpush.msrb.mxu3 %v3040_v35  ;;  %v3038_v16 = vld [vmem:[%s11742_s3 + $0x98] sm:$0xff] }
 0x3a8   : > { %v2994_v39 = vld [vmem:[#allocation3 + $0x2f8] sm:$0xff] }
 0x3a9   : > { %2579 = vrot.lane.b32.xlu2 %v9077_v18, %s7676_s16  ;;  %3240 = vmatmul.f32.gmra.mxu3 %v2994_v39  ;;  %v3039_v18 = vld [vmem:[%s11742_s3 + $0xa0] sm:$0xff] }
 0x3aa   : > { %3267 = vmatpush.msrb.mxu3 %v3039_v18  ;;  %v11806_v18 = vld [vmem:[#allocation12_spill] sm:$0xff] }
 0x3ab   : > { %v2225_v49 = vpop.permute.xlu2 %2224 }
 0x3ac   : > { %2274 = vst.msk [vmem:[#allocation3 + $0x398] sm:$0xff] %vm2250_vm5, %v2225_v49  ;;  %3268 = vmatpush.msrb.mxu3 %v3038_v16  ;;  %v3078_v16 = vld [vmem:[%s11742_s3 + $0x1d8] sm:$0xff] }
 0x3ae   : > { %2589 = vrot.lane.b32.xlu1 %v9209_v24, %s7676_s16  ;;  %v3037_v24 = vld [vmem:[%s11742_s3 + $0x90] sm:$0xff] }
 0x3af   : > { %2593 = vrot.lane.b32.xlu0 %v9253_v32, %s7676_s16  ;;  %3269 = vmatpush.msrb.mxu3 %v3037_v24  ;;  %v3082_v32 = vld [vmem:[%s11742_s3 + $0x1f8] sm:$0xff] }
 0x3b0   : > { %3434 = vmatpush.msrb.mxu0 %v3082_v32 }
 0x3b1   : > { %2585 = vrot.lane.b32.xlu2 %v9168_v6, %s7676_s16  ;;  %v2221_v50 = vpop.permute.xlu0 %2220  ;;  %3243 = vmatmul.f32.gmra.mxu3 %v2999_v38  ;;  %v3036_v6 = vld [vmem:[%s11742_s3 + $0x88] sm:$0xff] }
 0x3b2   : > { %2272 = vst.msk [vmem:[#allocation3 + $0x348] sm:$0xff] %vm2250_vm5, %v2221_v50  ;;  %3270 = vmatpush.msrb.mxu3 %v3036_v6  ;;  %v11808_v50 = vld [vmem:[#allocation14_spill] sm:$0xff] }
 0x3b3   : > { %v2376_v29 = vpop.permute.xlu2 %2375 }
 0x3b4   : > { %2445 = vst.msk [vmem:[#allocation3 + $0x58] sm:$0xff] %vm2250_vm5, %v2376_v29  ;;  %3271 = vmatpush.msrb.mxu3 %v3035_v19  ;;  %v11807_v29 = vld [vmem:[#allocation10_spill] sm:$0xff] }
 0x3b6   : > { %2595 = vrot.lane.b32.xlu1 %v9272_v41, %s7676_s16 }
 0x3b7   : > { %2599 = vrot.lane.b32.xlu0 %v9310_v22, %s7676_s16 }
 0x3b8   : > { %v2223_v31 = vpop.permute.xlu1 %2222 }
 0x3b9   : > { %2591 = vrot.lane.b32.xlu2 %v9228_v37, %s7676_s16  ;;  %2273 = vst.msk [vmem:[#allocation3 + $0x370] sm:$0xff] %vm2250_vm5, %v2223_v31  ;;  %v2372_v41 = vpop.permute.xlu0 %2371  ;;  %v3004_v10 = vld [vmem:[#allocation3 + $0x348] sm:$0xff]  ;;  %v11809_v31 = vld [vmem:[#allocation15_spill] sm:$0xff] }
 0x3ba   : > { %2443 = vst.msk [vmem:[#allocation3 + $0x8] sm:$0xff] %vm2250_vm5, %v2372_v41  ;;  %3246 = vmatmul.f32.gmra.mxu3 %v3004_v10  ;;  %v11811_v41 = vld [vmem:[#allocation17_spill] sm:$0xff] }
 0x3bb   : > { %v2382_v48 = vpop.permute.xlu2 %2381  ;;  %v2910_v12 = vld [vmem:[#allocation3 + $0x58] sm:$0xff] }
 0x3bc   : > { %2448 = vst.msk [vmem:[#allocation3 + $0xd0] sm:$0xff] %vm2250_vm5, %v2382_v48  ;;  %v11810_v48 = vld [vmem:[#allocation13_spill] sm:$0xff] }
 0x3be   : > { %2601 = vrot.lane.b32.xlu1 %v9331_v20, %s7676_s16  ;;  %v3066_v20 = vld [vmem:[%s11742_s3 + $0x178] sm:$0xff] }
 0x3bf   : > { %2605 = vrot.lane.b32.xlu0 %v9372_v53, %s7676_s16  ;;  %3345 = vmatpush.msra.mxu2 %v3066_v20  ;;  %v3081_v53 = vld [vmem:[%s11742_s3 + $0x1f0] sm:$0xff]  ;;  %v11812_v20 = vld [vmem:[#allocation16_spill] sm:$0xff] }
 0x3c0   : > { %v2374_v37 = vpop.permute.xlu1 %2373  ;;  %v3009_v22 = vld [vmem:[#allocation3 + $0x370] sm:$0xff]  ;;  %3435 = vmatpush.msrb.mxu0 %v3081_v53 }
 0x3c1   : > { %2597 = vrot.lane.b32.xlu2 %v9292_v63, %s7676_s16  ;;  %2444 = vst.msk [vmem:[#allocation3 + $0x30] sm:$0xff] %vm2250_vm5, %v2374_v37  ;;  %v2378_v27 = vpop.permute.xlu0 %2377  ;;  %v3065_v63 = vld [vmem:[%s11742_s3 + $0x170] sm:$0xff] }
 0x3c2   : > { %2446 = vst.msk [vmem:[#allocation3 + $0x80] sm:$0xff] %vm2250_vm5, %v2378_v27  ;;  %3249 = vmatmul.f32.gmra.mxu3 %v3009_v22  ;;  %3346 = vmatpush.msra.mxu2 %v3065_v63  ;;  %v3077_v27 = vld [vmem:[%s11742_s3 + $0x1d0] sm:$0xff] }
 0x3c3   : > { %v2388_v23 = vpop.permute.xlu2 %2387  ;;  %3436 = vmatpush.msrb.mxu0 %v3080_v54 }
 0x3c4   : > { %2451 = vst.msk [vmem:[#allocation3 + $0x148] sm:$0xff] %vm2250_vm5, %v2388_v23  ;;  %3347 = vmatpush.msra.mxu2 %v3064_v0  ;;  %v2925_v23 = vld [vmem:[#allocation3 + $0xd0] sm:$0xff] }
 0x3c5   : > { %3437 = vmatpush.msrb.mxu0 %v3079_v58  ;;  %v3069_v58 = vld [vmem:[%s11742_s3 + $0x190] sm:$0xff] }
 0x3c6   : > { %2607 = vrot.lane.b32.xlu1 %v9391_v3, %s7676_s16  ;;  %3348 = vmatpush.msra.mxu2 %v3063_v51 }
 0x3c7   : > { %2755 = vrot.lane.b32.xlu0 %v8909_v45, %s7676_s16  ;;  %v3062_v45 = vld [vmem:[%s11742_s3 + $0x158] sm:$0xff]  ;;  %3438 = vmatpush.msrb.mxu0 %v3078_v16 }
 0x3c8   : > { %v2380_v11 = vpop.permute.xlu1 %2379  ;;  %3349 = vmatpush.msra.mxu2 %v3062_v45 }
 0x3c9   : > { %2603 = vrot.lane.b32.xlu2 %v9349_v57, %s7676_s16  ;;  %2447 = vst.msk [vmem:[#allocation3 + $0xa8] sm:$0xff] %vm2250_vm5, %v2380_v11  ;;  %v2384_v55 = vpop.permute.xlu0 %2383  ;;  %v3014_v57 = vld [vmem:[#allocation3 + $0x398] sm:$0xff]  ;;  %v2915_v35 = vld [vmem:[#allocation3 + $0x80] sm:$0xff]  ;;  %3439 = vmatpush.msrb.mxu0 %v3077_v27 }
 0x3ca   : > { %2449 = vst.msk [vmem:[#allocation3 + $0xf8] sm:$0xff] %vm2250_vm5, %v2384_v55  ;;  %3252 = vmatmul.f32.gmra.mxu3 %v3014_v57  ;;  %3350 = vmatpush.msra.mxu2 %v3061_v28  ;;  %v2729_v55 = vld [vmem:[#allocation4 + $0xd1] sm:$0xff] }
 0x3cb   : > { %v2394_v3 = vpop.permute.xlu2 %2393 }
 0x3cc   : > { %2454 = vst.msk [vmem:[#allocation3 + $0x1c0] sm:$0xff] %vm2250_vm5, %v2394_v3  ;;  %3351 = vmatpush.msra.mxu2 %v3060_v33 }
 0x3ce   : > { %2757 = vrot.lane.b32.xlu1 %v8944_v13, %s7676_s16  ;;  %3352 = vmatpush.msra.mxu2 %v3059_v56 }
 0x3cf   : > { %2761 = vrot.lane.b32.xlu0 %v8991_v17, %s7676_s16  ;;  %v3058_v17 = vld [vmem:[%s11742_s3 + $0x138] sm:$0xff] }
 0x3d0   : > { %v2386_v42 = vpop.permute.xlu1 %2385  ;;  %3353 = vmatpush.msra.mxu2 %v3058_v17  ;;  %v2920_v32 = vld [vmem:[#allocation3 + $0xa8] sm:$0xff] }
 0x3d1   : > { %2609 = vrot.lane.b32.xlu2 %v9410_v9, %s7676_s16  ;;  %2450 = vst.msk [vmem:[#allocation3 + $0x120] sm:$0xff] %vm2250_vm5, %v2386_v42  ;;  %v2390_v13 = vpop.permute.xlu0 %2389  ;;  %v2900_v9 = vld [vmem:[#allocation3 + $0x8] sm:$0xff] }
 0x3d2   : > { %2452 = vst.msk [vmem:[#allocation3 + $0x170] sm:$0xff] %vm2250_vm5, %v2390_v13  ;;  %3272 = vmatmul.f32.vlgmr.msrb.gmra.mxu3 %v2900_v9  ;;  %3354 = vmatpush.msra.mxu2 %v3057_v47  ;;  %v3076_v42 = vld [vmem:[%s11742_s3 + $0x1c8] sm:$0xff]  ;;  %v3074_v47 = vld [vmem:[%s11742_s3 + $0x1b8] sm:$0xff] }
 0x3d3   : > { %v2400_v8 = vpop.permute.xlu2 %2399  ;;  %3440 = vmatpush.msrb.mxu0 %v3076_v42  ;;  %v2940_v17 = vld [vmem:[#allocation3 + $0x148] sm:$0xff] }
 0x3d4   : > { %2457 = vst.msk [vmem:[#allocation3 + $0x238] sm:$0xff] %vm2250_vm5, %v2400_v8  ;;  %3355 = vmatpush.msra.mxu2 %v3056_v2  ;;  %v3075_v8 = vld [vmem:[%s11742_s3 + $0x1c0] sm:$0xff] }
 0x3d5   : > { %3441 = vmatpush.msrb.mxu0 %v3075_v8 }
 0x3d6   : > { %2763 = vrot.lane.b32.xlu1 %v9024_v4, %s7676_s16  ;;  %3356 = vmatpush.msra.mxu2 %v3055_v43 }
 0x3d7   : > { %2767 = vrot.lane.b32.xlu0 %v9093_v5, %s7676_s16  ;;  %v3054_v5 = vld [vmem:[%s11742_s3 + $0x118] sm:$0xff]  ;;  %3442 = vmatpush.msrb.mxu0 %v3074_v47 }
 0x3d8   : > { %v2392_v7 = vpop.permute.xlu1 %2391  ;;  %3357 = vmatpush.msra.mxu2 %v3054_v5  ;;  %v2935_v33 = vld [vmem:[#allocation3 + $0x120] sm:$0xff] }
 0x3d9   : > { %2759 = vrot.lane.b32.xlu2 %v8970_v36, %s7676_s16  ;;  %2453 = vst.msk [vmem:[#allocation3 + $0x198] sm:$0xff] %vm2250_vm5, %v2392_v7  ;;  %v2396_v4 = vpop.permute.xlu0 %2395  ;;  %v2905_v36 = vld [vmem:[#allocation3 + $0x30] sm:$0xff]  ;;  %v3071_v5 = vld [vmem:[%s11742_s3 + $0x1a0] sm:$0xff] }
 0x3da   : > { %2455 = vst.msk [vmem:[#allocation3 + $0x1e8] sm:$0xff] %vm2250_vm5, %v2396_v4  ;;  %3275 = vmatmul.f32.gmra.mxu3 %v2905_v36  ;;  %3358 = vmatpush.msra.mxu2 %v3053_v26  ;;  %v3073_v7 = vld [vmem:[%s11742_s3 + $0x1b0] sm:$0xff] }
 0x3db   : > { %v2406_v62 = vpop.permute.xlu2 %2405  ;;  %3443 = vmatpush.msrb.mxu0 %v3073_v7  ;;  %v2945_v26 = vld [vmem:[#allocation3 + $0x170] sm:$0xff] }
 0x3dc   : > { %2460 = vst.msk [vmem:[#allocation3 + $0x2b0] sm:$0xff] %vm2250_vm5, %v2406_v62  ;;  %3359 = vmatpush.msra.mxu2 %v3052_v44  ;;  %v9690_v19 = vpop.f32.mrf.mxu3  ;;  %v3072_v62 = vld [vmem:[%s11742_s3 + $0x1a8] sm:$0xff] }
 0x3dd   : > { %3444 = vmatpush.msrb.mxu0 %v3072_v62 }
 0x3de   : > { %2769 = vrot.lane.b32.xlu1 %v9129_v21, %s7676_s16  ;;  %3360 = vmatpush.msra.mxu2 %v3051_v46 }
 0x3df   : > { %2773 = vrot.lane.b32.xlu0 %v11802_v52, %s7676_s16  ;;  %v3070_v52 = vld [vmem:[%s11742_s3 + $0x198] sm:$0xff]  ;;  %3445 = vmatpush.msrb.mxu0 %v3071_v5 }
 0x3e0   : > { %v2398_v21 = vpop.permute.xlu1 %2397 }
 0x3e1   : > { %2765 = vrot.lane.b32.xlu2 %v11801_v34, %s7676_s16  ;;  %2456 = vst.msk [vmem:[#allocation3 + $0x210] sm:$0xff] %vm2250_vm5, %v2398_v21  ;;  %v2402_v1 = vpop.permute.xlu0 %2401  ;;  %3446 = vmatpush.msrb.mxu0 %v3070_v52  ;;  %v3068_v21 = vld [vmem:[%s11742_s3 + $0x188] sm:$0xff] }
 0x3e2   : > { %2458 = vst.msk [vmem:[#allocation3 + $0x260] sm:$0xff] %vm2250_vm5, %v2402_v1  ;;  %3278 = vmatmul.f32.gmra.mxu3 %v2910_v12  ;;  %v3067_v12 = vld [vmem:[%s11742_s3 + $0x180] sm:$0xff] }
 0x3e3   : > { %v2412_v40 = vpop.permute.xlu2 %2411  ;;  %3447 = vmatpush.msrb.mxu0 %v3069_v58 }
 0x3e4   : > { %2463 = vst.msk [vmem:[#allocation3 + $0x328] sm:$0xff] %vm2250_vm5, %v2412_v40  ;;  %v9710_v63 = vpop.f32.mrf.mxu3 }
 0x3e5   : > { %3448 = vmatpush.msrb.mxu0 %v3068_v21 }
 0x3e6   : > { %2775 = vrot.lane.b32.xlu1 %v11803_v61, %s7676_s16  ;;  %v2950_v61 = vld [vmem:[#allocation3 + $0x198] sm:$0xff] }
 0x3e7   : > { %2779 = vrot.lane.b32.xlu0 %v11805_v25, %s7676_s16  ;;  %3449 = vmatpush.msrb.mxu0 %v3067_v12 }
 0x3e8   : > { %v2404_v30 = vpop.permute.xlu1 %2403 }
 0x3e9   : > { %2771 = vrot.lane.b32.xlu2 %v11804_v15, %s7676_s16  ;;  %2459 = vst.msk [vmem:[#allocation3 + $0x288] sm:$0xff] %vm2250_vm5, %v2404_v30  ;;  %v2408_v39 = vpop.permute.xlu0 %2407 }
 0x3ea   : > { %2461 = vst.msk [vmem:[#allocation3 + $0x2d8] sm:$0xff] %vm2250_vm5, %v2408_v39  ;;  %3281 = vmatmul.f32.gmra.mxu3 %v2915_v35  ;;  %v2955_v35 = vld [vmem:[#allocation3 + $0x1c0] sm:$0xff] }
 0x3eb   : > { %v2418_v49 = vpop.permute.xlu2 %2417 }
 0x3ec   : > { %2466 = vst.msk [vmem:[#allocation3 + $0x3a0] sm:$0xff] %vm2250_vm5, %v2418_v49  ;;  %v9719_v28 = vpop.f32.mrf.mxu3 }
 0x3ee   : > { %2781 = vrot.lane.b32.xlu1 %v11806_v18, %s7676_s16 }
 0x3ef   : > { %2785 = vrot.lane.b32.xlu0 %v11808_v50, %s7676_s16 }
 0x3f0   : > { %v2410_v38 = vpop.permute.xlu1 %2409 }
 0x3f1   : > { %2777 = vrot.lane.b32.xlu2 %v11807_v29, %s7676_s16  ;;  %2462 = vst.msk [vmem:[#allocation3 + $0x300] sm:$0xff] %vm2250_vm5, %v2410_v38  ;;  %v2414_v6 = vpop.permute.xlu0 %2413 }
 0x3f2   : > { %2464 = vst.msk [vmem:[#allocation3 + $0x350] sm:$0xff] %vm2250_vm5, %v2414_v6  ;;  %3284 = vmatmul.f32.gmra.mxu3 %v2920_v32  ;;  %v9777_v32 = vpop.f32.mrf.mxu2 }
 0x3f3   : > { %v2568_v24 = vpop.permute.xlu2 %2567 }
 0x3f4   : > { %2637 = vst.msk [vmem:[#allocation3 + $0x60] sm:$0xff] %vm2250_vm5, %v2568_v24  ;;  %v9736_v2 = vpop.f32.mrf.mxu3  ;;  %v2960_v24 = vld [vmem:[#allocation3 + $0x1e8] sm:$0xff] }
 0x3f6   : > { %2787 = vrot.lane.b32.xlu1 %v11809_v31, %s7676_s16 }
 0x3f7   : > { %2791 = vrot.lane.b32.xlu0 %v11811_v41, %s7676_s16 }
 0x3f8   : > { %v2416_v10 = vpop.permute.xlu1 %2415 }
 0x3f9   : > { %2783 = vrot.lane.b32.xlu2 %v11810_v48, %s7676_s16  ;;  %2465 = vst.msk [vmem:[#allocation3 + $0x378] sm:$0xff] %vm2250_vm5, %v2416_v10  ;;  %v2564_v22 = vpop.permute.xlu0 %2563  ;;  %v2965_v10 = vld [vmem:[#allocation3 + $0x210] sm:$0xff] }
 0x3fa   : > { %2635 = vst.msk [vmem:[#allocation3 + $0x10] sm:$0xff] %vm2250_vm5, %v2564_v22  ;;  %3287 = vmatmul.f32.gmra.mxu3 %v2925_v23  ;;  %v9784_v23 = vpop.f32.mrf.mxu2 }
 0x3fb   : > { %v2574_v37 = vpop.permute.xlu2 %2573  ;;  %v2911_v54 = vld [vmem:[#allocation3 + $0x60] sm:$0xff] }
 0x3fc   : > { %2640 = vst.msk [vmem:[#allocation3 + $0xd8] sm:$0xff] %vm2250_vm5, %v2574_v37  ;;  %v9753_v44 = vpop.f32.mrf.mxu3 }
 0x3fe   : > { %2793 = vrot.lane.b32.xlu1 %v9375_v14, %s7676_s16  ;;  %v2930_v14 = vld [vmem:[#allocation3 + $0xf8] sm:$0xff] }
 0x3ff   : > { %2797 = vrot.lane.b32.xlu0 %v9415_v60, %s7676_s16 }
 0x400   : > { %v2566_v53 = vpop.permute.xlu1 %2565 }
 0x401   : > { %2789 = vrot.lane.b32.xlu2 %v11812_v20, %s7676_s16  ;;  %2636 = vst.msk [vmem:[#allocation3 + $0x38] sm:$0xff] %vm2250_vm5, %v2566_v53  ;;  %v2570_v11 = vpop.permute.xlu0 %2569  ;;  %v2901_v3 = vld [vmem:[#allocation3 + $0x10] sm:$0xff] }
 0x402   : > { %2638 = vst.msk [vmem:[#allocation3 + $0x88] sm:$0xff] %vm2250_vm5, %v2570_v11  ;;  %3290 = vmatmul.f32.gmra.mxu3 %v2930_v14  ;;  %3361 = vmatmul.f32.vlgmr.msra.gmra.mxu2 %v2901_v3 }
 0x403   : > { %v2580_v0 = vpop.permute.xlu2 %2579  ;;  %v2926_v18 = vld [vmem:[#allocation3 + $0xd8] sm:$0xff] }
 0x404   : > { %2643 = vst.msk [vmem:[#allocation3 + $0x150] sm:$0xff] %vm2250_vm5, %v2580_v0  ;;  %v9767_v25 = vpop.f32.mrf.mxu3  ;;  %v2970_v0 = vld [vmem:[#allocation3 + $0x238] sm:$0xff] }
 0x406   : > { %2799 = vrot.lane.b32.xlu1 %v2729_v55, %s7676_s16 }
 0x408   : > { %v2572_v60 = vpop.permute.xlu1 %2571  ;;  %v2906_v51 = vld [vmem:[#allocation3 + $0x38] sm:$0xff] }
 0x409   : > { %2795 = vrot.lane.b32.xlu2 %v9393_v59, %s7676_s16  ;;  %2639 = vst.msk [vmem:[#allocation3 + $0xb0] sm:$0xff] %vm2250_vm5, %v2572_v60  ;;  %v2576_v45 = vpop.permute.xlu0 %2575  ;;  %v2730_v59 = vld [vmem:[#allocation4 + $0xd9] sm:$0xff]  ;;  %v2916_v34 = vld [vmem:[#allocation3 + $0x88] sm:$0xff] }
 0x40a   : > { %2641 = vst.msk [vmem:[#allocation3 + $0x100] sm:$0xff] %vm2250_vm5, %v2576_v45  ;;  %3293 = vmatmul.f32.gmra.mxu3 %v2935_v33  ;;  %3364 = vmatmul.f32.gmra.mxu2 %v2906_v51  ;;  %v9792_v45 = vpop.f32.mrf.mxu2  ;;  %v2975_v33 = vld [vmem:[#allocation3 + $0x260] sm:$0xff] }
 0x40b   : > { %v2586_v57 = vpop.permute.xlu2 %2585  ;;  %v2941_v11 = vld [vmem:[#allocation3 + $0x150] sm:$0xff] }
 0x40c   : > { %2646 = vst.msk [vmem:[#allocation3 + $0x1c8] sm:$0xff] %vm2250_vm5, %v2586_v57  ;;  %v9773_v38 = vpop.f32.mrf.mxu3 }
 0x410   : > { %v2578_v13 = vpop.permute.xlu1 %2577  ;;  %v2921_v15 = vld [vmem:[#allocation3 + $0xb0] sm:$0xff] }
 0x411   : > { %2801 = vrot.lane.b32.xlu2 %v2730_v59, %s7676_s16  ;;  %2642 = vst.msk [vmem:[#allocation3 + $0x128] sm:$0xff] %vm2250_vm5, %v2578_v13  ;;  %v2582_v9 = vpop.permute.xlu0 %2581  ;;  %v2931_v6 = vld [vmem:[#allocation3 + $0x100] sm:$0xff] }
 0x412   : > { %2644 = vst.msk [vmem:[#allocation3 + $0x178] sm:$0xff] %vm2250_vm5, %v2582_v9  ;;  %3296 = vmatmul.f32.gmra.mxu3 %v2940_v17  ;;  %3367 = vmatmul.f32.gmra.mxu2 %v2911_v54  ;;  %v2980_v9 = vld [vmem:[#allocation3 + $0x288] sm:$0xff]  ;;  %v9801_v47 = vpop.f32.mrf.mxu2 }
 0x413   : > { %v2592_v56 = vpop.permute.xlu2 %2591 }
 0x414   : > { %2649 = vst.msk [vmem:[#allocation3 + $0x240] sm:$0xff] %vm2250_vm5, %v2592_v56  ;;  %v9782_v22 = vpop.f32.mrf.mxu3 }
 0x418   : > { %v2584_v4 = vpop.permute.xlu1 %2583  ;;  %v2936_v37 = vld [vmem:[#allocation3 + $0x128] sm:$0xff] }
 0x419   : > { %2645 = vst.msk [vmem:[#allocation3 + $0x1a0] sm:$0xff] %vm2250_vm5, %v2584_v4  ;;  %v2588_v36 = vpop.permute.xlu0 %2587  ;;  %v2946_v42 = vld [vmem:[#allocation3 + $0x178] sm:$0xff] }
 0x41a   : > { %2647 = vst.msk [vmem:[#allocation3 + $0x1f0] sm:$0xff] %vm2250_vm5, %v2588_v36  ;;  %3299 = vmatmul.f32.gmra.mxu3 %v2945_v26  ;;  %3370 = vmatmul.f32.gmra.mxu2 %v2916_v34  ;;  %v2956_v36 = vld [vmem:[#allocation3 + $0x1c8] sm:$0xff]  ;;  %v9808_v34 = vpop.f32.mrf.mxu2 }
 0x41b   : > { %v2598_v43 = vpop.permute.xlu2 %2597 }
 0x41c   : > { %2652 = vst.msk [vmem:[#allocation3 + $0x2b8] sm:$0xff] %vm2250_vm5, %v2598_v43  ;;  %v9789_v3 = vpop.f32.mrf.mxu3  ;;  %v2985_v43 = vld [vmem:[#allocation3 + $0x2b0] sm:$0xff] }
 0x420   : > { %v2590_v40 = vpop.permute.xlu1 %2589  ;;  %v2951_v17 = vld [vmem:[#allocation3 + $0x1a0] sm:$0xff] }
 0x421   : > { %2648 = vst.msk [vmem:[#allocation3 + $0x218] sm:$0xff] %vm2250_vm5, %v2590_v40  ;;  %v2594_v46 = vpop.permute.xlu0 %2593  ;;  %v2990_v40 = vld [vmem:[#allocation3 + $0x2d8] sm:$0xff] }
 0x422   : > { %2650 = vst.msk [vmem:[#allocation3 + $0x268] sm:$0xff] %vm2250_vm5, %v2594_v46  ;;  %3302 = vmatmul.f32.gmra.mxu3 %v2950_v61  ;;  %3373 = vmatmul.f32.gmra.mxu2 %v2921_v15  ;;  %v9815_v61 = vpop.f32.mrf.mxu2 }
 0x423   : > { %v2604_v1 = vpop.permute.xlu2 %2603 }
 0x424   : > { %2655 = vst.msk [vmem:[#allocation3 + $0x330] sm:$0xff] %vm2250_vm5, %v2604_v1  ;;  %v9796_v59 = vpop.f32.mrf.mxu3  ;;  %v2961_v1 = vld [vmem:[#allocation3 + $0x1f0] sm:$0xff] }
 0x428   : > { %v2596_v30 = vpop.permute.xlu1 %2595 }
 0x429   : > { %2651 = vst.msk [vmem:[#allocation3 + $0x290] sm:$0xff] %vm2250_vm5, %v2596_v30  ;;  %v2600_v39 = vpop.permute.xlu0 %2599 }
 0x42a   : > { %2653 = vst.msk [vmem:[#allocation3 + $0x2e0] sm:$0xff] %vm2250_vm5, %v2600_v39  ;;  %3305 = vmatmul.f32.gmra.mxu3 %v2955_v35  ;;  %3376 = vmatmul.f32.gmra.mxu2 %v2926_v18  ;;  %v2995_v39 = vld [vmem:[#allocation3 + $0x300] sm:$0xff]  ;;  %v2966_v35 = vld [vmem:[#allocation3 + $0x218] sm:$0xff] }
 0x42b   : > { %v2610_v49 = vpop.permute.xlu2 %2609 }
 0x42c   : > { %2658 = vst.msk [vmem:[#allocation3 + $0x3a8] sm:$0xff] %vm2250_vm5, %v2610_v49  ;;  %v9805_v5 = vpop.f32.mrf.mxu3 }
 0x430   : > { %v2602_v16 = vpop.permute.xlu1 %2601 }
 0x431   : > { %2654 = vst.msk [vmem:[#allocation3 + $0x308] sm:$0xff] %vm2250_vm5, %v2602_v16  ;;  %v2606_v50 = vpop.permute.xlu0 %2605 }
 0x432   : > { %2656 = vst.msk [vmem:[#allocation3 + $0x358] sm:$0xff] %vm2250_vm5, %v2606_v50  ;;  %3308 = vmatmul.f32.gmra.mxu3 %v2960_v24  ;;  %3379 = vmatmul.f32.gmra.mxu2 %v2931_v6  ;;  %v3000_v24 = vld [vmem:[#allocation3 + $0x328] sm:$0xff]  ;;  %v2971_v6 = vld [vmem:[#allocation3 + $0x240] sm:$0xff] }
 0x433   : > { %v2760_v29 = vpop.permute.xlu2 %2759 }
 0x434   : > { %2829 = vst.msk [vmem:[#allocation3 + $0x68] sm:$0xff] %vm2250_vm5, %v2760_v29  ;;  %v9813_v12 = vpop.f32.mrf.mxu3 }
 0x438   : > { %v2608_v31 = vpop.permute.xlu1 %2607 }
 0x439   : > { %2657 = vst.msk [vmem:[#allocation3 + $0x380] sm:$0xff] %vm2250_vm5, %v2608_v31  ;;  %v2756_v41 = vpop.permute.xlu0 %2755  ;;  %v9824_v31 = vpop.f32.mrf.mxu2 }
 0x43a   : > { %2827 = vst.msk [vmem:[#allocation3 + $0x18] sm:$0xff] %vm2250_vm5, %v2756_v41  ;;  %3311 = vmatmul.f32.gmra.mxu3 %v2965_v10  ;;  %3382 = vmatmul.f32.gmra.mxu2 %v2936_v37  ;;  %v3005_v37 = vld [vmem:[#allocation3 + $0x350] sm:$0xff] }
 0x43b   : > { %v2766_v48 = vpop.permute.xlu2 %2765  ;;  %v2912_v54 = vld [vmem:[#allocation3 + $0x68] sm:$0xff] }
 0x43c   : > { %2832 = vst.msk [vmem:[#allocation3 + $0xe0] sm:$0xff] %vm2250_vm5, %v2766_v48 }
 0x43d   : > { %v9820_v16 = vpop.f32.mrf.mxu3 }
 0x440   : > { %v2758_v27 = vpop.permute.xlu1 %2757 }
 0x441   : > { %2828 = vst.msk [vmem:[#allocation3 + $0x40] sm:$0xff] %vm2250_vm5, %v2758_v27  ;;  %v2762_v53 = vpop.permute.xlu0 %2761  ;;  %v2902_v14 = vld [vmem:[#allocation3 + $0x18] sm:$0xff]  ;;  %v2976_v27 = vld [vmem:[#allocation3 + $0x268] sm:$0xff] }
 0x442   : > { %2830 = vst.msk [vmem:[#allocation3 + $0x90] sm:$0xff] %vm2250_vm5, %v2762_v53  ;;  %3314 = vmatmul.f32.gmra.mxu3 %v2970_v0  ;;  %3385 = vmatmul.f32.gmra.mxu2 %v2941_v11  ;;  %v9829_v53 = vpop.f32.mrf.mxu2  ;;  %v3010_v0 = vld [vmem:[#allocation3 + $0x378] sm:$0xff]  ;;  %v2981_v11 = vld [vmem:[#allocation3 + $0x290] sm:$0xff] }
 0x443   : > { %v2772_v20 = vpop.permute.xlu2 %2771  ;;  %3450 = vmatmul.f32.vlgmr.msrb.gmra.mxu0 %v2902_v14  ;;  %v2927_v18 = vld [vmem:[#allocation3 + $0xe0] sm:$0xff] }
 0x444   : > { %2835 = vst.msk [vmem:[#allocation3 + $0x158] sm:$0xff] %vm2250_vm5, %v2772_v20 }
 0x445   : > { %v9826_v10 = vpop.f32.mrf.mxu3 }
 0x448   : > { %v2764_v55 = vpop.permute.xlu1 %2763  ;;  %v2907_v57 = vld [vmem:[#allocation3 + $0x40] sm:$0xff] }
 0x449   : > { %2831 = vst.msk [vmem:[#allocation3 + $0xb8] sm:$0xff] %vm2250_vm5, %v2764_v55  ;;  %v2768_v51 = vpop.permute.xlu0 %2767  ;;  %v2917_v26 = vld [vmem:[#allocation3 + $0x90] sm:$0xff] }
 0x44a   : > { %2833 = vst.msk [vmem:[#allocation3 + $0x108] sm:$0xff] %vm2250_vm5, %v2768_v51  ;;  %3317 = vmatmul.f32.gmra.mxu3 %v2975_v33  ;;  %3388 = vmatmul.f32.gmra.mxu2 %v2946_v42  ;;  %v3015_v51 = vld [vmem:[#allocation3 + $0x3a0] sm:$0xff] }
 0x44b   : > { %v2778_v60 = vpop.permute.xlu2 %2777  ;;  %3453 = vmatmul.f32.gmra.mxu0 %v2907_v57  ;;  %v2942_v55 = vld [vmem:[#allocation3 + $0x158] sm:$0xff] }
 0x44c   : > { %2838 = vst.msk [vmem:[#allocation3 + $0x1d0] sm:$0xff] %vm2250_vm5, %v2778_v60  ;;  %v9833_v60 = vpop.f32.mrf.mxu2  ;;  %v2986_v57 = vld [vmem:[#allocation3 + $0x2b8] sm:$0xff] }
 0x44d   : > { %v9831_v14 = vpop.f32.mrf.mxu3 }
 0x450   : > { %v2770_v8 = vpop.permute.xlu1 %2769  ;;  %v2922_v46 = vld [vmem:[#allocation3 + $0xb8] sm:$0xff] }
 0x451   : > { %2834 = vst.msk [vmem:[#allocation3 + $0x130] sm:$0xff] %vm2250_vm5, %v2770_v8  ;;  %v2774_v56 = vpop.permute.xlu0 %2773  ;;  %v2932_v48 = vld [vmem:[#allocation3 + $0x108] sm:$0xff] }
 0x452   : > { %2836 = vst.msk [vmem:[#allocation3 + $0x180] sm:$0xff] %vm2250_vm5, %v2774_v56  ;;  %3320 = vmatmul.f32.gmra.mxu3 %v2980_v9  ;;  %3391 = vmatmul.f32.gmra.mxu2 %v2951_v17  ;;  %v3540_v9 = vpop.f32.mrf.mxu1 }
 0x453   : > { %v2784_v13 = vpop.permute.xlu2 %2783  ;;  %3456 = vmatmul.f32.gmra.mxu0 %v2912_v54 }
 0x454   : > { %2841 = vst.msk [vmem:[#allocation3 + $0x248] sm:$0xff] %vm2250_vm5, %v2784_v13  ;;  %v2991_v13 = vld [vmem:[#allocation3 + $0x2e0] sm:$0xff] }
 0x455   : > { %v3273_v42 = vpop.f32.mrf.mxu3 }
 0x458   : > { %v2776_v7 = vpop.permute.xlu1 %2775  ;;  %v2937_v20 = vld [vmem:[#allocation3 + $0x130] sm:$0xff] }
 0x459   : > { %2837 = vst.msk [vmem:[#allocation3 + $0x1a8] sm:$0xff] %vm2250_vm5, %v2776_v7  ;;  %v2780_v4 = vpop.permute.xlu0 %2779  ;;  %v2947_v33 = vld [vmem:[#allocation3 + $0x180] sm:$0xff]  ;;  %v2996_v7 = vld [vmem:[#allocation3 + $0x308] sm:$0xff] }
 0x45a   : > { %2839 = vst.msk [vmem:[#allocation3 + $0x1f8] sm:$0xff] %vm2250_vm5, %v2780_v4  ;;  %3323 = vmatmul.f32.gmra.mxu3 %v2985_v43  ;;  %3394 = vmatmul.f32.gmra.mxu2 %v2956_v36  ;;  %v3543_v4 = vpop.f32.mrf.mxu1  ;;  %v3001_v36 = vld [vmem:[#allocation3 + $0x330] sm:$0xff] }
 0x45b   : > { %v2790_v62 = vpop.permute.xlu2 %2789  ;;  %3459 = vmatmul.f32.gmra.mxu0 %v2917_v26 }
 0x45c   : > { %2844 = vst.msk [vmem:[#allocation3 + $0x2c0] sm:$0xff] %vm2250_vm5, %v2790_v62  ;;  %v2957_v62 = vld [vmem:[#allocation3 + $0x1d0] sm:$0xff] }
 0x45d   : > { %v3276_v17 = vpop.f32.mrf.mxu3 }
 0x460   : > { %v2782_v52 = vpop.permute.xlu1 %2781  ;;  %v2952_v56 = vld [vmem:[#allocation3 + $0x1a8] sm:$0xff] }
 0x461   : > { %2840 = vst.msk [vmem:[#allocation3 + $0x220] sm:$0xff] %vm2250_vm5, %v2782_v52  ;;  %v2786_v21 = vpop.permute.xlu0 %2785  ;;  %v2962_v52 = vld [vmem:[#allocation3 + $0x1f8] sm:$0xff] }
 0x462   : > { %2842 = vst.msk [vmem:[#allocation3 + $0x270] sm:$0xff] %vm2250_vm5, %v2786_v21  ;;  %3326 = vmatmul.f32.gmra.mxu3 %v2990_v40  ;;  %3397 = vmatmul.f32.gmra.mxu2 %v2961_v1  ;;  %v9839_v21 = vpop.f32.mrf.mxu1  ;;  %v3006_v40 = vld [vmem:[#allocation3 + $0x358] sm:$0xff] }
 0x463   : > { %v2796_v58 = vpop.permute.xlu2 %2795  ;;  %3462 = vmatmul.f32.gmra.mxu0 %v2922_v46 }
 0x464   : > { %2847 = vst.msk [vmem:[#allocation3 + $0x338] sm:$0xff] %vm2250_vm5, %v2796_v58  ;;  %v7679_v58 = vmov 0  }
 0x465   : > { %v9835_v43 = vpop.f32.mrf.mxu3  ;;  %6763 = vset.pattern.permute.xlu2 %v7679_v58  ;;  %6762 = vset.pattern.permute.xlu1 %v7679_v58 }
 0x466   : > { %6761 = vset.pattern.permute.xlu0 %v7679_v58 }
 0x468   : > { %v2788_v15 = vpop.permute.xlu1 %2787  ;;  %v2967_v46 = vld [vmem:[#allocation3 + $0x220] sm:$0xff] }
 0x469   : > { %2843 = vst.msk [vmem:[#allocation3 + $0x298] sm:$0xff] %vm2250_vm5, %v2788_v15  ;;  %v2792_v49 = vpop.permute.xlu0 %2791 }
 0x46a   : > { %2845 = vst.msk [vmem:[#allocation3 + $0x2e8] sm:$0xff] %vm2250_vm5, %v2792_v49  ;;  %3329 = vmatmul.f32.gmra.mxu3 %v2995_v39  ;;  %3400 = vmatmul.f32.gmra.mxu2 %v2966_v35  ;;  %v3011_v49 = vld [vmem:[#allocation3 + $0x380] sm:$0xff]  ;;  %v9844_v39 = vpop.f32.mrf.mxu1  ;;  %v2972_v35 = vld [vmem:[#allocation3 + $0x248] sm:$0xff] }
 0x46b   : > { %v2802_v30 = vpop.permute.xlu2 %2801  ;;  %3465 = vmatmul.f32.gmra.mxu0 %v2927_v18 }
 0x46c   : > { %2850 = vst.msk [vmem:[#allocation3 + $0x3b0] sm:$0xff] %vm2250_vm5, %v2802_v30  ;;  %v3662_v30 = vld [vmem:[%s11745_s6 + $0x10] sm:$0xff] }
 0x46d   : > { %v3282_v1 = vpop.f32.mrf.mxu3  ;;  %3778 = vperm.xlu2 %6763, %v3662_v30  }
 0x470   : > { %v2794_v29 = vpop.permute.xlu1 %2793 }
 0x471   : > { %2846 = vst.msk [vmem:[#allocation3 + $0x310] sm:$0xff] %vm2250_vm5, %v2794_v29  ;;  %v2798_v50 = vpop.permute.xlu0 %2797 }
 0x472   : > { %2848 = vst.msk [vmem:[#allocation3 + $0x360] sm:$0xff] %vm2250_vm5, %v2798_v50  ;;  %3332 = vmatmul.f32.gmra.mxu3 %v3000_v24  ;;  %3403 = vmatmul.f32.gmra.mxu2 %v2971_v6  ;;  %v3016_v50 = vld [vmem:[#allocation3 + $0x3a8] sm:$0xff]  ;;  %v2977_v24 = vld [vmem:[#allocation3 + $0x270] sm:$0xff]  ;;  %v9853_v6 = vld [vmem:[%s11743_s4] ss:$0 sm:$0xff] }
 0x473   : > { %3468 = vmatmul.f32.gmra.mxu0 %v2932_v48  ;;  %v9855_v48 = vpop.f32.mrf.mxu1 }
 0x475   : > { %v9846_v18 = vpop.f32.mrf.mxu3 }
 0x478   : > { %v2800_v41 = vpop.permute.xlu1 %2799 }
 0x479   : > { %2849 = vst.msk [vmem:[#allocation3 + $0x388] sm:$0xff] %vm2250_vm5, %v2800_v41  ;;  %v3661_v41 = vld [vmem:[%s11745_s6 + $0x8] sm:$0xff] }
 0x47a   : > { %3335 = vmatmul.f32.gmra.mxu3 %v3005_v37  ;;  %3406 = vmatmul.f32.gmra.mxu2 %v2976_v27  ;;  %v3660_v37 = vld [vmem:[%s11745_s6] sm:$0xff] }
 0x47b   : > { %3471 = vmatmul.f32.gmra.mxu0 %v2937_v20  ;;  %3773 = vperm.xlu1 %6762, %v3661_v41   ;;  %v3185_v20 = vadd.f32 %v9853_v6, %v9777_v32 }
 0x47c   : > { %3768 = vperm.xlu0 %6761, %v3660_v37  }
 0x47d   : > { %v9863_v27 = vpop.f32.mrf.mxu3 }
 0x482   : > { %3338 = vmatmul.f32.gmra.mxu3 %v3010_v0  ;;  %3409 = vmatmul.f32.gmra.mxu2 %v2981_v11 }
 0x483   : > { %3474 = vmatmul.f32.gmra.mxu0 %v2942_v55  ;;  %v3274_v55 = vadd.f32 %v3273_v42, %v3185_v20 }
 0x485   : > { %v3362_v8 = vpop.f32.mrf.mxu2 }
 0x48a   : > { %3341 = vmatmul.f32.gmra.mxu3 %v3015_v51  ;;  %3412 = vmatmul.f32.gmra.mxu2 %v2986_v57  ;;  %v2982_v51 = vld [vmem:[#allocation3 + $0x298] sm:$0xff]  ;;  %v3188_v57 = vadd.f32 %v9853_v6, %v9784_v23  ;;  %v2987_v23 = vld [vmem:[#allocation3 + $0x2c0] sm:$0xff] }
 0x48b   : > { %3477 = vmatmul.f32.gmra.mxu0 %v2947_v33  ;;  %v3363_v33 = vadd.f32 %v3362_v8, %v3274_v55 }
 0x48d   : > { %v3365_v54 = vpop.f32.mrf.mxu2 }
 0x492   : > { %3415 = vmatmul.f32.gmra.mxu2 %v2991_v13  ;;  %v3663_v13 = vld [vmem:[%s11745_s6 + $0x18] sm:$0xff] }
 0x493   : > { %3480 = vmatmul.f32.gmra.mxu0 %v2952_v56  ;;  %v3277_v56 = vadd.f32 %v3276_v17, %v3188_v57  ;;  %3783 = vperm.xlu1 %6762, %v3663_v13   ;;  %v3191_v17 = vadd.f32 %v9853_v6, %v9792_v45 }
 0x495   : > { %v9837_v26 = vpop.f32.mrf.mxu2  ;;  %v3366_v32 = vadd.f32 %v3365_v54, %v3277_v56 }
 0x49a   : > { %3418 = vmatmul.f32.gmra.mxu2 %v2996_v7 }
 0x49b   : > { %3483 = vmatmul.f32.gmra.mxu0 %v2957_v62  ;;  %v9874_v62 = vpop.f32.mrf.mxu1 }
 0x49d   : > { %v3371_v15 = vpop.f32.mrf.mxu2 }
 0x4a2   : > { %3421 = vmatmul.f32.gmra.mxu2 %v3001_v36  ;;  %v9876_v36 = vpop.f32.mrf.mxu3 }
 0x4a3   : > { %3486 = vmatmul.f32.gmra.mxu0 %v2962_v52 }
 0x4a5   : > { %v9848_v29 = vpop.f32.mrf.mxu2 }
 0x4aa   : > { %3424 = vmatmul.f32.gmra.mxu2 %v3006_v40 }
 0x4ab   : > { %3489 = vmatmul.f32.gmra.mxu0 %v2967_v46 }
 0x4ad   : > { %v9867_v0 = vpop.f32.mrf.mxu2 }
 0x4b2   : > { %3427 = vmatmul.f32.gmra.mxu2 %v3011_v49  ;;  %v9890_v49 = vpop.f32.mrf.mxu1 }
 0x4b3   : > { %3492 = vmatmul.f32.gmra.mxu0 %v2972_v35  ;;  %v3280_v35 = vadd.f32 %v9835_v43, %v3191_v17 }
 0x4b5   : > { %v9878_v40 = vpop.f32.mrf.mxu2  ;;  %v3369_v45 = vadd.f32 %v9837_v26, %v3280_v35 }
 0x4ba   : > { %3430 = vmatmul.f32.gmra.mxu2 %v3016_v50  ;;  %v2992_v50 = vld [vmem:[#allocation3 + $0x2e8] sm:$0xff]  ;;  %v9903_v57 = vpop.f32.mrf.mxu1 }
 0x4bb   : > { %3495 = vmatmul.f32.gmra.mxu0 %v2977_v24  ;;  %v3194_v24 = vadd.f32 %v9853_v6, %v9801_v47 }
 0x4bd   : > { %v3383_v41 = vpop.f32.mrf.mxu2  ;;  %v3283_v37 = vadd.f32 %v3282_v1, %v3194_v24 }
 0x4c0   : > { %v3451_v11 = vpop.f32.mrf.mxu0 }
 0x4c1   : > { %v3452_v7 = vadd.f32 %v3451_v11, %v3363_v33  ;;  %v3372_v11 = vadd.f32 %v3371_v15, %v3283_v37  ;;  %v2997_v33 = vld [vmem:[#allocation3 + $0x310] sm:$0xff] }
 0x4c3   : > { %3498 = vmatmul.f32.gmra.mxu0 %v2982_v51  ;;  %v3541_v42 = vadd.f32 %v3540_v9, %v3452_v7 }
 0x4c5   : > { %v9880_v46 = vmax.f32 %v3541_v42, 0.0  ;;  %v9912_v15 = vpop.f32.mrf.mxu2  ;;  %v9928_v42 = vpop.f32.mrf.mxu1 }
 0x4c7   : > { %11813 = vst [vmem:[#allocation6_spill] sm:$0xff] %v9880_v46 }
 0x4c8   : > { %v3454_v52 = vpop.f32.mrf.mxu0 }
 0x4c9   : > { %v3455_v58 = vadd.f32 %v3454_v52, %v3366_v32  ;;  %v3200_v52 = vadd.f32 %v9853_v6, %v9815_v61  ;;  %v3007_v61 = vld [vmem:[#allocation3 + $0x360] sm:$0xff] }
 0x4cb   : > { %v3544_v8 = vadd.f32 %v3543_v4, %v3455_v58  ;;  %3501 = vmatmul.f32.gmra.mxu0 %v2987_v23  ;;  %v9895_v4 = vpop.f32.mrf.mxu3  ;;  %v3289_v58 = vadd.f32 %v9863_v27, %v3200_v52  ;;  %v3209_v52 = vadd.f32 %v9853_v6, %v9833_v60  ;;  %v3212_v60 = vadd.f32 %v9853_v6, %v9690_v19 }
 0x4cd   : > { %v9882_v30 = vmax.f32 %v3544_v8, 0.0  ;;  %v3378_v8 = vadd.f32 %v9867_v0, %v3289_v58  ;;  %v3389_v17 = vpop.f32.mrf.mxu2  ;;  %v3567_v0 = vpop.f32.mrf.mxu1 }
 0x4cf   : > { %11814 = vst [vmem:[#allocation8_spill] sm:$0xff] %v9882_v30  ;;  %v9888_v54 = vpack.i.bf16 %v9882_v30, %v9880_v46 }
 0x4d0   : > { %v3457_v9 = vpop.f32.mrf.mxu0 }
 0x4d1   : > { %6765 = vrot.lane.b32.xlu2 %v9888_v54, %s7680_s28  ;;  %v3458_v20 = vadd.f32 %v3457_v9, %v3369_v45  ;;  %v3203_v45 = vadd.f32 %v9853_v6, %v9824_v31  ;;  %v3012_v31 = vld [vmem:[#allocation3 + $0x388] sm:$0xff] }
 0x4d3   : > { %3504 = vmatmul.f32.gmra.mxu0 %v2992_v50  ;;  %v3547_v43 = vadd.f32 %v9839_v21, %v3458_v20  ;;  %v9906_v26 = vpop.f32.mrf.mxu3  ;;  %v3197_v21 = vadd.f32 %v9853_v6, %v9808_v34 }
 0x4d5   : > { %v9908_v13 = vmax.f32 %v3547_v43, 0.0  ;;  %v3286_v32 = vadd.f32 %v9846_v18, %v3197_v21 }
 0x4d7   : > { %11815 = vst [vmem:[#allocation9_spill] sm:$0xff] %v9908_v13  ;;  %v3375_v34 = vadd.f32 %v9848_v29, %v3286_v32 }
 0x4d8   : > { %v3460_v55 = vpop.f32.mrf.mxu0 }
 0x4d9   : > { %v3461_v51 = vadd.f32 %v3460_v55, %v3372_v11  ;;  %6770 = vrot.lane.b32.xlu2 %v9888_v54, %s7681_s29  ;;  %v3292_v11 = vadd.f32 %v9876_v36, %v3203_v45  ;;  %v3206_v55 = vadd.f32 %v9853_v6, %v9829_v53  ;;  %v3017_v53 = vld [vmem:[#allocation3 + $0x3b0] sm:$0xff] }
 0x4db   : > { %v3550_v47 = vadd.f32 %v9844_v39, %v3461_v51  ;;  %3507 = vmatmul.f32.gmra.mxu0 %v2997_v33  ;;  %v3002_v39 = vld [vmem:[#allocation3 + $0x338] sm:$0xff]  ;;  %v3300_v18 = vpop.f32.mrf.mxu3  ;;  %v3381_v43 = vadd.f32 %v9878_v40, %v3292_v11  ;;  %v3295_v36 = vadd.f32 %v9895_v4, %v3206_v55 }
 0x4dd   : > { %v9910_v1 = vmax.f32 %v3550_v47, 0.0  ;;  %v3384_v33 = vadd.f32 %v3383_v41, %v3295_v36  ;;  %v3570_v47 = vpop.f32.mrf.mxu1 }
 0x4df   : > { %11816 = vst [vmem:[#allocation7_spill] sm:$0xff] %v9910_v1  ;;  %v9918_v56 = vpack.i.bf16 %v9910_v1, %v9908_v13 }
 0x4e0   : > { %v3463_v7 = vpop.f32.mrf.mxu0 }
 0x4e1   : > { %6795 = vrot.lane.b32.xlu0 %v9918_v56, %s7680_s28  ;;  %6775 = vrot.lane.b32.xlu2 %v9888_v54, %s7682_s11  ;;  %v3464_v23 = vadd.f32 %v3463_v7, %v3375_v34 }
 0x4e3   : > { %3510 = vmatmul.f32.gmra.mxu0 %v3002_v39  ;;  %v3553_v35 = vadd.f32 %v9855_v48, %v3464_v23  ;;  %v3303_v37 = vpop.f32.mrf.mxu3  ;;  %v3298_v23 = vadd.f32 %v9906_v26, %v3209_v52 }
 0x4e5   : > { %v9938_v27 = vmax.f32 %v3553_v35, 0.0  ;;  %v3301_v35 = vadd.f32 %v3300_v18, %v3212_v60 }
 0x4e7   : > { %11817 = vst [vmem:[#allocation11_spill] sm:$0xff] %v9938_v27  ;;  %v3390_v26 = vadd.f32 %v3389_v17, %v3301_v35 }
 0x4e8   : > { %v3466_v9 = vpop.f32.mrf.mxu0 }
 0x4e9   : > { %v3467_v50 = vadd.f32 %v3466_v9, %v3378_v8  ;;  %6800 = vrot.lane.b32.xlu0 %v9918_v56, %s7681_s29  ;;  %6780 = vrot.lane.b32.xlu2 %v9888_v54, %s7677_s17  ;;  %v3387_v8 = vadd.f32 %v9912_v15, %v3298_v23 }
 0x4eb   : > { %v3556_v29 = vadd.f32 %v9874_v62, %v3467_v50  ;;  %3513 = vmatmul.f32.gmra.mxu0 %v3007_v61  ;;  %v3392_v62 = vpop.f32.mrf.mxu2  ;;  %v3306_v39 = vpop.f32.mrf.mxu3 }
 0x4ed   : > { %v9940_v24 = vmax.f32 %v3556_v29, 0.0 }
 0x4ef   : > { %11818 = vst [vmem:[#allocation12_spill] sm:$0xff] %v9940_v24  ;;  %v9946_v48 = vpack.i.bf16 %v9940_v24, %v9938_v27 }
 0x4f0   : > { %v3469_v20 = vpop.f32.mrf.mxu0 }
 0x4f1   : > { %6825 = vrot.lane.b32.xlu1 %v9946_v48, %s7680_s28  ;;  %6805 = vrot.lane.b32.xlu0 %v9918_v56, %s7682_s11  ;;  %v3470_v51 = vadd.f32 %v3469_v20, %v3381_v43 }
 0x4f2   : > { %6785 = vrot.lane.b32.xlu2 %v9888_v54, %s7683_s12 }
 0x4f3   : > { %3516 = vmatmul.f32.gmra.mxu0 %v3012_v31  ;;  %v3559_v7 = vadd.f32 %v9890_v49, %v3470_v51  ;;  %v3395_v4 = vpop.f32.mrf.mxu2  ;;  %v3309_v9 = vpop.f32.mrf.mxu3 }
 0x4f5   : > { %v9967_v41 = vmax.f32 %v3559_v7, 0.0 }
 0x4f8   : > { %v3472_v21 = vpop.f32.mrf.mxu0 }
 0x4f9   : > { %v3473_v32 = vadd.f32 %v3472_v21, %v3384_v33  ;;  %6830 = vrot.lane.b32.xlu1 %v9946_v48, %s7681_s29  ;;  %6810 = vrot.lane.b32.xlu0 %v9918_v56, %s7677_s17 }
 0x4fa   : > { %6790 = vrot.lane.b32.xlu2 %v9888_v54, %s7684_s14 }
 0x4fb   : > { %v3562_v40 = vadd.f32 %v9903_v57, %v3473_v32  ;;  %3519 = vmatmul.f32.gmra.mxu0 %v3017_v53  ;;  %v3573_v57 = vpop.f32.mrf.mxu1  ;;  %v3398_v61 = vpop.f32.mrf.mxu2 }
 0x4fc   : > { %v3312_v17 = vpop.f32.mrf.mxu3 }
 0x4fd   : > { %v9969_v49 = vmax.f32 %v3562_v40, 0.0 }
 0x4ff   : > { %v9975_v34 = vpack.i.bf16 %v9969_v49, %v9967_v41 }
 0x500   : > { %v3475_v58 = vpop.f32.mrf.mxu0 }
 0x501   : > { %6835 = vrot.lane.b32.xlu1 %v9946_v48, %s7682_s11  ;;  %6815 = vrot.lane.b32.xlu0 %v9918_v56, %s7683_s12  ;;  %v3476_v50 = vadd.f32 %v3475_v58, %v3387_v8 }
 0x502   : > { %6855 = vrot.lane.b32.xlu2 %v9975_v34, %s7680_s28 }
 0x503   : > { %v3565_v45 = vadd.f32 %v9928_v42, %v3476_v50  ;;  %v3576_v15 = vpop.f32.mrf.mxu1  ;;  %v3215_v42 = vadd.f32 %v9853_v6, %v9710_v63  ;;  %v3401_v55 = vpop.f32.mrf.mxu2  ;;  %v3218_v63 = vadd.f32 %v9853_v6, %v9719_v28  ;;  %v3224_v50 = vadd.f32 %v9853_v6, %v9753_v44 }
 0x504   : > { %v3315_v32 = vpop.f32.mrf.mxu3 }
 0x505   : > { %v9994_v11 = vmax.f32 %v3565_v45, 0.0  ;;  %v3304_v36 = vadd.f32 %v3303_v37, %v3215_v42  ;;  %v3307_v33 = vadd.f32 %v3306_v39, %v3218_v63 }
 0x507   : > { %v3393_v51 = vadd.f32 %v3392_v62, %v3304_v36  ;;  %v3396_v7 = vadd.f32 %v3395_v4, %v3307_v33  ;;  %v3221_v4 = vadd.f32 %v9853_v6, %v9736_v2 }
 0x508   : > { %v3478_v29 = vpop.f32.mrf.mxu0 }
 0x509   : > { %v3479_v20 = vadd.f32 %v3478_v29, %v3390_v26  ;;  %6840 = vrot.lane.b32.xlu1 %v9946_v48, %s7677_s17  ;;  %6820 = vrot.lane.b32.xlu0 %v9918_v56, %s7684_s14  ;;  %v3310_v8 = vadd.f32 %v3309_v9, %v3221_v4  ;;  %v3313_v29 = vadd.f32 %v3312_v17, %v3224_v50 }
 0x50a   : > { %6860 = vrot.lane.b32.xlu2 %v9975_v34, %s7681_s29 }
 0x50b   : > { %v3568_v19 = vadd.f32 %v3567_v0, %v3479_v20  ;;  %v3579_v37 = vpop.f32.mrf.mxu1  ;;  %v3404_v58 = vpop.f32.mrf.mxu2  ;;  %v3399_v9 = vadd.f32 %v3398_v61, %v3310_v8  ;;  %v3402_v20 = vadd.f32 %v3401_v55, %v3313_v29 }
 0x50c   : > { %v3318_v2 = vpop.f32.mrf.mxu3 }
 0x50d   : > { %v9996_v18 = vmax.f32 %v3568_v19, 0.0 }
 0x50f   : > { %v10002_v31 = vpack.i.bf16 %v9996_v18, %v9994_v11  ;;  %v10010_v0 = vpack.i.bf16 %v9994_v11, %v9996_v18 }
 0x510   : > { %v3481_v43 = vpop.f32.mrf.mxu0 }
 0x511   : > { %6845 = vrot.lane.b32.xlu1 %v9946_v48, %s7683_s12  ;;  %6885 = vrot.lane.b32.xlu0 %v10002_v31, %s7680_s28  ;;  %v3482_v21 = vadd.f32 %v3481_v43, %v3393_v51 }
 0x512   : > { %6865 = vrot.lane.b32.xlu2 %v9975_v34, %s7682_s11 }
 0x513   : > { %v3571_v40 = vadd.f32 %v3570_v47, %v3482_v21  ;;  %v3582_v23 = vpop.f32.mrf.mxu1  ;;  %v3407_v26 = vpop.f32.mrf.mxu2 }
 0x514   : > { %v3321_v61 = vpop.f32.mrf.mxu3 }
 0x515   : > { %v10022_v62 = vmax.f32 %v3571_v40, 0.0 }
 0x518   : > { %v3484_v53 = vpop.f32.mrf.mxu0 }
 0x519   : > { %v3485_v52 = vadd.f32 %v3484_v53, %v3396_v7  ;;  %6850 = vrot.lane.b32.xlu1 %v9946_v48, %s7684_s14  ;;  %6890 = vrot.lane.b32.xlu0 %v10002_v31, %s7681_s29  ;;  %v3230_v53 = vadd.f32 %v9853_v6, %v9773_v38 }
 0x51a   : > { %6870 = vrot.lane.b32.xlu2 %v9975_v34, %s7677_s17 }
 0x51b   : > { %v3574_v28 = vadd.f32 %v3573_v57, %v3485_v52  ;;  %v10036_v57 = vpop.permute.xlu2 %3778  ;;  %v3585_v36 = vpop.f32.mrf.mxu1 }
 0x51c   : > { %11819 = vst [vmem:[#allocation10_spill] sm:$0xff] %v10036_v57  ;;  %v3410_v55 = vpop.f32.mrf.mxu2  ;;  %v3324_v4 = vpop.f32.mrf.mxu3 }
 0x51d   : > { %v10024_v39 = vmax.f32 %v3574_v28, 0.0  ;;  %v3319_v28 = vadd.f32 %v3318_v2, %v3230_v53 }
 0x51f   : > { %v10030_v47 = vpack.i.bf16 %v10024_v39, %v10022_v62  ;;  %v10040_v35 = vpack.i.bf16 %v10022_v62, %v10024_v39 }
 0x520   : > { %v3487_v60 = vpop.f32.mrf.mxu0 }
 0x521   : > { %6915 = vrot.lane.b32.xlu1 %v10030_v47, %s7680_s28  ;;  %6895 = vrot.lane.b32.xlu0 %v10002_v31, %s7682_s11  ;;  %v3488_v45 = vadd.f32 %v3487_v60, %v3399_v9  ;;  %v3408_v60 = vadd.f32 %v3407_v26, %v3319_v28  ;;  %v3233_v26 = vadd.f32 %v9853_v6, %v9782_v22 }
 0x522   : > { %6875 = vrot.lane.b32.xlu2 %v9975_v34, %s7683_s12  ;;  %v3236_v22 = vadd.f32 %v9853_v6, %v9789_v3  ;;  %v10098_v3 = vpop.permute.xlu0 %3768 }
 0x523   : > { %v3577_v42 = vadd.f32 %v3576_v15, %v3488_v45  ;;  %v3227_v15 = vadd.f32 %v9853_v6, %v9767_v25  ;;  %v3588_v52 = vpop.f32.mrf.mxu1  ;;  %11821 = vst [vmem:[#allocation15_spill] sm:$0xff] %v10098_v3 }
 0x524   : > { %v3413_v8 = vpop.f32.mrf.mxu2 }
 0x525   : > { %v3624_v17 = vmax.f32 %v3577_v42, 0.0  ;;  %v3316_v7 = vadd.f32 %v3315_v32, %v3227_v15 }
 0x527   : > { %v3405_v25 = vadd.f32 %v3404_v58, %v3316_v7 }
 0x528   : > { %v3490_v19 = vpop.f32.mrf.mxu0 }
 0x529   : > { %v3491_v43 = vadd.f32 %v3490_v19, %v3402_v20  ;;  %6920 = vrot.lane.b32.xlu1 %v10030_v47, %s7681_s29  ;;  %6900 = vrot.lane.b32.xlu0 %v10002_v31, %s7677_s17  ;;  %v3327_v19 = vpop.f32.mrf.mxu3 }
 0x52a   : > { %6880 = vrot.lane.b32.xlu2 %v9975_v34, %s7684_s14 }
 0x52b   : > { %v3580_v63 = vadd.f32 %v3579_v37, %v3491_v43  ;;  %v10052_v44 = vpop.permute.xlu2 %6765  ;;  %v3591_v20 = vpop.f32.mrf.mxu1  ;;  %v3322_v43 = vadd.f32 %v3321_v61, %v3233_v26  ;;  %v3325_v61 = vadd.f32 %v3324_v4, %v3236_v22  ;;  %v3239_v4 = vadd.f32 %v9853_v6, %v9796_v59 }
 0x52c   : > { %v3242_v59 = vadd.f32 %v9853_v6, %v9805_v5 }
 0x52d   : > { %v3625_v51 = vmax.f32 %v3580_v63, 0.0  ;;  %v3411_v15 = vadd.f32 %v3410_v55, %v3322_v43  ;;  %v3414_v53 = vadd.f32 %v3413_v8, %v3325_v61 }
 0x52f   : > { %v10056_v33 = vpack.i.bf16 %v3625_v51, %v3624_v17  ;;  %v10062_v37 = vpack.i.bf16 %v3624_v17, %v3625_v51 }
 0x530   : > { %v3493_v21 = vpop.f32.mrf.mxu0 }
 0x531   : > { %6925 = vrot.lane.b32.xlu1 %v10030_v47, %s7682_s11  ;;  %6905 = vrot.lane.b32.xlu0 %v10002_v31, %s7683_s12  ;;  %11820 = vst [vmem:[#allocation14_spill] sm:$0xff] %v10062_v37  ;;  %v3494_v32 = vadd.f32 %v3493_v21, %v3405_v25 }
 0x532   : > { %6945 = vrot.lane.b32.xlu2 %v10056_v33, %s7680_s28 }
 0x533   : > { %v10068_v40 = vpop.permute.xlu2 %6770  ;;  %v3583_v9 = vadd.f32 %v3582_v23, %v3494_v32  ;;  %v3594_v25 = vpop.f32.mrf.mxu1 }
 0x535   : > { %v3626_v2 = vmax.f32 %v3583_v9, 0.0  ;;  %v10119_v9 = vpop.permute.xlu1 %3773 }
 0x536   : > { %11823 = vst [vmem:[#allocation17_spill] sm:$0xff] %v10119_v9  ;;  %v3668_v9 = vld [vmem:[%s11744_s5 + $0x20] sm:$0xff] }
 0x538   : > { %v3496_v50 = vpop.f32.mrf.mxu0 }
 0x539   : > { %v3497_v29 = vadd.f32 %v3496_v50, %v3408_v60  ;;  %6930 = vrot.lane.b32.xlu1 %v10030_v47, %s7677_s17  ;;  %6910 = vrot.lane.b32.xlu0 %v10002_v31, %s7684_s14 }
 0x53a   : > { %6950 = vrot.lane.b32.xlu2 %v10056_v33, %s7681_s29 }
 0x53b   : > { %v3586_v38 = vadd.f32 %v3585_v36, %v3497_v29  ;;  %v10076_v58 = vpop.permute.xlu2 %6775  ;;  %v3416_v36 = vpop.f32.mrf.mxu2 }
 0x53c   : > { %v3597_v29 = vpop.f32.mrf.mxu1 }
 0x53d   : > { %v3627_v45 = vmax.f32 %v3586_v38, 0.0  ;;  %v10144_v5 = vpop.permute.xlu1 %3783 }
 0x53e   : > { %11825 = vst [vmem:[#allocation18_spill] sm:$0xff] %v10144_v5 }
 0x53f   : > { %3708 = vmatpush.msra.mxu3 %v3627_v45  ;;  %v10080_v23 = vpack.i.bf16 %v3627_v45, %v3626_v2  ;;  %v10084_v63 = vpack.i.bf16 %v3626_v2, %v3627_v45 }
 0x540   : > { %v3499_v42 = vpop.f32.mrf.mxu0 }
 0x541   : > { %3709 = vmatpush.msra.mxu3 %v3626_v2  ;;  %6935 = vrot.lane.b32.xlu1 %v10030_v47, %s7683_s12  ;;  %v3500_v7 = vadd.f32 %v3499_v42, %v3411_v15 }
 0x542   : > { %6975 = vrot.lane.b32.xlu0 %v10080_v23, %s7680_s28  ;;  %6955 = vrot.lane.b32.xlu2 %v10056_v33, %s7682_s11 }
 0x543   : > { %3710 = vmatpush.msra.mxu3 %v3625_v51  ;;  %v10092_v21 = vpop.permute.xlu2 %6780  ;;  %v3589_v32 = vadd.f32 %v3588_v52, %v3500_v7  ;;  %v3330_v51 = vpop.f32.mrf.mxu3 }
 0x544   : > { %v3600_v7 = vpop.f32.mrf.mxu1 }
 0x545   : > { %3711 = vmatpush.msra.mxu3 %v3624_v17  ;;  %v10107_v52 = vmax.f32 %v3589_v32, 0.0  ;;  %v3245_v32 = vadd.f32 %v9853_v6, %v9813_v12  ;;  %v3248_v12 = vadd.f32 %v9853_v6, %v9820_v16 }
 0x547   : > { %3712 = vmatpush.msra.mxu3 %v10024_v39  ;;  %v3419_v39 = vpop.f32.mrf.mxu2 }
 0x548   : > { %v3502_v28 = vpop.f32.mrf.mxu0 }
 0x549   : > { %v3503_v60 = vadd.f32 %v3502_v28, %v3414_v53  ;;  %3713 = vmatpush.msra.mxu3 %v10022_v62  ;;  %6940 = vrot.lane.b32.xlu1 %v10030_v47, %s7684_s14 }
 0x54a   : > { %6980 = vrot.lane.b32.xlu0 %v10080_v23, %s7681_s29  ;;  %6960 = vrot.lane.b32.xlu2 %v10056_v33, %s7677_s17 }
 0x54b   : > { %v3592_v17 = vadd.f32 %v3591_v20, %v3503_v60  ;;  %3714 = vmatpush.msra.mxu3 %v9996_v18  ;;  %v3328_v18 = vadd.f32 %v3327_v19, %v3239_v4  ;;  %v3333_v2 = vpop.f32.mrf.mxu3  ;;  %v3331_v20 = vadd.f32 %v3330_v51, %v3242_v59 }
 0x54c   : > { %v10105_v55 = vpop.permute.xlu2 %6785  ;;  %v3334_v4 = vadd.f32 %v3333_v2, %v3245_v32 }
 0x54d   : > { %11822 = vst [vmem:[#allocation13_spill] sm:$0xff] %v10105_v55  ;;  %v10109_v62 = vmax.f32 %v3592_v17, 0.0  ;;  %3715 = vmatpush.msra.mxu3 %v9994_v11  ;;  %v3417_v11 = vadd.f32 %v3416_v36, %v3328_v18  ;;  %v3420_v42 = vadd.f32 %v3419_v39, %v3331_v20 }
 0x54f   : > { %3716 = vmatpush.msra.mxu3 %v9969_v49  ;;  %v10117_v8 = vpack.i.bf16 %v10109_v62, %v10107_v52  ;;  %v3422_v19 = vpop.f32.mrf.mxu2 }
 0x550   : > { %v3505_v50 = vpop.f32.mrf.mxu0  ;;  %v3423_v18 = vadd.f32 %v3422_v19, %v3334_v4 }
 0x551   : > { %3717 = vmatpush.msra.mxu3 %v9967_v41  ;;  %7005 = vrot.lane.b32.xlu1 %v10117_v8, %s7680_s28  ;;  %v3506_v26 = vadd.f32 %v3505_v50, %v3417_v11 }
 0x552   : > { %6985 = vrot.lane.b32.xlu0 %v10080_v23, %s7682_s11  ;;  %6965 = vrot.lane.b32.xlu2 %v10056_v33, %s7683_s12 }
 0x553   : > { %3718 = vmatpush.msra.mxu3 %v9940_v24  ;;  %v10131_v38 = vpop.permute.xlu0 %6795  ;;  %v3595_v22 = vadd.f32 %v3594_v25, %v3506_v26  ;;  %v3336_v60 = vpop.f32.mrf.mxu3 }
 0x554   : > { %v10133_v45 = vpop.permute.xlu2 %6790  ;;  %v3337_v2 = vadd.f32 %v3336_v60, %v3248_v12  ;;  %v3603_v26 = vpop.f32.mrf.mxu1  ;;  %v3251_v12 = vadd.f32 %v9853_v6, %v9826_v10 }
 0x555   : > { %11824 = vst [vmem:[#allocation16_spill] sm:$0xff] %v10133_v45  ;;  %3719 = vmatpush.msra.mxu3 %v9938_v27  ;;  %v10151_v25 = vmax.f32 %v3595_v22, 0.0  ;;  %v3671_v45 = vld [vmem:[%s11744_s5 + $0x38] sm:$0xff] }
 0x557   : > { %3720 = vmatpush.msra.mxu3 %v9910_v1  ;;  %11826 = vst [vmem:[#allocation19_spill] sm:$0xff] %v10151_v25  ;;  %v3425_v17 = vpop.f32.mrf.mxu2 }
 0x558   : > { %v3508_v43 = vpop.f32.mrf.mxu0 }
 0x559   : > { %v3509_v15 = vadd.f32 %v3508_v43, %v3420_v42  ;;  %7010 = vrot.lane.b32.xlu1 %v10117_v8, %s7681_s29  ;;  %3721 = vmatpush.msra.mxu3 %v9908_v13  ;;  %v3426_v42 = vadd.f32 %v3425_v17, %v3337_v2  ;;  %v3664_v43 = vld [vmem:[%s11744_s5] sm:$0xff] }
 0x55a   : > { %6990 = vrot.lane.b32.xlu0 %v10080_v23, %s7677_s17  ;;  %6970 = vrot.lane.b32.xlu2 %v10056_v33, %s7684_s14 }
 0x55b   : > { %v3598_v36 = vadd.f32 %v3597_v29, %v3509_v15  ;;  %v10146_v61 = vpop.permute.xlu0 %6800  ;;  %3722 = vmatpush.msra.mxu3 %v9882_v30  ;;  %v3339_v22 = vpop.f32.mrf.mxu3 }
 0x55c   : > { %v10149_v53 = vpop.permute.xlu2 %6855 }
 0x55d   : > { %v10153_v28 = vmax.f32 %v3598_v36, 0.0  ;;  %3723 = vmatpush.msra.mxu3 %v9880_v46 }
 0x55e   : > { %3724 = vmatmul.f32.vlgmr.msra.gmra.mxu3 %v3664_v43 }
 0x55f   : > { %11827 = vst [vmem:[#allocation20_spill] sm:$0xff] %v10153_v28  ;;  %v10160_v51 = vpack.i.bf16 %v10153_v28, %v10151_v25  ;;  %v10166_v50 = vpack.i.bf16 %v10151_v25, %v10153_v28  ;;  %v3428_v19 = vpop.f32.mrf.mxu2 }
 0x560   : > { %v3511_v39 = vpop.f32.mrf.mxu0 }
 0x561   : > { %7015 = vrot.lane.b32.xlu1 %v10117_v8, %s7682_s11  ;;  %v3512_v20 = vadd.f32 %v3511_v39, %v3423_v18  ;;  %v3666_v18 = vld [vmem:[%s11744_s5 + $0x10] sm:$0xff] }
 0x562   : > { %6995 = vrot.lane.b32.xlu0 %v10080_v23, %s7683_s12  ;;  %7035 = vrot.lane.b32.xlu2 %v10160_v51, %s7680_s28 }
 0x563   : > { %v10174_v29 = vpop.permute.xlu1 %6825  ;;  %v10176_v59 = vpop.permute.xlu0 %6805  ;;  %v3601_v36 = vadd.f32 %v3600_v7, %v3512_v20 }
 0x564   : > { %v10178_v11 = vpop.permute.xlu2 %6860  ;;  %v3606_v20 = vpop.f32.mrf.mxu1 }
 0x565   : > { %v10195_v4 = vmax.f32 %v3601_v36, 0.0  ;;  %v3342_v10 = vpop.f32.mrf.mxu3 }
 0x566   : > { %3727 = vmatmul.f32.gmra.mxu3 %v3666_v18 }
 0x567   : > { %11828 = vst [vmem:[#allocation21_spill] sm:$0xff] %v10195_v4 }
 0x568   : > { %v3514_v15 = vpop.f32.mrf.mxu0 }
 0x569   : > { %v3515_v16 = vadd.f32 %v3514_v15, %v3426_v42  ;;  %7020 = vrot.lane.b32.xlu1 %v10117_v8, %s7677_s17  ;;  %v3340_v42 = vadd.f32 %v3339_v22, %v3251_v12  ;;  %v3254_v15 = vadd.f32 %v9853_v6, %v9831_v14 }
 0x56a   : > { %7000 = vrot.lane.b32.xlu0 %v10080_v23, %s7684_s14  ;;  %7040 = vrot.lane.b32.xlu2 %v10160_v51, %s7681_s29 }
 0x56b   : > { %v3604_v32 = vadd.f32 %v3603_v26, %v3515_v16  ;;  %v10189_v60 = vpop.permute.xlu1 %6830  ;;  %v10191_v17 = vpop.permute.xlu0 %6810  ;;  %v3429_v36 = vadd.f32 %v3428_v19, %v3340_v42  ;;  %v3343_v18 = vadd.f32 %v3342_v10, %v3254_v15 }
 0x56c   : > { %v10193_v39 = vpop.permute.xlu2 %6865  ;;  %v3609_v14 = vpop.f32.mrf.mxu1 }
 0x56d   : > { %v10197_v7 = vmax.f32 %v3604_v32, 0.0  ;;  %v3431_v32 = vpop.f32.mrf.mxu2 }
 0x56e   : > { %v3432_v57 = vadd.f32 %v3431_v32, %v3343_v18  ;;  %3730 = vmatmul.f32.gmra.mxu3 %v3668_v9  ;;  %v3665_v32 = vld [vmem:[%s11744_s5 + $0x8] sm:$0xff] }
 0x56f   : > { %11829 = vst [vmem:[#allocation22_spill] sm:$0xff] %v10197_v7  ;;  %v10206_v2 = vpack.i.bf16 %v10197_v7, %v10195_v4  ;;  %v10212_v43 = vpack.i.bf16 %v10195_v4, %v10197_v7 }
 0x570   : > { %v3517_v26 = vpop.f32.mrf.mxu0 }
 0x571   : > { %7025 = vrot.lane.b32.xlu1 %v10117_v8, %s7683_s12  ;;  %v3518_v5 = vadd.f32 %v3517_v26, %v3429_v36 }
 0x572   : > { %7070 = vrot.lane.b32.xlu0 %v10206_v2, %s7680_s28  ;;  %7045 = vrot.lane.b32.xlu2 %v10160_v51, %s7682_s11 }
 0x573   : > { %v10220_v16 = vpop.permute.xlu1 %6835  ;;  %v10222_v22 = vpop.permute.xlu0 %6815  ;;  %v3607_v30 = vadd.f32 %v3606_v20, %v3518_v5 }
 0x574   : > { %11830 = vst [vmem:[#allocation23_spill] sm:$0xff] %v10222_v22  ;;  %v10224_v12 = vpop.permute.xlu2 %6870 }
 0x575   : > { %v10241_v9 = vmax.f32 %v3607_v30, 0.0 }
 0x577   : > { %11833 = vst [vmem:[#allocation26_spill] sm:$0xff] %v10241_v9 }
 0x578   : > { %v3520_v3 = vpop.f32.mrf.mxu0 }
 0x579   : > { %v3521_v46 = vadd.f32 %v3520_v3, %v3432_v57  ;;  %7030 = vrot.lane.b32.xlu1 %v10117_v8, %s7684_s14  ;;  %v3670_v3 = vld [vmem:[%s11744_s5 + $0x30] sm:$0xff] }
 0x57a   : > { %7075 = vrot.lane.b32.xlu0 %v10206_v2, %s7681_s29  ;;  %7050 = vrot.lane.b32.xlu2 %v10160_v51, %s7677_s17 }
 0x57b   : > { %v3610_v6 = vadd.f32 %v3609_v14, %v3521_v46  ;;  %v10235_v19 = vpop.permute.xlu1 %6840  ;;  %v10237_v26 = vpop.permute.xlu0 %6820  ;;  %3733 = vmatmul.f32.gmra.mxu3 %v3670_v3  ;;  %v3667_v3 = vld [vmem:[%s11744_s5 + $0x18] sm:$0xff] }
 0x57c   : > { %11831 = vst [vmem:[#allocation24_spill] sm:$0xff] %v10237_v26  ;;  %v10239_v42 = vpop.permute.xlu2 %6875 }
 0x57d   : > { %11832 = vst [vmem:[#allocation25_spill] sm:$0xff] %v10239_v42  ;;  %v10243_v57 = vmax.f32 %v3610_v6, 0.0 }
 0x57f   : > { %11834 = vst [vmem:[#allocation27_spill] sm:$0xff] %v10243_v57  ;;  %3745 = vmatpush.msra.mxu0 %v10243_v57  ;;  %v10251_v5 = vpack.i.bf16 %v10243_v57, %v10241_v9  ;;  %v10255_v46 = vpack.i.bf16 %v10241_v9, %v10243_v57 }
 0x581   : > { %3746 = vmatpush.msra.mxu0 %v10241_v9  ;;  %7105 = vrot.lane.b32.xlu1 %v9946_v48, %s7685_s25 }
 0x582   : > { %7080 = vrot.lane.b32.xlu0 %v10206_v2, %s7682_s11  ;;  %7055 = vrot.lane.b32.xlu2 %v10160_v51, %s7683_s12 }
 0x583   : > { %3747 = vmatpush.msra.mxu0 %v10197_v7  ;;  %v10265_v30 = vpop.permute.xlu1 %6845  ;;  %v10267_v20 = vpop.permute.xlu0 %6885 }
 0x584   : > { %11835 = vst [vmem:[#allocation28_spill] sm:$0xff] %v10265_v30  ;;  %v10269_v10 = vpop.permute.xlu2 %6880  ;;  %v6888_v37 = vunpack.i.h.bf16 %v10267_v20 }
 0x585   : > { %11836 = vst [vmem:[#allocation29_spill] sm:$0xff] %v10269_v10  ;;  %3748 = vmatpush.msra.mxu0 %v10195_v4 }
 0x587   : > { %3749 = vmatpush.msra.mxu0 %v10153_v28 }
 0x589   : > { %3750 = vmatpush.msra.mxu0 %v10151_v25  ;;  %7120 = vrot.lane.b32.xlu1 %v10030_v47, %s7685_s25  ;;  %v3669_v25 = vld [vmem:[%s11744_s5 + $0x28] sm:$0xff] }
 0x58a   : > { %7085 = vrot.lane.b32.xlu0 %v10206_v2, %s7677_s17  ;;  %7060 = vrot.lane.b32.xlu2 %v10160_v51, %s7684_s14 }
 0x58b   : > { %3751 = vmatpush.msra.mxu0 %v10109_v62  ;;  %v10281_v15 = vpop.permute.xlu1 %6850  ;;  %v10283_v36 = vpop.permute.xlu0 %6890 }
 0x58c   : > { %11837 = vst [vmem:[#allocation30_spill] sm:$0xff] %v10281_v15  ;;  %v6946_v18 = vpop.permute.xlu2 %6945 }
 0x58d   : > { %3752 = vmatpush.msra.mxu0 %v10107_v52  ;;  %v6948_v7 = vunpack.i.h.bf16 %v6946_v18  ;;  %v6947_v24 = vunpack.i.l.bf16 %v6946_v18 }
 0x58e   : > { %6500 = vmatmul.msk.f32.vlgmr.msra.gmra.mxu0 %vm2052_vm4, %v3665_v32 }
 0x591   : > { %7135 = vrot.lane.b32.xlu1 %v10251_v5, %s7680_s28 }
 0x592   : > { %7090 = vrot.lane.b32.xlu0 %v10206_v2, %s7683_s12  ;;  %7065 = vrot.lane.b32.xlu2 %v9888_v54, %s7685_s25 }
 0x593   : > { %v6916_v14 = vpop.permute.xlu1 %6915  ;;  %v10296_v6 = vpop.permute.xlu0 %6895 }
 0x594   : > { %v10301_v4 = vpop.permute.xlu2 %6950 }
 0x596   : > { %6501 = vmatmul.msk.f32.gmra.mxu0 %vm2052_vm4, %v3667_v3 }
 0x599   : > { %7140 = vrot.lane.b32.xlu1 %v10251_v5, %s7681_s29 }
 0x59a   : > { %7095 = vrot.lane.b32.xlu0 %v10206_v2, %s7684_s14  ;;  %7110 = vrot.lane.b32.xlu2 %v9975_v34, %s7685_s25 }
 0x59b   : > { %v10310_v32 = vpop.permute.xlu1 %6920  ;;  %v10312_v27 = vpop.permute.xlu0 %6900 }
 0x59c   : > { %v10317_v13 = vpop.permute.xlu2 %6955 }
 0x59e   : > { %6502 = vmatmul.msk.f32.gmra.mxu0 %vm2052_vm4, %v3669_v25 }
 0x5a1   : > { %7145 = vrot.lane.b32.xlu1 %v10251_v5, %s7682_s11 }
 0x5a2   : > { %7100 = vrot.lane.b32.xlu0 %v9918_v56, %s7685_s25  ;;  %7125 = vrot.lane.b32.xlu2 %v10056_v33, %s7685_s25 }
 0x5a3   : > { %v10326_v3 = vpop.permute.xlu1 %6925  ;;  %v10328_v9 = vpop.permute.xlu0 %6905 }
 0x5a4   : > { %v10333_v26 = vpop.permute.xlu2 %6960 }
 0x5a6   : > { %6503 = vmatmul.msk.f32.gmra.mxu0 %vm2052_vm4, %v3671_v45 }
 0x5a9   : > { %7150 = vrot.lane.b32.xlu1 %v10251_v5, %s7677_s17  ;;  %s7686_s17 = smov 56  }
 0x5aa   : > { %7115 = vrot.lane.b32.xlu0 %v10002_v31, %s7685_s25  ;;  %7170 = vrot.lane.b32.xlu2 %v10160_v51, %s7685_s25 }
 0x5ab   : > { %v10342_v25 = vpop.permute.xlu1 %6930  ;;  %v10344_v28 = vpop.permute.xlu0 %6910 }
 0x5ac   : > { %11838 = vst [vmem:[#allocation31_spill] sm:$0xff] %v10344_v28  ;;  %v10346_v1 = vpop.permute.xlu2 %6965 }
 0x5b1   : > { %7155 = vrot.lane.b32.xlu1 %v10251_v5, %s7683_s12 }
 0x5b2   : > { %7130 = vrot.lane.b32.xlu0 %v10080_v23, %s7685_s25  ;;  %7185 = vrot.lane.b32.xlu2 %v9888_v54, %s7676_s16 }
 0x5b3   : > { %v10354_v45 = vpop.permute.xlu1 %6935 }
 0x5b4   : > { %v6976_v15 = vpop.permute.xlu0 %6975  ;;  %v10356_v55 = vpop.permute.xlu2 %6970 }
 0x5b5   : > { %v6978_v10 = vunpack.i.h.bf16 %v6976_v15  ;;  %v6977_v22 = vunpack.i.l.bf16 %v6976_v15  ;;  %v6918_v15 = vunpack.i.h.bf16 %v6916_v14 }
 0x5b7   : > { %3907 = vmatpush.msrb.mxu0 %v6978_v10 }
 0x5b9   : > { %3908 = vmatpush.msrb.mxu0 %v6977_v22  ;;  %7160 = vrot.lane.b32.xlu1 %v10251_v5, %s7684_s14  ;;  %v6917_v22 = vunpack.i.l.bf16 %v6916_v14  ;;  %v6858_v14 = vunpack.i.h.bf16 %v10149_v53 }
 0x5ba   : > { %7175 = vrot.lane.b32.xlu0 %v10206_v2, %s7685_s25  ;;  %7200 = vrot.lane.b32.xlu2 %v9975_v34, %s7676_s16  ;;  %v6953_v34 = vunpack.i.h.bf16 %v10301_v4 }
 0x5bb   : > { %3909 = vmatpush.msrb.mxu0 %v6948_v7  ;;  %v10364_v28 = vpop.permute.xlu1 %6940  ;;  %v6887_v7 = vunpack.i.l.bf16 %v10267_v20  ;;  %v6857_v20 = vunpack.i.l.bf16 %v10149_v53 }
 0x5bc   : > { %v6981_v30 = vpop.permute.xlu0 %6980  ;;  %v10366_v42 = vpop.permute.xlu2 %7035 }
 0x5bd   : > { %v6983_v10 = vunpack.i.h.bf16 %v6981_v30  ;;  %3910 = vmatpush.msrb.mxu0 %v6947_v24  ;;  %v6982_v57 = vunpack.i.l.bf16 %v6981_v30  ;;  %v6952_v30 = vunpack.i.l.bf16 %v10301_v4  ;;  %v6893_v4 = vunpack.i.h.bf16 %v10283_v36 }
 0x5bf   : > { %3911 = vmatpush.msrb.mxu0 %v6918_v15  ;;  %4062 = vmatpush.msrb.mxu3 %v6983_v10  ;;  %v6923_v15 = vunpack.i.h.bf16 %v10310_v32  ;;  %v6892_v10 = vunpack.i.l.bf16 %v10283_v36  ;;  %v6833_v36 = vunpack.i.h.bf16 %v10189_v60 }
 0x5c1   : > { %3912 = vmatpush.msrb.mxu0 %v6917_v22  ;;  %4063 = vmatpush.msrb.mxu3 %v6982_v57 }
 0x5c2   : > { %7165 = vrot.lane.b32.xlu1 %v10117_v8, %s7685_s25  ;;  %7190 = vrot.lane.b32.xlu0 %v9918_v56, %s7676_s16 }
 0x5c3   : > { %7215 = vrot.lane.b32.xlu2 %v10056_v33, %s7676_s16  ;;  %3913 = vmatpush.msrb.mxu0 %v6888_v37  ;;  %v10377_v24 = vpop.permute.xlu1 %7005  ;;  %v6922_v33 = vunpack.i.l.bf16 %v10310_v32  ;;  %v6828_v37 = vunpack.i.h.bf16 %v10174_v29  ;;  %v6827_v32 = vunpack.i.l.bf16 %v10174_v29  ;;  %v6768_v29 = vunpack.i.h.bf16 %v10052_v44 }
 0x5c4   : > { %4064 = vmatpush.msrb.mxu3 %v6953_v34  ;;  %v6986_v57 = vpop.permute.xlu0 %6985  ;;  %v10380_v18 = vpop.permute.xlu2 %7040 }
 0x5c5   : > { %3914 = vmatpush.msrb.mxu0 %v6887_v7  ;;  %v6798_v7 = vunpack.i.h.bf16 %v10131_v38 }
 0x5c6   : > { %4065 = vmatpush.msrb.mxu3 %v6952_v30  ;;  %v6863_v30 = vunpack.i.h.bf16 %v10178_v11 }
 0x5c7   : > { %3915 = vmatpush.msrb.mxu0 %v6858_v14 }
 0x5c8   : > { %4066 = vmatpush.msrb.mxu3 %v6923_v15 }
 0x5c9   : > { %3916 = vmatpush.msrb.mxu0 %v6857_v20  ;;  %v6832_v20 = vunpack.i.l.bf16 %v10189_v60  ;;  %v6958_v60 = vunpack.i.h.bf16 %v10317_v13 }
 0x5ca   : > { %4067 = vmatpush.msrb.mxu3 %v6922_v33  ;;  %7180 = vrot.lane.b32.xlu1 %v10251_v5, %s7685_s25  ;;  %v6988_v33 = vunpack.i.h.bf16 %v6986_v57  ;;  %s6702_s25 = sshll.u32 %s11866_s10, 7 }
 0x5cb   : > { %7205 = vrot.lane.b32.xlu0 %v10002_v31, %s7676_s16  ;;  %7230 = vrot.lane.b32.xlu2 %v10160_v51, %s7676_s16  ;;  %v10394_v53 = vpop.permute.xlu1 %7010  ;;  %v6797_v31 = vunpack.i.l.bf16 %v10131_v38  ;;  %v6862_v51 = vunpack.i.l.bf16 %v10178_v11  ;;  %v6767_v38 = vunpack.i.l.bf16 %v10052_v44  ;;  %v6504_v44 = vld [vmem:[%s11744_s5 + $0x40] sm:$0xff] }
 0x5cc   : > { %3917 = vmatpush.msrb.mxu0 %v6828_v37  ;;  %4068 = vmatpush.msrb.mxu3 %v6893_v4  ;;  %v6991_v22 = vpop.permute.xlu0 %6990  ;;  %v10398_v34 = vpop.permute.xlu2 %7045  ;;  %v6987_v37 = vunpack.i.l.bf16 %v6986_v57  ;;  %v6773_v4 = vunpack.i.h.bf16 %v10068_v40 }
 0x5ce   : > { %3918 = vmatpush.msrb.mxu0 %v6827_v32  ;;  %4069 = vmatpush.msrb.mxu3 %v6892_v10  ;;  %v6772_v10 = vunpack.i.l.bf16 %v10068_v40  ;;  %v6898_v40 = vunpack.i.h.bf16 %v10296_v6 }
 0x5d0   : > { %3919 = vmatpush.msrb.mxu0 %v6798_v7  ;;  %4070 = vmatpush.msrb.mxu3 %v6863_v30  ;;  %v6957_v7 = vunpack.i.l.bf16 %v10317_v13  ;;  %v6993_v30 = vunpack.i.h.bf16 %v6991_v22  ;;  %v10448_v13 = vpack.i.bf16 %v10107_v52, %v10109_v62 }
 0x5d2   : > { %3920 = vmatpush.msrb.mxu0 %v6797_v31  ;;  %4071 = vmatpush.msrb.mxu3 %v6862_v51  ;;  %v6992_v31 = vunpack.i.l.bf16 %v6991_v22  ;;  %v6927_v51 = vunpack.i.l.bf16 %v10326_v3 }
 0x5d3   : > { %7195 = vrot.lane.b32.xlu1 %v9946_v48, %s7676_s16  ;;  %7220 = vrot.lane.b32.xlu0 %v10080_v23, %s7676_s16  ;;  %v10410_v14 = vpop.permute.xlu1 %7015  ;;  %v6803_v23 = vunpack.i.h.bf16 %v10146_v61 }
 0x5d4   : > { %7245 = vrot.lane.b32.xlu2 %v9888_v54, %s7686_s17  ;;  %3921 = vmatpush.msrb.mxu0 %v6768_v29  ;;  %v10415_v11 = vpop.permute.xlu0 %6995  ;;  %v10417_v15 = vpop.permute.xlu2 %7050  ;;  %v6802_v54 = vunpack.i.l.bf16 %v10146_v61  ;;  %v6963_v29 = vunpack.i.h.bf16 %v10333_v26 }
 0x5d5   : > { %4072 = vmatpush.msrb.mxu3 %v6833_v36 }
 0x5d6   : > { %3922 = vmatpush.msrb.mxu0 %v6767_v38  ;;  %v6897_v38 = vunpack.i.l.bf16 %v10296_v6 }
 0x5d7   : > { %4073 = vmatpush.msrb.mxu3 %v6832_v20  ;;  %3923 = vmatmul.f32.vlgmr.msrb.gmra.mxu0 %v6504_v44  ;;  %v6962_v20 = vunpack.i.l.bf16 %v10333_v26  ;;  %v6903_v26 = vunpack.i.h.bf16 %v10312_v27 }
 0x5d8   : > { %4217 = vmatpush.msra.mxu0 %v6988_v33  ;;  %v6933_v33 = vunpack.i.h.bf16 %v10342_v25 }
 0x5d9   : > { %4074 = vmatpush.msrb.mxu3 %v6803_v23  ;;  %v6932_v23 = vunpack.i.l.bf16 %v10342_v25  ;;  %v6837_v25 = vunpack.i.l.bf16 %v10220_v16 }
 0x5da   : > { %4218 = vmatpush.msra.mxu0 %v6987_v37  ;;  %v6838_v37 = vunpack.i.h.bf16 %v10220_v16  ;;  %v6506_v16 = vld [vmem:[%s11744_s5 + $0x50] sm:$0xff] }
 0x5db   : > { %4075 = vmatpush.msrb.mxu3 %v6802_v54  ;;  %7210 = vrot.lane.b32.xlu1 %v10030_v47, %s7676_s16  ;;  %v10429_v57 = vpop.permute.xlu1 %7020  ;;  %v6928_v47 = vunpack.i.h.bf16 %v10326_v3  ;;  %v6902_v54 = vunpack.i.l.bf16 %v10312_v27 }
 0x5dc   : > { %7235 = vrot.lane.b32.xlu0 %v10206_v2, %s7676_s16  ;;  %7260 = vrot.lane.b32.xlu2 %v10255_v46, %s7686_s17  ;;  %v10435_v61 = vpop.permute.xlu0 %7000  ;;  %v10437_v32 = vpop.permute.xlu2 %7055  ;;  %v6516_v2 = vld [vmem:[%s11744_s5 + $0x80] sm:$0xff] }
 0x5dd   : > { %4219 = vmatpush.msra.mxu0 %v6958_v60  ;;  %4076 = vmatpush.msrb.mxu3 %v6773_v4  ;;  %v6808_v4 = vunpack.i.h.bf16 %v10176_v59  ;;  %v6807_v60 = vunpack.i.l.bf16 %v10176_v59 }
 0x5df   : > { %4220 = vmatpush.msra.mxu0 %v6957_v7  ;;  %4077 = vmatpush.msrb.mxu3 %v6772_v10  ;;  %v6872_v10 = vunpack.i.l.bf16 %v10224_v12  ;;  %v6778_v7 = vunpack.i.h.bf16 %v10076_v58 }
 0x5e0   : > { %4078 = vmatmul.f32.vlgmr.msrb.gmra.mxu3 %v6516_v2  ;;  %3926 = vmatmul.f32.gmra.mxu0 %v6506_v16  ;;  %v6998_v2 = vunpack.i.h.bf16 %v10415_v11  ;;  %v6907_v16 = vunpack.i.l.bf16 %v10328_v9 }
 0x5e1   : > { %4372 = vmatpush.msra.mxu3 %v6993_v30  ;;  %4221 = vmatpush.msra.mxu0 %v6928_v47  ;;  %v6843_v30 = vunpack.i.h.bf16 %v10235_v19 }
 0x5e3   : > { %4373 = vmatpush.msra.mxu3 %v6992_v31  ;;  %4222 = vmatpush.msra.mxu0 %v6927_v51  ;;  %v10454_v22 = vpop.permute.xlu1 %7025  ;;  %v6842_v31 = vunpack.i.l.bf16 %v10235_v19  ;;  %v6997_v51 = vunpack.i.l.bf16 %v10415_v11  ;;  %v6783_v19 = vunpack.i.h.bf16 %v10092_v21 }
 0x5e4   : > { %7225 = vrot.lane.b32.xlu1 %v10117_v8, %s7676_s16  ;;  %7250 = vrot.lane.b32.xlu0 %v9918_v56, %s7686_s17  ;;  %v10460_v3 = vpop.permute.xlu0 %7070  ;;  %v10462_v36 = vpop.permute.xlu2 %7060  ;;  %v6868_v8 = vunpack.i.h.bf16 %v10193_v39  ;;  %v6867_v56 = vunpack.i.l.bf16 %v10193_v39 }
 0x5e5   : > { %7275 = vrot.lane.b32.xlu2 %v10448_v13, %s7686_s17  ;;  %4223 = vmatpush.msra.mxu0 %v6898_v40  ;;  %v6812_v40 = vunpack.i.l.bf16 %v10191_v17 }
 0x5e6   : > { %4374 = vmatpush.msra.mxu3 %v6963_v29  ;;  %v6968_v29 = vunpack.i.h.bf16 %v10346_v1 }
 0x5e7   : > { %4224 = vmatpush.msra.mxu0 %v6897_v38  ;;  %v10521_v38 = vpack.i.bf16 %v9967_v41, %v9969_v49 }
 0x5e8   : > { %4375 = vmatpush.msra.mxu3 %v6962_v20 }
 0x5e9   : > { %4225 = vmatpush.msra.mxu0 %v6868_v8  ;;  %v6508_v8 = vld [vmem:[%s11744_s5 + $0x60] sm:$0xff] }
 0x5ea   : > { %4376 = vmatpush.msra.mxu3 %v6933_v33  ;;  %v6782_v33 = vunpack.i.l.bf16 %v10092_v21  ;;  %3929 = vmatmul.f32.gmra.mxu0 %v6508_v8  ;;  %v6973_v21 = vunpack.i.h.bf16 %v10356_v55  ;;  %v11845_v8 = vld [vmem:[#allocation22_spill] sm:$0xff] }
 0x5eb   : > { %4226 = vmatpush.msra.mxu0 %v6867_v56  ;;  %v10471_v6 = vpop.permute.xlu1 %7030  ;;  %v6938_v56 = vunpack.i.h.bf16 %v10354_v45 }
 0x5ec   : > { %4377 = vmatpush.msra.mxu3 %v6932_v23  ;;  %7240 = vrot.lane.b32.xlu1 %v10251_v5, %s7676_s16  ;;  %v10478_v44 = vpop.permute.xlu0 %7075  ;;  %v10480_v39 = vpop.permute.xlu2 %7065  ;;  %v6873_v5 = vunpack.i.h.bf16 %v10224_v12  ;;  %v6777_v12 = vunpack.i.l.bf16 %v10076_v58  ;;  %v7003_v23 = vunpack.i.h.bf16 %v10435_v61 }
 0x5ed   : > { %7265 = vrot.lane.b32.xlu0 %v10212_v43, %s7686_s17  ;;  %7290 = vrot.lane.b32.xlu2 %v10084_v63, %s7687_s22 }
 0x5ee   : > { %4227 = vmatpush.msra.mxu0 %v6838_v37  ;;  %4378 = vmatpush.msra.mxu3 %v6903_v26  ;;  %v7002_v37 = vunpack.i.l.bf16 %v10435_v61  ;;  %v6908_v26 = vunpack.i.h.bf16 %v10328_v9 }
 0x5f0   : > { %4228 = vmatpush.msra.mxu0 %v6837_v25  ;;  %4379 = vmatpush.msra.mxu3 %v6902_v54  ;;  %v11839_v54 = vld [vmem:[#allocation14_spill] sm:$0xff] }
 0x5f2   : > { %4229 = vmatpush.msra.mxu0 %v6808_v4  ;;  %4380 = vmatpush.msra.mxu3 %v6873_v5  ;;  %v11840_v4 = vld [vmem:[#allocation27_spill] sm:$0xff] }
 0x5f3   : > { %v10493_v27 = vpop.permute.xlu1 %7105  ;;  %v10546_v5 = vpack.i.bf16 %v11840_v4, %v9969_v49  ;;  %v11841_v49 = vld [vmem:[#allocation25_spill] sm:$0xff] }
 0x5f4   : > { %4230 = vmatpush.msra.mxu0 %v6807_v60  ;;  %4381 = vmatpush.msra.mxu3 %v6872_v10  ;;  %v10499_v59 = vpop.permute.xlu0 %7080  ;;  %v10501_v47 = vpop.permute.xlu2 %7110  ;;  %v6972_v10 = vunpack.i.l.bf16 %v10356_v55  ;;  %v6877_v55 = vunpack.i.l.bf16 %v11841_v49  ;;  %v11847_v4 = vld [vmem:[#allocation29_spill] sm:$0xff] }
 0x5f5   : > { %7255 = vrot.lane.b32.xlu1 %v9946_v48, %s7686_s17  ;;  %7280 = vrot.lane.b32.xlu0 %v10084_v63, %s7686_s17  ;;  %v6813_v48 = vunpack.i.h.bf16 %v10191_v17  ;;  %v6967_v17 = vunpack.i.l.bf16 %v10346_v1  ;;  %v6937_v1 = vunpack.i.l.bf16 %v10354_v45 }
 0x5f6   : > { %7305 = vrot.lane.b32.xlu2 %v10010_v0, %s7686_s17  ;;  %4231 = vmatpush.msra.mxu0 %v6778_v7  ;;  %v6510_v7 = vld [vmem:[%s11744_s5 + $0x70] sm:$0xff] }
 0x5f7   : > { %4382 = vmatpush.msra.mxu3 %v6843_v30  ;;  %v6878_v30 = vunpack.i.h.bf16 %v11841_v49  ;;  %3932 = vmatmul.f32.gmra.mxu0 %v6510_v7  ;;  %v7037_v49 = vunpack.i.l.bf16 %v10366_v42 }
 0x5f8   : > { %4232 = vmatpush.msra.mxu0 %v6777_v12  ;;  %v6943_v12 = vunpack.i.h.bf16 %v10364_v28 }
 0x5f9   : > { %4383 = vmatpush.msra.mxu3 %v6842_v31  ;;  %v6942_v31 = vunpack.i.l.bf16 %v10364_v28 }
 0x5fa   : > { %4527 = vmatpush.msrb.mxu0 %v6998_v2  ;;  %v7073_v2 = vunpack.i.h.bf16 %v10460_v3 }
 0x5fb   : > { %4384 = vmatpush.msra.mxu3 %v6813_v48  ;;  %v10514_v58 = vpop.permute.xlu1 %7120  ;;  %v11842_v48 = vld [vmem:[#allocation28_spill] sm:$0xff] }
 0x5fc   : > { %4528 = vmatpush.msrb.mxu0 %v6997_v51  ;;  %v10523_v11 = vpop.permute.xlu0 %7085  ;;  %v10525_v20 = vpop.permute.xlu2 %7125  ;;  %v6848_v51 = vunpack.i.h.bf16 %v11842_v48 }
 0x5fd   : > { %4385 = vmatpush.msra.mxu3 %v6812_v40  ;;  %7270 = vrot.lane.b32.xlu1 %v10166_v50, %s7686_s17  ;;  %v11843_v40 = vld [vmem:[#allocation31_spill] sm:$0xff] }
 0x5fe   : > { %4529 = vmatpush.msrb.mxu0 %v6968_v29  ;;  %7295 = vrot.lane.b32.xlu0 %v10040_v35, %s7686_s17  ;;  %v6913_v29 = vunpack.i.h.bf16 %v11843_v40 }
 0x5ff   : > { %7320 = vrot.lane.b32.xlu2 %v10521_v38, %s7686_s17  ;;  %4386 = vmatpush.msra.mxu3 %v6783_v19 }
 0x600   : > { %4530 = vmatpush.msrb.mxu0 %v6967_v17  ;;  %v11844_v17 = vld [vmem:[#allocation12_spill] sm:$0xff] }
 0x601   : > { %4387 = vmatpush.msra.mxu3 %v6782_v33  ;;  %v10572_v33 = vpack.i.bf16 %v11845_v8, %v11844_v17 }
 0x602   : > { %4531 = vmatpush.msrb.mxu0 %v6938_v56 }
 0x603   : > { %4682 = vmatpush.msrb.mxu3 %v7003_v23  ;;  %v7136_v25 = vpop.permute.xlu1 %7135 }
 0x604   : > { %4532 = vmatpush.msrb.mxu0 %v6937_v1  ;;  %v7138_v60 = vunpack.i.h.bf16 %v7136_v25  ;;  %v10548_v45 = vpop.permute.xlu0 %7090  ;;  %v10550_v61 = vpop.permute.xlu2 %7170  ;;  %v7137_v9 = vunpack.i.l.bf16 %v7136_v25  ;;  %v6847_v1 = vunpack.i.l.bf16 %v11842_v48  ;;  %v11851_v48 = vld [vmem:[#allocation20_spill] sm:$0xff] }
 0x605   : > { %4683 = vmatpush.msrb.mxu3 %v7002_v37  ;;  %7285 = vrot.lane.b32.xlu1 %v11839_v54, %s7686_s17  ;;  %v6912_v37 = vunpack.i.l.bf16 %v11843_v40  ;;  %s7690_s17 = smov 8  }
 0x606   : > { %4533 = vmatpush.msrb.mxu0 %v6908_v26  ;;  %7310 = vrot.lane.b32.xlu0 %v10040_v35, %s7687_s22  ;;  %v7072_v26 = vunpack.i.l.bf16 %v10460_v3  ;;  %v6882_v3 = vunpack.i.l.bf16 %v11847_v4 }
 0x607   : > { %4684 = vmatpush.msrb.mxu3 %v6973_v21  ;;  %7335 = vrot.lane.b32.xlu2 %v10546_v5, %s7687_s22  ;;  %v11846_v21 = vld [vmem:[#allocation23_spill] sm:$0xff] }
 0x608   : > { %4534 = vmatpush.msrb.mxu0 %v6907_v16  ;;  %3944 = vmatpush.msra.mxu1 %v7138_v60  ;;  %v6818_v25 = vunpack.i.h.bf16 %v11846_v21  ;;  %v6883_v60 = vunpack.i.h.bf16 %v11847_v4  ;;  %v7038_v16 = vunpack.i.h.bf16 %v10366_v42  ;;  %v6817_v7 = vunpack.i.l.bf16 %v11846_v21  ;;  %v6505_v21 = vld [vmem:[%s11744_s5 + $0x48] sm:$0xff] }
 0x609   : > { %4685 = vmatpush.msrb.mxu3 %v6972_v10 }
 0x60a   : > { %4535 = vmatpush.msrb.mxu0 %v6878_v30  ;;  %3945 = vmatpush.msra.mxu1 %v7137_v9  ;;  %v11848_v30 = vld [vmem:[#allocation13_spill] sm:$0xff]  ;;  %v11849_v9 = vld [vmem:[#allocation30_spill] sm:$0xff] }
 0x60b   : > { %4686 = vmatpush.msrb.mxu3 %v6943_v12  ;;  %v7141_v19 = vpop.permute.xlu1 %7140  ;;  %v6788_v12 = vunpack.i.h.bf16 %v11848_v30  ;;  %v6787_v8 = vunpack.i.l.bf16 %v11848_v30  ;;  %v7013_v30 = vunpack.i.h.bf16 %v10394_v53 }
 0x60c   : > { %4536 = vmatpush.msrb.mxu0 %v6877_v55  ;;  %3946 = vmatpush.msra.mxu1 %v7073_v2  ;;  %v7143_v28 = vunpack.i.h.bf16 %v7141_v19  ;;  %v10574_v56 = vpop.permute.xlu0 %7095  ;;  %v10576_v23 = vpop.permute.xlu2 %7185  ;;  %v7142_v10 = vunpack.i.l.bf16 %v7141_v19  ;;  %v6853_v55 = vunpack.i.h.bf16 %v11849_v9  ;;  %v11850_v2 = vld [vmem:[#allocation7_spill] sm:$0xff]  ;;  %v7078_v19 = vunpack.i.h.bf16 %v10478_v44 }
 0x60d   : > { %4687 = vmatpush.msrb.mxu3 %v6942_v31  ;;  %7300 = vrot.lane.b32.xlu1 %v11839_v54, %s7687_s22 }
 0x60e   : > { %4537 = vmatpush.msrb.mxu0 %v6848_v51  ;;  %7325 = vrot.lane.b32.xlu0 %v10010_v0, %s7687_s22  ;;  %v10597_v51 = vpack.i.bf16 %v11851_v48, %v11850_v2 }
 0x60f   : > { %4688 = vmatpush.msrb.mxu3 %v6913_v29  ;;  %7350 = vrot.lane.b32.xlu2 %v10572_v33, %s7687_s22  ;;  %v7008_v29 = vunpack.i.h.bf16 %v10377_v24 }
 0x610   : > { %4538 = vmatpush.msrb.mxu0 %v6847_v1  ;;  %3947 = vmatpush.msra.mxu1 %v7072_v26  ;;  %v7007_v1 = vunpack.i.l.bf16 %v10377_v24  ;;  %v7042_v24 = vunpack.i.l.bf16 %v10380_v18 }
 0x611   : > { %4689 = vmatpush.msrb.mxu3 %v6912_v37  ;;  %4099 = vmatpush.msrb.mxu2 %v7143_v28  ;;  %v6852_v28 = vunpack.i.l.bf16 %v11849_v9  ;;  %v7077_v37 = vunpack.i.l.bf16 %v10478_v44  ;;  %v7083_v9 = vunpack.i.h.bf16 %v10499_v59 }
 0x612   : > { %4539 = vmatpush.msrb.mxu0 %v6818_v25  ;;  %3948 = vmatpush.msra.mxu1 %v7038_v16  ;;  %v11852_v25 = vld [vmem:[#allocation24_spill] sm:$0xff] }
 0x613   : > { %4690 = vmatpush.msrb.mxu3 %v6883_v60  ;;  %4100 = vmatpush.msrb.mxu2 %v7142_v10  ;;  %v7146_v31 = vpop.permute.xlu1 %7145  ;;  %v6823_v4 = vunpack.i.h.bf16 %v11852_v25  ;;  %v7043_v60 = vunpack.i.h.bf16 %v10380_v18  ;;  %v6822_v16 = vunpack.i.l.bf16 %v11852_v25  ;;  %v11855_v25 = vld [vmem:[#allocation9_spill] sm:$0xff] }
 0x614   : > { %4540 = vmatpush.msrb.mxu0 %v6817_v7  ;;  %3949 = vmatpush.msra.mxu1 %v7037_v49  ;;  %v10599_v40 = vpop.permute.xlu0 %7100  ;;  %v10601_v42 = vpop.permute.xlu2 %7200  ;;  %v7148_v26 = vunpack.i.h.bf16 %v7146_v31  ;;  %v7147_v44 = vunpack.i.l.bf16 %v7146_v31  ;;  %v11853_v7 = vld [vmem:[#allocation16_spill] sm:$0xff]  ;;  %v7012_v31 = vunpack.i.l.bf16 %v10394_v53  ;;  %v7048_v53 = vunpack.i.h.bf16 %v10398_v34 }
 0x615   : > { %4691 = vmatpush.msrb.mxu3 %v6882_v3  ;;  %7315 = vrot.lane.b32.xlu1 %v10255_v46, %s7688_s13  ;;  %v6793_v3 = vunpack.i.h.bf16 %v11853_v7  ;;  %v6792_v18 = vunpack.i.l.bf16 %v11853_v7  ;;  %v7087_v7 = vunpack.i.l.bf16 %v10523_v11 }
 0x616   : > { %4541 = vmatpush.msrb.mxu0 %v6788_v12  ;;  %7340 = vrot.lane.b32.xlu0 %v10166_v50, %s7688_s13 }
 0x617   : > { %4692 = vmatpush.msrb.mxu3 %v6853_v55  ;;  %7365 = vrot.lane.b32.xlu2 %v10597_v51, %s7687_s22  ;;  %v6518_v55 = vld [vmem:[%s11744_s5 + $0x90] sm:$0xff] }
 0x618   : > { %3950 = vmatpush.msra.mxu1 %v7008_v29  ;;  %4101 = vmatpush.msrb.mxu2 %v7078_v19  ;;  %v6517_v29 = vld [vmem:[%s11744_s5 + $0x88] sm:$0xff]  ;;  %v7082_v19 = vunpack.i.l.bf16 %v10499_v59  ;;  %v6528_v59 = vld [vmem:[%s11744_s5 + $0xc0] sm:$0xff] }
 0x619   : > { %4542 = vmatpush.msrb.mxu0 %v6787_v8  ;;  %4693 = vmatpush.msrb.mxu3 %v6852_v28  ;;  %v6507_v8 = vld [vmem:[%s11744_s5 + $0x58] sm:$0xff]  ;;  %v11854_v28 = vld [vmem:[#allocation26_spill] sm:$0xff] }
 0x61a   : > { %3951 = vmatpush.msra.mxu1 %v7007_v1  ;;  %4102 = vmatpush.msrb.mxu2 %v7077_v37  ;;  %v10650_v1 = vpack.i.bf16 %v11854_v28, %v9967_v41 }
 0x61b   : > { %4694 = vmatpush.msrb.mxu3 %v6823_v4  ;;  %6512 = vmatmul.msk.f32.vlgmr.msra.gmra.mxu1 %vm2052_vm4, %v6505_v21  ;;  %v7151_v10 = vpop.permute.xlu1 %7150  ;;  %v7047_v21 = vunpack.i.l.bf16 %v10398_v34  ;;  %v11856_v4 = vld [vmem:[#allocation19_spill] sm:$0xff]  ;;  %v6520_v34 = vld [vmem:[%s11744_s5 + $0xa0] sm:$0xff] }
 0x61c   : > { %4103 = vmatpush.msrb.mxu2 %v7043_v60  ;;  %4254 = vmatpush.msrb.mxu1 %v7148_v26  ;;  %v10624_v49 = vpop.permute.xlu0 %7115  ;;  %v7153_v48 = vunpack.i.h.bf16 %v7151_v10  ;;  %v7152_v37 = vunpack.i.l.bf16 %v7151_v10  ;;  %v10661_v60 = vpack.i.bf16 %v11856_v4, %v11855_v25  ;;  %v7018_v10 = vunpack.i.h.bf16 %v10410_v14 }
 0x61d   : > { %4695 = vmatpush.msrb.mxu3 %v6822_v16  ;;  %7330 = vrot.lane.b32.xlu1 %v10212_v43, %s7688_s13  ;;  %v10627_v12 = vpop.permute.xlu2 %7215  ;;  %v7088_v16 = vunpack.i.h.bf16 %v10523_v11  ;;  %v7022_v4 = vunpack.i.l.bf16 %v10429_v57 }
 0x61e   : > { %4104 = vmatpush.msrb.mxu2 %v7042_v24  ;;  %4255 = vmatpush.msrb.mxu1 %v7147_v44 }
 0x61f   : > { %4696 = vmatpush.msrb.mxu3 %v6793_v3  ;;  %7355 = vrot.lane.b32.xlu0 %v10448_v13, %s7688_s13  ;;  %v6519_v3 = vld [vmem:[%s11744_s5 + $0x98] sm:$0xff] }
 0x620   : > { %7380 = vrot.lane.b32.xlu2 %v10084_v63, %s7688_s13  ;;  %4105 = vmatpush.msrb.mxu2 %v7013_v30  ;;  %v7017_v30 = vunpack.i.l.bf16 %v10410_v14  ;;  %v11857_v14 = vld [vmem:[#allocation11_spill] sm:$0xff] }
 0x621   : > { %4256 = vmatpush.msrb.mxu1 %v7083_v9  ;;  %4697 = vmatpush.msrb.mxu3 %v6792_v18  ;;  %v6509_v9 = vld [vmem:[%s11744_s5 + $0x68] sm:$0xff] }
 0x622   : > { %4106 = vmatpush.msrb.mxu2 %v7012_v31  ;;  %4081 = vmatmul.f32.gmra.mxu3 %v6518_v55  ;;  %v7053_v55 = vunpack.i.h.bf16 %v10417_v15  ;;  %v7052_v31 = vunpack.i.l.bf16 %v10417_v15  ;;  %v7128_v15 = vunpack.i.h.bf16 %v10525_v20 }
 0x623   : > { %4257 = vmatpush.msrb.mxu1 %v7082_v19  ;;  %6524 = vmatmul.msk.f32.vlgmr.msrb.gmra.mxu2 %vm2052_vm4, %v6517_v29  ;;  %v7156_v26 = vpop.permute.xlu1 %7155 }
 0x624   : > { %6513 = vmatmul.msk.f32.gmra.mxu1 %vm2052_vm4, %v6507_v8  ;;  %4409 = vmatpush.msra.mxu2 %v7153_v48  ;;  %v7131_v41 = vpop.permute.xlu0 %7130  ;;  %v7158_v18 = vunpack.i.h.bf16 %v7156_v26  ;;  %v11858_v48 = vld [vmem:[#allocation21_spill] sm:$0xff]  ;;  %v7157_v8 = vunpack.i.l.bf16 %v7156_v26 }
 0x625   : > { %4258 = vmatpush.msrb.mxu1 %v7048_v53  ;;  %7345 = vrot.lane.b32.xlu1 %v10650_v1, %s7687_s22  ;;  %v7133_v24 = vunpack.i.h.bf16 %v7131_v41  ;;  %v10664_v44 = vpop.permute.xlu2 %7230  ;;  %v7132_v11 = vunpack.i.l.bf16 %v7131_v41  ;;  %v10688_v29 = vpack.i.bf16 %v11858_v48, %v11857_v14  ;;  %v11859_v53 = vld [vmem:[#allocation6_spill] sm:$0xff]  ;;  %v7127_v41 = vunpack.i.l.bf16 %v10525_v20 }
 0x626   : > { %4410 = vmatpush.msra.mxu2 %v7152_v37  ;;  %4233 = vmatmul.f32.vlgmr.msra.gmra.mxu0 %v6528_v59  ;;  %v10692_v28 = vpack.i.bf16 %v10107_v52, %v11859_v53  ;;  %v7023_v37 = vunpack.i.h.bf16 %v10429_v57  ;;  %v6522_v52 = vld [vmem:[%s11744_s5 + $0xb0] sm:$0xff]  ;;  %v7058_v57 = vunpack.i.h.bf16 %v10437_v32  ;;  %v7123_v20 = vunpack.i.h.bf16 %v10514_v58 }
 0x627   : > { %4259 = vmatpush.msrb.mxu1 %v7047_v21  ;;  %7370 = vrot.lane.b32.xlu0 %v10661_v60, %s7687_s22  ;;  %v7093_v21 = vunpack.i.h.bf16 %v10548_v45  ;;  %v7027_v48 = vunpack.i.l.bf16 %v10454_v22 }
 0x628   : > { %7395 = vrot.lane.b32.xlu2 %v10084_v63, %s7675_s15  ;;  %4411 = vmatpush.msra.mxu2 %v7088_v16  ;;  %v7092_v16 = vunpack.i.l.bf16 %v10548_v45  ;;  %v11860_v45 = vld [vmem:[#allocation8_spill] sm:$0xff] }
 0x629   : > { %4260 = vmatpush.msrb.mxu1 %v7018_v10  ;;  %4837 = vmatpush.msra.mxu0 %v7133_v24  ;;  %v6511_v10 = vld [vmem:[%s11744_s5 + $0x78] sm:$0xff] }
 0x62a   : > { %4412 = vmatpush.msra.mxu2 %v7087_v7  ;;  %4084 = vmatmul.f32.gmra.mxu3 %v6520_v34  ;;  %v6521_v34 = vld [vmem:[%s11744_s5 + $0xa8] sm:$0xff]  ;;  %v10725_v7 = vpack.i.bf16 %v10109_v62, %v11860_v45 }
 0x62b   : > { %4261 = vmatpush.msrb.mxu1 %v7017_v30  ;;  %6525 = vmatmul.msk.f32.gmra.mxu2 %vm2052_vm4, %v6519_v3  ;;  %v7161_v19 = vpop.permute.xlu1 %7160  ;;  %v7057_v3 = vunpack.i.l.bf16 %v10437_v32  ;;  %v7098_v32 = vunpack.i.h.bf16 %v10574_v56 }
 0x62c   : > { %6514 = vmatmul.msk.f32.gmra.mxu1 %vm2052_vm4, %v6509_v9  ;;  %4413 = vmatpush.msra.mxu2 %v7053_v55  ;;  %v10694_v59 = vpop.permute.xlu0 %7175  ;;  %v7163_v24 = vunpack.i.h.bf16 %v7161_v19  ;;  %v7162_v30 = vunpack.i.l.bf16 %v7161_v19  ;;  %v7122_v55 = vunpack.i.l.bf16 %v10514_v58  ;;  %v6530_v58 = vld [vmem:[%s11744_s5 + $0xd0] sm:$0xff]  ;;  %v7097_v19 = vunpack.i.l.bf16 %v10574_v56  ;;  %v6540_v56 = vld [vmem:[%s11744_s5 + $0x100] sm:$0xff] }
 0x62d   : > { %4564 = vmatpush.msra.mxu1 %v7158_v18  ;;  %4838 = vmatpush.msra.mxu0 %v7132_v11  ;;  %v7028_v11 = vunpack.i.h.bf16 %v10454_v22  ;;  %v7063_v22 = vunpack.i.h.bf16 %v10462_v36 }
 0x62e   : > { %4414 = vmatpush.msra.mxu2 %v7052_v31  ;;  %7360 = vrot.lane.b32.xlu1 %v10688_v29, %s7687_s22  ;;  %v10703_v26 = vpop.permute.xlu2 %7245  ;;  %v7118_v31 = vunpack.i.h.bf16 %v10624_v49 }
 0x62f   : > { %4565 = vmatpush.msra.mxu1 %v7157_v8  ;;  %7385 = vrot.lane.b32.xlu0 %v10692_v28, %s7687_s22  ;;  %v7117_v8 = vunpack.i.l.bf16 %v10624_v49 }
 0x630   : > { %7410 = vrot.lane.b32.xlu2 %v10010_v0, %s7688_s13  ;;  %4415 = vmatpush.msra.mxu2 %v7023_v37  ;;  %v6523_v37 = vld [vmem:[%s11744_s5 + $0xb8] sm:$0xff] }
 0x631   : > { %4566 = vmatpush.msra.mxu1 %v7093_v21  ;;  %4839 = vmatpush.msra.mxu0 %v7128_v15  ;;  %v6529_v15 = vld [vmem:[%s11744_s5 + $0xc8] sm:$0xff]  ;;  %v7113_v21 = vunpack.i.h.bf16 %v10501_v47 }
 0x632   : > { %4416 = vmatpush.msra.mxu2 %v7022_v4  ;;  %4087 = vmatmul.f32.gmra.mxu3 %v6522_v52  ;;  %v7062_v52 = vunpack.i.l.bf16 %v10462_v36  ;;  %v7112_v4 = vunpack.i.l.bf16 %v10501_v47  ;;  %v7108_v36 = vunpack.i.h.bf16 %v10493_v27  ;;  %v6532_v47 = vld [vmem:[%s11744_s5 + $0xe0] sm:$0xff] }
 0x633   : > { %4567 = vmatpush.msra.mxu1 %v7092_v16  ;;  %4840 = vmatpush.msra.mxu0 %v7127_v41  ;;  %v10771_v16 = vpack.i.bf16 %v11857_v14, %v11844_v17  ;;  %v7032_v17 = vunpack.i.l.bf16 %v10471_v6  ;;  %v7107_v14 = vunpack.i.l.bf16 %v10493_v27  ;;  %v7102_v27 = vunpack.i.l.bf16 %v10599_v40 }
 0x634   : > { %6515 = vmatmul.msk.f32.gmra.mxu1 %vm2052_vm4, %v6511_v10  ;;  %6526 = vmatmul.msk.f32.gmra.mxu2 %vm2052_vm4, %v6521_v34  ;;  %v10728_v18 = vpop.permute.xlu1 %7165  ;;  %v10730_v9 = vpop.permute.xlu0 %7190  ;;  %v7033_v34 = vunpack.i.h.bf16 %v10471_v6  ;;  %v6542_v6 = vld [vmem:[%s11744_s5 + $0x110] sm:$0xff] }
 0x635   : > { %4568 = vmatpush.msra.mxu1 %v7058_v57  ;;  %4719 = vmatpush.msrb.mxu2 %v7163_v24  ;;  %v6531_v57 = vld [vmem:[%s11744_s5 + $0xd8] sm:$0xff] }
 0x636   : > { %4841 = vmatpush.msra.mxu0 %v7123_v20  ;;  %7375 = vrot.lane.b32.xlu1 %v10725_v7, %s7687_s22  ;;  %v10736_v62 = vpop.permute.xlu2 %7260  ;;  %v6541_v20 = vld [vmem:[%s11744_s5 + $0x108] sm:$0xff] }
 0x637   : > { %4569 = vmatpush.msra.mxu1 %v7057_v3  ;;  %4720 = vmatpush.msrb.mxu2 %v7162_v30  ;;  %v7103_v3 = vunpack.i.h.bf16 %v10599_v40  ;;  %v6534_v40 = vld [vmem:[%s11744_s5 + $0xf0] sm:$0xff] }
 0x638   : > { %4842 = vmatpush.msra.mxu0 %v7122_v55  ;;  %7400 = vrot.lane.b32.xlu0 %v10040_v35, %s7688_s13  ;;  %v7178_v55 = vunpack.i.h.bf16 %v10694_v59 }
 0x639   : > { %7425 = vrot.lane.b32.xlu2 %v10521_v38, %s7688_s13  ;;  %4570 = vmatpush.msra.mxu1 %v7028_v11 }
 0x63a   : > { %4721 = vmatpush.msrb.mxu2 %v7098_v32  ;;  %4843 = vmatpush.msra.mxu0 %v7118_v31 }
 0x63b   : > { %4571 = vmatpush.msra.mxu1 %v7027_v48  ;;  %4236 = vmatmul.f32.gmra.mxu0 %v6530_v58  ;;  %v7068_v58 = vunpack.i.h.bf16 %v10480_v39  ;;  %v7177_v48 = vunpack.i.l.bf16 %v10694_v59  ;;  %v6533_v59 = vld [vmem:[%s11744_s5 + $0xe8] sm:$0xff] }
 0x63c   : > { %4722 = vmatpush.msrb.mxu2 %v7097_v19  ;;  %4844 = vmatpush.msra.mxu0 %v7117_v8  ;;  %v7181_v49 = vpop.permute.xlu1 %7180  ;;  %v7067_v8 = vunpack.i.l.bf16 %v10480_v39  ;;  %v6544_v39 = vld [vmem:[%s11744_s5 + $0x120] sm:$0xff] }
 0x63d   : > { %6527 = vmatmul.msk.f32.gmra.mxu2 %vm2052_vm4, %v6523_v37  ;;  %6536 = vmatmul.msk.f32.vlgmr.msrb.gmra.mxu1 %vm2052_vm4, %v6529_v15  ;;  %v10765_v41 = vpop.permute.xlu0 %7205  ;;  %v7183_v24 = vunpack.i.h.bf16 %v7181_v49  ;;  %v7182_v30 = vunpack.i.l.bf16 %v7181_v49  ;;  %v7173_v37 = vunpack.i.h.bf16 %v10550_v61  ;;  %v6543_v15 = vld [vmem:[%s11744_s5 + $0x118] sm:$0xff]  ;;  %v7168_v49 = vunpack.i.h.bf16 %v10728_v18 }
 0x63e   : > { %4723 = vmatpush.msrb.mxu2 %v7063_v22  ;;  %4845 = vmatpush.msra.mxu0 %v7113_v21  ;;  %v7172_v22 = vunpack.i.l.bf16 %v10550_v61 }
 0x63f   : > { %7390 = vrot.lane.b32.xlu1 %v11839_v54, %s7688_s13  ;;  %v10773_v10 = vpop.permute.xlu2 %7275  ;;  %4388 = vmatmul.f32.vlgmr.msra.gmra.mxu3 %v6540_v56  ;;  %v7218_v56 = vunpack.i.h.bf16 %v10627_v12 }
 0x640   : > { %4724 = vmatpush.msrb.mxu2 %v7062_v52  ;;  %4846 = vmatpush.msra.mxu0 %v7112_v4  ;;  %v7217_v4 = vunpack.i.l.bf16 %v10627_v12  ;;  %v6535_v12 = vld [vmem:[%s11744_s5 + $0xf8] sm:$0xff] }
 0x641   : > { %7415 = vrot.lane.b32.xlu0 %v10040_v35, %s7675_s15  ;;  %7440 = vrot.lane.b32.xlu2 %v10771_v16, %s7688_s13 }
 0x642   : > { %4725 = vmatpush.msrb.mxu2 %v7033_v34  ;;  %4847 = vmatpush.msra.mxu0 %v7108_v36 }
 0x643   : > { %4874 = vmatpush.msrb.mxu1 %v7183_v24  ;;  %4239 = vmatmul.f32.gmra.mxu0 %v6532_v47  ;;  %v7167_v24 = vunpack.i.l.bf16 %v10728_v18  ;;  %v6552_v47 = vld [vmem:[%s11744_s5 + $0x140] sm:$0xff]  ;;  %v6545_v18 = vld [vmem:[%s11744_s5 + $0x128] sm:$0xff] }
 0x644   : > { %4726 = vmatpush.msrb.mxu2 %v7032_v17  ;;  %4848 = vmatpush.msra.mxu0 %v7107_v14  ;;  %v6546_v14 = vld [vmem:[%s11744_s5 + $0x130] sm:$0xff] }
 0x645   : > { %6537 = vmatmul.msk.f32.gmra.mxu1 %vm2052_vm4, %v6531_v57  ;;  %6548 = vmatmul.msk.f32.vlgmr.msra.gmra.mxu2 %vm2052_vm4, %v6541_v20  ;;  %v10800_v11 = vpop.permute.xlu1 %7195  ;;  %v7221_v32 = vpop.permute.xlu0 %7220  ;;  %v7208_v57 = vunpack.i.h.bf16 %v10765_v41 }
 0x646   : > { %4849 = vmatpush.msra.mxu0 %v7103_v3  ;;  %4875 = vmatpush.msrb.mxu1 %v7182_v30  ;;  %v7223_v31 = vunpack.i.h.bf16 %v7221_v32  ;;  %v7222_v21 = vunpack.i.l.bf16 %v7221_v32  ;;  %v10864_v3 = vpack.i.bf16 %v11855_v25, %v11850_v2  ;;  %v7203_v2 = vunpack.i.h.bf16 %v10601_v42  ;;  %v6547_v25 = vld [vmem:[%s11744_s5 + $0x138] sm:$0xff] }
 0x647   : > { %7405 = vrot.lane.b32.xlu1 %v11839_v54, %s7675_s15  ;;  %4391 = vmatmul.f32.gmra.mxu3 %v6542_v6  ;;  %v10806_v19 = vpop.permute.xlu2 %7290  ;;  %v7207_v6 = vunpack.i.l.bf16 %v10765_v41  ;;  %v6553_v41 = vld [vmem:[%s11744_s5 + $0x148] sm:$0xff]  ;;  %v7202_v32 = vunpack.i.l.bf16 %v10601_v42 }
 0x648   : > { %4850 = vmatpush.msra.mxu0 %v7102_v27  ;;  %4876 = vmatpush.msrb.mxu1 %v7178_v55  ;;  %v6554_v27 = vld [vmem:[%s11744_s5 + $0x150] sm:$0xff] }
 0x649   : > { %7430 = vrot.lane.b32.xlu0 %v10010_v0, %s7675_s15  ;;  %7455 = vrot.lane.b32.xlu2 %v10650_v1, %s7675_s15 }
 0x64a   : > { %4851 = vmatpush.msra.mxu0 %v7068_v58  ;;  %4877 = vmatpush.msrb.mxu1 %v7177_v48  ;;  %v6564_v58 = vld [vmem:[%s11744_s5 + $0x180] sm:$0xff]  ;;  %v10892_v48 = vpop.f32.mrf.mxu0 }
 0x64b   : > { %4992 = vmatpush.msra.mxu3 %v7223_v31  ;;  %4242 = vmatmul.f32.gmra.mxu0 %v6534_v40  ;;  %v7262_v31 = vunpack.i.l.bf16 %v10736_v62  ;;  %v7263_v40 = vunpack.i.h.bf16 %v10736_v62  ;;  %v6556_v62 = vld [vmem:[%s11744_s5 + $0x160] sm:$0xff] }
 0x64c   : > { %4852 = vmatpush.msra.mxu0 %v7067_v8  ;;  %4878 = vmatpush.msrb.mxu1 %v7173_v37  ;;  %v7198_v8 = vunpack.i.h.bf16 %v10800_v11 }
 0x64d   : > { %6538 = vmatmul.msk.f32.gmra.mxu1 %vm2052_vm4, %v6533_v59  ;;  %6549 = vmatmul.msk.f32.gmra.mxu2 %vm2052_vm4, %v6543_v15  ;;  %v7211_v52 = vpop.permute.xlu1 %7210  ;;  %v7197_v59 = vunpack.i.l.bf16 %v10800_v11  ;;  %v6555_v11 = vld [vmem:[%s11744_s5 + $0x158] sm:$0xff] }
 0x64e   : > { %4879 = vmatpush.msrb.mxu1 %v7172_v22  ;;  %4993 = vmatpush.msra.mxu3 %v7222_v21  ;;  %v10833_v61 = vpop.permute.xlu0 %7235  ;;  %v7213_v34 = vunpack.i.h.bf16 %v7211_v52  ;;  %v7212_v17 = vunpack.i.l.bf16 %v7211_v52  ;;  %v7192_v52 = vunpack.i.l.bf16 %v10730_v9 }
 0x64f   : > { %7420 = vrot.lane.b32.xlu1 %v10255_v46, %s7689_s24  ;;  %4394 = vmatmul.f32.gmra.mxu3 %v6544_v39  ;;  %v7193_v39 = vunpack.i.h.bf16 %v10730_v9  ;;  %v7187_v9 = vunpack.i.l.bf16 %v10576_v23 }
 0x650   : > { %4880 = vmatpush.msrb.mxu1 %v7168_v49  ;;  %4994 = vmatpush.msra.mxu3 %v7218_v56  ;;  %v10837_v36 = vpop.permute.xlu2 %7305  ;;  %v6565_v49 = vld [vmem:[%s11744_s5 + $0x188] sm:$0xff] }
 0x651   : > { %7445 = vrot.lane.b32.xlu0 %v10546_v5, %s7675_s15  ;;  %7470 = vrot.lane.b32.xlu2 %v10448_v13, %s7689_s24 }
 0x652   : > { %4881 = vmatpush.msrb.mxu1 %v7167_v24  ;;  %4995 = vmatpush.msra.mxu3 %v7217_v4  ;;  %v7238_v24 = vunpack.i.h.bf16 %v10833_v61 }
 0x653   : > { %4543 = vmatmul.f32.vlgmr.msrb.gmra.mxu0 %v6552_v47 }
 0x654   : > { %4996 = vmatpush.msra.mxu3 %v7213_v34  ;;  %v7188_v34 = vunpack.i.h.bf16 %v10576_v23  ;;  %v7233_v23 = vunpack.i.h.bf16 %v10664_v44 }
 0x655   : > { %6539 = vmatmul.msk.f32.gmra.mxu1 %vm2052_vm4, %v6535_v12  ;;  %6550 = vmatmul.msk.f32.gmra.mxu2 %vm2052_vm4, %v6545_v18  ;;  %v7237_v12 = vunpack.i.l.bf16 %v10833_v61  ;;  %v7292_v61 = vunpack.i.l.bf16 %v10806_v19 }
 0x656   : > { %4997 = vmatpush.msra.mxu3 %v7212_v17  ;;  %v10858_v20 = vpop.permute.xlu1 %7225  ;;  %v10866_v30 = vpop.permute.xlu0 %7250  ;;  %v6566_v17 = vld [vmem:[%s11744_s5 + $0x190] sm:$0xff] }
 0x657   : > { %7435 = vrot.lane.b32.xlu1 %v10212_v43, %s7689_s24  ;;  %4397 = vmatmul.f32.gmra.mxu3 %v6546_v14  ;;  %v10929_v14 = vpop.f32.mrf.mxu0 }
 0x658   : > { %4998 = vmatpush.msra.mxu3 %v7208_v57 }
 0x659   : > { %7460 = vrot.lane.b32.xlu0 %v10864_v3, %s7688_s13  ;;  %7485 = vrot.lane.b32.xlu2 %v10597_v51, %s7675_s15  ;;  %v10876_v55 = vpop.permute.xlu2 %7320 }
 0x65a   : > { %4999 = vmatpush.msra.mxu3 %v7207_v6 }
 0x65b   : > { %4546 = vmatmul.f32.gmra.mxu0 %v6554_v27  ;;  %v6557_v27 = vld [vmem:[%s11744_s5 + $0x168] sm:$0xff] }
 0x65c   : > { %5000 = vmatpush.msra.mxu3 %v7203_v2  ;;  %v6567_v2 = vld [vmem:[%s11744_s5 + $0x198] sm:$0xff] }
 0x65d   : > { %6551 = vmatmul.msk.f32.gmra.mxu2 %vm2052_vm4, %v6547_v25  ;;  %6560 = vmatmul.msk.f32.vlgmr.msra.gmra.mxu1 %vm2052_vm4, %v6553_v41  ;;  %v7232_v25 = vunpack.i.l.bf16 %v10664_v44  ;;  %v7293_v41 = vunpack.i.h.bf16 %v10806_v19  ;;  %v7227_v19 = vunpack.i.l.bf16 %v10858_v20 }
 0x65e   : > { %5184 = vmatpush.msra.mxu1 %v7262_v31  ;;  %5001 = vmatpush.msra.mxu3 %v7202_v32  ;;  %v7241_v42 = vpop.permute.xlu1 %7240  ;;  %v10951_v31 = vpack.i.bf16 %v11859_v53, %v11860_v45  ;;  %v6568_v53 = vld [vmem:[%s11744_s5 + $0x1a0] sm:$0xff] }
 0x65f   : > { %7450 = vrot.lane.b32.xlu1 %v10166_v50, %s7689_s24  ;;  %v7266_v37 = vpop.permute.xlu0 %7265  ;;  %4698 = vmatmul.f32.vlgmr.msrb.gmra.mxu3 %v6564_v58  ;;  %v7243_v15 = vunpack.i.h.bf16 %v7241_v42  ;;  %v7242_v56 = vunpack.i.l.bf16 %v7241_v42  ;;  %v6558_v58 = vld [vmem:[%s11744_s5 + $0x170] sm:$0xff] }
 0x660   : > { %5185 = vmatpush.msra.mxu1 %v7263_v40  ;;  %5002 = vmatpush.msra.mxu3 %v7198_v8  ;;  %v7267_v22 = vunpack.i.l.bf16 %v7266_v37  ;;  %v7268_v4 = vunpack.i.h.bf16 %v7266_v37  ;;  %v7228_v40 = vunpack.i.h.bf16 %v10858_v20  ;;  %v6559_v20 = vld [vmem:[%s11744_s5 + $0x178] sm:$0xff] }
 0x661   : > { %7475 = vrot.lane.b32.xlu0 %v10688_v29, %s7675_s15  ;;  %7500 = vrot.lane.b32.xlu2 %v10725_v7, %s7675_s15  ;;  %v10906_v21 = vpop.permute.xlu2 %7335 }
 0x662   : > { %5003 = vmatpush.msra.mxu3 %v7197_v59  ;;  %5029 = vmatpush.msra.mxu2 %v7243_v15  ;;  %v7338_v45 = vunpack.i.h.bf16 %v10906_v21  ;;  %v6569_v15 = vld [vmem:[%s11744_s5 + $0x1a8] sm:$0xff] }
 0x663   : > { %5186 = vmatpush.msra.mxu1 %v7267_v22  ;;  %4549 = vmatmul.f32.gmra.mxu0 %v6556_v62  ;;  %v10976_v22 = vpop.f32.mrf.mxu0  ;;  %v7277_v62 = vunpack.i.l.bf16 %v10773_v10 }
 0x664   : > { %5004 = vmatpush.msra.mxu3 %v7193_v39  ;;  %5030 = vmatpush.msra.mxu2 %v7242_v56  ;;  %v10979_v39 = vpop.f32.mrf.mxu3  ;;  %v6576_v56 = vld [vmem:[%s11744_s5 + $0x1c0] sm:$0xff] }
 0x665   : > { %6561 = vmatmul.msk.f32.gmra.mxu1 %vm2052_vm4, %v6555_v11  ;;  %6572 = vmatmul.msk.f32.vlgmr.msrb.gmra.mxu2 %vm2052_vm4, %v6565_v49  ;;  %v7278_v11 = vunpack.i.h.bf16 %v10773_v10 }
 0x666   : > { %5005 = vmatpush.msra.mxu3 %v7192_v52  ;;  %5187 = vmatpush.msra.mxu1 %v7268_v4  ;;  %v6570_v4 = vld [vmem:[%s11744_s5 + $0x1b0] sm:$0xff] }
 0x667   : > { %7465 = vrot.lane.b32.xlu1 %v10572_v33, %s7675_s15  ;;  %5031 = vmatpush.msra.mxu2 %v7238_v24  ;;  %v10922_v47 = vpop.permute.xlu1 %7255  ;;  %v7281_v18 = vpop.permute.xlu0 %7280 }
 0x668   : > { %5006 = vmatpush.msra.mxu3 %v7188_v34  ;;  %v7282_v57 = vunpack.i.l.bf16 %v7281_v18  ;;  %v7283_v32 = vunpack.i.h.bf16 %v7281_v18 }
 0x669   : > { %7490 = vrot.lane.b32.xlu0 %v10084_v63, %s7690_s17  ;;  %7515 = vrot.lane.b32.xlu2 %v10692_v28, %s7675_s15  ;;  %v10935_v6 = vpop.permute.xlu2 %7350 }
 0x66a   : > { %5007 = vmatpush.msra.mxu3 %v7187_v9  ;;  %5032 = vmatpush.msra.mxu2 %v7237_v12  ;;  %v6571_v9 = vld [vmem:[%s11744_s5 + $0x1b8] sm:$0xff]  ;;  %v6577_v12 = vld [vmem:[%s11744_s5 + $0x1c8] sm:$0xff] }
 0x66b   : > { %4701 = vmatmul.f32.gmra.mxu3 %v6566_v17  ;;  %5147 = vmatpush.msrb.mxu0 %v7282_v57  ;;  %v11004_v17 = vpop.f32.mrf.mxu0 }
 0x66c   : > { %5302 = vmatpush.msrb.mxu3 %v7292_v61  ;;  %5033 = vmatpush.msra.mxu2 %v7233_v23  ;;  %v11008_v23 = vpop.f32.mrf.mxu3 }
 0x66d   : > { %6562 = vmatmul.msk.f32.gmra.mxu1 %vm2052_vm4, %v6557_v27  ;;  %6573 = vmatmul.msk.f32.gmra.mxu2 %vm2052_vm4, %v6567_v2  ;;  %v6578_v27 = vld [vmem:[%s11744_s5 + $0x1d0] sm:$0xff] }
 0x66e   : > { %5303 = vmatpush.msrb.mxu3 %v7293_v41  ;;  %5034 = vmatpush.msra.mxu2 %v7232_v25  ;;  %v6588_v25 = vld [vmem:[%s11744_s5 + $0x200] sm:$0xff]  ;;  %v7307_v41 = vunpack.i.l.bf16 %v10837_v36 }
 0x66f   : > { %5148 = vmatpush.msrb.mxu0 %v7283_v32  ;;  %7480 = vrot.lane.b32.xlu1 %v10951_v31, %s7688_s13  ;;  %v7271_v44 = vpop.permute.xlu1 %7270 }
 0x670   : > { %5035 = vmatpush.msra.mxu2 %v7228_v40  ;;  %v7272_v8 = vunpack.i.l.bf16 %v7271_v44  ;;  %v7296_v42 = vpop.permute.xlu0 %7295  ;;  %4552 = vmatmul.f32.gmra.mxu0 %v6558_v58  ;;  %v7273_v59 = vunpack.i.h.bf16 %v7271_v44  ;;  %v6579_v44 = vld [vmem:[%s11744_s5 + $0x1d8] sm:$0xff] }
 0x671   : > { %7505 = vrot.lane.b32.xlu0 %v10084_v63, %s7689_s24  ;;  %7530 = vrot.lane.b32.xlu2 %v10040_v35, %s7690_s17  ;;  %v10968_v37 = vpop.permute.xlu2 %7365  ;;  %v7297_v18 = vunpack.i.l.bf16 %v7296_v42  ;;  %v7298_v57 = vunpack.i.h.bf16 %v7296_v42 }
 0x672   : > { %5036 = vmatpush.msra.mxu2 %v7227_v19  ;;  %5188 = vmatpush.msra.mxu1 %v7272_v8  ;;  %v6589_v19 = vld [vmem:[%s11744_s5 + $0x208] sm:$0xff]  ;;  %v7308_v8 = vunpack.i.h.bf16 %v10837_v36  ;;  %v7323_v36 = vunpack.i.h.bf16 %v10876_v55 }
 0x673   : > { %4704 = vmatmul.f32.gmra.mxu3 %v6568_v53  ;;  %v11034_v53 = vpop.f32.mrf.mxu0 }
 0x674   : > { %5339 = vmatpush.msrb.mxu2 %v7338_v45  ;;  %5189 = vmatpush.msra.mxu1 %v7273_v59  ;;  %v7322_v45 = vunpack.i.l.bf16 %v10876_v55  ;;  %v7258_v55 = vunpack.i.h.bf16 %v10922_v47 }
 0x675   : > { %6563 = vmatmul.msk.f32.gmra.mxu1 %vm2052_vm4, %v6559_v20  ;;  %6574 = vmatmul.msk.f32.gmra.mxu2 %vm2052_vm4, %v6569_v15 }
 0x676   : > { %5190 = vmatpush.msra.mxu1 %v7277_v62 }
 0x677   : > { %7495 = vrot.lane.b32.xlu1 %v10661_v60, %s7675_s15  ;;  %v7286_v49 = vpop.permute.xlu1 %7285 }
 0x678   : > { %v7287_v52 = vunpack.i.l.bf16 %v7286_v49  ;;  %5191 = vmatpush.msra.mxu1 %v7278_v11  ;;  %4853 = vmatmul.f32.vlgmr.msra.gmra.mxu0 %v6576_v56  ;;  %v7311_v24 = vpop.permute.xlu0 %7310  ;;  %v7288_v10 = vunpack.i.h.bf16 %v7286_v49  ;;  %v6580_v56 = vld [vmem:[%s11744_s5 + $0x1e0] sm:$0xff]  ;;  %v6590_v11 = vld [vmem:[%s11744_s5 + $0x210] sm:$0xff]  ;;  %v11046_v49 = vpop.f32.mrf.mxu3 }
 0x679   : > { %7520 = vrot.lane.b32.xlu0 %v11839_v54, %s7689_s24  ;;  %7545 = vrot.lane.b32.xlu2 %v10010_v0, %s7690_s17  ;;  %v7312_v42 = vunpack.i.l.bf16 %v7311_v24  ;;  %v7313_v59 = vunpack.i.h.bf16 %v7311_v24 }
 0x67a   : > { %v10996_v34 = vpop.permute.xlu2 %7380  ;;  %5149 = vmatpush.msrb.mxu0 %v7287_v52  ;;  %v6581_v52 = vld [vmem:[%s11744_s5 + $0x1e8] sm:$0xff] }
 0x67b   : > { %4707 = vmatmul.f32.gmra.mxu3 %v6570_v4  ;;  %v6591_v4 = vld [vmem:[%s11744_s5 + $0x218] sm:$0xff] }
 0x67c   : > { %5150 = vmatpush.msrb.mxu0 %v7288_v10  ;;  %v7257_v10 = vunpack.i.l.bf16 %v10922_v47  ;;  %v11068_v47 = vpop.f32.mrf.mxu0 }
 0x67d   : > { %6575 = vmatmul.msk.f32.gmra.mxu2 %vm2052_vm4, %v6571_v9  ;;  %6584 = vmatmul.msk.f32.vlgmr.msrb.gmra.mxu1 %vm2052_vm4, %v6577_v12 }
 0x67e   : > { %5151 = vmatpush.msrb.mxu0 %v7297_v18  ;;  %v7253_v18 = vunpack.i.h.bf16 %v10866_v30 }
 0x67f   : > { %7510 = vrot.lane.b32.xlu1 %v11839_v54, %s7690_s17  ;;  %v7301_v61 = vpop.permute.xlu1 %7300 }
 0x680   : > { %v7302_v2 = vunpack.i.l.bf16 %v7301_v61  ;;  %5152 = vmatpush.msrb.mxu0 %v7298_v57  ;;  %v7326_v32 = vpop.permute.xlu0 %7325  ;;  %v7303_v58 = vunpack.i.h.bf16 %v7301_v61  ;;  %v7337_v57 = vunpack.i.l.bf16 %v10906_v21  ;;  %v6592_v21 = vld [vmem:[%s11744_s5 + $0x220] sm:$0xff] }
 0x681   : > { %7535 = vrot.lane.b32.xlu0 %v10040_v35, %s7689_s24  ;;  %7560 = vrot.lane.b32.xlu2 %v10521_v38, %s7690_s17  ;;  %v7327_v15 = vunpack.i.l.bf16 %v7326_v32  ;;  %v7328_v9 = vunpack.i.h.bf16 %v7326_v32  ;;  %v6583_v32 = vld [vmem:[%s11744_s5 + $0x1f8] sm:$0xff] }
 0x682   : > { %v11023_v40 = vpop.permute.xlu2 %7395  ;;  %4856 = vmatmul.f32.gmra.mxu0 %v6578_v27  ;;  %5304 = vmatpush.msrb.mxu3 %v7302_v2  ;;  %v7252_v27 = vunpack.i.l.bf16 %v10866_v30  ;;  %v7248_v30 = vunpack.i.h.bf16 %v10703_v26 }
 0x683   : > { %5008 = vmatmul.f32.vlgmr.msra.gmra.mxu3 %v6588_v25  ;;  %5153 = vmatpush.msrb.mxu0 %v7307_v41  ;;  %v6582_v25 = vld [vmem:[%s11744_s5 + $0x1f0] sm:$0xff] }
 0x684   : > { %5305 = vmatpush.msrb.mxu3 %v7303_v58  ;;  %v6593_v58 = vld [vmem:[%s11744_s5 + $0x228] sm:$0xff] }
 0x685   : > { %6585 = vmatmul.msk.f32.gmra.mxu1 %vm2052_vm4, %v6579_v44  ;;  %6596 = vmatmul.msk.f32.vlgmr.msra.gmra.mxu2 %vm2052_vm4, %v6589_v19  ;;  %v11088_v44 = vpop.f32.mrf.mxu3 }
 0x686   : > { %5154 = vmatpush.msrb.mxu0 %v7308_v8  ;;  %5306 = vmatpush.msrb.mxu3 %v7312_v42  ;;  %v7382_v8 = vunpack.i.l.bf16 %v10996_v34 }
 0x687   : > { %7525 = vrot.lane.b32.xlu1 %v10084_v63, %s7691_s18  ;;  %v7316_v20 = vpop.permute.xlu1 %7315 }
 0x688   : > { %5155 = vmatpush.msrb.mxu0 %v7322_v45  ;;  %v7317_v62 = vunpack.i.l.bf16 %v7316_v20  ;;  %5307 = vmatpush.msrb.mxu3 %v7313_v59  ;;  %v7341_v63 = vpop.permute.xlu0 %7340  ;;  %v7318_v12 = vunpack.i.h.bf16 %v7316_v20 }
 0x689   : > { %7550 = vrot.lane.b32.xlu0 %v10010_v0, %s7689_s24  ;;  %7575 = vrot.lane.b32.xlu2 %v10771_v16, %s7690_s17  ;;  %v7342_v19 = vunpack.i.l.bf16 %v7341_v63  ;;  %v7343_v45 = vunpack.i.h.bf16 %v7341_v63  ;;  %v6595_v63 = vld [vmem:[%s11744_s5 + $0x238] sm:$0xff] }
 0x68a   : > { %5156 = vmatpush.msrb.mxu0 %v7323_v36  ;;  %5308 = vmatpush.msrb.mxu3 %v7327_v15  ;;  %v11059_v24 = vpop.permute.xlu2 %7410 }
 0x68b   : > { %4859 = vmatmul.f32.gmra.mxu0 %v6580_v56  ;;  %5011 = vmatmul.f32.gmra.mxu3 %v6590_v11  ;;  %v6600_v56 = vld [vmem:[%s11744_s5 + $0x240] sm:$0xff] }
 0x68c   : > { %5157 = vmatpush.msrb.mxu0 %v7258_v55  ;;  %5494 = vmatpush.msrb.mxu1 %v7317_v62  ;;  %v6594_v62 = vld [vmem:[%s11744_s5 + $0x230] sm:$0xff]  ;;  %v6601_v55 = vld [vmem:[%s11744_s5 + $0x248] sm:$0xff] }
 0x68d   : > { %6586 = vmatmul.msk.f32.gmra.mxu1 %vm2052_vm4, %v6581_v52  ;;  %6597 = vmatmul.msk.f32.gmra.mxu2 %vm2052_vm4, %v6591_v4  ;;  %v7352_v52 = vunpack.i.l.bf16 %v10935_v6 }
 0x68e   : > { %5158 = vmatpush.msrb.mxu0 %v7257_v10  ;;  %5309 = vmatpush.msrb.mxu3 %v7328_v9 }
 0x68f   : > { %5495 = vmatpush.msrb.mxu1 %v7318_v12  ;;  %7540 = vrot.lane.b32.xlu1 %v11839_v54, %s7691_s18  ;;  %v7331_v61 = vpop.permute.xlu1 %7330 }
 0x690   : > { %5159 = vmatpush.msrb.mxu0 %v7253_v18  ;;  %5310 = vmatpush.msrb.mxu3 %v7337_v57  ;;  %v7332_v2 = vunpack.i.l.bf16 %v7331_v61  ;;  %v7333_v41 = vunpack.i.h.bf16 %v7331_v61 }
 0x691   : > { %7565 = vrot.lane.b32.xlu0 %v10521_v38, %s7689_s24  ;;  %7590 = vrot.lane.b32.xlu2 %v10864_v3, %s7690_s17  ;;  %v7356_v54 = vpop.permute.xlu0 %7355  ;;  %v7247_v38 = vunpack.i.l.bf16 %v10703_v26  ;;  %v7383_v26 = vunpack.i.h.bf16 %v10996_v34  ;;  %v11111_v34 = vpop.f32.mrf.mxu0 }
 0x692   : > { %5160 = vmatpush.msrb.mxu0 %v7252_v27  ;;  %5496 = vmatpush.msrb.mxu1 %v7332_v2  ;;  %v7357_v11 = vunpack.i.l.bf16 %v7356_v54  ;;  %v7358_v4 = vunpack.i.h.bf16 %v7356_v54  ;;  %v7367_v27 = vunpack.i.l.bf16 %v10968_v37 }
 0x693   : > { %4862 = vmatmul.f32.gmra.mxu0 %v6582_v25  ;;  %5014 = vmatmul.f32.gmra.mxu3 %v6592_v21  ;;  %v11092_v42 = vpop.permute.xlu2 %7425 }
 0x694   : > { %5161 = vmatpush.msrb.mxu0 %v7248_v30  ;;  %5497 = vmatpush.msrb.mxu1 %v7333_v41 }
 0x695   : > { %6587 = vmatmul.msk.f32.gmra.mxu1 %vm2052_vm4, %v6583_v32  ;;  %6598 = vmatmul.msk.f32.gmra.mxu2 %vm2052_vm4, %v6593_v58 }
 0x696   : > { %5162 = vmatpush.msrb.mxu0 %v7247_v38  ;;  %5498 = vmatpush.msrb.mxu1 %v7342_v19 }
 0x697   : > { %7555 = vrot.lane.b32.xlu1 %v10040_v35, %s7691_s18  ;;  %v7346_v59 = vpop.permute.xlu1 %7345 }
 0x698   : > { %5457 = vmatpush.msra.mxu0 %v7382_v8  ;;  %v11099_v20 = vpop.f32.mrf.mxu1  ;;  %v7348_v36 = vunpack.i.h.bf16 %v7346_v59  ;;  %v7347_v15 = vunpack.i.l.bf16 %v7346_v59  ;;  %5499 = vmatpush.msrb.mxu1 %v7343_v45  ;;  %v6605_v8 = vld [vmem:[%s11744_s5 + $0x268] sm:$0xff]  ;;  %v6612_v59 = vld [vmem:[%s11744_s5 + $0x280] sm:$0xff] }
 0x699   : > { %7580 = vrot.lane.b32.xlu0 %v10771_v16, %s7689_s24  ;;  %7605 = vrot.lane.b32.xlu2 %v10572_v33, %s7691_s18  ;;  %v7371_v35 = vpop.permute.xlu0 %7370  ;;  %v11119_v16 = vpop.f32.mrf.mxu3  ;;  %v7353_v33 = vunpack.i.h.bf16 %v10935_v6  ;;  %v6602_v6 = vld [vmem:[%s11744_s5 + $0x250] sm:$0xff] }
 0x69a   : > { %5458 = vmatpush.msra.mxu0 %v7383_v26  ;;  %5311 = vmatpush.msrb.mxu3 %v7347_v15  ;;  %v11142_v2 = vpop.f32.mrf.mxu0  ;;  %v7372_v25 = vunpack.i.l.bf16 %v7371_v35  ;;  %v7373_v54 = vunpack.i.h.bf16 %v7371_v35  ;;  %v6606_v35 = vld [vmem:[%s11744_s5 + $0x270] sm:$0xff] }
 0x69b   : > { %5017 = vmatmul.f32.gmra.mxu3 %v6594_v62  ;;  %5163 = vmatmul.f32.vlgmr.msrb.gmra.mxu0 %v6600_v56  ;;  %v11125_v10 = vpop.permute.xlu2 %7440  ;;  %v7398_v56 = vunpack.i.h.bf16 %v11023_v40 }
 0x69c   : > { %5340 = vmatpush.msrb.mxu2 %v7348_v36  ;;  %5500 = vmatpush.msrb.mxu1 %v7357_v11  ;;  %v7397_v36 = vunpack.i.l.bf16 %v11023_v40 }
 0x69d   : > { %6599 = vmatmul.msk.f32.gmra.mxu2 %vm2052_vm4, %v6595_v63  ;;  %6608 = vmatmul.msk.f32.vlgmr.msra.gmra.mxu1 %vm2052_vm4, %v6601_v55 }
 0x69e   : > { %5312 = vmatpush.msrb.mxu3 %v7352_v52  ;;  %5341 = vmatpush.msrb.mxu2 %v7353_v33 }
 0x69f   : > { %5501 = vmatpush.msrb.mxu1 %v7358_v4  ;;  %7570 = vrot.lane.b32.xlu1 %v10010_v0, %s7691_s18  ;;  %v6603_v0 = vld [vmem:[%s11744_s5 + $0x258] sm:$0xff] }
 0x6a0   : > { %v7361_v9 = vpop.permute.xlu1 %7360 }
 0x6a1   : > { %7595 = vrot.lane.b32.xlu0 %v10650_v1, %s7691_s18  ;;  %7620 = vrot.lane.b32.xlu2 %v10951_v31, %s7689_s24  ;;  %v11136_v12 = vpop.f32.mrf.mxu1  ;;  %v7363_v18 = vunpack.i.h.bf16 %v7361_v9  ;;  %v7362_v57 = vunpack.i.l.bf16 %v7361_v9  ;;  %v7386_v61 = vpop.permute.xlu0 %7385  ;;  %v7368_v1 = vunpack.i.h.bf16 %v10968_v37  ;;  %v6604_v37 = vld [vmem:[%s11744_s5 + $0x260] sm:$0xff] }
 0x6a2   : > { %v7387_v45 = vunpack.i.l.bf16 %v7386_v61  ;;  %v6159_v9 = vld [vmem:[%s11747_s8] sm:$0xff] }
 0x6a3   : > { %5166 = vmatmul.f32.gmra.mxu0 %v6602_v6  ;;  %5313 = vmatpush.msrb.mxu3 %v7362_v57  ;;  %v11155_v32 = vpop.permute.xlu2 %7455  ;;  %v11173_v26 = vpop.f32.mrf.mxu0 }
 0x6a4   : > { %5342 = vmatpush.msrb.mxu2 %v7363_v18 }
 0x6a5   : > { %6609 = vmatmul.msk.f32.gmra.mxu1 %vm2052_vm4, %v6603_v0  ;;  %5314 = vmatpush.msrb.mxu3 %v7367_v27  ;;  %v11146_v21 = vpop.f32.mrf.mxu3  ;;  %v7412_v27 = vunpack.i.l.bf16 %v11059_v24 }
 0x6a6   : > { %v11148_v30 = vpop.f32.mrf.mxu2  ;;  %5343 = vmatpush.msrb.mxu2 %v7368_v1 }
 0x6a7   : > { %7585 = vrot.lane.b32.xlu1 %v10546_v5, %s7691_s18  ;;  %5315 = vmatpush.msrb.mxu3 %v7372_v25 }
 0x6a8   : > { %5344 = vmatpush.msrb.mxu2 %v7373_v54  ;;  %v7376_v41 = vpop.permute.xlu1 %7375  ;;  %v7413_v54 = vunpack.i.h.bf16 %v11059_v24  ;;  %v6162_v24 = vld [vmem:[%s11747_s8 + $0x18] sm:$0xff] }
 0x6a9   : > { %7610 = vrot.lane.b32.xlu0 %v10951_v31, %s7690_s17  ;;  %7635 = vrot.lane.b32.xlu2 %v10661_v60, %s7691_s18  ;;  %v11161_v58 = vpop.f32.mrf.mxu1  ;;  %v7378_v38 = vunpack.i.h.bf16 %v7376_v41  ;;  %v7377_v19 = vunpack.i.l.bf16 %v7376_v41  ;;  %v7388_v31 = vunpack.i.h.bf16 %v7386_v61  ;;  %v6613_v60 = vld [vmem:[%s11744_s5 + $0x288] sm:$0xff] }
 0x6aa   : > { %v7401_v5 = vpop.permute.xlu0 %7400 }
 0x6ab   : > { %5169 = vmatmul.f32.gmra.mxu0 %v6604_v37  ;;  %5316 = vmatpush.msrb.mxu3 %v7377_v19  ;;  %v11196_v40 = vpop.permute.xlu2 %7470  ;;  %v7402_v4 = vunpack.i.l.bf16 %v7401_v5  ;;  %v7403_v18 = vunpack.i.h.bf16 %v7401_v5  ;;  %v6616_v37 = vld [vmem:[%s11744_s5 + $0x2a0] sm:$0xff]  ;;  %v7427_v19 = vunpack.i.l.bf16 %v11092_v42  ;;  %v7428_v5 = vunpack.i.h.bf16 %v11092_v42 }
 0x6ac   : > { %5345 = vmatpush.msrb.mxu2 %v7378_v38 }
 0x6ad   : > { %6610 = vmatmul.msk.f32.gmra.mxu1 %vm2052_vm4, %v6605_v8  ;;  %5317 = vmatpush.msrb.mxu3 %v7387_v45  ;;  %v11178_v62 = vpop.f32.mrf.mxu3 }
 0x6ae   : > { %v11176_v15 = vpop.f32.mrf.mxu2  ;;  %5346 = vmatpush.msrb.mxu2 %v7388_v31  ;;  %5318 = vmatmul.f32.vlgmr.msrb.gmra.mxu3 %v6612_v59  ;;  %v6625_v31 = vld [vmem:[%s11744_s5 + $0x2c8] sm:$0xff] }
 0x6af   : > { %7600 = vrot.lane.b32.xlu1 %v10864_v3, %s7689_s24  ;;  %6620 = vmatmul.msk.f32.vlgmr.msrb.gmra.mxu2 %vm2052_vm4, %v6613_v60  ;;  %v6607_v3 = vld [vmem:[%s11744_s5 + $0x278] sm:$0xff]  ;;  %v7442_v60 = vunpack.i.l.bf16 %v11125_v10 }
 0x6b0   : > { %5612 = vmatpush.msra.mxu3 %v7397_v36 }
 0x6b1   : > { %7625 = vrot.lane.b32.xlu0 %v10597_v51, %s7691_s18  ;;  %7650 = vrot.lane.b32.xlu2 %v10692_v28, %s7691_s18  ;;  %v11191_v11 = vpop.f32.mrf.mxu1  ;;  %v7391_v63 = vpop.permute.xlu1 %7390  ;;  %v6614_v51 = vld [vmem:[%s11744_s5 + $0x290] sm:$0xff]  ;;  %v6615_v28 = vld [vmem:[%s11744_s5 + $0x298] sm:$0xff] }
 0x6b2   : > { %v7392_v55 = vunpack.i.l.bf16 %v7391_v63  ;;  %5613 = vmatpush.msra.mxu3 %v7398_v56  ;;  %v7393_v52 = vunpack.i.h.bf16 %v7391_v63 }
 0x6b3   : > { %v7416_v33 = vpop.permute.xlu0 %7415  ;;  %5172 = vmatmul.f32.gmra.mxu0 %v6606_v35  ;;  %v11226_v38 = vpop.permute.xlu2 %7485 }
 0x6b4   : > { %5459 = vmatpush.msra.mxu0 %v7392_v55  ;;  %v7417_v8 = vunpack.i.l.bf16 %v7416_v33  ;;  %v7418_v42 = vunpack.i.h.bf16 %v7416_v33  ;;  %v7458_v33 = vunpack.i.h.bf16 %v11155_v32 }
 0x6b5   : > { %6611 = vmatmul.msk.f32.gmra.mxu1 %vm2052_vm4, %v6607_v3  ;;  %v11213_v57 = vpop.f32.mrf.mxu3 }
 0x6b6   : > { %5460 = vmatpush.msra.mxu0 %v7393_v52  ;;  %5321 = vmatmul.f32.gmra.mxu3 %v6614_v51 }
 0x6b7   : > { %v11208_v6 = vpop.f32.mrf.mxu2  ;;  %7615 = vrot.lane.b32.xlu1 %v10688_v29, %s7691_s18  ;;  %6621 = vmatmul.msk.f32.gmra.mxu2 %vm2052_vm4, %v6615_v28  ;;  %v6160_v28 = vld [vmem:[%s11747_s8 + $0x8] sm:$0xff] }
 0x6b8   : > { %5461 = vmatpush.msra.mxu0 %v7402_v4  ;;  %v11215_v61 = vpop.f32.mrf.mxu0 }
 0x6b9   : > { %7640 = vrot.lane.b32.xlu0 %v10725_v7, %s7691_s18  ;;  %6177 = vperm.xlu2 %6763, %v6159_v9   ;;  %v7406_v0 = vpop.permute.xlu1 %7405  ;;  %v6617_v7 = vld [vmem:[%s11744_s5 + $0x2a8] sm:$0xff]  ;;  %v6165_v9 = vld [vmem:[%s11747_s8 + $0x30] sm:$0xff]  ;;  %s11702_s18 = scalar_lea.vmem %s11748_s9, %s6702_s25 }
 0x6ba   : > { %v11220_v1 = vpop.f32.mrf.mxu1  ;;  %v7407_v25 = vunpack.i.l.bf16 %v7406_v0  ;;  %5462 = vmatpush.msra.mxu0 %v7403_v18  ;;  %v7408_v41 = vunpack.i.h.bf16 %v7406_v0  ;;  %v6619_v0 = vld [vmem:[%s11744_s5 + $0x2b8] sm:$0xff] }
 0x6bb   : > { %v7431_v29 = vpop.permute.xlu0 %7430  ;;  %v11259_v4 = vpop.permute.xlu2 %7500 }
 0x6bc   : > { %5463 = vmatpush.msra.mxu0 %v7412_v27  ;;  %5614 = vmatpush.msra.mxu3 %v7407_v25  ;;  %v7432_v55 = vunpack.i.l.bf16 %v7431_v29  ;;  %v7433_v52 = vunpack.i.h.bf16 %v7431_v29 }
 0x6bd   : > { %6632 = vmatmul.msk.f32.vlgmr.msrb.gmra.mxu1 %vm2052_vm4, %v6625_v31  ;;  %v3755_v31 = vadd.f32 %v10892_v48, %v10979_v39 }
 0x6be   : > { %5464 = vmatpush.msra.mxu0 %v7413_v54  ;;  %5615 = vmatpush.msra.mxu3 %v7408_v41 }
 0x6bf   : > { %7630 = vrot.lane.b32.xlu1 %v10255_v46, %s7690_s17  ;;  %5324 = vmatmul.f32.gmra.mxu3 %v6616_v37 }
 0x6c0   : > { %v11238_v45 = vpop.f32.mrf.mxu2  ;;  %6622 = vmatmul.msk.f32.gmra.mxu2 %vm2052_vm4, %v6617_v7  ;;  %5465 = vmatpush.msra.mxu0 %v7427_v19  ;;  %v11241_v59 = vpop.f32.mrf.mxu0  ;;  %v7457_v7 = vunpack.i.l.bf16 %v11155_v32  ;;  %v3761_v32 = vadd.f32 %v10976_v22, %v11046_v49 }
 0x6c1   : > { %7655 = vrot.lane.b32.xlu0 %v10166_v50, %s7690_s17  ;;  %6192 = vperm.xlu2 %6763, %v6162_v24   ;;  %v7421_v46 = vpop.permute.xlu1 %7420  ;;  %v7443_v50 = vunpack.i.h.bf16 %v11125_v10  ;;  %v6618_v10 = vld [vmem:[%s11744_s5 + $0x2b0] sm:$0xff] }
 0x6c2   : > { %v11249_v36 = vpop.f32.mrf.mxu1  ;;  %5616 = vmatpush.msra.mxu3 %v7417_v8  ;;  %v7422_v56 = vunpack.i.l.bf16 %v7421_v46  ;;  %5466 = vmatpush.msra.mxu0 %v7428_v5  ;;  %v11251_v35 = vpop.f32.mrf.mxu3  ;;  %v7423_v51 = vunpack.i.h.bf16 %v7421_v46  ;;  %v6168_v46 = vld [vmem:[%s11747_s8 + $0x48] sm:$0xff] }
 0x6c3   : > { %v7446_v63 = vpop.permute.xlu0 %7445 }
 0x6c4   : > { %v7448_v3 = vunpack.i.h.bf16 %v7446_v63  ;;  %5617 = vmatpush.msra.mxu3 %v7418_v42  ;;  %5467 = vmatpush.msra.mxu0 %v7442_v60  ;;  %v7447_v25 = vunpack.i.l.bf16 %v7446_v63  ;;  %v3960_v63 = vadd.f32 %v11161_v58, %v11111_v34  ;;  %v4109_v34 = vadd.f32 %v11148_v30, %v11119_v16 }
 0x6c5   : > { %5804 = vmatpush.msra.mxu1 %v7422_v56  ;;  %v3954_v56 = vadd.f32 %v11099_v20, %v11034_v53  ;;  %v11862_v20 = vld [vmem:[#allocation10_spill] sm:$0xff]  ;;  %v3764_v16 = vadd.f32 %v11004_v17, %v11088_v44  ;;  %v7472_v30 = vunpack.i.l.bf16 %v11196_v40  ;;  %v6171_v17 = vld [vmem:[%s11747_s8 + $0x60] sm:$0xff] }
 0x6c6   : > { %5618 = vmatpush.msra.mxu3 %v7432_v55  ;;  %5649 = vmatpush.msra.mxu2 %v7448_v3  ;;  %v11296_v55 = vpop.permute.xlu2 %7515  ;;  %v6627_v3 = vld [vmem:[%s11744_s5 + $0x2d8] sm:$0xff]  ;;  %v11863_v44 = vld [vmem:[#allocation17_spill] sm:$0xff] }
 0x6c7   : > { %5468 = vmatpush.msra.mxu0 %v7443_v50  ;;  %5805 = vmatpush.msra.mxu1 %v7423_v51  ;;  %v11861_v50 = vld [vmem:[#allocation15_spill] sm:$0xff]  ;;  %v3788_v51 = vadd.f32 %v11862_v20, %v3761_v32  ;;  %v6174_v20 = vld [vmem:[%s11747_s8 + $0x78] sm:$0xff] }
 0x6c8   : > { %v11267_v18 = vpop.f32.mrf.mxu2  ;;  %5619 = vmatpush.msra.mxu3 %v7433_v52  ;;  %5650 = vmatpush.msra.mxu2 %v7458_v33  ;;  %v11272_v27 = vpop.f32.mrf.mxu0  ;;  %v3786_v53 = vadd.f32 %v11861_v50, %v3755_v31  ;;  %v3758_v33 = vadd.f32 %v10929_v14, %v11008_v23  ;;  %v6166_v14 = vld [vmem:[%s11747_s8 + $0x38] sm:$0xff] }
 0x6c9   : > { %7645 = vrot.lane.b32.xlu1 %v10212_v43, %s7690_s17  ;;  %6182 = vperm.xlu0 %6761, %v6160_v28   ;;  %v7436_v29 = vpop.permute.xlu1 %7435  ;;  %v6163_v43 = vld [vmem:[%s11747_s8 + $0x20] sm:$0xff] }
 0x6ca   : > { %6207 = vperm.xlu2 %6763, %v6165_v9   ;;  %5327 = vmatmul.f32.gmra.mxu3 %v6618_v10  ;;  %v4269_v54 = vpop.f32.mrf.mxu1  ;;  %v7437_v41 = vunpack.i.l.bf16 %v7436_v29  ;;  %v11276_v37 = vpop.f32.mrf.mxu3  ;;  %v7438_v24 = vunpack.i.h.bf16 %v7436_v29  ;;  %v3965_v28 = vadd.f32 %v3954_v56, %v3786_v53  ;;  %v3967_v9 = vadd.f32 %v3960_v63, %v3788_v51  ;;  %v6164_v53 = vld [vmem:[%s11747_s8 + $0x28] sm:$0xff] }
 0x6cb   : > { %6623 = vmatmul.msk.f32.gmra.mxu2 %vm2052_vm4, %v6619_v0  ;;  %5620 = vmatpush.msra.mxu3 %v7447_v25  ;;  %v7461_v19 = vpop.permute.xlu0 %7460  ;;  %v4264_v10 = vadd.f32 %v11220_v1, %v11173_v26  ;;  %v4270_v0 = vadd.f32 %v4269_v54, %v11241_v59  ;;  %v4419_v26 = vadd.f32 %v11267_v18, %v11251_v35  ;;  %v7473_v25 = vunpack.i.h.bf16 %v11196_v40 }
 0x6cc   : > { %v7462_v5 = vunpack.i.l.bf16 %v7461_v19  ;;  %5806 = vmatpush.msra.mxu1 %v7437_v41  ;;  %v7463_v8 = vunpack.i.h.bf16 %v7461_v19  ;;  %v4120_v23 = vadd.f32 %v4109_v34, %v3965_v28  ;;  %v3787_v1 = vadd.f32 %v11863_v44, %v3758_v33  ;;  %v6631_v28 = vld [vmem:[%s11744_s5 + $0x2f8] sm:$0xff]  ;;  %v6172_v44 = vld [vmem:[%s11747_s8 + $0x68] sm:$0xff] }
 0x6cd   : > { %5621 = vmatpush.msra.mxu3 %v7457_v7  ;;  %6633 = vmatmul.msk.f32.gmra.mxu1 %vm2052_vm4, %v6627_v3  ;;  %v3957_v59 = vadd.f32 %v11136_v12, %v11068_v47  ;;  %v3963_v29 = vadd.f32 %v11191_v11, %v11142_v2  ;;  %v6629_v11 = vld [vmem:[%s11744_s5 + $0x2e8] sm:$0xff]  ;;  %v7487_v3 = vunpack.i.l.bf16 %v11226_v38  ;;  %v7488_v51 = vunpack.i.h.bf16 %v11226_v38 }
 0x6ce   : > { %5469 = vmatpush.msra.mxu0 %v7462_v5  ;;  %5807 = vmatpush.msra.mxu1 %v7438_v24  ;;  %v4275_v41 = vadd.f32 %v4264_v10, %v4120_v23  ;;  %v11864_v24 = vld [vmem:[#allocation18_spill] sm:$0xff]  ;;  %v11350_v63 = vpop.permute.xlu2 %7530 }
 0x6cf   : > { %v3789_v5 = vadd.f32 %v11864_v24, %v3764_v16  ;;  %v7502_v24 = vunpack.i.l.bf16 %v11259_v4 }
 0x6d0   : > { %v11290_v60 = vpop.f32.mrf.mxu2  ;;  %5470 = vmatpush.msra.mxu0 %v7463_v8  ;;  %v4544_v42 = vpop.f32.mrf.mxu0  ;;  %v4112_v8 = vadd.f32 %v11176_v15, %v11146_v21  ;;  %v4430_v31 = vadd.f32 %v4419_v26, %v4275_v41  ;;  %v3966_v21 = vadd.f32 %v3957_v59, %v3787_v1 }
 0x6d1   : > { %7660 = vrot.lane.b32.xlu1 %v10448_v13, %s7690_s17  ;;  %6197 = vperm.xlu0 %6761, %v6163_v43   ;;  %v7451_v48 = vpop.permute.xlu1 %7450  ;;  %v4115_v13 = vadd.f32 %v11208_v6, %v11178_v62  ;;  %v6161_v62 = vld [vmem:[%s11747_s8 + $0x10] sm:$0xff]  ;;  %v4118_v43 = vadd.f32 %v11238_v45, %v11213_v57  ;;  %v3968_v15 = vadd.f32 %v3963_v29, %v3789_v5 }
 0x6d2   : > { %6222 = vperm.xlu2 %6763, %v6168_v46   ;;  %v4272_v22 = vpop.f32.mrf.mxu1  ;;  %v7452_v39 = vunpack.i.l.bf16 %v7451_v48  ;;  %v4395_v49 = vpop.f32.mrf.mxu3  ;;  %v7453_v52 = vunpack.i.h.bf16 %v7451_v48  ;;  %v4267_v57 = vadd.f32 %v11249_v36, %v11215_v61  ;;  %v6169_v61 = vld [vmem:[%s11747_s8 + $0x50] sm:$0xff]  ;;  %v4121_v36 = vadd.f32 %v4112_v8, %v3966_v21 }
 0x6d3   : > { %v11309_v58 = vpop.permute.xlu0 %7475  ;;  %v4122_v6 = vadd.f32 %v4115_v13, %v3967_v9  ;;  %v4273_v45 = vadd.f32 %v4272_v22, %v11272_v27  ;;  %v4123_v27 = vadd.f32 %v4118_v43, %v3968_v15  ;;  %v4422_v22 = vadd.f32 %v11290_v60, %v11276_v37  ;;  %v6626_v8 = vld [vmem:[%s11744_s5 + $0x2d0] sm:$0xff] }
 0x6d4   : > { %5808 = vmatpush.msra.mxu1 %v7452_v39  ;;  %v7477_v48 = vunpack.i.l.bf16 %v11309_v58  ;;  %v4276_v13 = vadd.f32 %v4267_v57, %v4121_v36  ;;  %v6628_v36 = vld [vmem:[%s11744_s5 + $0x2e0] sm:$0xff] }
 0x6d5   : > { %v4277_v7 = vadd.f32 %v4270_v0, %v4122_v6  ;;  %6634 = vmatmul.msk.f32.gmra.mxu1 %vm2052_vm4, %v6629_v11 }
 0x6d6   : > { %5809 = vmatpush.msra.mxu1 %v7453_v52  ;;  %v4431_v38 = vadd.f32 %v4422_v22, %v4276_v13  ;;  %v11385_v6 = vpop.permute.xlu2 %7545  ;;  %v6173_v13 = vld [vmem:[%s11747_s8 + $0x70] sm:$0xff] }
 0x6d8   : > { %v4424_v54 = vpop.f32.mrf.mxu2  ;;  %5810 = vmatpush.msra.mxu1 %v7472_v30  ;;  %v4547_v18 = vpop.f32.mrf.mxu0 }
 0x6d9   : > { %v4425_v19 = vadd.f32 %v4424_v54, %v4395_v49  ;;  %6187 = vperm.xlu1 %6762, %v6161_v62   ;;  %6212 = vperm.xlu0 %6761, %v6166_v14   ;;  %v7466_v35 = vpop.permute.xlu1 %7465  ;;  %v6624_v14 = vld [vmem:[%s11744_s5 + $0x2c0] sm:$0xff] }
 0x6da   : > { %6237 = vperm.xlu2 %6763, %v6171_v17   ;;  %v4573_v47 = vpop.f32.mrf.mxu1  ;;  %v7468_v12 = vunpack.i.h.bf16 %v7466_v35  ;;  %v7467_v40 = vunpack.i.l.bf16 %v7466_v35  ;;  %5811 = vmatpush.msra.mxu1 %v7473_v25  ;;  %v4398_v2 = vpop.f32.mrf.mxu3  ;;  %v6167_v17 = vld [vmem:[%s11747_s8 + $0x40] sm:$0xff] }
 0x6db   : > { %v11345_v32 = vadd.f32 %v4425_v19, %v4277_v7  ;;  %v4574_v46 = vadd.f32 %v4573_v47, %v4544_v42  ;;  %v11347_v56 = vpop.permute.xlu0 %7490  ;;  %v7478_v42 = vunpack.i.h.bf16 %v11309_v58  ;;  %v4278_v58 = vadd.f32 %v4273_v45, %v4123_v27 }
 0x6dc   : > { %v7492_v39 = vunpack.i.l.bf16 %v11347_v56  ;;  %5622 = vmatpush.msra.mxu3 %v7467_v40  ;;  %5651 = vmatpush.msra.mxu2 %v7468_v12  ;;  %v7493_v50 = vunpack.i.h.bf16 %v11347_v56  ;;  %v7503_v47 = vunpack.i.h.bf16 %v11259_v4  ;;  %v6636_v4 = vld [vmem:[%s11744_s5 + $0x300] sm:$0xff] }
 0x6dd   : > { %v4585_v49 = vadd.f32 %v4574_v46, %v4430_v31  ;;  %6635 = vmatmul.msk.f32.gmra.mxu1 %vm2052_vm4, %v6631_v28  ;;  %v6170_v31 = vld [vmem:[%s11747_s8 + $0x58] sm:$0xff]  ;;  %v7518_v46 = vunpack.i.h.bf16 %v11296_v55 }
 0x6de   : > { %6719 = vmatpush.msrb.mxu1 %v7492_v39  ;;  %5623 = vmatpush.msra.mxu3 %v7477_v48  ;;  %v11412_v21 = vpop.permute.xlu2 %7560 }
 0x6df   : > { %5652 = vmatpush.msra.mxu2 %v7478_v42 }
 0x6e0   : > { %v4427_v34 = vpop.f32.mrf.mxu2  ;;  %6720 = vmatpush.msrb.mxu1 %v7493_v50  ;;  %5624 = vmatpush.msra.mxu3 %v7487_v3  ;;  %v4550_v16 = vpop.f32.mrf.mxu0 }
 0x6e1   : > { %v4428_v33 = vadd.f32 %v4427_v34, %v4398_v2  ;;  %6202 = vperm.xlu1 %6762, %v6164_v53   ;;  %6227 = vperm.xlu0 %6761, %v6169_v61   ;;  %v7481_v52 = vpop.permute.xlu1 %7480  ;;  %v7517_v2 = vunpack.i.l.bf16 %v11296_v55 }
 0x6e2   : > { %6252 = vperm.xlu2 %6763, %v6174_v20   ;;  %v4576_v37 = vpop.f32.mrf.mxu1  ;;  %5653 = vmatpush.msra.mxu2 %v7488_v51  ;;  %v7482_v60 = vunpack.i.l.bf16 %v7481_v52  ;;  %v7483_v30 = vunpack.i.h.bf16 %v7481_v52  ;;  %v4699_v62 = vpop.f32.mrf.mxu3  ;;  %v7532_v20 = vunpack.i.l.bf16 %v11350_v63 }
 0x6e3   : > { %v11379_v9 = vadd.f32 %v4428_v33, %v4278_v58  ;;  %v4577_v10 = vadd.f32 %v4576_v37, %v4547_v18  ;;  %v7506_v0 = vpop.permute.xlu0 %7505  ;;  %v6638_v58 = vld [vmem:[%s11744_s5 + $0x310] sm:$0xff]  ;;  %v6639_v33 = vld [vmem:[%s11744_s5 + $0x318] sm:$0xff]  ;;  %v7533_v37 = vunpack.i.h.bf16 %v11350_v63 }
 0x6e4   : > { %5471 = vmatpush.msra.mxu0 %v7482_v60  ;;  %v7507_v26 = vunpack.i.l.bf16 %v7506_v0  ;;  %v7508_v1 = vunpack.i.h.bf16 %v7506_v0  ;;  %v6649_v0 = vld [vmem:[%s11744_s5 + $0x348] sm:$0xff]  ;;  %v6662_v63 = vld [vmem:[%s11744_s5 + $0x390] sm:$0xff] }
 0x6e5   : > { %v4586_v23 = vadd.f32 %v4577_v10, %v4431_v38  ;;  %6656 = vmatmul.msk.f32.vlgmr.msra.gmra.mxu1 %vm2052_vm4, %v6649_v0 }
 0x6e6   : > { %5472 = vmatpush.msra.mxu0 %v7483_v30  ;;  %v11442_v38 = vpop.permute.xlu2 %7575 }
 0x6e7   : > { %5473 = vmatmul.f32.vlgmr.msra.gmra.mxu0 %v6624_v14 }
 0x6e8   : > { %v4728_v59 = vpop.f32.mrf.mxu2  ;;  %5767 = vmatpush.msrb.mxu0 %v7507_v26 }
 0x6e9   : > { %v4729_v25 = vadd.f32 %v4728_v59, %v4699_v62  ;;  %6217 = vperm.xlu1 %6762, %v6167_v17   ;;  %6242 = vperm.xlu0 %6761, %v6172_v44   ;;  %v7496_v29 = vpop.permute.xlu1 %7495  ;;  %v6630_v17 = vld [vmem:[%s11744_s5 + $0x2f0] sm:$0xff]  ;;  %v7548_v44 = vunpack.i.h.bf16 %v11385_v6 }
 0x6ea   : > { %v4579_v54 = vpop.f32.mrf.mxu1  ;;  %v7498_v41 = vunpack.i.h.bf16 %v7496_v29  ;;  %v7497_v7 = vunpack.i.l.bf16 %v7496_v29  ;;  %5768 = vmatpush.msrb.mxu0 %v7508_v1  ;;  %v7562_v29 = vunpack.i.l.bf16 %v11412_v21 }
 0x6eb   : > { %v11393_v19 = vadd.f32 %v4729_v25, %v4585_v49  ;;  %v4580_v35 = vadd.f32 %v4579_v54, %v4550_v16  ;;  %v7521_v18 = vpop.permute.xlu0 %7520  ;;  %v7547_v16 = vunpack.i.l.bf16 %v11385_v6 }
 0x6ec   : > { %v7522_v5 = vunpack.i.l.bf16 %v7521_v18  ;;  %5625 = vmatpush.msra.mxu3 %v7497_v7  ;;  %5654 = vmatpush.msra.mxu2 %v7498_v41  ;;  %v7523_v11 = vunpack.i.h.bf16 %v7521_v18  ;;  %v6640_v41 = vld [vmem:[%s11744_s5 + $0x320] sm:$0xff]  ;;  %v6641_v7 = vld [vmem:[%s11744_s5 + $0x328] sm:$0xff] }
 0x6ed   : > { %v4587_v12 = vadd.f32 %v4580_v35, %v11345_v32  ;;  %v4553_v40 = vpop.f32.mrf.mxu0  ;;  %v6637_v32 = vld [vmem:[%s11744_s5 + $0x308] sm:$0xff]  ;;  %v7563_v35 = vunpack.i.h.bf16 %v11412_v21  ;;  %v6664_v21 = vld [vmem:[%s11744_s5 + $0x3a0] sm:$0xff] }
 0x6ee   : > { %5769 = vmatpush.msrb.mxu0 %v7522_v5  ;;  %v4702_v43 = vpop.f32.mrf.mxu3  ;;  %5626 = vmatpush.msra.mxu3 %v7502_v24 }
 0x6ef   : > { %5655 = vmatpush.msra.mxu2 %v7503_v47  ;;  %5476 = vmatmul.f32.gmra.mxu0 %v6626_v8  ;;  %v6651_v47 = vld [vmem:[%s11744_s5 + $0x358] sm:$0xff] }
 0x6f0   : > { %v4731_v15 = vpop.f32.mrf.mxu2  ;;  %5770 = vmatpush.msrb.mxu0 %v7523_v11  ;;  %5627 = vmatpush.msra.mxu3 %v7517_v2 }
 0x6f1   : > { %v4732_v48 = vadd.f32 %v4731_v15, %v4702_v43  ;;  %6232 = vperm.xlu1 %6762, %v6170_v31   ;;  %5656 = vmatpush.msra.mxu2 %v7518_v46  ;;  %v11414_v57 = vpop.permute.xlu1 %7510  ;;  %v11480_v43 = vpop.permute.xlu2 %7590 }
 0x6f2   : > { %v4582_v55 = vpop.f32.mrf.mxu1  ;;  %v7512_v45 = vunpack.i.l.bf16 %v11414_v57  ;;  %5628 = vmatmul.f32.vlgmr.msra.gmra.mxu3 %v6636_v4  ;;  %6644 = vmatmul.msk.f32.vlgmr.msra.gmra.mxu2 %vm2052_vm4, %v6637_v32  ;;  %v7513_v53 = vunpack.i.h.bf16 %v11414_v57  ;;  %v7578_v4 = vunpack.i.h.bf16 %v11442_v38 }
 0x6f3   : > { %v11418_v42 = vadd.f32 %v4732_v48, %v4586_v23  ;;  %v4583_v49 = vadd.f32 %v4582_v55, %v4553_v40  ;;  %v7536_v3 = vpop.permute.xlu0 %7535  ;;  %6657 = vmatmul.msk.f32.gmra.mxu1 %vm2052_vm4, %v6651_v47  ;;  %v7592_v55 = vunpack.i.l.bf16 %v11480_v43 }
 0x6f4   : > { %v7537_v61 = vunpack.i.l.bf16 %v7536_v3  ;;  %6721 = vmatpush.msrb.mxu1 %v7512_v45  ;;  %v7538_v51 = vunpack.i.h.bf16 %v7536_v3 }
 0x6f5   : > { %v4588_v27 = vadd.f32 %v4583_v49, %v11379_v9  ;;  %v4854_v22 = vpop.f32.mrf.mxu0  ;;  %v6642_v49 = vld [vmem:[%s11744_s5 + $0x330] sm:$0xff] }
 0x6f6   : > { %5771 = vmatpush.msrb.mxu0 %v7537_v61  ;;  %v4705_v34 = vpop.f32.mrf.mxu3  ;;  %6722 = vmatpush.msrb.mxu1 %v7513_v53 }
 0x6f7   : > { %5479 = vmatmul.f32.gmra.mxu0 %v6628_v36  ;;  %v7593_v36 = vunpack.i.h.bf16 %v11480_v43  ;;  %v6667_v43 = vld [vmem:[%s11744_s5 + $0x3b8] sm:$0xff] }
 0x6f8   : > { %v4734_v52 = vpop.f32.mrf.mxu2  ;;  %5772 = vmatpush.msrb.mxu0 %v7538_v51  ;;  %6723 = vmatpush.msrb.mxu1 %v7532_v20  ;;  %v6653_v51 = vld [vmem:[%s11744_s5 + $0x368] sm:$0xff] }
 0x6f9   : > { %v4735_v60 = vadd.f32 %v4734_v52, %v4705_v34  ;;  %6247 = vperm.xlu1 %6762, %v6173_v13   ;;  %v7526_v28 = vpop.permute.xlu1 %7525 }
 0x6fa   : > { %v4883_v9 = vpop.f32.mrf.mxu1  ;;  %v7527_v10 = vunpack.i.l.bf16 %v7526_v28  ;;  %5631 = vmatmul.f32.gmra.mxu3 %v6638_v58  ;;  %6645 = vmatmul.msk.f32.gmra.mxu2 %vm2052_vm4, %v6639_v33  ;;  %v7528_v23 = vunpack.i.h.bf16 %v7526_v28 }
 0x6fb   : > { %v11449_v30 = vadd.f32 %v4735_v60, %v4587_v12  ;;  %v4884_v62 = vadd.f32 %v4883_v9, %v4854_v22  ;;  %v7551_v14 = vpop.permute.xlu0 %7550  ;;  %6724 = vmatpush.msrb.mxu1 %v7533_v37  ;;  %v7577_v12 = vunpack.i.l.bf16 %v11442_v38  ;;  %v6673_v38 = vld [vmem:[%s11744_s5 + $0x3c8] sm:$0xff] }
 0x6fc   : > { %v7552_v26 = vunpack.i.l.bf16 %v7551_v14  ;;  %5922 = vmatpush.msrb.mxu3 %v7527_v10  ;;  %v7553_v59 = vunpack.i.h.bf16 %v7551_v14  ;;  %6658 = vmatmul.msk.f32.gmra.mxu1 %vm2052_vm4, %v6653_v51  ;;  %v6676_v51 = vld [vmem:[%s11744_s5 + $0x3e0] sm:$0xff] }
 0x6fd   : > { %v4895_v1 = vadd.f32 %v4884_v62, %v11393_v19  ;;  %6725 = vmatpush.msrb.mxu1 %v7547_v16 }
 0x6fe   : > { %5773 = vmatpush.msrb.mxu0 %v7552_v26  ;;  %v4708_v25 = vpop.f32.mrf.mxu3  ;;  %5923 = vmatpush.msrb.mxu3 %v7528_v23  ;;  %v7606_v23 = vpop.permute.xlu2 %7605 }
 0x6ff   : > { %6726 = vmatpush.msrb.mxu1 %v7548_v44  ;;  %5482 = vmatmul.f32.gmra.mxu0 %v6630_v17  ;;  %v4857_v54 = vpop.f32.mrf.mxu0 }
 0x700   : > { %v4737_v19 = vpop.f32.mrf.mxu2  ;;  %5774 = vmatpush.msrb.mxu0 %v7553_v59 }
 0x701   : > { %v4738_v18 = vadd.f32 %v4737_v19, %v4708_v25  ;;  %6727 = vmatpush.msrb.mxu1 %v7562_v29  ;;  %v7541_v24 = vpop.permute.xlu1 %7540 }
 0x702   : > { %v4886_v5 = vpop.f32.mrf.mxu1  ;;  %v7542_v8 = vunpack.i.l.bf16 %v7541_v24  ;;  %5634 = vmatmul.f32.gmra.mxu3 %v6640_v41  ;;  %6646 = vmatmul.msk.f32.gmra.mxu2 %vm2052_vm4, %v6641_v7  ;;  %v7543_v31 = vunpack.i.h.bf16 %v7541_v24 }
 0x703   : > { %v4743_v40 = vadd.f32 %v4738_v18, %v4588_v27  ;;  %v4887_v2 = vadd.f32 %v4886_v5, %v4857_v54  ;;  %v7566_v11 = vpop.permute.xlu0 %7565  ;;  %6728 = vmatpush.msrb.mxu1 %v7563_v35 }
 0x704   : > { %v7567_v46 = vunpack.i.l.bf16 %v7566_v11  ;;  %5924 = vmatpush.msrb.mxu3 %v7542_v8  ;;  %v7568_v15 = vunpack.i.h.bf16 %v7566_v11 }
 0x705   : > { %v4896_v32 = vadd.f32 %v4887_v2, %v11418_v42  ;;  %6729 = vmatpush.msrb.mxu1 %v7577_v12  ;;  %v6643_v42 = vld [vmem:[%s11744_s5 + $0x338] sm:$0xff] }
 0x706   : > { %5775 = vmatpush.msrb.mxu0 %v7567_v46  ;;  %v5009_v48 = vpop.f32.mrf.mxu3  ;;  %5925 = vmatpush.msrb.mxu3 %v7543_v31  ;;  %v7621_v46 = vpop.permute.xlu2 %7620 }
 0x707   : > { %6730 = vmatpush.msrb.mxu1 %v7578_v4 }
 0x708   : > { %v5038_v3 = vpop.f32.mrf.mxu2  ;;  %5776 = vmatpush.msrb.mxu0 %v7568_v15  ;;  %v4860_v61 = vpop.f32.mrf.mxu0 }
 0x709   : > { %v5039_v27 = vadd.f32 %v5038_v3, %v5009_v48  ;;  %6731 = vmatpush.msrb.mxu1 %v7592_v55  ;;  %v7556_v22 = vpop.permute.xlu1 %7555 }
 0x70a   : > { %v4889_v34 = vpop.f32.mrf.mxu1  ;;  %v7557_v13 = vunpack.i.l.bf16 %v7556_v22  ;;  %5637 = vmatmul.f32.gmra.mxu3 %v6642_v49  ;;  %6647 = vmatmul.msk.f32.gmra.mxu2 %vm2052_vm4, %v6643_v42  ;;  %v7558_v60 = vunpack.i.h.bf16 %v7556_v22 }
 0x70b   : > { %v5050_v58 = vadd.f32 %v5039_v27, %v4895_v1  ;;  %v4890_v33 = vadd.f32 %v4889_v34, %v4860_v61  ;;  %v7581_v52 = vpop.permute.xlu0 %7580  ;;  %6732 = vmatpush.msrb.mxu1 %v7593_v36  ;;  %v6655_v1 = vld [vmem:[%s11744_s5 + $0x378] sm:$0xff]  ;;  %v7607_v61 = vunpack.i.l.bf16 %v7606_v23  ;;  %v7608_v34 = vunpack.i.h.bf16 %v7606_v23 }
 0x70c   : > { %v7582_v28 = vunpack.i.l.bf16 %v7581_v52  ;;  %5926 = vmatpush.msrb.mxu3 %v7557_v13  ;;  %v7583_v10 = vunpack.i.h.bf16 %v7581_v52  ;;  %6659 = vmatmul.msk.f32.gmra.mxu1 %vm2052_vm4, %v6655_v1  ;;  %v7623_v1 = vunpack.i.h.bf16 %v7621_v46 }
 0x70d   : > { %v4897_v9 = vadd.f32 %v4890_v33, %v11449_v30 }
 0x70e   : > { %5777 = vmatpush.msrb.mxu0 %v7582_v28  ;;  %v5012_v0 = vpop.f32.mrf.mxu3  ;;  %5927 = vmatpush.msrb.mxu3 %v7558_v60 }
 0x710   : > { %v5041_v62 = vpop.f32.mrf.mxu2  ;;  %5778 = vmatpush.msrb.mxu0 %v7583_v10  ;;  %v4863_v14 = vpop.f32.mrf.mxu0 }
 0x711   : > { %v5042_v26 = vadd.f32 %v5041_v62, %v5012_v0  ;;  %v7571_v17 = vpop.permute.xlu1 %7570 }
 0x712   : > { %v4892_v59 = vpop.f32.mrf.mxu1  ;;  %v7572_v25 = vunpack.i.l.bf16 %v7571_v17  ;;  %v7573_v30 = vunpack.i.h.bf16 %v7571_v17  ;;  %v6678_v17 = vld [vmem:[%s11744_s5 + $0x3f0] sm:$0xff] }
 0x713   : > { %v5051_v54 = vadd.f32 %v5042_v26, %v4896_v32  ;;  %v4893_v41 = vadd.f32 %v4892_v59, %v4863_v14  ;;  %v7596_v7 = vpop.permute.xlu0 %7595  ;;  %v7636_v14 = vpop.permute.xlu2 %7635  ;;  %v7622_v26 = vunpack.i.l.bf16 %v7621_v46 }
 0x714   : > { %5928 = vmatpush.msrb.mxu3 %v7572_v25  ;;  %v7597_v49 = vunpack.i.l.bf16 %v7596_v7  ;;  %v6648_v25 = vld [vmem:[%s11744_s5 + $0x340] sm:$0xff] }
 0x715   : > { %v4898_v19 = vadd.f32 %v4893_v41, %v4743_v40  ;;  %v7598_v40 = vunpack.i.h.bf16 %v7596_v7 }
 0x716   : > { %v5015_v18 = vpop.f32.mrf.mxu3  ;;  %5929 = vmatpush.msrb.mxu3 %v7573_v30 }
 0x718   : > { %v5044_v24 = vpop.f32.mrf.mxu2  ;;  %v5164_v5 = vpop.f32.mrf.mxu0 }
 0x719   : > { %v5045_v8 = vadd.f32 %v5044_v24, %v5015_v18  ;;  %v7586_v47 = vpop.permute.xlu1 %7585 }
 0x71a   : > { %v5193_v2 = vpop.f32.mrf.mxu1  ;;  %v7588_v11 = vunpack.i.h.bf16 %v7586_v47  ;;  %v7587_v31 = vunpack.i.l.bf16 %v7586_v47  ;;  %v7637_v47 = vunpack.i.l.bf16 %v7636_v14 }
 0x71b   : > { %v5052_v15 = vadd.f32 %v5045_v8, %v4897_v9  ;;  %v5194_v48 = vadd.f32 %v5193_v2, %v5164_v5  ;;  %v11511_v32 = vpop.permute.xlu0 %7610  ;;  %v7638_v2 = vunpack.i.h.bf16 %v7636_v14 }
 0x71c   : > { %v7612_v42 = vunpack.i.l.bf16 %v11511_v32  ;;  %5930 = vmatpush.msrb.mxu3 %v7587_v31  ;;  %5959 = vmatpush.msrb.mxu2 %v7588_v11  ;;  %v7613_v27 = vunpack.i.h.bf16 %v11511_v32  ;;  %v7651_v11 = vpop.permute.xlu2 %7650  ;;  %v6674_v32 = vld [vmem:[%s11744_s5 + $0x3d0] sm:$0xff] }
 0x71d   : > { %v11514_v3 = vadd.f32 %v5194_v48, %v5050_v58  ;;  %v7652_v56 = vunpack.i.l.bf16 %v7651_v11 }
 0x71e   : > { %6733 = vmatpush.msrb.mxu1 %v7612_v42  ;;  %v5018_v22 = vpop.f32.mrf.mxu3  ;;  %5931 = vmatpush.msrb.mxu3 %v7597_v49 }
 0x71f   : > { %5960 = vmatpush.msrb.mxu2 %v7598_v40 }
 0x720   : > { %v5047_v13 = vpop.f32.mrf.mxu2  ;;  %6734 = vmatpush.msrb.mxu1 %v7613_v27  ;;  %v5167_v58 = vpop.f32.mrf.mxu0  ;;  %5932 = vmatpush.msrb.mxu3 %v7607_v61 }
 0x721   : > { %v5048_v33 = vadd.f32 %v5047_v13, %v5018_v22  ;;  %5961 = vmatpush.msrb.mxu2 %v7608_v34  ;;  %v7601_v52 = vpop.permute.xlu1 %7600  ;;  %6099 = vmatmul.f32.vlgmr.msrb.gmra.mxu1 %v6676_v51  ;;  %v7653_v22 = vunpack.i.h.bf16 %v7651_v11  ;;  %v6660_v34 = vld [vmem:[%s11744_s5 + $0x380] sm:$0xff]  ;;  %v6661_v13 = vld [vmem:[%s11744_s5 + $0x388] sm:$0xff] }
 0x722   : > { %v5196_v60 = vpop.f32.mrf.mxu1  ;;  %v7602_v28 = vunpack.i.l.bf16 %v7601_v52  ;;  %v7603_v62 = vunpack.i.h.bf16 %v7601_v52 }
 0x723   : > { %v5053_v9 = vadd.f32 %v5048_v33, %v4898_v19  ;;  %v5197_v10 = vadd.f32 %v5196_v60, %v5167_v58  ;;  %v7626_v0 = vpop.permute.xlu0 %7625  ;;  %v6652_v33 = vld [vmem:[%s11744_s5 + $0x360] sm:$0xff] }
 0x724   : > { %5779 = vmatpush.msrb.mxu0 %v7602_v28  ;;  %v7627_v18 = vunpack.i.l.bf16 %v7626_v0  ;;  %v7628_v24 = vunpack.i.h.bf16 %v7626_v0 }
 0x725   : > { %v11524_v23 = vadd.f32 %v5197_v10, %v5051_v54 }
 0x726   : > { %5780 = vmatpush.msrb.mxu0 %v7603_v62 }
 0x728   : > { %v5170_v59 = vpop.f32.mrf.mxu0  ;;  %5781 = vmatpush.msrb.mxu0 %v7622_v26 }
 0x729   : > { %v7616_v41 = vpop.permute.xlu1 %7615  ;;  %6102 = vmatmul.f32.gmra.mxu1 %v6678_v17  ;;  %v6666_v17 = vld [vmem:[%s11744_s5 + $0x3b0] sm:$0xff] }
 0x72a   : > { %v5199_v7 = vpop.f32.mrf.mxu1  ;;  %v7618_v30 = vunpack.i.h.bf16 %v7616_v41  ;;  %v7617_v19 = vunpack.i.l.bf16 %v7616_v41  ;;  %5782 = vmatpush.msrb.mxu0 %v7623_v1  ;;  %v6679_v1 = vld [vmem:[%s11744_s5 + $0x3f8] sm:$0xff] }
 0x72b   : > { %v5200_v54 = vadd.f32 %v5199_v7, %v5170_v59  ;;  %5783 = vmatmul.f32.vlgmr.msrb.gmra.mxu0 %v6648_v25  ;;  %v7641_v8 = vpop.permute.xlu0 %7640 }
 0x72c   : > { %6077 = vmatpush.msra.mxu0 %v7492_v39  ;;  %5933 = vmatpush.msrb.mxu3 %v7617_v19  ;;  %v7642_v31 = vunpack.i.l.bf16 %v7641_v8  ;;  %v6650_v39 = vld [vmem:[%s11744_s5 + $0x350] sm:$0xff] }
 0x72d   : > { %v11534_v5 = vadd.f32 %v5200_v54, %v5052_v15  ;;  %5962 = vmatpush.msrb.mxu2 %v7618_v30  ;;  %v7643_v15 = vunpack.i.h.bf16 %v7641_v8 }
 0x72e   : > { %6078 = vmatpush.msra.mxu0 %v7493_v50  ;;  %5934 = vmatpush.msrb.mxu3 %v7627_v18 }
 0x72f   : > { %5963 = vmatpush.msrb.mxu2 %v7628_v24 }
 0x730   : > { %6079 = vmatpush.msra.mxu0 %v7512_v45  ;;  %v5173_v46 = vpop.f32.mrf.mxu0  ;;  %5935 = vmatpush.msrb.mxu3 %v7637_v47 }
 0x731   : > { %5964 = vmatpush.msrb.mxu2 %v7638_v2  ;;  %v7631_v48 = vpop.permute.xlu1 %7630  ;;  %v5319_v49 = vpop.f32.mrf.mxu3 }
 0x732   : > { %v5202_v50 = vpop.f32.mrf.mxu1  ;;  %v7632_v40 = vunpack.i.l.bf16 %v7631_v48  ;;  %6080 = vmatpush.msra.mxu0 %v7513_v53  ;;  %v5348_v61 = vpop.f32.mrf.mxu2  ;;  %5936 = vmatpush.msrb.mxu3 %v7642_v31  ;;  %v7633_v53 = vunpack.i.h.bf16 %v7631_v48 }
 0x733   : > { %v5203_v45 = vadd.f32 %v5202_v50, %v5173_v46  ;;  %v5349_v51 = vadd.f32 %v5348_v61, %v5319_v49  ;;  %5965 = vmatpush.msrb.mxu2 %v7643_v15  ;;  %5786 = vmatmul.f32.gmra.mxu0 %v6650_v39  ;;  %v7656_v28 = vpop.permute.xlu0 %7655 }
 0x734   : > { %6081 = vmatpush.msra.mxu0 %v7532_v20  ;;  %5937 = vmatpush.msrb.mxu3 %v7652_v56  ;;  %v7657_v6 = vunpack.i.l.bf16 %v7656_v28  ;;  %v7658_v0 = vunpack.i.h.bf16 %v7656_v28 }
 0x735   : > { %v11553_v57 = vadd.f32 %v5203_v45, %v5053_v9  ;;  %v11556_v58 = vadd.f32 %v5349_v51, %v11514_v3  ;;  %5966 = vmatpush.msrb.mxu2 %v7653_v22  ;;  %6114 = vmatpush.msra.mxu1 %v7632_v40 }
 0x736   : > { %5938 = vmatmul.f32.vlgmr.msrb.gmra.mxu3 %v6660_v34  ;;  %6668 = vmatmul.msk.f32.vlgmr.msrb.gmra.mxu2 %vm2052_vm4, %v6661_v13 }
 0x737   : > { %6082 = vmatpush.msra.mxu0 %v7533_v37  ;;  %6115 = vmatpush.msra.mxu1 %v7633_v53 }
 0x739   : > { %6083 = vmatpush.msra.mxu0 %v7547_v16  ;;  %v5322_v20 = vpop.f32.mrf.mxu3  ;;  %v6663_v16 = vld [vmem:[%s11744_s5 + $0x398] sm:$0xff] }
 0x73a   : > { %v5351_v52 = vpop.f32.mrf.mxu2 }
 0x73b   : > { %v7646_v3 = vpop.permute.xlu1 %7645  ;;  %6084 = vmatpush.msra.mxu0 %v7548_v44  ;;  %v5352_v60 = vadd.f32 %v5351_v52, %v5322_v20  ;;  %v6654_v44 = vld [vmem:[%s11744_s5 + $0x370] sm:$0xff] }
 0x73c   : > { %v7647_v37 = vunpack.i.l.bf16 %v7646_v3  ;;  %5789 = vmatmul.f32.gmra.mxu0 %v6652_v33  ;;  %v7648_v10 = vunpack.i.h.bf16 %v7646_v3 }
 0x73d   : > { %v5361_v9 = vadd.f32 %v5352_v60, %v11524_v23  ;;  %6085 = vmatpush.msra.mxu0 %v7562_v29 }
 0x73e   : > { %6116 = vmatpush.msra.mxu1 %v7647_v37  ;;  %5941 = vmatmul.f32.gmra.mxu3 %v6662_v63 }
 0x73f   : > { %6669 = vmatmul.msk.f32.gmra.mxu2 %vm2052_vm4, %v6663_v16  ;;  %6086 = vmatpush.msra.mxu0 %v7563_v35 }
 0x740   : > { %6117 = vmatpush.msra.mxu1 %v7648_v10 }
 0x741   : > { %6087 = vmatpush.msra.mxu0 %v7577_v12  ;;  %v6665_v12 = vld [vmem:[%s11744_s5 + $0x3a8] sm:$0xff] }
 0x742   : > { %6118 = vmatpush.msra.mxu1 %v7657_v6  ;;  %v5325_v29 = vpop.f32.mrf.mxu3 }
 0x743   : > { %v7661_v62 = vpop.permute.xlu1 %7660  ;;  %6088 = vmatpush.msra.mxu0 %v7578_v4  ;;  %v5354_v14 = vpop.f32.mrf.mxu2 }
 0x744   : > { %v7662_v35 = vunpack.i.l.bf16 %v7661_v62  ;;  %6119 = vmatpush.msra.mxu1 %v7658_v0  ;;  %5792 = vmatmul.f32.gmra.mxu0 %v6654_v44  ;;  %v5355_v23 = vadd.f32 %v5354_v14, %v5325_v29  ;;  %v7663_v26 = vunpack.i.h.bf16 %v7661_v62 }
 0x745   : > { %6089 = vmatpush.msra.mxu0 %v7592_v55  ;;  %v6672_v55 = vld [vmem:[%s11744_s5 + $0x3c0] sm:$0xff] }
 0x746   : > { %6120 = vmatpush.msra.mxu1 %v7662_v35  ;;  %5944 = vmatmul.f32.gmra.mxu3 %v6664_v21  ;;  %v5362_v4 = vadd.f32 %v5355_v23, %v11534_v5 }
 0x747   : > { %6670 = vmatmul.msk.f32.gmra.mxu2 %vm2052_vm4, %v6665_v12  ;;  %6090 = vmatpush.msra.mxu0 %v7593_v36  ;;  %v6675_v36 = vld [vmem:[%s11744_s5 + $0x3d8] sm:$0xff] }
 0x748   : > { %6121 = vmatpush.msra.mxu1 %v7663_v26 }
 0x749   : > { %6091 = vmatpush.msra.mxu0 %v7612_v42  ;;  %6680 = vmatmul.msk.f32.vlgmr.msra.gmra.mxu1 %vm2052_vm4, %v6673_v38  ;;  %v6677_v42 = vld [vmem:[%s11744_s5 + $0x3e8] sm:$0xff] }
 0x74b   : > { %6092 = vmatpush.msra.mxu0 %v7613_v27  ;;  %v5503_v27 = vpop.f32.mrf.mxu1 }
 0x74c   : > { %6093 = vmatmul.f32.vlgmr.msra.gmra.mxu0 %v6672_v55 }
 0x74d   : > { %v5328_v8 = vpop.f32.mrf.mxu3 }
 0x74e   : > { %5947 = vmatmul.f32.gmra.mxu3 %v6666_v17  ;;  %v5357_v47 = vpop.f32.mrf.mxu2 }
 0x74f   : > { %6671 = vmatmul.msk.f32.gmra.mxu2 %vm2052_vm4, %v6667_v43  ;;  %v5358_v11 = vadd.f32 %v5357_v47, %v5328_v8 }
 0x751   : > { %6681 = vmatmul.msk.f32.gmra.mxu1 %vm2052_vm4, %v6675_v36  ;;  %v5363_v39 = vadd.f32 %v5358_v11, %v11553_v57 }
 0x753   : > { %v5506_v41 = vpop.f32.mrf.mxu1 }
 0x754   : > { %6096 = vmatmul.f32.gmra.mxu0 %v6674_v32 }
 0x759   : > { %6682 = vmatmul.msk.f32.gmra.mxu1 %vm2052_vm4, %v6677_v42 }
 0x75b   : > { %v5509_v18 = vpop.f32.mrf.mxu1 }
 0x761   : > { %6683 = vmatmul.msk.f32.gmra.mxu1 %vm2052_vm4, %v6679_v1 }
 0x763   : > { %v5512_v31 = vpop.f32.mrf.mxu1 }
 0x764   : > { %v5474_v59 = vpop.f32.mrf.mxu0 }
 0x765   : > { %v5504_v25 = vadd.f32 %v5503_v27, %v5474_v59 }
 0x767   : > { %v5515_v7 = vadd.f32 %v5504_v25, %v11556_v58 }
 0x76b   : > { %v5813_v49 = vpop.f32.mrf.mxu1 }
 0x76c   : > { %v5477_v30 = vpop.f32.mrf.mxu0 }
 0x76d   : > { %v5507_v19 = vadd.f32 %v5506_v41, %v5477_v30 }
 0x76f   : > { %v5516_v54 = vadd.f32 %v5507_v19, %v5361_v9 }
 0x773   : > { %v5816_v40 = vpop.f32.mrf.mxu1 }
 0x774   : > { %v5480_v24 = vpop.f32.mrf.mxu0 }
 0x775   : > { %v5510_v5 = vadd.f32 %v5509_v18, %v5480_v24  ;;  %v5629_v56 = vpop.f32.mrf.mxu3  ;;  %v5658_v50 = vpop.f32.mrf.mxu2 }
 0x776   : > { %v5659_v51 = vadd.f32 %v5658_v50, %v5629_v56 }
 0x777   : > { %v5517_v2 = vadd.f32 %v5510_v5, %v5362_v4 }
 0x778   : > { %v5670_v20 = vadd.f32 %v5659_v51, %v5515_v7  ;;  %v6146_v51 = vld [vmem:[%s11746_s7 + $0x18] sm:$0xff] }
 0x77b   : > { %v5819_v45 = vpop.f32.mrf.mxu1 }
 0x77c   : > { %v5483_v46 = vpop.f32.mrf.mxu0 }
 0x77d   : > { %v5513_v15 = vadd.f32 %v5512_v31, %v5483_v46  ;;  %v5632_v61 = vpop.f32.mrf.mxu3  ;;  %v5661_v22 = vpop.f32.mrf.mxu2 }
 0x77e   : > { %v5662_v3 = vadd.f32 %v5661_v22, %v5632_v61  ;;  %v6143_v61 = vld [vmem:[%s11746_s7] sm:$0xff]  ;;  %v6144_v22 = vld [vmem:[%s11746_s7 + $0x8] sm:$0xff] }
 0x77f   : > { %v5518_v48 = vadd.f32 %v5513_v15, %v5363_v39 }
 0x780   : > { %v5671_v57 = vadd.f32 %v5662_v3, %v5516_v54  ;;  %v6154_v3 = vld [vmem:[%s11746_s7 + $0x58] sm:$0xff] }
 0x785   : > { %v5635_v34 = vpop.f32.mrf.mxu3  ;;  %v5664_v13 = vpop.f32.mrf.mxu2 }
 0x786   : > { %v5665_v4 = vadd.f32 %v5664_v13, %v5635_v34  ;;  %v6147_v34 = vld [vmem:[%s11746_s7 + $0x20] sm:$0xff]  ;;  %v6148_v13 = vld [vmem:[%s11746_s7 + $0x28] sm:$0xff] }
 0x788   : > { %v5672_v42 = vadd.f32 %v5665_v4, %v5517_v2 }
 0x789   : > { %v5822_v58 = vpop.f32.mrf.mxu1 }
 0x78d   : > { %v5638_v63 = vpop.f32.mrf.mxu3  ;;  %v5667_v16 = vpop.f32.mrf.mxu2 }
 0x78e   : > { %v5668_v55 = vadd.f32 %v5667_v16, %v5638_v63  ;;  %v6157_v63 = vld [vmem:[%s11746_s7 + $0x70] sm:$0xff]  ;;  %v6178_v16 = vpop.permute.xlu2 %6177 }
 0x790   : > { %v5673_v27 = vadd.f32 %v5668_v55, %v5518_v48 }
 0x79e   : > { %v6100_v28 = vpop.f32.mrf.mxu1 }
 0x7a6   : > { %v6103_v44 = vpop.f32.mrf.mxu1 }
 0x7a8   : > { %v5784_v53 = vpop.f32.mrf.mxu0 }
 0x7a9   : > { %v5814_v33 = vadd.f32 %v5813_v49, %v5784_v53  ;;  %v6149_v53 = vld [vmem:[%s11746_s7 + $0x30] sm:$0xff] }
 0x7ab   : > { %v5825_v52 = vadd.f32 %v5814_v33, %v5670_v20  ;;  %v6151_v20 = vld [vmem:[%s11746_s7 + $0x40] sm:$0xff]  ;;  %v6152_v33 = vld [vmem:[%s11746_s7 + $0x48] sm:$0xff] }
 0x7b0   : > { %v5787_v60 = vpop.f32.mrf.mxu0 }
 0x7b1   : > { %v5817_v37 = vadd.f32 %v5816_v40, %v5787_v60  ;;  %v6155_v60 = vld [vmem:[%s11746_s7 + $0x60] sm:$0xff] }
 0x7b3   : > { %v5826_v9 = vadd.f32 %v5817_v37, %v5671_v57  ;;  %v6156_v57 = vld [vmem:[%s11746_s7 + $0x68] sm:$0xff]  ;;  %v6158_v37 = vld [vmem:[%s11746_s7 + $0x78] sm:$0xff] }
 0x7b9   : > { %v5939_v10 = vpop.f32.mrf.mxu3  ;;  %v5968_v6 = vpop.f32.mrf.mxu2 }
 0x7ba   : > { %v5790_v0 = vpop.f32.mrf.mxu0  ;;  %v5969_v54 = vadd.f32 %v5968_v6, %v5939_v10  ;;  %v6183_v10 = vpop.permute.xlu0 %6182 }
 0x7bb   : > { %v5820_v36 = vadd.f32 %v5819_v45, %v5790_v0  ;;  %v6145_v45 = vld [vmem:[%s11746_s7 + $0x10] sm:$0xff]  ;;  %v6188_v0 = vpop.permute.xlu1 %6187 }
 0x7bc   : > { %v5980_v15 = vadd.f32 %v5969_v54, %v5825_v52  ;;  %v6153_v52 = vld [vmem:[%s11746_s7 + $0x50] sm:$0xff] }
 0x7bd   : > { %v5827_v41 = vadd.f32 %v5820_v36, %v5672_v42 }
 0x7c1   : > { %v5942_v29 = vpop.f32.mrf.mxu3 }
 0x7c2   : > { %v5971_v62 = vpop.f32.mrf.mxu2  ;;  %v5793_v35 = vpop.f32.mrf.mxu0 }
 0x7c3   : > { %v5823_v32 = vadd.f32 %v5822_v58, %v5793_v35  ;;  %v5972_v30 = vadd.f32 %v5971_v62, %v5942_v29  ;;  %v6150_v58 = vld [vmem:[%s11746_s7 + $0x38] sm:$0xff] }
 0x7c5   : > { %v5828_v7 = vadd.f32 %v5823_v32, %v5673_v27  ;;  %v5981_v11 = vadd.f32 %v5972_v30, %v5826_v9 }
 0x7c6   : > { %v6123_v21 = vpop.f32.mrf.mxu1 }
 0x7c9   : > { %v5945_v14 = vpop.f32.mrf.mxu3 }
 0x7ca   : > { %v5974_v12 = vpop.f32.mrf.mxu2  ;;  %v6094_v26 = vpop.f32.mrf.mxu0 }
 0x7cb   : > { %v5975_v1 = vadd.f32 %v5974_v12, %v5945_v14  ;;  %v6124_v31 = vadd.f32 %v6123_v21, %v6094_v26  ;;  %v6193_v21 = vpop.permute.xlu2 %6192  ;;  %v6198_v12 = vpop.permute.xlu0 %6197 }
 0x7cd   : > { %v5982_v24 = vadd.f32 %v5975_v1, %v5827_v41  ;;  %v6135_v49 = vadd.f32 %v6124_v31, %v5980_v15 }
 0x7ce   : > { %v6126_v23 = vpop.f32.mrf.mxu1 }
 0x7cf   : > { %v6139_v40 = vmax.f32 %v6135_v49, 0.0 }
 0x7d1   : > { %v5948_v17 = vpop.f32.mrf.mxu3 }
 0x7d2   : > { %v5977_v43 = vpop.f32.mrf.mxu2  ;;  %v6097_v25 = vpop.f32.mrf.mxu0 }
 0x7d3   : > { %v5978_v59 = vadd.f32 %v5977_v43, %v5948_v17  ;;  %v6127_v8 = vadd.f32 %v6126_v23, %v6097_v25  ;;  %v6208_v17 = vpop.permute.xlu2 %6207  ;;  %v6213_v32 = vpop.permute.xlu0 %6212 }
 0x7d5   : > { %v5983_v5 = vadd.f32 %v5978_v59, %v5828_v7  ;;  %v6136_v2 = vadd.f32 %v6127_v8, %v5981_v11 }
 0x7d6   : > { %v6129_v38 = vpop.f32.mrf.mxu1 }
 0x7d7   : > { %v6130_v19 = vadd.f32 %v6129_v38, %v6100_v28  ;;  %v6140_v50 = vmax.f32 %v6136_v2, 0.0  ;;  %v6203_v38 = vpop.permute.xlu1 %6202 }
 0x7d9   : > { %v6137_v46 = vadd.f32 %v6130_v19, %v5982_v24 }
 0x7db   : > { %v6141_v56 = vmax.f32 %v6137_v46, 0.0  ;;  %v6223_v41 = vpop.permute.xlu2 %6222  ;;  %v6228_v19 = vpop.permute.xlu0 %6227 }
 0x7de   : > { %v6132_v18 = vpop.f32.mrf.mxu1 }
 0x7df   : > { %v6133_v47 = vadd.f32 %v6132_v18, %v6103_v44  ;;  %v6218_v1 = vpop.permute.xlu1 %6217 }
 0x7e1   : > { %v6138_v39 = vadd.f32 %v6133_v47, %v5983_v5 }
 0x7e3   : > { %v6142_v48 = vmax.f32 %v6138_v39, 0.0  ;;  %v6238_v47 = vpop.permute.xlu2 %6237  ;;  %v6243_v46 = vpop.permute.xlu0 %6242 }
 0x7e5   : > { %6315 = vmatpush.msra.mxu3 %v6142_v48 }
 0x7e7   : > { %6316 = vmatpush.msra.mxu3 %v6141_v56  ;;  %v6233_v24 = vpop.permute.xlu1 %6232 }
 0x7e9   : > { %6317 = vmatpush.msra.mxu3 %v6140_v50 }
 0x7eb   : > { %6318 = vmatpush.msra.mxu3 %v6139_v40  ;;  %v6253_v56 = vpop.permute.xlu2 %6252 }
 0x7ec   : > { %6684 = vmatmul.msk.f32.vlgmr.msra.gmra.mxu3 %vm361_vm0, %v6143_v61 }
 0x7ef   : > { %v6248_v2 = vpop.permute.xlu1 %6247 }
 0x7f4   : > { %6685 = vmatmul.msk.f32.gmra.mxu3 %vm361_vm0, %v6144_v22 }
 0x7fc   : > { %6686 = vmatmul.msk.f32.gmra.mxu3 %vm361_vm0, %v6145_v45 }
 0x804   : > { %6687 = vmatmul.msk.f32.gmra.mxu3 %vm361_vm0, %v6146_v51 }
 0x80c   : > { %6688 = vmatmul.msk.f32.gmra.mxu3 %vm361_vm0, %v6147_v34 }
 0x814   : > { %6689 = vmatmul.msk.f32.gmra.mxu3 %vm361_vm0, %v6148_v13 }
 0x81c   : > { %6690 = vmatmul.msk.f32.gmra.mxu3 %vm361_vm0, %v6149_v53 }
 0x824   : > { %6691 = vmatmul.msk.f32.gmra.mxu3 %vm361_vm0, %v6150_v58 }
 0x82c   : > { %6692 = vmatmul.msk.f32.gmra.mxu3 %vm361_vm0, %v6151_v20 }
 0x834   : > { %6693 = vmatmul.msk.f32.gmra.mxu3 %vm361_vm0, %v6152_v33 }
 0x83c   : > { %6694 = vmatmul.msk.f32.gmra.mxu3 %vm361_vm0, %v6153_v52 }
 0x844   : > { %6695 = vmatmul.msk.f32.gmra.mxu3 %vm361_vm0, %v6154_v3 }
 0x84c   : > { %6696 = vmatmul.msk.f32.gmra.mxu3 %vm361_vm0, %v6155_v60 }
 0x854   : > { %6697 = vmatmul.msk.f32.gmra.mxu3 %vm361_vm0, %v6156_v57 }
 0x85c   : > { %6698 = vmatmul.msk.f32.gmra.mxu3 %vm361_vm0, %v6157_v63 }
 0x864   : > { %6699 = vmatmul.msk.f32.gmra.mxu3 %vm361_vm0, %v6158_v37 }
 0x86f   : > { %v6320_v28 = vpop.f32.mrf.mxu3 }
 0x870   : > { %v6321_v9 = vadd.f32 %v6320_v28, %v6178_v16 }
 0x872   : > { %6369 = vst.msk [vmem:[%s11702_s18] sm:$0xff] %vm6368_vm6, %v6321_v9 }
 0x877   : > { %v6323_v6 = vpop.f32.mrf.mxu3 }
 0x878   : > { %v6324_v44 = vadd.f32 %v6323_v6, %v6183_v10 }
 0x87a   : > { %6370 = vst.msk [vmem:[%s11702_s18 + $0x8] sm:$0xff] %vm6368_vm6, %v6324_v44 }
 0x87f   : > { %v6326_v29 = vpop.f32.mrf.mxu3 }
 0x880   : > { %v6327_v62 = vadd.f32 %v6326_v29, %v6188_v0 }
 0x882   : > { %6371 = vst.msk [vmem:[%s11702_s18 + $0x10] sm:$0xff] %vm6368_vm6, %v6327_v62 }
 0x887   : > { %v6329_v35 = vpop.f32.mrf.mxu3 }
 0x888   : > { %v6330_v14 = vadd.f32 %v6329_v35, %v6193_v21 }
 0x88a   : > { %6372 = vst.msk [vmem:[%s11702_s18 + $0x18] sm:$0xff] %vm6368_vm6, %v6330_v14 }
 0x88f   : > { %v6332_v23 = vpop.f32.mrf.mxu3 }
 0x890   : > { %v6333_v26 = vadd.f32 %v6332_v23, %v6198_v12 }
 0x892   : > { %6373 = vst.msk [vmem:[%s11702_s18 + $0x20] sm:$0xff] %vm6368_vm6, %v6333_v26 }
 0x897   : > { %v6335_v4 = vpop.f32.mrf.mxu3 }
 0x898   : > { %v6336_v55 = vadd.f32 %v6335_v4, %v6203_v38 }
 0x89a   : > { %6374 = vst.msk [vmem:[%s11702_s18 + $0x28] sm:$0xff] %vm6368_vm6, %v6336_v55 }
 0x89f   : > { %v6338_v43 = vpop.f32.mrf.mxu3 }
 0x8a0   : > { %v6339_v36 = vadd.f32 %v6338_v43, %v6208_v17 }
 0x8a2   : > { %6375 = vst.msk [vmem:[%s11702_s18 + $0x30] sm:$0xff] %vm6368_vm6, %v6339_v36 }
 0x8a7   : > { %v6341_v42 = vpop.f32.mrf.mxu3 }
 0x8a8   : > { %v6342_v27 = vadd.f32 %v6341_v42, %v6213_v32 }
 0x8aa   : > { %6376 = vst.msk [vmem:[%s11702_s18 + $0x38] sm:$0xff] %vm6368_vm6, %v6342_v27 }
 0x8af   : > { %v6344_v59 = vpop.f32.mrf.mxu3 }
 0x8b0   : > { %v6345_v25 = vadd.f32 %v6344_v59, %v6218_v1 }
 0x8b2   : > { %6377 = vst.msk [vmem:[%s11702_s18 + $0x40] sm:$0xff] %vm6368_vm6, %v6345_v25 }
 0x8b7   : > { %v6347_v7 = vpop.f32.mrf.mxu3 }
 0x8b8   : > { %v6348_v30 = vadd.f32 %v6347_v7, %v6223_v41 }
 0x8ba   : > { %6378 = vst.msk [vmem:[%s11702_s18 + $0x48] sm:$0xff] %vm6368_vm6, %v6348_v30 }
 0x8bf   : > { %v6350_v54 = vpop.f32.mrf.mxu3 }
 0x8c0   : > { %v6351_v18 = vadd.f32 %v6350_v54, %v6228_v19 }
 0x8c2   : > { %6379 = vst.msk [vmem:[%s11702_s18 + $0x50] sm:$0xff] %vm6368_vm6, %v6351_v18 }
 0x8c7   : > { %v6353_v5 = vpop.f32.mrf.mxu3 }
 0x8c8   : > { %v6354_v8 = vadd.f32 %v6353_v5, %v6233_v24 }
 0x8ca   : > { %6380 = vst.msk [vmem:[%s11702_s18 + $0x58] sm:$0xff] %vm6368_vm6, %v6354_v8 }
 0x8cf   : > { %v6356_v11 = vpop.f32.mrf.mxu3 }
 0x8d0   : > { %v6357_v31 = vadd.f32 %v6356_v11, %v6238_v47 }
 0x8d2   : > { %6381 = vst.msk [vmem:[%s11702_s18 + $0x60] sm:$0xff] %vm6368_vm6, %v6357_v31 }
 0x8d7   : > { %v6359_v39 = vpop.f32.mrf.mxu3 }
 0x8d8   : > { %v6360_v15 = vadd.f32 %v6359_v39, %v6243_v46 }
 0x8da   : > { %6382 = vst.msk [vmem:[%s11702_s18 + $0x68] sm:$0xff] %vm6368_vm6, %v6360_v15 }
 0x8df   : > { %v6362_v48 = vpop.f32.mrf.mxu3 }
 0x8e0   : > { %v6363_v49 = vadd.f32 %v6362_v48, %v6248_v2 }
 0x8e2   : > { %6383 = vst.msk [vmem:[%s11702_s18 + $0x70] sm:$0xff] %vm6368_vm6, %v6363_v49 }
 0x8e7   : > { %v6365_v50 = vpop.f32.mrf.mxu3 }
 0x8e8   : > { %v6366_v40 = vadd.f32 %v6365_v50, %v6253_v56 }
 0x8ea   : > { %6384 = vst.msk [vmem:[%s11702_s18 + $0x78] sm:$0xff] %vm6368_vm6, %v6366_v40 }
 0x8eb PF: > { %s19_s30 = sadd.s32 1, %s7673_s30  }
 0x8ec   : > { %p16_p4 = scmp.ge.s32.totalorder %s19_s30, 4  }
 0x8ee   :  { %18 = sbr.rel (!%p16_p4) target bundleno = 1 (0x1), region = 101 }

</bundles_post_ra>
